<compile_context>
chip_gen: v5e
topology: v5e:2x2
jax: 0.10.0
libtpu: 0.0.40
codegen_flags: <defaults>
</compile_context>

<pallas_src>
import functools

import jax
import jax.numpy as jnp
from jax.experimental import pallas as pl
from jax.experimental.pallas import tpu as pltpu

EPSILON = 1e-5
DROPOUT = 0.2  # unused in eval-mode forward


def _quantize(w, eps):
    # gamma = mean(|W|);  clamp(round(W / (gamma + eps)), -1, 1)
    gamma = jnp.mean(jnp.abs(w))
    return jnp.clip(jnp.round(w / (gamma + eps)), -1.0, 1.0)


def _round_up(x, m):
    return (x + m - 1) // m * m


def _choose_tile_m(M, requested):
    """Row tile: prefer 512/256 (v6e/v7x MXU is 256-wide), keep >=4 grid steps
    when M allows it (megacore sharding + pipeline depth), multiple of 16."""
    if requested is None:
        t = 512
        while t > 128 and pl.cdiv(M, t) < 4:
            t //= 2
    else:
        t = requested
    t = min(t, _round_up(M, 16))
    return max(16, _round_up(t, 16))


def ff_kernel(x_ref, w1_ref, b1_ref, w2_ref, b2_ref, o_ref):
    # x_ref: (tile_m, C) f32; w1_ref: (C, H) bf16 ternary; w2_ref: (H, C) bf16
    # ternary; biases f32 as (1, H)/(1, C).  Both dots accumulate in f32.
    x = x_ref[...].astype(jnp.bfloat16)            # in-kernel cast (no HBM pass)
    h = jnp.dot(x, w1_ref[...], preferred_element_type=jnp.float32)
    h = jnp.maximum(h + b1_ref[...], 0.0)
    h = h.astype(jnp.bfloat16)                     # halve the (tile_m, 4C) intermediate

    y = jnp.dot(h, w2_ref[...], preferred_element_type=jnp.float32)
    y = y + b2_ref[...]

    # Dropout: identity in eval mode.
    o_ref[...] = y.astype(o_ref.dtype)


def feedforward_pallas(x, w1, b1, w2, b2, *, tile_m=None, out_dtype=None):
    """x: (B, T, C) float32. w1: (C, 4C), b1: (4C,), w2: (4C, C), b2: (C,)."""
    B, T, C = x.shape
    H = w1.shape[1]
    assert w1.shape == (C, H) and w2.shape == (H, C)
    assert b1.shape == (H,) and b2.shape == (C,)
    out_dtype = x.dtype if out_dtype is None else jnp.dtype(out_dtype)

    # Per-forward ternary quantization, hoisted out of the grid loop
    # (grid-invariant).  Ternary values are exact in bf16.
    w1q = _quantize(w1, EPSILON).astype(jnp.bfloat16)
    w2q = _quantize(w2, EPSILON).astype(jnp.bfloat16)
    b1_2d = b1.reshape(1, H).astype(jnp.float32)
    b2_2d = b2.reshape(1, C).astype(jnp.float32)

    M = B * T
    x2d = x.reshape(M, C)  # no dtype cast, no padding -> no extra HBM copy

    tm = _choose_tile_m(M, tile_m)
    grid = (pl.cdiv(M, tm),)  # edge block (if any) is masked by Pallas

    # Advisory cost: two matmuls, x + weights + biases + output traffic.
    cost = pl.CostEstimate(
        flops=4 * M * C * H,
        transcendentals=0,
        bytes_accessed=(M * C * x.dtype.itemsize          # x
                        + 2 * C * H * 2                   # W1q + W2q (bf16)
                        + (H + C) * 4                     # biases
                        + M * C * jnp.dtype(out_dtype).itemsize),  # out
    )

    # Grid-invariant operands: fetched once, single-buffered (saves VMEM).
    inv = pl.Buffered(1)

    out = pl.pallas_call(
        ff_kernel,
        out_shape=jax.ShapeDtypeStruct((M, C), out_dtype),
        grid_spec=pltpu.PrefetchScalarGridSpec(
            num_scalar_prefetch=0,
            grid=grid,
            in_specs=[
                pl.BlockSpec((tm, C), lambda i: (i, 0)),                        # x row-tile
                pl.BlockSpec((C, H), lambda i: (0, 0), pipeline_mode=inv),      # W1q
                pl.BlockSpec((1, H), lambda i: (0, 0), pipeline_mode=inv),      # b1
                pl.BlockSpec((H, C), lambda i: (0, 0), pipeline_mode=inv),      # W2q
                pl.BlockSpec((1, C), lambda i: (0, 0), pipeline_mode=inv),      # b2
            ],
            out_specs=pl.BlockSpec((tm, C), lambda i: (i, 0)),
        ),
        compiler_params=pltpu.CompilerParams(
            dimension_semantics=("parallel",),
            vmem_limit_bytes=32 * 1024 * 1024,  # lets v5e match v6e/v7x tiling
        ),
        cost_estimate=cost,
    )(x2d, w1q, b1_2d, w2q, b2_2d)

    return out.reshape(B, T, C)


def init_params(key, n_embd):
    """Deterministic init mimicking nn.Linear defaults + the __init__ ternary
    quantization pass (apply_custom_weight_modifications)."""
    k1, k2, k3, k4 = jax.random.split(key, 4)
    hidden = 4 * n_embd

    # nn.Linear default: U(-1/sqrt(fan_in), 1/sqrt(fan_in)) for weight & bias.
    bound1 = 1.0 / jnp.sqrt(n_embd)
    w1 = jax.random.uniform(k1, (hidden, n_embd), jnp.float32, -bound1, bound1)
    b1 = jax.random.uniform(k2, (hidden,), jnp.float32, -bound1, bound1)

    bound2 = 1.0 / jnp.sqrt(hidden)
    w2 = jax.random.uniform(k3, (n_embd, hidden), jnp.float32, -bound2, bound2)
    b2 = jax.random.uniform(k4, (n_embd,), jnp.float32, -bound2, bound2)

    # __init__-time quantization (no epsilon, per apply_custom_weight_modifications)
    def init_quant(w):
        gamma = jnp.mean(jnp.abs(w))
        return jnp.clip(jnp.round(w / gamma), -1.0, 1.0)

    w1 = init_quant(w1)
    w2 = init_quant(w2)

    # Transpose to (in, out) for the kernel's x @ W convention.
    return w1.T, b1, w2.T, b2


def feedforward_ref(x, w1, b1, w2, b2):
    """Pure-JAX f32 reference of the same forward (eval mode)."""
    w1q = _quantize(w1, EPSILON)
    w2q = _quantize(w2, EPSILON)
    h = jnp.maximum(x @ w1q + b1, 0.0)
    return h @ w2q + b2


if __name__ == "__main__":
    # Module's n_embd = 384 (keeps C, 4C multiples of 128); small batch/seq.
    n_embd = 384
    B, T = 2, 128

    key = jax.random.PRNGKey(0)
    kx, kp = jax.random.split(key)
    x = jax.random.normal(kx, (B, T, n_embd), jnp.float32)
    w1, b1, w2, b2 = init_params(kp, n_embd)

    fn = jax.jit(functools.partial(feedforward_pallas))
    y = fn(x, w1, b1, w2, b2)
    y = jax.block_until_ready(y)

    y_ref = feedforward_ref(x, w1, b1, w2, b2)
    assert y.shape == (B, T, n_embd)

    # bf16 activations / bf16 h (weights are exact ternary) -> loose tolerance.
    rel_err = jnp.max(jnp.abs(y - y_ref)) / (jnp.max(jnp.abs(y_ref)) + 1e-6)
    assert rel_err < 2e-2, f"mismatch vs reference: rel_err={rel_err}"

    print("KERNEL_OK")
</pallas_src>

<mosaic_0001>
module attributes {stable_mosaic.version = 11 : i64} {
  func.func @ff_kernel(%arg0: i32, %arg1: memref<128x384xf32, #tpu.memory_space<vmem>>, %arg2: memref<384x1536xbf16, #tpu.memory_space<vmem>>, %arg3: memref<1x1536xf32, #tpu.memory_space<vmem>>, %arg4: memref<1536x384xbf16, #tpu.memory_space<vmem>>, %arg5: memref<1x384xf32, #tpu.memory_space<vmem>>, %arg6: memref<128x384xf32, #tpu.memory_space<vmem>>) attributes {dimension_semantics = [#tpu.dimension_semantics<parallel>], iteration_bounds = array<i64: 2>, scalar_prefetch = 0 : i64, scratch_operands = 0 : i64, tpu.core_type = #tpu.core_type<tc>, window_params = [{transform_indices = @transform_0, window_bounds = array<i64: 128, 384>}, {pipeline_mode = #tpu.pipeline_mode<synchronous>, transform_indices = @transform_1, window_bounds = array<i64: 384, 1536>}, {pipeline_mode = #tpu.pipeline_mode<synchronous>, transform_indices = @transform_2, window_bounds = array<i64: 1, 1536>}, {pipeline_mode = #tpu.pipeline_mode<synchronous>, transform_indices = @transform_3, window_bounds = array<i64: 1536, 384>}, {pipeline_mode = #tpu.pipeline_mode<synchronous>, transform_indices = @transform_4, window_bounds = array<i64: 1, 384>}, {transform_indices = @transform_5, window_bounds = array<i64: 128, 384>}]} {
    %c0 = arith.constant 0 : index
    %c0_0 = arith.constant 0 : index
    %0 = vector.load %arg1[%c0, %c0_0] : memref<128x384xf32, #tpu.memory_space<vmem>>, vector<128x384xf32>
    %1 = arith.truncf %0 : vector<128x384xf32> to vector<128x384xbf16>
    %c0_1 = arith.constant 0 : index
    %c0_2 = arith.constant 0 : index
    %2 = vector.load %arg2[%c0_1, %c0_2] : memref<384x1536xbf16, #tpu.memory_space<vmem>>, vector<384x1536xbf16>
    %cst = arith.constant dense<0.000000e+00> : vector<128x1536xf32>
    %3 = tpu.matmul %1, %2, %cst {dimension_numbers = #tpu.dot_dimension_numbers<[1], [0], [0], [1], [0, 0, 1, 1], [], []>} : vector<128x384xbf16>, vector<384x1536xbf16>, vector<128x1536xf32> -> vector<128x1536xf32>
    %c0_3 = arith.constant 0 : index
    %c0_4 = arith.constant 0 : index
    %4 = vector.load %arg3[%c0_3, %c0_4] : memref<1x1536xf32, #tpu.memory_space<vmem>>, vector<1x1536xf32>
    %5 = vector.broadcast %4 : vector<1x1536xf32> to vector<128x1536xf32>
    %6 = arith.addf %3, %5 : vector<128x1536xf32>
    %cst_5 = arith.constant 0.000000e+00 : f32
    %7 = vector.broadcast %cst_5 : f32 to vector<128x1536xf32>
    %8 = arith.maximumf %6, %7 : vector<128x1536xf32>
    %9 = arith.truncf %8 : vector<128x1536xf32> to vector<128x1536xbf16>
    %c0_6 = arith.constant 0 : index
    %c0_7 = arith.constant 0 : index
    %10 = vector.load %arg4[%c0_6, %c0_7] : memref<1536x384xbf16, #tpu.memory_space<vmem>>, vector<1536x384xbf16>
    %cst_8 = arith.constant dense<0.000000e+00> : vector<128x384xf32>
    %11 = tpu.matmul %9, %10, %cst_8 {dimension_numbers = #tpu.dot_dimension_numbers<[1], [0], [0], [1], [0, 0, 1, 1], [], []>} : vector<128x1536xbf16>, vector<1536x384xbf16>, vector<128x384xf32> -> vector<128x384xf32>
    %c0_9 = arith.constant 0 : index
    %c0_10 = arith.constant 0 : index
    %12 = vector.load %arg5[%c0_9, %c0_10] : memref<1x384xf32, #tpu.memory_space<vmem>>, vector<1x384xf32>
    %13 = vector.broadcast %12 : vector<1x384xf32> to vector<128x384xf32>
    %14 = arith.addf %11, %13 : vector<128x384xf32>
    %c0_11 = arith.constant 0 : index
    %c0_12 = arith.constant 0 : index
    %15 = vector.load %arg6[%c0_11, %c0_12] : memref<128x384xf32, #tpu.memory_space<vmem>>, vector<128x384xf32>
    tpu.vector_store %arg6[%c0_11, %c0_12], %14 {strides = array<i32>} : memref<128x384xf32, #tpu.memory_space<vmem>>, vector<128x384xf32>,
    return
  }
  func.func @transform_0(%arg0: i32) -> (i32, i32) {
    %c0_i32 = arith.constant 0 : i32
    %c0_i32_0 = arith.constant 0 : i32
    return %arg0, %c0_i32 : i32, i32
  }
  func.func @transform_1(%arg0: i32) -> (i32, i32) {
    %c0_i32 = arith.constant 0 : i32
    %c0_i32_0 = arith.constant 0 : i32
    %c0_i32_1 = arith.constant 0 : i32
    return %c0_i32, %c0_i32_0 : i32, i32
  }
  func.func @transform_2(%arg0: i32) -> (i32, i32) {
    %c0_i32 = arith.constant 0 : i32
    %c0_i32_0 = arith.constant 0 : i32
    %c0_i32_1 = arith.constant 0 : i32
    return %c0_i32, %c0_i32_0 : i32, i32
  }
  func.func @transform_3(%arg0: i32) -> (i32, i32) {
    %c0_i32 = arith.constant 0 : i32
    %c0_i32_0 = arith.constant 0 : i32
    %c0_i32_1 = arith.constant 0 : i32
    return %c0_i32, %c0_i32_0 : i32, i32
  }
  func.func @transform_4(%arg0: i32) -> (i32, i32) {
    %c0_i32 = arith.constant 0 : i32
    %c0_i32_0 = arith.constant 0 : i32
    %c0_i32_1 = arith.constant 0 : i32
    return %c0_i32, %c0_i32_0 : i32, i32
  }
  func.func @transform_5(%arg0: i32) -> (i32, i32) {
    %c0_i32 = arith.constant 0 : i32
    %c0_i32_0 = arith.constant 0 : i32
    return %arg0, %c0_i32 : i32, i32
  }
}

</mosaic_0001>

<bundles_post_ra>
// kernel: feedforward_pallas.1
= control target key start
LH: loop header
LB: loop body
LE: loop exit
PB: predicated region body
PF: predicated region fallthrough
CT: control target
= control target key end

     0   :  { %10 = vsyncpa [#allocation3], 0  ;;  %s16314_s0 = inlined_call_operand.vmem [shape: f32[256,384], index: 0, kind: input, shape index: {}]   ;;  %s16315_s1 = inlined_call_operand.vmem [shape: bf16[384,1536], index: 1, kind: input, shape index: {}]   ;;  %s16316_s2 = inlined_call_operand.vmem [shape: f32[1,1536], index: 2, kind: input, shape index: {}]   ;;  %s16317_s3 = inlined_call_operand.vmem [shape: bf16[1536,384], index: 3, kind: input, shape index: {}]   ;;  %s16318_s4 = inlined_call_operand.vmem [shape: f32[1,384], index: 4, kind: input, shape index: {}]   ;;  %s16319_s5 = inlined_call_operand.hbm [shape: f32[256,384], index: 5, kind: output, shape index: {}]  }
   0x1   :  { %12 = vsyncpa [#allocation3 + $0x1], 0  ;;  %s10964_s18 = smov 0   ;;  %s10966_s19 = smov 0  }
   0x2   :  { %s10968_s20 = smov 0   ;;  %s10970_s21 = smov 0  }
   0x3 LB: > { %s10985_s22 = sadd.s32 4294967295, %s10930_s21   ;;  %s7928_s23 = sadd.s32 4294967294, %s10930_s21   ;;  %s10930_s21 = sphi %s10970_s21, %s16683_s21   ;;  %s10926_s20 = sphi %s10968_s20, %s16682_s20   ;;  %s10922_s19 = sphi %s10966_s19, %s16681_s19   ;;  %s10918_s18 = sphi %s10964_s18, %s16680_s18  }
   0x4   : > { %s10989_s24 = sadd.s32 1, %s10930_s21   ;;  %s135_s25 = sadd.s32 1, %s10926_s20 }
   0x5   : > { %s132_s26 = ssub.s32 %s10930_s21, %s10989_s24  ;;  %p145_p0 = scmp.ne.s32.totalorder %s10926_s20, %s10922_s19 }
   0x6   : > { %p133_p1 = scmp.eq.s32.totalorder %s132_s26, 0  ;;  %p146_p2 = scmp.eq.s32.totalorder %s10985_s22, 1 }
   0x7   : > { %p151_p3 = scmp.ne.s32.totalorder %s10922_s19, %s10918_s18  ;;  %p152_p4 = scmp.eq.s32.totalorder %s7928_s23, 1 }
   0x8   : > { %s11000_s27 = scalar_select %p133_p1, %s10926_s20, %s135_s25  }
   0x9   : > { %p11002_p5 = por %p146_p2, %p145_p0  ;;  %p11006_p6 = por %p152_p4, %p151_p3 }
   0xa   : > { %p7931_p7 = scmp.ge.s32.totalorder %s10930_s21, 1  ;;  %p192_p8 = scmp.lt.s32.totalorder %s10930_s21, 3 }
   0xc   : > { %p193_p9 = pnand %p7931_p7, %p192_p8 }
   0xe   : > { %196 = sbr.rel (%p193_p9) target bundleno = 2491 (0x9bb), region = 40 }
  0x13   : > { %v8272_v0 = vld [vmem:[%s16315_s1 + $0x2a0] sm:$0xf]  ;;  %v10333_v1 = vld [vmem:[%s16315_s1 + $0x2cc] sm:$0xf0]  ;;  %v10327_v9 = vld [vmem:[%s16315_s1 + $0x2a4] sm:$0xf] }
  0x14   : > { %v8656_v2 = vld [vmem:[%s16315_s1 + $0x5a0] sm:$0xf]  ;;  %v8273_v3 = vor.u32 %v10333_v1, %v8272_v0  ;;  %v10429_v4 = vld [vmem:[%s16315_s1 + $0x5cc] sm:$0xf0]  ;;  %v8274_v10 = vld [vmem:[%s16315_s1 + $0x2d0] sm:$0xf0] }
  0x15   : > { %v9040_v5 = vld [vmem:[%s16315_s1 + $0x8a0] sm:$0xf]  ;;  %v10525_v6 = vld [vmem:[%s16315_s1 + $0x8cc] sm:$0xf0]  ;;  %v8657_v7 = vor.u32 %v10429_v4, %v8656_v2  ;;  %v8277_v12 = vor.u32 %v10327_v9, %v8274_v10  ;;  %v10315_v20 = vld [vmem:[%s16315_s1 + $0x244] sm:$0xf] }
  0x16   : > { %v9041_v8 = vor.u32 %v10525_v6, %v9040_v5  ;;  %v8224_v11 = vld [vmem:[%s16315_s1 + $0x240] sm:$0xf]  ;;  %2057 = vmatpush.bf16.msra.mxu0 %v8273_v3  ;;  %v10321_v13 = vld [vmem:[%s16315_s1 + $0x26c] sm:$0xf0]  ;;  %v8226_v22 = vld [vmem:[%s16315_s1 + $0x270] sm:$0xf0] }
  0x17   : > { %v8608_v14 = vld [vmem:[%s16315_s1 + $0x540] sm:$0xf]  ;;  %v10417_v15 = vld [vmem:[%s16315_s1 + $0x56c] sm:$0xf0]  ;;  %2106 = vmatpush.bf16.msra.mxu1 %v8657_v7  ;;  %v8225_v16 = vor.u32 %v10321_v13, %v8224_v11  ;;  %2204 = vmatpush.bf16.msra.mxu3 %v8277_v12  ;;  %v8229_v25 = vor.u32 %v10315_v20, %v8226_v22  ;;  %v10303_v31 = vld [vmem:[%s16315_s1 + $0x1e4] sm:$0xf] }
  0x18   : > { %2155 = vmatpush.bf16.msra.mxu2 %v9041_v8  ;;  %v8609_v17 = vor.u32 %v10417_v15, %v8608_v14  ;;  %v8992_v18 = vld [vmem:[%s16315_s1 + $0x840] sm:$0xf]  ;;  %v10513_v19 = vld [vmem:[%s16315_s1 + $0x86c] sm:$0xf0]  ;;  %v8178_v32 = vld [vmem:[%s16315_s1 + $0x210] sm:$0xf0] }
  0x19   : > { %v8993_v21 = vor.u32 %v10513_v19, %v8992_v18  ;;  %v8176_v23 = vld [vmem:[%s16315_s1 + $0x1e0] sm:$0xf]  ;;  %v10309_v24 = vld [vmem:[%s16315_s1 + $0x20c] sm:$0xf0]  ;;  %v8181_v38 = vor.u32 %v10303_v31, %v8178_v32  ;;  %v10291_v42 = vld [vmem:[%s16315_s1 + $0x184] sm:$0xf] }
  0x1a   : > { %v8560_v26 = vld [vmem:[%s16315_s1 + $0x4e0] sm:$0xf]  ;;  %v10405_v27 = vld [vmem:[%s16315_s1 + $0x50c] sm:$0xf0]  ;;  %2058 = vmatpush.bf16.msra.mxu0 %v8225_v16  ;;  %v8177_v29 = vor.u32 %v10309_v24, %v8176_v23  ;;  %v8130_v43 = vld [vmem:[%s16315_s1 + $0x1b0] sm:$0xf0] }
  0x1b   : > { %v8944_v28 = vld [vmem:[%s16315_s1 + $0x7e0] sm:$0xf]  ;;  %v10501_v30 = vld [vmem:[%s16315_s1 + $0x80c] sm:$0xf0]  ;;  %2107 = vmatpush.bf16.msra.mxu1 %v8609_v17  ;;  %v8561_v33 = vor.u32 %v10405_v27, %v8560_v26  ;;  %2205 = vmatpush.bf16.msra.mxu3 %v8229_v25  ;;  %v8133_v50 = vor.u32 %v10291_v42, %v8130_v43  ;;  %v10279_v54 = vld [vmem:[%s16315_s1 + $0x124] sm:$0xf] }
  0x1c   : > { %2156 = vmatpush.bf16.msra.mxu2 %v8993_v21  ;;  %v8945_v34 = vor.u32 %v10501_v30, %v8944_v28  ;;  %v8128_v35 = vld [vmem:[%s16315_s1 + $0x180] sm:$0xf]  ;;  %v10297_v36 = vld [vmem:[%s16315_s1 + $0x1ac] sm:$0xf0]  ;;  %v8082_v55 = vld [vmem:[%s16315_s1 + $0x150] sm:$0xf0] }
  0x1d   : > { %v8512_v37 = vld [vmem:[%s16315_s1 + $0x480] sm:$0xf]  ;;  %v10393_v39 = vld [vmem:[%s16315_s1 + $0x4ac] sm:$0xf0]  ;;  %v8129_v44 = vor.u32 %v10297_v36, %v8128_v35  ;;  %v8085_v62 = vor.u32 %v10279_v54, %v8082_v55  ;;  %v10267_v2 = vld [vmem:[%s16315_s1 + $0xc4] sm:$0xf] }
  0x1e   : > { %v8896_v40 = vld [vmem:[%s16315_s1 + $0x780] sm:$0xf]  ;;  %v10489_v41 = vld [vmem:[%s16315_s1 + $0x7ac] sm:$0xf0]  ;;  %2059 = vmatpush.bf16.msra.mxu0 %v8177_v29  ;;  %v8513_v45 = vor.u32 %v10393_v39, %v8512_v37  ;;  %v8034_v3 = vld [vmem:[%s16315_s1 + $0xf0] sm:$0xf0] }
  0x1f   : > { %2108 = vmatpush.bf16.msra.mxu1 %v8561_v33  ;;  %v8897_v46 = vor.u32 %v10489_v41, %v8896_v40  ;;  %v8080_v47 = vld [vmem:[%s16315_s1 + $0x120] sm:$0xf]  ;;  %v10285_v48 = vld [vmem:[%s16315_s1 + $0x14c] sm:$0xf0]  ;;  %2206 = vmatpush.bf16.msra.mxu3 %v8181_v38  ;;  %v8037_v11 = vor.u32 %v10267_v2, %v8034_v3  ;;  %s7932_s17 = sshll.u32 %s10985_s22, 4  ;;  %s218_s15 = sand.u32 1, %s10922_s19  }
  0x20   : > { %2157 = vmatpush.bf16.msra.mxu2 %v8945_v34  ;;  %v8464_v49 = vld [vmem:[%s16315_s1 + $0x420] sm:$0xf]  ;;  %v10381_v51 = vld [vmem:[%s16315_s1 + $0x44c] sm:$0xf0]  ;;  %v8081_v56 = vor.u32 %v10285_v48, %v8080_v47  ;;  %v10255_v14 = vld [vmem:[%s16315_s1 + $0x64] sm:$0xf] }
  0x21   : > { %v8848_v52 = vld [vmem:[%s16315_s1 + $0x720] sm:$0xf]  ;;  %v10477_v53 = vld [vmem:[%s16315_s1 + $0x74c] sm:$0xf0]  ;;  %v8465_v57 = vor.u32 %v10381_v51, %v8464_v49  ;;  %v7986_v15 = vld [vmem:[%s16315_s1 + $0x90] sm:$0xf0] }
  0x22   : > { %2060 = vmatpush.bf16.msra.mxu0 %v8129_v44  ;;  %v8849_v58 = vor.u32 %v10477_v53, %v8848_v52  ;;  %v8032_v59 = vld [vmem:[%s16315_s1 + $0xc0] sm:$0xf]  ;;  %v10273_v60 = vld [vmem:[%s16315_s1 + $0xec] sm:$0xf0]  ;;  %p222_p10 = scmp.lt.s32.totalorder %s7932_s17, 31  ;;  %v7989_v24 = vor.u32 %v10255_v14, %v7986_v15  ;;  %s10819_s16 = smul.u32 384, %s218_s15 }
  0x23   : > { %2109 = vmatpush.bf16.msra.mxu1 %v8513_v45  ;;  %v8416_v61 = vld [vmem:[%s16315_s1 + $0x3c0] sm:$0xf]  ;;  %2207 = vmatpush.bf16.msra.mxu3 %v8133_v50  ;;  %v10369_v63 = vld [vmem:[%s16315_s1 + $0x3ec] sm:$0xf0]  ;;  %v8033_v4 = vor.u32 %v10273_v60, %v8032_v59  ;;  %v10243_v26 = vld [vmem:[%s16315_s1 + $0x4] sm:$0xf] }
  0x24   : > { %2158 = vmatpush.bf16.msra.mxu2 %v8897_v46  ;;  %v8800_v0 = vld [vmem:[%s16315_s1 + $0x6c0] sm:$0xf]  ;;  %v10465_v1 = vld [vmem:[%s16315_s1 + $0x6ec] sm:$0xf0]  ;;  %v8417_v6 = vor.u32 %v10369_v63, %v8416_v61  ;;  %s16685_s17 = smov (!%p222_p10, %s7932_s17), 31  ;;  %s10821_s12 = smul.u32 384, %s10985_s22 }
  0x25   : > { %v7984_v5 = vld [vmem:[%s16315_s1 + $0x60] sm:$0xf]  ;;  %v8801_v7 = vor.u32 %v10465_v1, %v8800_v0  ;;  %v10261_v8 = vld [vmem:[%s16315_s1 + $0x8c] sm:$0xf0]  ;;  %v7938_v27 = vld [vmem:[%s16315_s1 + $0x30] sm:$0xf0] }
  0x26   : > { %2061 = vmatpush.bf16.msra.mxu0 %v8081_v56  ;;  %v8368_v9 = vld [vmem:[%s16315_s1 + $0x360] sm:$0xf]  ;;  %v10357_v10 = vld [vmem:[%s16315_s1 + $0x38c] sm:$0xf0]  ;;  %v7985_v16 = vor.u32 %v10261_v8, %v7984_v5  ;;  %s10820_s7 = smul.u32 24, %s16685_s17  ;;  %v7941_v41 = vor.u32 %v10243_v26, %v7938_v27  ;;  %s7862_s17 = scalar_lea.hbm %s16319_s5, %s10821_s12 }
  0x27   : > { %2110 = vmatpush.bf16.msra.mxu1 %v8465_v57  ;;  %2208 = vmatpush.bf16.msra.mxu3 %v8085_v62  ;;  %v8752_v12 = vld [vmem:[%s16315_s1 + $0x660] sm:$0xf]  ;;  %v10453_v13 = vld [vmem:[%s16315_s1 + $0x68c] sm:$0xf0]  ;;  %v8369_v20 = vor.u32 %v10357_v10, %v8368_v9  ;;  %v8280_v28 = vld [vmem:[%s16315_s1 + $0x2a8] sm:$0xf] }
  0x28   : > { %2159 = vmatpush.bf16.msra.mxu2 %v8849_v58  ;;  %v7936_v17 = vld [vmem:[%s16315_s1] sm:$0xf]  ;;  %v10249_v18 = vld [vmem:[%s16315_s1 + $0x2c] sm:$0xf0]  ;;  %v8753_v21 = vor.u32 %v10453_v13, %v8752_v12  ;;  %v10334_v29 = vld [vmem:[%s16315_s1 + $0x2d4] sm:$0xf0]  ;;  %s11226_s6 = scalar_lea.vmem %s16314_s0, %s10820_s7 }
  0x29   : > { %v8320_v19 = vld [vmem:[%s16315_s1 + $0x300] sm:$0xf]  ;;  %v10345_v22 = vld [vmem:[%s16315_s1 + $0x32c] sm:$0xf0]  ;;  %v7937_v30 = vor.u32 %v10249_v18, %v7936_v17  ;;  %v10423_v31 = vld [vmem:[%s16315_s1 + $0x5a4] sm:$0xf]  ;;  %v8281_v45 = vor.u32 %v10334_v29, %v8280_v28 }
  0x2a   : > { %2062 = vmatpush.bf16.msra.mxu0 %v8033_v4  ;;  %v8704_v23 = vld [vmem:[%s16315_s1 + $0x600] sm:$0xf]  ;;  %v10441_v25 = vld [vmem:[%s16315_s1 + $0x62c] sm:$0xf0]  ;;  %v8658_v32 = vld [vmem:[%s16315_s1 + $0x5d0] sm:$0xf0]  ;;  %v8321_v35 = vor.u32 %v10345_v22, %v8320_v19 }
  0x2b   : > { %2111 = vmatpush.bf16.msra.mxu1 %v8417_v6  ;;  %2209 = vmatpush.bf16.msra.mxu3 %v8037_v11  ;;  %v8664_v33 = vld [vmem:[%s16315_s1 + $0x5a8] sm:$0xf]  ;;  %v10430_v34 = vld [vmem:[%s16315_s1 + $0x5d4] sm:$0xf0]  ;;  %v8705_v36 = vor.u32 %v10441_v25, %v8704_v23  ;;  %v10519_v37 = vld [vmem:[%s16315_s1 + $0x8a4] sm:$0xf]  ;;  %v8661_v55 = vor.u32 %v10423_v31, %v8658_v32 }
  0x2c   : > { %2160 = vmatpush.bf16.msra.mxu2 %v8801_v7  ;;  %v9042_v38 = vld [vmem:[%s16315_s1 + $0x8d0] sm:$0xf0]  ;;  %v8232_v39 = vld [vmem:[%s16315_s1 + $0x248] sm:$0xf]  ;;  %v10322_v40 = vld [vmem:[%s16315_s1 + $0x274] sm:$0xf0]  ;;  %v8665_v50 = vor.u32 %v10430_v34, %v8664_v33 }
  0x2d   : > { %v229_v42 = vld [vmem:[%s11226_s6] sm:$0xff]  ;;  %v232_v43 = vld [vmem:[%s11226_s6 + $0x18] sm:$0xff]  ;;  %v230_v44 = vld [vmem:[%s11226_s6 + $0x8] sm:$0xff]  ;;  %v9045_v56 = vor.u32 %v10519_v37, %v9042_v38  ;;  %v8233_v57 = vor.u32 %v10322_v40, %v8232_v39  ;;  %s14900_s7 = scalar_lea.vmem [#allocation2], %s10819_s16  ;;  %s7865_s25 = sshll.u32 %s7862_s17, 4  ;;  %s7866_s25 = int_to_ptr.hbm [resolvable:$true] %s7865_s25 }
  0x2e   : > { %2063 = vmatpush.bf16.msra.mxu0 %v7985_v16  ;;  %v11243_v46 = vpack.c.bf16 %v232_v43, %v229_v42  ;;  %v233_v47 = vld [vmem:[%s11226_s6 + $0x20] sm:$0xff]  ;;  %v231_v48 = vld [vmem:[%s11226_s6 + $0x10] sm:$0xff]  ;;  %v234_v49 = vld [vmem:[%s11226_s6 + $0x28] sm:$0xff]  ;;  %s7863_s23 = sshll.u32 %s14900_s7, 4  ;;  %s7850_s22 = scalar_lea.sflag [#allocation3], %s218_s15  ;;  %s7864_s23 = int_to_ptr.vmem [resolvable:$true] %s7863_s23 }
  0x2f   : > { %2112 = vmatpush.bf16.msra.mxu1 %v8369_v20  ;;  %2210 = vmatpush.bf16.msra.mxu3 %v7989_v24  ;;  %v11248_v51 = vpack.c.bf16 %v233_v47, %v230_v44  ;;  %v11250_v52 = vpack.c.bf16 %v234_v49, %v231_v48  ;;  %v8616_v53 = vld [vmem:[%s16315_s1 + $0x548] sm:$0xf]  ;;  %v10418_v54 = vld [vmem:[%s16315_s1 + $0x574] sm:$0xf0]  ;;  %v10411_v58 = vld [vmem:[%s16315_s1 + $0x544] sm:$0xf] }
  0x30   : > { %2161 = vmatpush.bf16.msra.mxu2 %v8753_v21  ;;  %v8610_v59 = vld [vmem:[%s16315_s1 + $0x570] sm:$0xf0]  ;;  %v8617_v60 = vor.u32 %v10418_v54, %v8616_v53  ;;  %v10507_v61 = vld [vmem:[%s16315_s1 + $0x844] sm:$0xf]  ;;  %v8184_v0 = vld [vmem:[%s16315_s1 + $0x1e8] sm:$0xf] }
  0x31   : > { %v8994_v62 = vld [vmem:[%s16315_s1 + $0x870] sm:$0xf0]  ;;  %v8613_v63 = vor.u32 %v10411_v58, %v8610_v59  ;;  %v10310_v1 = vld [vmem:[%s16315_s1 + $0x214] sm:$0xf0]  ;;  %v10399_v2 = vld [vmem:[%s16315_s1 + $0x4e4] sm:$0xf] }
  0x32   : > { %2064 = vmatpush.bf16.msra.mxu0 %v7937_v30  ;;  %v8997_v3 = vor.u32 %v10507_v61, %v8994_v62  ;;  %v8185_v4 = vor.u32 %v10310_v1, %v8184_v0  ;;  %v8562_v5 = vld [vmem:[%s16315_s1 + $0x510] sm:$0xf0]  ;;  %v8568_v6 = vld [vmem:[%s16315_s1 + $0x4e8] sm:$0xf]  ;;  %v10406_v7 = vld [vmem:[%s16315_s1 + $0x514] sm:$0xf0] }
  0x33   : > { %2113 = vmatpush.bf16.msra.mxu1 %v8321_v35  ;;  %2211 = vmatpush.bf16.msra.mxu3 %v7941_v41  ;;  %v8569_v8 = vor.u32 %v10406_v7, %v8568_v6  ;;  %v10495_v9 = vld [vmem:[%s16315_s1 + $0x7e4] sm:$0xf]  ;;  %v8946_v10 = vld [vmem:[%s16315_s1 + $0x810] sm:$0xf0]  ;;  %v8565_v11 = vor.u32 %v10399_v2, %v8562_v5  ;;  %v238_v14 = vld [vmem:[%s11226_s6 + $0x48] sm:$0xff]  ;;  %s10882_s16 = sshra.s32 %s7866_s25, 4  ;;  %s10883_s16 = int_to_ptr.hbm [resolvable:$true] %s10882_s16 }
  0x34   : > { %2162 = vmatpush.bf16.msra.mxu2 %v8705_v36  ;;  %v8949_v12 = vor.u32 %v10495_v9, %v8946_v10  ;;  %v235_v13 = vld [vmem:[%s11226_s6 + $0x30] sm:$0xff]  ;;  %v236_v15 = vld [vmem:[%s11226_s6 + $0x38] sm:$0xff]  ;;  %v237_v17 = vld [vmem:[%s11226_s6 + $0x40] sm:$0xff]  ;;  %s10884_s26 = scalar_lea.hbm %s10883_s16, 384  ;;  %s10888_s8 = scalar_lea.hbm %s16319_s5, 768 }
  0x35   : > { %2065 = vmatmul.bf16.vlgmr.msra.gmra.mxu0 %v11243_v46  ;;  %v239_v16 = vld [vmem:[%s11226_s6 + $0x50] sm:$0xff]  ;;  %v240_v18 = vld [vmem:[%s11226_s6 + $0x58] sm:$0xff]  ;;  %v11304_v19 = vpack.c.bf16 %v238_v14, %v235_v13  ;;  %v8136_v22 = vld [vmem:[%s16315_s1 + $0x188] sm:$0xf]  ;;  %p10885_p11 = scmp.ne.s32.totalorder %s10883_s16, %s10884_s26  ;;  %p10889_p0 = scmp.lt.s32.totalorder %s10883_s16, %s16319_s5 }
  0x36   : > { %2114 = vmatmul.bf16.vlgmr.msra.gmra.mxu1 %v11248_v51  ;;  %2212 = vmatmul.bf16.vlgmr.msra.gmra.mxu3 %v11243_v46  ;;  %v11306_v20 = vpack.c.bf16 %v239_v16, %v236_v15  ;;  %v11308_v21 = vpack.c.bf16 %v240_v18, %v237_v17  ;;  %v10298_v23 = vld [vmem:[%s16315_s1 + $0x1b4] sm:$0xf0]  ;;  %v10387_v24 = vld [vmem:[%s16315_s1 + $0x484] sm:$0xf]  ;;  %v8514_v26 = vld [vmem:[%s16315_s1 + $0x4b0] sm:$0xf0]  ;;  %p10890_p1 = scmp.lt.s32.totalorder %s10888_s8, %s10884_s26 }
  0x37   : > { %2400 = vmatpush.bf16.msrb.mxu3 %v8665_v50  ;;  %2163 = vmatmul.bf16.vlgmr.msra.gmra.mxu2 %v11250_v52  ;;  %v8137_v25 = vor.u32 %v10298_v23, %v8136_v22  ;;  %v8520_v27 = vld [vmem:[%s16315_s1 + $0x488] sm:$0xf]  ;;  %v10394_v28 = vld [vmem:[%s16315_s1 + $0x4b4] sm:$0xf0]  ;;  %v8517_v29 = vor.u32 %v10387_v24, %v8514_v26  ;;  %v10483_v31 = vld [vmem:[%s16315_s1 + $0x784] sm:$0xf]  ;;  %p10886_p12 = pnand %p10885_p11, %p11002_p5 }
  0x38   : > { %2351 = vmatpush.bf16.msrb.mxu2 %v8281_v45  ;;  %2253 = vmatpush.bf16.msrb.mxu0 %v8661_v55  ;;  %v8521_v30 = vor.u32 %v10394_v28, %v8520_v27  ;;  %v8898_v32 = vld [vmem:[%s16315_s1 + $0x7b0] sm:$0xf0]  ;;  %v241_v34 = vld [vmem:[%s11226_s6 + $0x60] sm:$0xff]  ;;  %v244_v35 = vld [vmem:[%s11226_s6 + $0x78] sm:$0xff]  ;;  %p10891_p2 = por %p10890_p1, %p10889_p0 }
  0x39   : > { %2302 = vmatpush.bf16.msrb.mxu1 %v9045_v56  ;;  %v8901_v33 = vor.u32 %v10483_v31, %v8898_v32  ;;  %v242_v36 = vld [vmem:[%s11226_s6 + $0x68] sm:$0xff]  ;;  %v245_v37 = vld [vmem:[%s11226_s6 + $0x80] sm:$0xff]  ;;  %v243_v38 = vld [vmem:[%s11226_s6 + $0x70] sm:$0xff]  ;;  %v11344_v40 = vpack.c.bf16 %v244_v35, %v241_v34  ;;  %p10887_p13 = pneg %p10886_p12 }
  0x3a   : > { %v246_v39 = vld [vmem:[%s11226_s6 + $0x88] sm:$0xff]  ;;  %v11346_v41 = vpack.c.bf16 %v245_v37, %v242_v36  ;;  %v10286_v44 = vld [vmem:[%s16315_s1 + $0x154] sm:$0xf0]  ;;  %v10375_v45 = vld [vmem:[%s16315_s1 + $0x424] sm:$0xf] }
  0x3b   : > { %2401 = vmatpush.bf16.msrb.mxu3 %v8617_v60  ;;  %v11348_v42 = vpack.c.bf16 %v246_v39, %v243_v38  ;;  %v8088_v43 = vld [vmem:[%s16315_s1 + $0x128] sm:$0xf]  ;;  %v8466_v48 = vld [vmem:[%s16315_s1 + $0x450] sm:$0xf0]  ;;  %v10382_v50 = vld [vmem:[%s16315_s1 + $0x454] sm:$0xf0]  ;;  %p10892_p3 = pnand %p10891_p2, %p10887_p13 }
  0x3c   : > { %2352 = vmatpush.bf16.msrb.mxu2 %v8233_v57  ;;  %2254 = vmatpush.bf16.msrb.mxu0 %v8613_v63  ;;  %v8089_v47 = vor.u32 %v10286_v44, %v8088_v43  ;;  %v8472_v49 = vld [vmem:[%s16315_s1 + $0x428] sm:$0xf]  ;;  %v8469_v53 = vor.u32 %v10375_v45, %v8466_v48  ;;  %v10471_v55 = vld [vmem:[%s16315_s1 + $0x724] sm:$0xf]  ;;  %v8850_v56 = vld [vmem:[%s16315_s1 + $0x750] sm:$0xf0] }
  0x3d   : > { %2303 = vmatpush.bf16.msrb.mxu1 %v8997_v3  ;;  %v8473_v54 = vor.u32 %v10382_v50, %v8472_v49  ;;  %v8853_v57 = vor.u32 %v10471_v55, %v8850_v56  ;;  %v247_v58 = vld [vmem:[%s11226_s6 + $0x90] sm:$0xff]  ;;  %v250_v59 = vld [vmem:[%s11226_s6 + $0xa8] sm:$0xff]  ;;  %v248_v60 = vld [vmem:[%s11226_s6 + $0x98] sm:$0xff] }
  0x3e   : > { %v251_v61 = vld [vmem:[%s11226_s6 + $0xb0] sm:$0xff]  ;;  %v249_v62 = vld [vmem:[%s11226_s6 + $0xa0] sm:$0xff]  ;;  %v252_v63 = vld [vmem:[%s11226_s6 + $0xb8] sm:$0xff]  ;;  %v11384_v0 = vpack.c.bf16 %v250_v59, %v247_v58 }
  0x3f   : > { %2402 = vmatpush.bf16.msrb.mxu3 %v8569_v8  ;;  %v11386_v1 = vpack.c.bf16 %v251_v61, %v248_v60  ;;  %v11388_v2 = vpack.c.bf16 %v252_v63, %v249_v62  ;;  %v8040_v3 = vld [vmem:[%s16315_s1 + $0xc8] sm:$0xf]  ;;  %v10363_v5 = vld [vmem:[%s16315_s1 + $0x3c4] sm:$0xf]  ;;  %v8418_v7 = vld [vmem:[%s16315_s1 + $0x3f0] sm:$0xf0] }
  0x40   : > { %2353 = vmatpush.bf16.msrb.mxu2 %v8185_v4  ;;  %2255 = vmatpush.bf16.msrb.mxu0 %v8565_v11  ;;  %v10274_v4 = vld [vmem:[%s16315_s1 + $0xf4] sm:$0xf0]  ;;  %v8424_v8 = vld [vmem:[%s16315_s1 + $0x3c8] sm:$0xf]  ;;  %v8421_v10 = vor.u32 %v10363_v5, %v8418_v7  ;;  %v8802_v13 = vld [vmem:[%s16315_s1 + $0x6f0] sm:$0xf0] }
  0x41   : > { %2304 = vmatpush.bf16.msrb.mxu1 %v8949_v12  ;;  %v8041_v6 = vor.u32 %v10274_v4, %v8040_v3  ;;  %v10370_v9 = vld [vmem:[%s16315_s1 + $0x3f4] sm:$0xf0]  ;;  %v10459_v12 = vld [vmem:[%s16315_s1 + $0x6c4] sm:$0xf]  ;;  %v254_v17 = vld [vmem:[%s11226_s6 + $0xc8] sm:$0xff] }
  0x42   : > { %v8425_v11 = vor.u32 %v10370_v9, %v8424_v8  ;;  %v8805_v14 = vor.u32 %v10459_v12, %v8802_v13  ;;  %v253_v15 = vld [vmem:[%s11226_s6 + $0xc0] sm:$0xff]  ;;  %v256_v16 = vld [vmem:[%s11226_s6 + $0xd8] sm:$0xff]  ;;  %v255_v22 = vld [vmem:[%s11226_s6 + $0xd0] sm:$0xff] }
  0x43   : > { %2403 = vmatpush.bf16.msrb.mxu3 %v8521_v30  ;;  %v257_v18 = vld [vmem:[%s11226_s6 + $0xe0] sm:$0xff]  ;;  %v258_v23 = vld [vmem:[%s11226_s6 + $0xe8] sm:$0xff]  ;;  %v11424_v24 = vpack.c.bf16 %v256_v16, %v253_v15  ;;  %v10262_v28 = vld [vmem:[%s16315_s1 + $0x94] sm:$0xf0] }
  0x44   : > { %2354 = vmatpush.bf16.msrb.mxu2 %v8137_v25  ;;  %2256 = vmatpush.bf16.msrb.mxu0 %v8517_v29  ;;  %v11426_v25 = vpack.c.bf16 %v257_v18, %v254_v17  ;;  %v11428_v26 = vpack.c.bf16 %v258_v23, %v255_v22  ;;  %v7992_v27 = vld [vmem:[%s16315_s1 + $0x68] sm:$0xf]  ;;  %v10351_v29 = vld [vmem:[%s16315_s1 + $0x364] sm:$0xf]  ;;  %v8370_v31 = vld [vmem:[%s16315_s1 + $0x390] sm:$0xf0] }
  0x45   : > { %2070 = vmatmul.bf16.gmra.mxu0 %v11304_v19  ;;  %2305 = vmatpush.bf16.msrb.mxu1 %v8901_v33  ;;  %v7993_v30 = vor.u32 %v10262_v28, %v7992_v27  ;;  %v8376_v32 = vld [vmem:[%s16315_s1 + $0x368] sm:$0xf]  ;;  %v10358_v33 = vld [vmem:[%s16315_s1 + $0x394] sm:$0xf0]  ;;  %v8373_v34 = vor.u32 %v10351_v29, %v8370_v31  ;;  %v10447_v36 = vld [vmem:[%s16315_s1 + $0x664] sm:$0xf] }
  0x46   : > { %2119 = vmatmul.bf16.gmra.mxu1 %v11306_v20  ;;  %2217 = vmatmul.bf16.gmra.mxu3 %v11304_v19  ;;  %v8377_v35 = vor.u32 %v10358_v33, %v8376_v32  ;;  %v8754_v37 = vld [vmem:[%s16315_s1 + $0x690] sm:$0xf0]  ;;  %v262_v43 = vld [vmem:[%s11226_s6 + $0x108] sm:$0xff]  ;;  %v260_v44 = vld [vmem:[%s11226_s6 + $0xf8] sm:$0xff] }
  0x47   : > { %2168 = vmatmul.bf16.gmra.mxu2 %v11308_v21  ;;  %2404 = vmatpush.bf16.msrb.mxu3 %v8473_v54  ;;  %v8757_v38 = vor.u32 %v10447_v36, %v8754_v37  ;;  %v259_v39 = vld [vmem:[%s11226_s6 + $0xf0] sm:$0xff]  ;;  %v264_v48 = vld [vmem:[%s11226_s6 + $0x118] sm:$0xff]  ;;  %v7944_v54 = vld [vmem:[%s16315_s1 + $0x8] sm:$0xf] }
  0x48   : > { %2355 = vmatpush.bf16.msrb.mxu2 %v8089_v47  ;;  %2257 = vmatpush.bf16.msrb.mxu0 %v8469_v53  ;;  %v263_v45 = vld [vmem:[%s11226_s6 + $0x110] sm:$0xff]  ;;  %v261_v47 = vld [vmem:[%s11226_s6 + $0x100] sm:$0xff]  ;;  %v11464_v49 = vpack.c.bf16 %v262_v43, %v259_v39  ;;  %v10250_v55 = vld [vmem:[%s16315_s1 + $0x34] sm:$0xf0] }
  0x49   : > { %2306 = vmatpush.bf16.msrb.mxu1 %v8853_v57  ;;  %v11466_v50 = vpack.c.bf16 %v263_v45, %v260_v44  ;;  %v11468_v53 = vpack.c.bf16 %v264_v48, %v261_v47  ;;  %v10339_v56 = vld [vmem:[%s16315_s1 + $0x304] sm:$0xf]  ;;  %v7945_v57 = vor.u32 %v10250_v55, %v7944_v54  ;;  %v8322_v58 = vld [vmem:[%s16315_s1 + $0x330] sm:$0xf0]  ;;  %v8328_v59 = vld [vmem:[%s16315_s1 + $0x308] sm:$0xf] }
  0x4a   : > { %v10346_v60 = vld [vmem:[%s16315_s1 + $0x334] sm:$0xf0]  ;;  %v8325_v61 = vor.u32 %v10339_v56, %v8322_v58  ;;  %v10435_v63 = vld [vmem:[%s16315_s1 + $0x604] sm:$0xf]  ;;  %v8706_v3 = vld [vmem:[%s16315_s1 + $0x630] sm:$0xf0] }
  0x4b   : > { %2405 = vmatpush.bf16.msrb.mxu3 %v8425_v11  ;;  %v8329_v62 = vor.u32 %v10346_v60, %v8328_v59  ;;  %v8709_v4 = vor.u32 %v10435_v63, %v8706_v3  ;;  %v265_v5 = vld [vmem:[%s11226_s6 + $0x120] sm:$0xff]  ;;  %v266_v7 = vld [vmem:[%s11226_s6 + $0x128] sm:$0xff]  ;;  %v267_v9 = vld [vmem:[%s11226_s6 + $0x130] sm:$0xff] }
  0x4c   : > { %2356 = vmatpush.bf16.msrb.mxu2 %v8041_v6  ;;  %2258 = vmatpush.bf16.msrb.mxu0 %v8421_v10  ;;  %v268_v6 = vld [vmem:[%s11226_s6 + $0x138] sm:$0xff]  ;;  %v269_v8 = vld [vmem:[%s11226_s6 + $0x140] sm:$0xff]  ;;  %v270_v10 = vld [vmem:[%s11226_s6 + $0x148] sm:$0xff] }
  0x4d   : > { %2307 = vmatpush.bf16.msrb.mxu1 %v8805_v14  ;;  %v11504_v11 = vpack.c.bf16 %v268_v6, %v265_v5  ;;  %v11506_v12 = vpack.c.bf16 %v269_v8, %v266_v7  ;;  %v11508_v13 = vpack.c.bf16 %v270_v10, %v267_v9  ;;  %v10424_v14 = vld [vmem:[%s16315_s1 + $0x5ac] sm:$0xf]  ;;  %v8666_v15 = vld [vmem:[%s16315_s1 + $0x5d8] sm:$0xf0]  ;;  %v9048_v16 = vld [vmem:[%s16315_s1 + $0x8a8] sm:$0xf] }
  0x4e   : > { %v8669_v17 = vor.u32 %v10424_v14, %v8666_v15  ;;  %v10526_v18 = vld [vmem:[%s16315_s1 + $0x8d4] sm:$0xf0]  ;;  %v10520_v22 = vld [vmem:[%s16315_s1 + $0x8ac] sm:$0xf]  ;;  %v9050_v23 = vld [vmem:[%s16315_s1 + $0x8d8] sm:$0xf0] }
  0x4f   : > { %2406 = vmatpush.bf16.msrb.mxu3 %v8377_v35  ;;  %v9049_v27 = vor.u32 %v10526_v18, %v9048_v16  ;;  %v9053_v28 = vor.u32 %v10520_v22, %v9050_v23  ;;  %v10328_v29 = vld [vmem:[%s16315_s1 + $0x2ac] sm:$0xf]  ;;  %v271_v32 = vld [vmem:[%s11226_s6 + $0x150] sm:$0xff]  ;;  %v273_v36 = vld [vmem:[%s11226_s6 + $0x160] sm:$0xff] }
  0x50   : > { %2357 = vmatpush.bf16.msrb.mxu2 %v7993_v30  ;;  %2259 = vmatpush.bf16.msrb.mxu0 %v8373_v34  ;;  %v8282_v30 = vld [vmem:[%s16315_s1 + $0x2d8] sm:$0xf0]  ;;  %v274_v33 = vld [vmem:[%s11226_s6 + $0x168] sm:$0xff]  ;;  %v275_v35 = vld [vmem:[%s11226_s6 + $0x170] sm:$0xff] }
  0x51   : > { %2308 = vmatpush.bf16.msrb.mxu1 %v8757_v38  ;;  %v8285_v31 = vor.u32 %v10328_v29, %v8282_v30  ;;  %v272_v34 = vld [vmem:[%s11226_s6 + $0x158] sm:$0xff]  ;;  %v11544_v38 = vpack.c.bf16 %v274_v33, %v271_v32  ;;  %v10412_v44 = vld [vmem:[%s16315_s1 + $0x54c] sm:$0xf]  ;;  %v9000_v47 = vld [vmem:[%s16315_s1 + $0x848] sm:$0xf] }
  0x52   : > { %v276_v37 = vld [vmem:[%s11226_s6 + $0x178] sm:$0xff]  ;;  %v11546_v39 = vpack.c.bf16 %v275_v35, %v272_v34  ;;  %v10508_v55 = vld [vmem:[%s16315_s1 + $0x84c] sm:$0xf]  ;;  %v11575_v59 = vld [vmem:[%s16316_s2] sm:$0xff] }
  0x53   : > { %2407 = vmatpush.bf16.msrb.mxu3 %v8329_v62  ;;  %v11548_v43 = vpack.c.bf16 %v276_v37, %v273_v36  ;;  %v8618_v45 = vld [vmem:[%s16315_s1 + $0x578] sm:$0xf0]  ;;  %v10514_v54 = vld [vmem:[%s16315_s1 + $0x874] sm:$0xf0]  ;;  %v10316_v60 = vld [vmem:[%s16315_s1 + $0x24c] sm:$0xf] }
  0x54   : > { %2358 = vmatpush.bf16.msrb.mxu2 %v7945_v57  ;;  %2260 = vmatpush.bf16.msrb.mxu0 %v8325_v61  ;;  %v8621_v48 = vor.u32 %v10412_v44, %v8618_v45  ;;  %v9002_v56 = vld [vmem:[%s16315_s1 + $0x878] sm:$0xf0]  ;;  %v9001_v57 = vor.u32 %v10514_v54, %v9000_v47  ;;  %v11584_v63 = vperm.slane %v11575_v59, 0  ;;  %v10400_v7 = vld [vmem:[%s16315_s1 + $0x4ec] sm:$0xf] }
  0x55   : > { %2075 = vmatmul.bf16.gmra.mxu0 %v11344_v40  ;;  %2309 = vmatpush.bf16.msrb.mxu1 %v8709_v4  ;;  %v9005_v58 = vor.u32 %v10508_v55, %v9002_v56  ;;  %v8234_v61 = vld [vmem:[%s16315_s1 + $0x278] sm:$0xf0]  ;;  %v8952_v9 = vld [vmem:[%s16315_s1 + $0x7e8] sm:$0xf]  ;;  %v10502_v14 = vld [vmem:[%s16315_s1 + $0x814] sm:$0xf0] }
  0x56   : > { %2124 = vmatmul.bf16.gmra.mxu1 %v11346_v41  ;;  %2222 = vmatmul.bf16.gmra.mxu3 %v11344_v40  ;;  %v8237_v62 = vor.u32 %v10316_v60, %v8234_v61  ;;  %v8570_v8 = vld [vmem:[%s16315_s1 + $0x518] sm:$0xf0]  ;;  %v10496_v15 = vld [vmem:[%s16315_s1 + $0x7ec] sm:$0xf]  ;;  %v8953_v18 = vor.u32 %v10502_v14, %v8952_v9  ;;  %v8904_v60 = vld [vmem:[%s16315_s1 + $0x788] sm:$0xf] }
  0x57   : > { %2173 = vmatmul.bf16.gmra.mxu2 %v11348_v42  ;;  %2596 = vmatpush.bf16.msra.mxu3 %v9053_v28  ;;  %v8573_v10 = vor.u32 %v10400_v7, %v8570_v8  ;;  %v8954_v16 = vld [vmem:[%s16315_s1 + $0x818] sm:$0xf0] }
  0x58   : > { %2547 = vmatpush.bf16.msra.mxu2 %v8669_v17  ;;  %2449 = vmatpush.bf16.msra.mxu0 %v9049_v27  ;;  %v8957_v22 = vor.u32 %v10496_v15, %v8954_v16  ;;  %v8186_v32 = vld [vmem:[%s16315_s1 + $0x218] sm:$0xf0]  ;;  %v10292_v16 = vld [vmem:[%s16315_s1 + $0x18c] sm:$0xf] }
  0x59   : > { %2498 = vmatpush.bf16.msra.mxu1 %v8285_v31  ;;  %v10304_v31 = vld [vmem:[%s16315_s1 + $0x1ec] sm:$0xf] }
  0x5a   : > { %v8189_v34 = vor.u32 %v10304_v31, %v8186_v32 }
  0x5b   : > { %2597 = vmatpush.bf16.msra.mxu3 %v9005_v58  ;;  %v8522_v58 = vld [vmem:[%s16315_s1 + $0x4b8] sm:$0xf0] }
  0x5c   : > { %2548 = vmatpush.bf16.msra.mxu2 %v8621_v48  ;;  %2450 = vmatpush.bf16.msra.mxu0 %v9001_v57  ;;  %v10388_v57 = vld [vmem:[%s16315_s1 + $0x48c] sm:$0xf] }
  0x5d   : > { %2499 = vmatpush.bf16.msra.mxu1 %v8237_v62  ;;  %v8525_v61 = vor.u32 %v10388_v57, %v8522_v58  ;;  %v10490_v62 = vld [vmem:[%s16315_s1 + $0x7b4] sm:$0xf0]  ;;  %v8858_v57 = vld [vmem:[%s16315_s1 + $0x758] sm:$0xf0] }
  0x5f   : > { %2598 = vmatpush.bf16.msra.mxu3 %v8957_v22 }
  0x60   : > { %2549 = vmatpush.bf16.msra.mxu2 %v8573_v10  ;;  %2451 = vmatpush.bf16.msra.mxu0 %v8953_v18 }
  0x61   : > { %2500 = vmatpush.bf16.msra.mxu1 %v8189_v34 }
  0x64   : > { %2550 = vmatpush.bf16.msra.mxu2 %v8525_v61 }
  0x65   : > { %2080 = vmatmul.bf16.gmra.mxu0 %v11384_v0 }
  0x66   : > { %2129 = vmatmul.bf16.gmra.mxu1 %v11386_v1  ;;  %2227 = vmatmul.bf16.gmra.mxu3 %v11384_v0 }
  0x67   : > { %2178 = vmatmul.bf16.gmra.mxu2 %v11388_v2 }
  0x75   : > { %2085 = vmatmul.bf16.gmra.mxu0 %v11424_v24 }
  0x76   : > { %2134 = vmatmul.bf16.gmra.mxu1 %v11426_v25  ;;  %2232 = vmatmul.bf16.gmra.mxu3 %v11424_v24 }
  0x77   : > { %2183 = vmatmul.bf16.gmra.mxu2 %v11428_v26 }
  0x85   : > { %2090 = vmatmul.bf16.gmra.mxu0 %v11464_v49 }
  0x86   : > { %2139 = vmatmul.bf16.gmra.mxu1 %v11466_v50  ;;  %2237 = vmatmul.bf16.gmra.mxu3 %v11464_v49 }
  0x87   : > { %2188 = vmatmul.bf16.gmra.mxu2 %v11468_v53 }
  0x95   : > { %2095 = vmatmul.bf16.gmra.mxu0 %v11504_v11 }
  0x96   : > { %2144 = vmatmul.bf16.gmra.mxu1 %v11506_v12  ;;  %2242 = vmatmul.bf16.gmra.mxu3 %v11504_v11 }
  0x97   : > { %2193 = vmatmul.bf16.gmra.mxu2 %v11508_v13 }
  0xa5   : > { %2100 = vmatmul.bf16.gmra.mxu0 %v11544_v38 }
  0xa6   : > { %2149 = vmatmul.bf16.gmra.mxu1 %v11546_v39  ;;  %2247 = vmatmul.bf16.gmra.mxu3 %v11544_v38 }
  0xa7   : > { %2198 = vmatmul.bf16.gmra.mxu2 %v11548_v43 }
  0xb2   : > { %v2066_v3 = vpop.f32.mrf.mxu0 }
  0xb3   : > { %v2067_v4 = vadd.f32 %v2066_v3, %v11584_v63  ;;  %v2115_v5 = vpop.f32.mrf.mxu1  ;;  %v10484_v3 = vld [vmem:[%s16315_s1 + $0x78c] sm:$0xf] }
  0xb5   : > { %v2116_v6 = vadd.f32 %v2115_v5, %v2067_v4  ;;  %2261 = vmatmul.bf16.vlgmr.msrb.gmra.mxu0 %v11248_v51  ;;  %v8906_v4 = vld [vmem:[%s16315_s1 + $0x7b8] sm:$0xf0] }
  0xb6   : > { %2310 = vmatmul.bf16.vlgmr.msrb.gmra.mxu1 %v11250_v52  ;;  %2408 = vmatmul.bf16.vlgmr.msrb.gmra.mxu3 %v11248_v51  ;;  %v8909_v7 = vor.u32 %v10484_v3, %v8906_v4 }
  0xb7   : > { %2359 = vmatmul.bf16.vlgmr.msrb.gmra.mxu2 %v11243_v46 }
  0xb8   : > { %2599 = vmatpush.bf16.msra.mxu3 %v8909_v7  ;;  %v10280_v7 = vld [vmem:[%s16315_s1 + $0x12c] sm:$0xf] }
  0xb9   : > { %v11609_v27 = vpop.f32.mrf.mxu3 }
  0xba   : > { %v2164_v17 = vpop.f32.mrf.mxu2  ;;  %v2068_v28 = vpop.f32.mrf.mxu0 }
  0xbb   : > { %v2165_v23 = vadd.f32 %v2164_v17, %v2116_v6  ;;  %v2069_v29 = vadd.f32 %v2068_v28, %v11584_v63  ;;  %v2117_v30 = vpop.f32.mrf.mxu1  ;;  %v8905_v6 = vor.u32 %v10490_v62, %v8904_v60  ;;  %v8138_v17 = vld [vmem:[%s16315_s1 + $0x1b8] sm:$0xf0] }
  0xbc   : > { %v8141_v22 = vor.u32 %v10292_v16, %v8138_v17 }
  0xbd   : > { %v2118_v33 = vadd.f32 %v2117_v30, %v2069_v29  ;;  %v3821_v48 = vmax.f32 %v2165_v23, 0.0  ;;  %2452 = vmatpush.bf16.msra.mxu0 %v8905_v6 }
  0xbe   : > { %2501 = vmatpush.bf16.msra.mxu1 %v8141_v22 }
  0xc1   : > { %v11618_v37 = vpop.f32.mrf.mxu3 }
  0xc2   : > { %v2166_v35 = vpop.f32.mrf.mxu2  ;;  %v2071_v44 = vpop.f32.mrf.mxu0 }
  0xc3   : > { %v2167_v36 = vadd.f32 %v2166_v35, %v2118_v33  ;;  %v2072_v45 = vadd.f32 %v2071_v44, %v11584_v63  ;;  %v2120_v47 = vpop.f32.mrf.mxu1  ;;  %v10376_v44 = vld [vmem:[%s16315_s1 + $0x42c] sm:$0xf] }
  0xc5   : > { %v3833_v54 = vmax.f32 %v2167_v36, 0.0  ;;  %v2121_v55 = vadd.f32 %v2120_v47, %v2072_v45  ;;  %2266 = vmatmul.bf16.gmra.mxu0 %v11306_v20  ;;  %v8474_v45 = vld [vmem:[%s16315_s1 + $0x458] sm:$0xf0]  ;;  %v8856_v47 = vld [vmem:[%s16315_s1 + $0x728] sm:$0xf] }
  0xc6   : > { %2315 = vmatmul.bf16.gmra.mxu1 %v11308_v21  ;;  %2413 = vmatmul.bf16.gmra.mxu3 %v11306_v20 }
  0xc7   : > { %v11622_v56 = vpack.c.bf16 %v3833_v54, %v3821_v48  ;;  %2364 = vmatmul.bf16.gmra.mxu2 %v11304_v19  ;;  %v8477_v48 = vor.u32 %v10376_v44, %v8474_v45  ;;  %v10478_v54 = vld [vmem:[%s16315_s1 + $0x754] sm:$0xf0] }
  0xc8   : > { %v8857_v60 = vor.u32 %v10478_v54, %v8856_v47  ;;  %v10466_v45 = vld [vmem:[%s16315_s1 + $0x6f4] sm:$0xf0]  ;;  %v10460_v47 = vld [vmem:[%s16315_s1 + $0x6cc] sm:$0xf] }
  0xc9   : > { %v11645_v9 = vpop.f32.mrf.mxu3  ;;  %2551 = vmatpush.bf16.msra.mxu2 %v8477_v48  ;;  %v8810_v48 = vld [vmem:[%s16315_s1 + $0x6f8] sm:$0xf0] }
  0xca   : > { %v2169_v5 = vpop.f32.mrf.mxu2  ;;  %v2073_v10 = vpop.f32.mrf.mxu0  ;;  %2453 = vmatpush.bf16.msra.mxu0 %v8857_v60 }
  0xcb   : > { %v2170_v8 = vadd.f32 %v2169_v5, %v2121_v55  ;;  %v2074_v14 = vadd.f32 %v2073_v10, %v11584_v63  ;;  %v2122_v15 = vpop.f32.mrf.mxu1  ;;  %v10472_v55 = vld [vmem:[%s16315_s1 + $0x72c] sm:$0xf] }
  0xcc   : > { %v8861_v61 = vor.u32 %v10472_v55, %v8858_v57  ;;  %v8813_v57 = vor.u32 %v10460_v47, %v8810_v48  ;;  %v10448_v47 = vld [vmem:[%s16315_s1 + $0x66c] sm:$0xf]  ;;  %v8762_v48 = vld [vmem:[%s16315_s1 + $0x698] sm:$0xf0] }
  0xcd   : > { %v2123_v18 = vadd.f32 %v2122_v15, %v2074_v14  ;;  %v3845_v33 = vmax.f32 %v2170_v8, 0.0  ;;  %v8090_v8 = vld [vmem:[%s16315_s1 + $0x158] sm:$0xf0] }
  0xce   : > { %2600 = vmatpush.bf16.msra.mxu3 %v8861_v61  ;;  %v8093_v14 = vor.u32 %v10280_v7, %v8090_v8 }
  0xd0   : > { %2502 = vmatpush.bf16.msra.mxu1 %v8093_v14 }
  0xd1   : > { %v11654_v29 = vpop.f32.mrf.mxu3 }
  0xd2   : > { %v2171_v23 = vpop.f32.mrf.mxu2  ;;  %v2076_v30 = vpop.f32.mrf.mxu0  ;;  %2601 = vmatpush.bf16.msra.mxu3 %v8813_v57  ;;  %v8765_v57 = vor.u32 %v10448_v47, %v8762_v48  ;;  %v8712_v47 = vld [vmem:[%s16315_s1 + $0x608] sm:$0xf] }
  0xd3   : > { %v2172_v28 = vadd.f32 %v2171_v23, %v2123_v18  ;;  %v2077_v31 = vadd.f32 %v2076_v30, %v11584_v63  ;;  %v2125_v32 = vpop.f32.mrf.mxu1 }
  0xd5   : > { %v3857_v34 = vmax.f32 %v2172_v28, 0.0  ;;  %v2126_v35 = vadd.f32 %v2125_v32, %v2077_v31  ;;  %2271 = vmatmul.bf16.gmra.mxu0 %v11346_v41 }
  0xd6   : > { %2320 = vmatmul.bf16.gmra.mxu1 %v11348_v42  ;;  %2418 = vmatmul.bf16.gmra.mxu3 %v11346_v41 }
  0xd7   : > { %2369 = vmatmul.bf16.gmra.mxu2 %v11344_v40  ;;  %v11660_v36 = vpack.c.bf16 %v3857_v34, %v3845_v33  ;;  %v10364_v33 = vld [vmem:[%s16315_s1 + $0x3cc] sm:$0xf]  ;;  %v8426_v34 = vld [vmem:[%s16315_s1 + $0x3f8] sm:$0xf0]  ;;  %2602 = vmatpush.bf16.msra.mxu3 %v8765_v57 }
  0xd8   : > { %v8429_v44 = vor.u32 %v10364_v33, %v8426_v34  ;;  %v10352_v33 = vld [vmem:[%s16315_s1 + $0x36c] sm:$0xf]  ;;  %v8378_v34 = vld [vmem:[%s16315_s1 + $0x398] sm:$0xf0] }
  0xd9   : > { %16410 = vst [vmem:[#allocation5_spill] sm:$0xff] %v11660_v36  ;;  %v11681_v3 = vpop.f32.mrf.mxu3  ;;  %v8714_v57 = vld [vmem:[%s16315_s1 + $0x638] sm:$0xf0] }
  0xda   : > { %v2174_v58 = vpop.f32.mrf.mxu2  ;;  %v2078_v4 = vpop.f32.mrf.mxu0  ;;  %2552 = vmatpush.bf16.msra.mxu2 %v8429_v44  ;;  %v8381_v44 = vor.u32 %v10352_v33, %v8378_v34 }
  0xdb   : > { %v2175_v62 = vadd.f32 %v2174_v58, %v2126_v35  ;;  %v2079_v5 = vadd.f32 %v2078_v4, %v11584_v63  ;;  %v2127_v6 = vpop.f32.mrf.mxu1  ;;  %v8808_v35 = vld [vmem:[%s16315_s1 + $0x6c8] sm:$0xf] }
  0xdc   : > { %v8809_v55 = vor.u32 %v10466_v45, %v8808_v35  ;;  %v8760_v35 = vld [vmem:[%s16315_s1 + $0x668] sm:$0xf]  ;;  %v10454_v45 = vld [vmem:[%s16315_s1 + $0x694] sm:$0xf0] }
  0xdd   : > { %v2128_v10 = vadd.f32 %v2127_v6, %v2079_v5  ;;  %v3869_v28 = vmax.f32 %v2175_v62, 0.0  ;;  %v10268_v5 = vld [vmem:[%s16315_s1 + $0xcc] sm:$0xf]  ;;  %v8042_v6 = vld [vmem:[%s16315_s1 + $0xf8] sm:$0xf0] }
  0xde   : > { %2454 = vmatpush.bf16.msra.mxu0 %v8809_v55  ;;  %v8045_v8 = vor.u32 %v10268_v5, %v8042_v6  ;;  %v8761_v55 = vor.u32 %v10454_v45, %v8760_v35  ;;  %2553 = vmatpush.bf16.msra.mxu2 %v8381_v44  ;;  %v10256_v6 = vld [vmem:[%s16315_s1 + $0x6c] sm:$0xf]  ;;  %v8330_v45 = vld [vmem:[%s16315_s1 + $0x338] sm:$0xf0] }
  0xdf   : > { %v10340_v44 = vld [vmem:[%s16315_s1 + $0x30c] sm:$0xf] }
  0xe0   : > { %2503 = vmatpush.bf16.msra.mxu1 %v8045_v8  ;;  %v8333_v48 = vor.u32 %v10340_v44, %v8330_v45 }
  0xe1   : > { %v11690_v17 = vpop.f32.mrf.mxu3 }
  0xe2   : > { %v2176_v15 = vpop.f32.mrf.mxu2  ;;  %v2081_v18 = vpop.f32.mrf.mxu0  ;;  %2455 = vmatpush.bf16.msra.mxu0 %v8761_v55  ;;  %v10436_v55 = vld [vmem:[%s16315_s1 + $0x60c] sm:$0xf]  ;;  %2554 = vmatpush.bf16.msra.mxu2 %v8333_v48 }
  0xe3   : > { %v2177_v16 = vadd.f32 %v2176_v15, %v2128_v10  ;;  %v2082_v22 = vadd.f32 %v2081_v18, %v11584_v63  ;;  %v2130_v23 = vpop.f32.mrf.mxu1 }
  0xe5   : > { %v3881_v30 = vmax.f32 %v2177_v16, 0.0  ;;  %v2131_v31 = vadd.f32 %v2130_v23, %v2082_v22  ;;  %2276 = vmatmul.bf16.gmra.mxu0 %v11386_v1 }
  0xe6   : > { %2325 = vmatmul.bf16.gmra.mxu1 %v11388_v2  ;;  %2423 = vmatmul.bf16.gmra.mxu3 %v11386_v1 }
  0xe7   : > { %2374 = vmatmul.bf16.gmra.mxu2 %v11384_v0  ;;  %v11696_v32 = vpack.c.bf16 %v3881_v30, %v3869_v28 }
  0xe9   : > { %16411 = vst [vmem:[#allocation6_spill] sm:$0xff] %v11696_v32  ;;  %v11717_v60 = vpop.f32.mrf.mxu3 }
  0xea   : > { %v2179_v54 = vpop.f32.mrf.mxu2  ;;  %v2083_v61 = vpop.f32.mrf.mxu0 }
  0xeb   : > { %v2180_v58 = vadd.f32 %v2179_v54, %v2131_v31  ;;  %v2084_v62 = vadd.f32 %v2083_v61, %v11584_v63  ;;  %v2132_v4 = vpop.f32.mrf.mxu1 }
  0xed   : > { %v2133_v7 = vadd.f32 %v2132_v4, %v2084_v62  ;;  %v3893_v23 = vmax.f32 %v2180_v58, 0.0 }
  0xf1   : > { %v11726_v15 = vpop.f32.mrf.mxu3 }
  0xf2   : > { %v2181_v10 = vpop.f32.mrf.mxu2  ;;  %v2086_v16 = vpop.f32.mrf.mxu0 }
  0xf3   : > { %v2182_v14 = vadd.f32 %v2181_v10, %v2133_v7  ;;  %v2087_v18 = vadd.f32 %v2086_v16, %v11584_v63  ;;  %v2135_v22 = vpop.f32.mrf.mxu1  ;;  %v7994_v7 = vld [vmem:[%s16315_s1 + $0x98] sm:$0xf0] }
  0xf4   : > { %v7997_v10 = vor.u32 %v10256_v6, %v7994_v7 }
  0xf5   : > { %v3905_v28 = vmax.f32 %v2182_v14, 0.0  ;;  %v2136_v30 = vadd.f32 %v2135_v22, %v2087_v18  ;;  %2281 = vmatmul.bf16.gmra.mxu0 %v11426_v25 }
  0xf6   : > { %2330 = vmatmul.bf16.gmra.mxu1 %v11428_v26  ;;  %2428 = vmatmul.bf16.gmra.mxu3 %v11426_v25 }
  0xf7   : > { %2379 = vmatmul.bf16.gmra.mxu2 %v11424_v24  ;;  %v11732_v31 = vpack.c.bf16 %v3905_v28, %v3893_v23  ;;  %2504 = vmatpush.bf16.msra.mxu1 %v7997_v10 }
  0xf9   : > { %16412 = vst [vmem:[#allocation7_spill] sm:$0xff] %v11732_v31  ;;  %v11753_v61 = vpop.f32.mrf.mxu3 }
  0xfa   : > { %v2184_v54 = vpop.f32.mrf.mxu2  ;;  %v2088_v62 = vpop.f32.mrf.mxu0 }
  0xfb   : > { %v2185_v58 = vadd.f32 %v2184_v54, %v2136_v30  ;;  %v2089_v4 = vadd.f32 %v2088_v62, %v11584_v63  ;;  %v2137_v5 = vpop.f32.mrf.mxu1  ;;  %v10442_v54 = vld [vmem:[%s16315_s1 + $0x634] sm:$0xf0] }
  0xfc   : > { %v8713_v62 = vor.u32 %v10442_v54, %v8712_v47 }
  0xfd   : > { %v2138_v8 = vadd.f32 %v2137_v5, %v2089_v4  ;;  %v3917_v30 = vmax.f32 %v2185_v58, 0.0  ;;  %v8717_v4 = vor.u32 %v10436_v55, %v8714_v57  ;;  %v9056_v57 = vld [vmem:[%s16315_s1 + $0x8b0] sm:$0xf] }
  0xfe   : > { %2456 = vmatpush.bf16.msra.mxu0 %v8713_v62  ;;  %v8288_v62 = vld [vmem:[%s16315_s1 + $0x2b0] sm:$0xf] }
  0xff   : > { %2603 = vmatpush.bf16.msra.mxu3 %v8717_v4 }
 0x101   : > { %v11762_v18 = vpop.f32.mrf.mxu3 }
 0x102   : > { %v2186_v14 = vpop.f32.mrf.mxu2  ;;  %v2091_v22 = vpop.f32.mrf.mxu0 }
 0x103   : > { %v2187_v16 = vadd.f32 %v2186_v14, %v2138_v8  ;;  %v2092_v23 = vadd.f32 %v2091_v22, %v11584_v63  ;;  %v2140_v28 = vpop.f32.mrf.mxu1  ;;  %v10244_v14 = vld [vmem:[%s16315_s1 + $0xc] sm:$0xf] }
 0x105   : > { %v3929_v33 = vmax.f32 %v2187_v16, 0.0  ;;  %v2141_v34 = vadd.f32 %v2140_v28, %v2092_v23  ;;  %2286 = vmatmul.bf16.gmra.mxu0 %v11466_v50  ;;  %v7946_v16 = vld [vmem:[%s16315_s1 + $0x38] sm:$0xf0] }
 0x106   : > { %2335 = vmatmul.bf16.gmra.mxu1 %v11468_v53  ;;  %2433 = vmatmul.bf16.gmra.mxu3 %v11466_v50  ;;  %v7949_v23 = vor.u32 %v10244_v14, %v7946_v16 }
 0x107   : > { %2384 = vmatmul.bf16.gmra.mxu2 %v11464_v49  ;;  %v11768_v35 = vpack.c.bf16 %v3929_v33, %v3917_v30 }
 0x108   : > { %2505 = vmatpush.bf16.msra.mxu1 %v7949_v23 }
 0x109   : > { %16413 = vst [vmem:[#allocation8_spill] sm:$0xff] %v11768_v35  ;;  %v11789_v6 = vpop.f32.mrf.mxu3 }
 0x10a   : > { %v2189_v58 = vpop.f32.mrf.mxu2  ;;  %v2093_v7 = vpop.f32.mrf.mxu0 }
 0x10b   : > { %v2190_v5 = vadd.f32 %v2189_v58, %v2141_v34  ;;  %v2094_v8 = vadd.f32 %v2093_v7, %v11584_v63  ;;  %v2142_v10 = vpop.f32.mrf.mxu1  ;;  %v10527_v58 = vld [vmem:[%s16315_s1 + $0x8dc] sm:$0xf0]  ;;  %v10329_v7 = vld [vmem:[%s16315_s1 + $0x2b4] sm:$0xf] }
 0x10c   : > { %v9057_v4 = vor.u32 %v10527_v58, %v9056_v57 }
 0x10d   : > { %v2143_v22 = vadd.f32 %v2142_v10, %v2094_v8  ;;  %v3941_v47 = vmax.f32 %v2190_v5, 0.0  ;;  %v10335_v5 = vld [vmem:[%s16315_s1 + $0x2dc] sm:$0xf0]  ;;  %v8290_v8 = vld [vmem:[%s16315_s1 + $0x2e0] sm:$0xf0] }
 0x10e   : > { %v8289_v14 = vor.u32 %v10335_v5, %v8288_v62  ;;  %v8293_v16 = vor.u32 %v10329_v7, %v8290_v8  ;;  %2743 = vmatpush.bf16.msrb.mxu2 %v9057_v4 }
 0x110   : > { %2645 = vmatpush.bf16.msrb.mxu0 %v8289_v14  ;;  %2792 = vmatpush.bf16.msrb.mxu3 %v8293_v16  ;;  %v9008_v16 = vld [vmem:[%s16315_s1 + $0x850] sm:$0xf] }
 0x111   : > { %v11798_v33 = vpop.f32.mrf.mxu3 }
 0x112   : > { %v2191_v28 = vpop.f32.mrf.mxu2  ;;  %v2096_v34 = vpop.f32.mrf.mxu0 }
 0x113   : > { %v2192_v30 = vadd.f32 %v2191_v28, %v2143_v22  ;;  %v2097_v44 = vadd.f32 %v2096_v34, %v11584_v63  ;;  %v2145_v45 = vpop.f32.mrf.mxu1 }
 0x115   : > { %v3953_v48 = vmax.f32 %v2192_v30, 0.0  ;;  %v2146_v54 = vadd.f32 %v2145_v45, %v2097_v44  ;;  %2291 = vmatmul.bf16.gmra.mxu0 %v11506_v12  ;;  %v8672_v44 = vld [vmem:[%s16315_s1 + $0x5b0] sm:$0xf]  ;;  %v10431_v45 = vld [vmem:[%s16315_s1 + $0x5dc] sm:$0xf0] }
 0x116   : > { %2340 = vmatmul.bf16.gmra.mxu1 %v11508_v13  ;;  %2438 = vmatmul.bf16.gmra.mxu3 %v11506_v12 }
 0x117   : > { %2389 = vmatmul.bf16.gmra.mxu2 %v11504_v11  ;;  %v11804_v55 = vpack.c.bf16 %v3953_v48, %v3941_v47  ;;  %v8673_v48 = vor.u32 %v10431_v45, %v8672_v44  ;;  %v10317_v44 = vld [vmem:[%s16315_s1 + $0x254] sm:$0xf]  ;;  %v8242_v45 = vld [vmem:[%s16315_s1 + $0x280] sm:$0xf0] }
 0x119   : > { %16414 = vst [vmem:[#allocation9_spill] sm:$0xff] %v11804_v55  ;;  %v11825_v23 = vpop.f32.mrf.mxu3  ;;  %2694 = vmatpush.bf16.msrb.mxu1 %v8673_v48 }
 0x11a   : > { %v2194_v10 = vpop.f32.mrf.mxu2  ;;  %v2098_v28 = vpop.f32.mrf.mxu0 }
 0x11b   : > { %v2195_v22 = vadd.f32 %v2194_v10, %v2146_v54  ;;  %v2099_v30 = vadd.f32 %v2098_v28, %v11584_v63  ;;  %v2147_v34 = vpop.f32.mrf.mxu1  ;;  %v8240_v28 = vld [vmem:[%s16315_s1 + $0x250] sm:$0xf] }
 0x11d   : > { %v2148_v47 = vadd.f32 %v2147_v34, %v2099_v30  ;;  %v3965_v7 = vmax.f32 %v2195_v22, 0.0  ;;  %v10515_v22 = vld [vmem:[%s16315_s1 + $0x87c] sm:$0xf0] }
 0x11e   : > { %v9009_v30 = vor.u32 %v10515_v22, %v9008_v16  ;;  %v10323_v34 = vld [vmem:[%s16315_s1 + $0x27c] sm:$0xf0]  ;;  %v11871_v22 = vperm.slane %v11575_v59, 1 }
 0x11f   : > { %v8241_v48 = vor.u32 %v10323_v34, %v8240_v28  ;;  %v10419_v16 = vld [vmem:[%s16315_s1 + $0x57c] sm:$0xf0] }
 0x120   : > { %2744 = vmatpush.bf16.msrb.mxu2 %v9009_v30 }
 0x121   : > { %v11834_v58 = vpop.f32.mrf.mxu3  ;;  %2646 = vmatpush.bf16.msrb.mxu0 %v8241_v48 }
 0x122   : > { %v2196_v54 = vpop.f32.mrf.mxu2  ;;  %v2101_v62 = vpop.f32.mrf.mxu0 }
 0x123   : > { %v2197_v57 = vadd.f32 %v2196_v54, %v2148_v47  ;;  %v2102_v4 = vadd.f32 %v2101_v62, %v11584_v63  ;;  %v2150_v5 = vpop.f32.mrf.mxu1  ;;  %v8245_v54 = vor.u32 %v10317_v44, %v8242_v45 }
 0x125   : > { %v3977_v8 = vmax.f32 %v2197_v57, 0.0  ;;  %v2151_v10 = vadd.f32 %v2150_v5, %v2102_v4  ;;  %2296 = vmatmul.bf16.gmra.mxu0 %v11546_v39  ;;  %2793 = vmatpush.bf16.msrb.mxu3 %v8245_v54 }
 0x126   : > { %2345 = vmatmul.bf16.gmra.mxu1 %v11548_v43  ;;  %2443 = vmatmul.bf16.gmra.mxu3 %v11546_v39 }
 0x127   : > { %2394 = vmatmul.bf16.gmra.mxu2 %v11544_v38  ;;  %v11840_v14 = vpack.c.bf16 %v3977_v8, %v3965_v7  ;;  %v8624_v8 = vld [vmem:[%s16315_s1 + $0x550] sm:$0xf] }
 0x128   : > { %v8625_v28 = vor.u32 %v10419_v16, %v8624_v8  ;;  %v8192_v16 = vld [vmem:[%s16315_s1 + $0x1f0] sm:$0xf] }
 0x129   : > { %16415 = vst [vmem:[#allocation10_spill] sm:$0xff] %v11840_v14  ;;  %v11861_v62 = vpop.f32.mrf.mxu3 }
 0x12a   : > { %v2199_v47 = vpop.f32.mrf.mxu2  ;;  %v2103_v4 = vpop.f32.mrf.mxu0  ;;  %2695 = vmatpush.bf16.msrb.mxu1 %v8625_v28  ;;  %v2216_v28 = vadd.f32 %v11618_v37, %v11871_v22  ;;  %v8576_v37 = vld [vmem:[%s16315_s1 + $0x4f0] sm:$0xf] }
 0x12b   : > { %v2200_v57 = vadd.f32 %v2199_v47, %v2151_v10  ;;  %v2104_v5 = vadd.f32 %v2103_v4, %v11584_v63  ;;  %v2152_v7 = vpop.f32.mrf.mxu1  ;;  %v2214_v63 = vadd.f32 %v11609_v27, %v11871_v22 }
 0x12d   : > { %v2153_v10 = vadd.f32 %v2152_v7, %v2104_v5  ;;  %v3989_v54 = vmax.f32 %v2200_v57, 0.0  ;;  %v11881_v5 = vperm.slane %v11575_v59, 2  ;;  %v8960_v7 = vld [vmem:[%s16315_s1 + $0x7f0] sm:$0xf]  ;;  %v10503_v57 = vld [vmem:[%s16315_s1 + $0x81c] sm:$0xf0] }
 0x12e   : > { %v8961_v8 = vor.u32 %v10503_v57, %v8960_v7  ;;  %v10311_v59 = vld [vmem:[%s16315_s1 + $0x21c] sm:$0xf0] }
 0x130   : > { %2745 = vmatpush.bf16.msrb.mxu2 %v8961_v8  ;;  %v2219_v8 = vadd.f32 %v11645_v9, %v11871_v22  ;;  %v8912_v9 = vld [vmem:[%s16315_s1 + $0x790] sm:$0xf] }
 0x131   : > { %v11875_v44 = vpop.f32.mrf.mxu3 }
 0x132   : > { %v2201_v30 = vpop.f32.mrf.mxu2  ;;  %v2262_v45 = vpop.f32.mrf.mxu0 }
 0x133   : > { %v2202_v34 = vadd.f32 %v2201_v30, %v2153_v10  ;;  %v2263_v47 = vadd.f32 %v2262_v45, %v2214_v63  ;;  %v2311_v48 = vpop.f32.mrf.mxu1  ;;  %v10305_v10 = vld [vmem:[%s16315_s1 + $0x1f4] sm:$0xf]  ;;  %v8193_v30 = vor.u32 %v10311_v59, %v8192_v16  ;;  %v10407_v16 = vld [vmem:[%s16315_s1 + $0x51c] sm:$0xf0] }
 0x135   : > { %v4001_v4 = vmax.f32 %v2202_v34, 0.0  ;;  %v2312_v14 = vadd.f32 %v2311_v48, %v2263_v47  ;;  %2457 = vmatmul.bf16.vlgmr.msra.gmra.mxu0 %v11250_v52  ;;  %v8194_v34 = vld [vmem:[%s16315_s1 + $0x220] sm:$0xf0] }
 0x136   : > { %2506 = vmatmul.bf16.vlgmr.msra.gmra.mxu1 %v11243_v46  ;;  %2604 = vmatmul.bf16.vlgmr.msra.gmra.mxu3 %v11250_v52 }
 0x137   : > { %2555 = vmatmul.bf16.vlgmr.msra.gmra.mxu2 %v11248_v51  ;;  %v11883_v27 = vpack.c.bf16 %v4001_v4, %v3989_v54  ;;  %v8197_v54 = vor.u32 %v10305_v10, %v8194_v34  ;;  %2647 = vmatpush.bf16.msrb.mxu0 %v8193_v30 }
 0x139   : > { %16416 = vst [vmem:[#allocation11_spill] sm:$0xff] %v11883_v27  ;;  %v2409_v47 = vpop.f32.mrf.mxu3  ;;  %2794 = vmatpush.bf16.msrb.mxu3 %v8197_v54  ;;  %v3822_v27 = vmax.f32 %v2312_v14, 0.0 }
 0x13a   : > { %v2360_v63 = vpop.f32.mrf.mxu2  ;;  %v2264_v48 = vpop.f32.mrf.mxu0 }
 0x13b   : > { %v2361_v45 = vadd.f32 %v2360_v63, %v11881_v5  ;;  %v2265_v4 = vadd.f32 %v2264_v48, %v2216_v28  ;;  %v2313_v7 = vpop.f32.mrf.mxu1  ;;  %v8577_v63 = vor.u32 %v10407_v16, %v8576_v37  ;;  %v2221_v37 = vadd.f32 %v11654_v29, %v11871_v22  ;;  %v8528_v29 = vld [vmem:[%s16315_s1 + $0x490] sm:$0xf] }
 0x13d   : > { %v11907_v57 = vadd.f32 %v2409_v47, %v2361_v45  ;;  %v2314_v59 = vadd.f32 %v2313_v7, %v2265_v4  ;;  %2696 = vmatpush.bf16.msrb.mxu1 %v8577_v63  ;;  %v10299_v4 = vld [vmem:[%s16315_s1 + $0x1bc] sm:$0xf0]  ;;  %v10293_v7 = vld [vmem:[%s16315_s1 + $0x194] sm:$0xf]  ;;  %v8146_v63 = vld [vmem:[%s16315_s1 + $0x1c0] sm:$0xf0] }
 0x13f   : > { %v3834_v55 = vmax.f32 %v2314_v59, 0.0 }
 0x141   : > { %v11917_v10 = vpack.c.bf16 %v3834_v55, %v3822_v27  ;;  %v2411_v34 = vpop.f32.mrf.mxu3  ;;  %v10491_v55 = vld [vmem:[%s16315_s1 + $0x7bc] sm:$0xf0]  ;;  %v8144_v27 = vld [vmem:[%s16315_s1 + $0x190] sm:$0xf] }
 0x142   : > { %v2362_v28 = vpop.f32.mrf.mxu2  ;;  %v2267_v45 = vpop.f32.mrf.mxu0  ;;  %v8913_v14 = vor.u32 %v10491_v55, %v8912_v9  ;;  %v8145_v59 = vor.u32 %v10299_v4, %v8144_v27  ;;  %v10395_v9 = vld [vmem:[%s16315_s1 + $0x4bc] sm:$0xf0] }
 0x143   : > { %v2363_v30 = vadd.f32 %v2362_v28, %v11881_v5  ;;  %v2268_v47 = vadd.f32 %v2267_v45, %v2219_v8  ;;  %v2316_v48 = vpop.f32.mrf.mxu1  ;;  %v8529_v27 = vor.u32 %v10395_v9, %v8528_v29  ;;  %v10287_v29 = vld [vmem:[%s16315_s1 + $0x15c] sm:$0xf0]  ;;  %v10281_v9 = vld [vmem:[%s16315_s1 + $0x134] sm:$0xf] }
 0x144   : > { %2746 = vmatpush.bf16.msrb.mxu2 %v8913_v14  ;;  %2648 = vmatpush.bf16.msrb.mxu0 %v8145_v59  ;;  %v2224_v14 = vadd.f32 %v11681_v3, %v11871_v22  ;;  %v8864_v3 = vld [vmem:[%s16315_s1 + $0x730] sm:$0xf] }
 0x145   : > { %v11920_v54 = vadd.f32 %v2411_v34, %v2363_v30  ;;  %v2317_v35 = vadd.f32 %v2316_v48, %v2268_v47  ;;  %2462 = vmatmul.bf16.gmra.mxu0 %v11308_v21  ;;  %v8149_v34 = vor.u32 %v10293_v7, %v8146_v63  ;;  %2697 = vmatpush.bf16.msrb.mxu1 %v8529_v27 }
 0x146   : > { %2511 = vmatmul.bf16.gmra.mxu1 %v11304_v19  ;;  %2609 = vmatmul.bf16.gmra.mxu3 %v11308_v21 }
 0x147   : > { %2560 = vmatmul.bf16.gmra.mxu2 %v11306_v20  ;;  %2795 = vmatpush.bf16.msrb.mxu3 %v8149_v34  ;;  %v3846_v4 = vmax.f32 %v2317_v35, 0.0  ;;  %v10479_v35 = vld [vmem:[%s16315_s1 + $0x75c] sm:$0xf0] }
 0x149   : > { %v2414_v28 = vpop.f32.mrf.mxu3 }
 0x14a   : > { %v2365_v16 = vpop.f32.mrf.mxu2  ;;  %v2269_v30 = vpop.f32.mrf.mxu0 }
 0x14b   : > { %v2366_v8 = vadd.f32 %v2365_v16, %v11881_v5  ;;  %v2270_v45 = vadd.f32 %v2269_v30, %v2221_v37  ;;  %v2318_v47 = vpop.f32.mrf.mxu1 }
 0x14d   : > { %v11947_v48 = vadd.f32 %v2414_v28, %v2366_v8  ;;  %v2319_v55 = vadd.f32 %v2318_v47, %v2270_v45  ;;  %v8865_v45 = vor.u32 %v10479_v35, %v8864_v3  ;;  %v8096_v47 = vld [vmem:[%s16315_s1 + $0x130] sm:$0xf]  ;;  %v10383_v3 = vld [vmem:[%s16315_s1 + $0x45c] sm:$0xf0] }
 0x14f   : > { %v3858_v16 = vmax.f32 %v2319_v55, 0.0  ;;  %v2226_v55 = vadd.f32 %v11690_v17, %v11871_v22  ;;  %2747 = vmatpush.bf16.msrb.mxu2 %v8865_v45  ;;  %v8480_v17 = vld [vmem:[%s16315_s1 + $0x430] sm:$0xf]  ;;  %v2229_v45 = vadd.f32 %v11717_v60, %v11871_v22 }
 0x150   : > { %v8816_v60 = vld [vmem:[%s16315_s1 + $0x6d0] sm:$0xf] }
 0x151   : > { %v11957_v37 = vpack.c.bf16 %v3858_v16, %v3846_v4  ;;  %v2416_v63 = vpop.f32.mrf.mxu3  ;;  %v8097_v4 = vor.u32 %v10287_v29, %v8096_v47  ;;  %v8098_v16 = vld [vmem:[%s16315_s1 + $0x160] sm:$0xf0]  ;;  %v8481_v47 = vor.u32 %v10383_v3, %v8480_v17  ;;  %v10275_v17 = vld [vmem:[%s16315_s1 + $0xfc] sm:$0xf0]  ;;  %v10269_v3 = vld [vmem:[%s16315_s1 + $0xd4] sm:$0xf] }
 0x152   : > { %v2367_v7 = vpop.f32.mrf.mxu2  ;;  %v2272_v8 = vpop.f32.mrf.mxu0 }
 0x153   : > { %16417 = vst [vmem:[#allocation12_spill] sm:$0xff] %v11957_v37  ;;  %v2368_v59 = vadd.f32 %v2367_v7, %v11881_v5  ;;  %v2273_v28 = vadd.f32 %v2272_v8, %v2224_v14  ;;  %v2321_v30 = vpop.f32.mrf.mxu1  ;;  %2649 = vmatpush.bf16.msrb.mxu0 %v8097_v4  ;;  %2698 = vmatpush.bf16.msrb.mxu1 %v8481_v47 }
 0x155   : > { %v11960_v34 = vadd.f32 %v2416_v63, %v2368_v59  ;;  %v2322_v31 = vadd.f32 %v2321_v30, %v2273_v28  ;;  %2467 = vmatmul.bf16.gmra.mxu0 %v11348_v42  ;;  %v8101_v63 = vor.u32 %v10281_v9, %v8098_v16 }
 0x156   : > { %2516 = vmatmul.bf16.gmra.mxu1 %v11344_v40  ;;  %2614 = vmatmul.bf16.gmra.mxu3 %v11348_v42 }
 0x157   : > { %2565 = vmatmul.bf16.gmra.mxu2 %v11346_v41  ;;  %2796 = vmatpush.bf16.msrb.mxu3 %v8101_v63  ;;  %v3870_v29 = vmax.f32 %v2322_v31, 0.0  ;;  %v10467_v31 = vld [vmem:[%s16315_s1 + $0x6fc] sm:$0xf0] }
 0x159   : > { %v2419_v7 = vpop.f32.mrf.mxu3 }
 0x15a   : > { %v2370_v27 = vpop.f32.mrf.mxu2  ;;  %v2274_v59 = vpop.f32.mrf.mxu0 }
 0x15b   : > { %v2371_v14 = vadd.f32 %v2370_v27, %v11881_v5  ;;  %v2275_v8 = vadd.f32 %v2274_v59, %v2226_v55  ;;  %v2323_v28 = vpop.f32.mrf.mxu1 }
 0x15d   : > { %v11987_v30 = vadd.f32 %v2419_v7, %v2371_v14  ;;  %v2324_v35 = vadd.f32 %v2323_v28, %v2275_v8  ;;  %v8817_v8 = vor.u32 %v10467_v31, %v8816_v60  ;;  %v8048_v28 = vld [vmem:[%s16315_s1 + $0xd0] sm:$0xf]  ;;  %v10371_v60 = vld [vmem:[%s16315_s1 + $0x3fc] sm:$0xf0] }
 0x15f   : > { %v3882_v27 = vmax.f32 %v2324_v35, 0.0  ;;  %v2231_v35 = vadd.f32 %v11726_v15, %v11871_v22  ;;  %2748 = vmatpush.bf16.msrb.mxu2 %v8817_v8  ;;  %v8432_v15 = vld [vmem:[%s16315_s1 + $0x3d0] sm:$0xf]  ;;  %v2234_v8 = vadd.f32 %v11753_v61, %v11871_v22  ;;  %v10455_v61 = vld [vmem:[%s16315_s1 + $0x69c] sm:$0xf0] }
 0x161   : > { %v11997_v55 = vpack.c.bf16 %v3882_v27, %v3870_v29  ;;  %v2421_v16 = vpop.f32.mrf.mxu3  ;;  %v8049_v29 = vor.u32 %v10275_v17, %v8048_v28  ;;  %v8050_v27 = vld [vmem:[%s16315_s1 + $0x100] sm:$0xf0]  ;;  %v8433_v28 = vor.u32 %v10371_v60, %v8432_v15  ;;  %v10263_v15 = vld [vmem:[%s16315_s1 + $0x9c] sm:$0xf0]  ;;  %v10257_v60 = vld [vmem:[%s16315_s1 + $0x74] sm:$0xf] }
 0x162   : > { %v2372_v9 = vpop.f32.mrf.mxu2  ;;  %v2277_v14 = vpop.f32.mrf.mxu0 }
 0x163   : > { %16418 = vst [vmem:[#allocation13_spill] sm:$0xff] %v11997_v55  ;;  %v2373_v4 = vadd.f32 %v2372_v9, %v11881_v5  ;;  %v2278_v7 = vadd.f32 %v2277_v14, %v2229_v45  ;;  %v2326_v59 = vpop.f32.mrf.mxu1  ;;  %2650 = vmatpush.bf16.msrb.mxu0 %v8049_v29  ;;  %2699 = vmatpush.bf16.msrb.mxu1 %v8433_v28 }
 0x165   : > { %v12000_v63 = vadd.f32 %v2421_v16, %v2373_v4  ;;  %v2327_v32 = vadd.f32 %v2326_v59, %v2278_v7  ;;  %2472 = vmatmul.bf16.gmra.mxu0 %v11388_v2  ;;  %v8053_v16 = vor.u32 %v10269_v3, %v8050_v27 }
 0x166   : > { %2521 = vmatmul.bf16.gmra.mxu1 %v11384_v0  ;;  %2619 = vmatmul.bf16.gmra.mxu3 %v11388_v2 }
 0x167   : > { %2570 = vmatmul.bf16.gmra.mxu2 %v11386_v1  ;;  %2797 = vmatpush.bf16.msrb.mxu3 %v8053_v16  ;;  %v3894_v17 = vmax.f32 %v2327_v32, 0.0  ;;  %v8768_v32 = vld [vmem:[%s16315_s1 + $0x670] sm:$0xf] }
 0x169   : > { %v2424_v9 = vpop.f32.mrf.mxu3 }
 0x16a   : > { %v2375_v47 = vpop.f32.mrf.mxu2  ;;  %v2279_v4 = vpop.f32.mrf.mxu0 }
 0x16b   : > { %v2376_v45 = vadd.f32 %v2375_v47, %v11881_v5  ;;  %v2280_v14 = vadd.f32 %v2279_v4, %v2231_v35  ;;  %v2328_v7 = vpop.f32.mrf.mxu1 }
 0x16d   : > { %v12027_v59 = vadd.f32 %v2424_v9, %v2376_v45  ;;  %v2329_v31 = vadd.f32 %v2328_v7, %v2280_v14  ;;  %v8769_v14 = vor.u32 %v10455_v61, %v8768_v32  ;;  %v8000_v7 = vld [vmem:[%s16315_s1 + $0x70] sm:$0xf]  ;;  %v10359_v32 = vld [vmem:[%s16315_s1 + $0x39c] sm:$0xf0] }
 0x16f   : > { %v3906_v47 = vmax.f32 %v2329_v31, 0.0  ;;  %v2236_v31 = vadd.f32 %v11762_v18, %v11871_v22  ;;  %2749 = vmatpush.bf16.msrb.mxu2 %v8769_v14  ;;  %v8384_v18 = vld [vmem:[%s16315_s1 + $0x370] sm:$0xf]  ;;  %v2239_v14 = vadd.f32 %v11789_v6, %v11871_v22 }
 0x170   : > { %v8720_v6 = vld [vmem:[%s16315_s1 + $0x610] sm:$0xf] }
 0x171   : > { %v12037_v35 = vpack.c.bf16 %v3906_v47, %v3894_v17  ;;  %v2426_v27 = vpop.f32.mrf.mxu3  ;;  %v8001_v17 = vor.u32 %v10263_v15, %v8000_v7  ;;  %v8002_v47 = vld [vmem:[%s16315_s1 + $0xa0] sm:$0xf0]  ;;  %v8385_v7 = vor.u32 %v10359_v32, %v8384_v18  ;;  %v10251_v18 = vld [vmem:[%s16315_s1 + $0x3c] sm:$0xf0]  ;;  %v10245_v32 = vld [vmem:[%s16315_s1 + $0x14] sm:$0xf] }
 0x172   : > { %v2377_v3 = vpop.f32.mrf.mxu2  ;;  %v2282_v45 = vpop.f32.mrf.mxu0 }
 0x173   : > { %16419 = vst [vmem:[#allocation14_spill] sm:$0xff] %v12037_v35  ;;  %v2378_v29 = vadd.f32 %v2377_v3, %v11881_v5  ;;  %v2283_v9 = vadd.f32 %v2282_v45, %v2234_v8  ;;  %v2331_v4 = vpop.f32.mrf.mxu1  ;;  %2651 = vmatpush.bf16.msrb.mxu0 %v8001_v17  ;;  %2700 = vmatpush.bf16.msrb.mxu1 %v8385_v7 }
 0x175   : > { %v12040_v16 = vadd.f32 %v2426_v27, %v2378_v29  ;;  %v2332_v55 = vadd.f32 %v2331_v4, %v2283_v9  ;;  %2477 = vmatmul.bf16.gmra.mxu0 %v11428_v26  ;;  %v8005_v27 = vor.u32 %v10257_v60, %v8002_v47 }
 0x176   : > { %2526 = vmatmul.bf16.gmra.mxu1 %v11424_v24  ;;  %2624 = vmatmul.bf16.gmra.mxu3 %v11428_v26 }
 0x177   : > { %2575 = vmatmul.bf16.gmra.mxu2 %v11426_v25  ;;  %2798 = vmatpush.bf16.msrb.mxu3 %v8005_v27  ;;  %v3918_v15 = vmax.f32 %v2332_v55, 0.0  ;;  %v10443_v55 = vld [vmem:[%s16315_s1 + $0x63c] sm:$0xf0] }
 0x179   : > { %v2429_v3 = vpop.f32.mrf.mxu3 }
 0x17a   : > { %v2380_v28 = vpop.f32.mrf.mxu2  ;;  %v2284_v29 = vpop.f32.mrf.mxu0 }
 0x17b   : > { %v2381_v8 = vadd.f32 %v2380_v28, %v11881_v5  ;;  %v2285_v45 = vadd.f32 %v2284_v29, %v2236_v31  ;;  %v2333_v9 = vpop.f32.mrf.mxu1 }
 0x17d   : > { %v12067_v4 = vadd.f32 %v2429_v3, %v2381_v8  ;;  %v2334_v61 = vadd.f32 %v2333_v9, %v2285_v45  ;;  %v8721_v45 = vor.u32 %v10443_v55, %v8720_v6  ;;  %v7952_v9 = vld [vmem:[%s16315_s1 + $0x10] sm:$0xf]  ;;  %v10347_v6 = vld [vmem:[%s16315_s1 + $0x33c] sm:$0xf0] }
 0x17f   : > { %v3930_v28 = vmax.f32 %v2334_v61, 0.0  ;;  %v2241_v61 = vadd.f32 %v11798_v33, %v11871_v22  ;;  %2750 = vmatpush.bf16.msrb.mxu2 %v8721_v45  ;;  %v8336_v33 = vld [vmem:[%s16315_s1 + $0x310] sm:$0xf]  ;;  %v2244_v45 = vadd.f32 %v11825_v23, %v11871_v22  ;;  %v8296_v23 = vld [vmem:[%s16315_s1 + $0x2b8] sm:$0xf] }
 0x181   : > { %v12077_v31 = vpack.c.bf16 %v3930_v28, %v3918_v15  ;;  %v2431_v47 = vpop.f32.mrf.mxu3  ;;  %v7953_v15 = vor.u32 %v10251_v18, %v7952_v9  ;;  %v7954_v28 = vld [vmem:[%s16315_s1 + $0x40] sm:$0xf0]  ;;  %v8337_v9 = vor.u32 %v10347_v6, %v8336_v33  ;;  %v8680_v6 = vld [vmem:[%s16315_s1 + $0x5b8] sm:$0xf] }
 0x182   : > { %v2382_v60 = vpop.f32.mrf.mxu2  ;;  %v2287_v8 = vpop.f32.mrf.mxu0  ;;  %v8674_v33 = vld [vmem:[%s16315_s1 + $0x5e0] sm:$0xf0] }
 0x183   : > { %16420 = vst [vmem:[#allocation15_spill] sm:$0xff] %v12077_v31  ;;  %v2383_v17 = vadd.f32 %v2382_v60, %v11881_v5  ;;  %v2288_v3 = vadd.f32 %v2287_v8, %v2239_v14  ;;  %v2336_v29 = vpop.f32.mrf.mxu1  ;;  %2652 = vmatpush.bf16.msrb.mxu0 %v7953_v15  ;;  %2701 = vmatpush.bf16.msrb.mxu1 %v8337_v9 }
 0x185   : > { %v12080_v27 = vadd.f32 %v2431_v47, %v2383_v17  ;;  %v2337_v35 = vadd.f32 %v2336_v29, %v2288_v3  ;;  %2482 = vmatmul.bf16.gmra.mxu0 %v11468_v53  ;;  %v7957_v47 = vor.u32 %v10245_v32, %v7954_v28 }
 0x186   : > { %2531 = vmatmul.bf16.gmra.mxu1 %v11464_v49  ;;  %2629 = vmatmul.bf16.gmra.mxu3 %v11468_v53 }
 0x187   : > { %2580 = vmatmul.bf16.gmra.mxu2 %v11466_v50  ;;  %2799 = vmatpush.bf16.msrb.mxu3 %v7957_v47  ;;  %v3942_v18 = vmax.f32 %v2337_v35, 0.0  ;;  %v10336_v35 = vld [vmem:[%s16315_s1 + $0x2e4] sm:$0xf0] }
 0x189   : > { %v2434_v60 = vpop.f32.mrf.mxu3 }
 0x18a   : > { %v2385_v7 = vpop.f32.mrf.mxu2  ;;  %v2289_v17 = vpop.f32.mrf.mxu0 }
 0x18b   : > { %v2386_v14 = vadd.f32 %v2385_v7, %v11881_v5  ;;  %v2290_v8 = vadd.f32 %v2289_v17, %v2241_v61  ;;  %v2338_v3 = vpop.f32.mrf.mxu1 }
 0x18d   : > { %v12107_v29 = vadd.f32 %v2434_v60, %v2386_v14  ;;  %v2339_v55 = vadd.f32 %v2338_v3, %v2290_v8  ;;  %v8297_v8 = vor.u32 %v10336_v35, %v8296_v23  ;;  %v10425_v3 = vld [vmem:[%s16315_s1 + $0x5b4] sm:$0xf]  ;;  %v9058_v35 = vld [vmem:[%s16315_s1 + $0x8e0] sm:$0xf0] }
 0x18f   : > { %v3954_v7 = vmax.f32 %v2339_v55, 0.0  ;;  %v2246_v55 = vadd.f32 %v11834_v58, %v11871_v22  ;;  %2939 = vmatpush.bf16.msra.mxu2 %v8297_v8  ;;  %v10521_v58 = vld [vmem:[%s16315_s1 + $0x8b4] sm:$0xf]  ;;  %v2249_v8 = vadd.f32 %v11861_v62, %v11871_v22  ;;  %v8248_v62 = vld [vmem:[%s16315_s1 + $0x258] sm:$0xf] }
 0x191   : > { %v12117_v61 = vpack.c.bf16 %v3954_v7, %v3942_v18  ;;  %v2436_v28 = vpop.f32.mrf.mxu3  ;;  %v8677_v18 = vor.u32 %v10425_v3, %v8674_v33  ;;  %v10432_v7 = vld [vmem:[%s16315_s1 + $0x5e4] sm:$0xf0] }
 0x192   : > { %v2387_v32 = vpop.f32.mrf.mxu2  ;;  %v2292_v14 = vpop.f32.mrf.mxu0 }
 0x193   : > { %16421 = vst [vmem:[#allocation16_spill] sm:$0xff] %v12117_v61  ;;  %v2388_v15 = vadd.f32 %v2387_v32, %v11881_v5  ;;  %v2293_v60 = vadd.f32 %v2292_v14, %v2244_v45  ;;  %v2341_v17 = vpop.f32.mrf.mxu1  ;;  %2841 = vmatpush.bf16.msra.mxu0 %v8677_v18  ;;  %v10497_v61 = vld [vmem:[%s16315_s1 + $0x7f4] sm:$0xf] }
 0x195   : > { %v12120_v47 = vadd.f32 %v2436_v28, %v2388_v15  ;;  %v2342_v31 = vadd.f32 %v2341_v17, %v2293_v60  ;;  %2487 = vmatmul.bf16.gmra.mxu0 %v11508_v13  ;;  %v8681_v28 = vor.u32 %v10432_v7, %v8680_v6 }
 0x196   : > { %2536 = vmatmul.bf16.gmra.mxu1 %v11504_v11  ;;  %2634 = vmatmul.bf16.gmra.mxu3 %v11508_v13 }
 0x197   : > { %2585 = vmatmul.bf16.gmra.mxu2 %v11506_v12  ;;  %2988 = vmatpush.bf16.msra.mxu3 %v8681_v28  ;;  %v3966_v3 = vmax.f32 %v2342_v31, 0.0  ;;  %v10324_v31 = vld [vmem:[%s16315_s1 + $0x284] sm:$0xf0] }
 0x199   : > { %v2439_v32 = vpop.f32.mrf.mxu3 }
 0x19a   : > { %v2390_v9 = vpop.f32.mrf.mxu2  ;;  %v2294_v15 = vpop.f32.mrf.mxu0 }
 0x19b   : > { %v2391_v45 = vadd.f32 %v2390_v9, %v11881_v5  ;;  %v2295_v14 = vadd.f32 %v2294_v15, %v2246_v55  ;;  %v2343_v60 = vpop.f32.mrf.mxu1  ;;  %v9061_v9 = vor.u32 %v10521_v58, %v9058_v35  ;;  %v8249_v35 = vor.u32 %v10324_v31, %v8248_v62  ;;  %v10509_v62 = vld [vmem:[%s16315_s1 + $0x854] sm:$0xf]  ;;  %v9010_v31 = vld [vmem:[%s16315_s1 + $0x880] sm:$0xf0] }
 0x19d   : > { %v12147_v17 = vadd.f32 %v2439_v32, %v2391_v45  ;;  %v2344_v23 = vadd.f32 %v2343_v60, %v2295_v14  ;;  %2890 = vmatpush.bf16.msra.mxu1 %v9061_v9  ;;  %v10413_v60 = vld [vmem:[%s16315_s1 + $0x554] sm:$0xf]  ;;  %v10420_v9 = vld [vmem:[%s16315_s1 + $0x584] sm:$0xf0]  ;;  %2940 = vmatpush.bf16.msra.mxu2 %v8249_v35 }
 0x19f   : > { %v3978_v33 = vmax.f32 %v2344_v23, 0.0  ;;  %v2251_v23 = vadd.f32 %v11875_v44, %v11871_v22 }
 0x1a1   : > { %v12157_v55 = vpack.c.bf16 %v3978_v33, %v3966_v3  ;;  %v2441_v7 = vpop.f32.mrf.mxu3  ;;  %v8626_v3 = vld [vmem:[%s16315_s1 + $0x580] sm:$0xf0]  ;;  %v8632_v33 = vld [vmem:[%s16315_s1 + $0x558] sm:$0xf] }
 0x1a2   : > { %v2392_v6 = vpop.f32.mrf.mxu2  ;;  %v2297_v45 = vpop.f32.mrf.mxu0  ;;  %v8633_v22 = vor.u32 %v10420_v9, %v8632_v33 }
 0x1a3   : > { %16422 = vst [vmem:[#allocation17_spill] sm:$0xff] %v12157_v55  ;;  %v2393_v18 = vadd.f32 %v2392_v6, %v11881_v5  ;;  %v2298_v32 = vadd.f32 %v2297_v45, %v2249_v8  ;;  %v2346_v15 = vpop.f32.mrf.mxu1 }
 0x1a4   : > { %2989 = vmatpush.bf16.msra.mxu3 %v8633_v22  ;;  %v10401_v22 = vld [vmem:[%s16315_s1 + $0x4f4] sm:$0xf] }
 0x1a5   : > { %v12160_v28 = vadd.f32 %v2441_v7, %v2393_v18  ;;  %v2347_v14 = vadd.f32 %v2346_v15, %v2298_v32  ;;  %2492 = vmatmul.bf16.gmra.mxu0 %v11548_v43  ;;  %v8629_v7 = vor.u32 %v10413_v60, %v8626_v3  ;;  %v9013_v60 = vor.u32 %v10509_v62, %v9010_v31  ;;  %v10408_v62 = vld [vmem:[%s16315_s1 + $0x524] sm:$0xf0] }
 0x1a6   : > { %2541 = vmatmul.bf16.gmra.mxu1 %v11544_v38  ;;  %2639 = vmatmul.bf16.gmra.mxu3 %v11548_v43 }
 0x1a7   : > { %2590 = vmatmul.bf16.gmra.mxu2 %v11546_v39  ;;  %2842 = vmatpush.bf16.msra.mxu0 %v8629_v7 }
 0x1a8   : > { %2891 = vmatpush.bf16.msra.mxu1 %v9013_v60 }
 0x1a9   : > { %v2444_v6 = vpop.f32.mrf.mxu3 }
 0x1aa   : > { %v2395_v58 = vpop.f32.mrf.mxu2  ;;  %v2299_v18 = vpop.f32.mrf.mxu0 }
 0x1ab   : > { %v2396_v8 = vadd.f32 %v2395_v58, %v11881_v5  ;;  %v2300_v44 = vadd.f32 %v2299_v18, %v2251_v23  ;;  %v2348_v45 = vpop.f32.mrf.mxu1  ;;  %v3990_v58 = vmax.f32 %v2347_v14, 0.0 }
 0x1ad   : > { %v12187_v32 = vadd.f32 %v2444_v6, %v2396_v8  ;;  %v2349_v15 = vadd.f32 %v2348_v45, %v2300_v44  ;;  %v12201_v8 = vld [vmem:[%s16316_s2] sm:$0xff] }
 0x1ae   : > { %v12204_v6 = vperm.slane %v12201_v8, 3  ;;  %v8578_v45 = vld [vmem:[%s16315_s1 + $0x520] sm:$0xf0] }
 0x1af   : > { %v4002_v55 = vmax.f32 %v2349_v15, 0.0  ;;  %v8584_v15 = vld [vmem:[%s16315_s1 + $0x4f8] sm:$0xf] }
 0x1b0   : > { %v8585_v60 = vor.u32 %v10408_v62, %v8584_v15 }
 0x1b1   : > { %v12195_v23 = vpack.c.bf16 %v4002_v55, %v3990_v58  ;;  %v2446_v33 = vpop.f32.mrf.mxu3  ;;  %v8581_v58 = vor.u32 %v10401_v22, %v8578_v45  ;;  %v8962_v22 = vld [vmem:[%s16315_s1 + $0x820] sm:$0xf0] }
 0x1b2   : > { %v2397_v3 = vpop.f32.mrf.mxu2  ;;  %v2458_v9 = vpop.f32.mrf.mxu0  ;;  %2990 = vmatpush.bf16.msra.mxu3 %v8585_v60  ;;  %v8965_v45 = vor.u32 %v10497_v61, %v8962_v22  ;;  %v8152_v61 = vld [vmem:[%s16315_s1 + $0x198] sm:$0xf]  ;;  %v10396_v22 = vld [vmem:[%s16315_s1 + $0x4c4] sm:$0xf0] }
 0x1b3   : > { %16423 = vst [vmem:[#allocation18_spill] sm:$0xff] %v12195_v23  ;;  %v2398_v35 = vadd.f32 %v2397_v3, %v11881_v5  ;;  %v2459_v14 = vadd.f32 %v2458_v9, %v11907_v57  ;;  %v2507_v18 = vpop.f32.mrf.mxu1  ;;  %v8200_v5 = vld [vmem:[%s16315_s1 + $0x1f8] sm:$0xf]  ;;  %v10312_v57 = vld [vmem:[%s16315_s1 + $0x224] sm:$0xf0]  ;;  %2843 = vmatpush.bf16.msra.mxu0 %v8581_v58 }
 0x1b4   : > { %v2508_v55 = vadd.f32 %v2507_v18, %v12204_v6  ;;  %v8201_v44 = vor.u32 %v10312_v57, %v8200_v5  ;;  %2892 = vmatpush.bf16.msra.mxu1 %v8965_v45 }
 0x1b5   : > { %v12207_v7 = vadd.f32 %v2446_v33, %v2398_v35  ;;  %2653 = vmatmul.bf16.vlgmr.msrb.gmra.mxu0 %v11243_v46  ;;  %v3823_v57 = vmax.f32 %v2459_v14, 0.0 }
 0x1b6   : > { %2702 = vmatmul.bf16.vlgmr.msrb.gmra.mxu1 %v11248_v51  ;;  %2800 = vmatmul.bf16.vlgmr.msrb.gmra.mxu3 %v11243_v46 }
 0x1b7   : > { %2751 = vmatmul.bf16.vlgmr.msrb.gmra.mxu2 %v11250_v52 }
 0x1b8   : > { %2941 = vmatpush.bf16.msra.mxu2 %v8201_v44 }
 0x1b9   : > { %v2605_v35 = vpop.f32.mrf.mxu3 }
 0x1ba   : > { %v2556_v31 = vpop.f32.mrf.mxu2  ;;  %v2460_v33 = vpop.f32.mrf.mxu0 }
 0x1bb   : > { %v2557_v3 = vadd.f32 %v2556_v31, %v2508_v55  ;;  %v2461_v9 = vadd.f32 %v2460_v33, %v11920_v54  ;;  %v2509_v18 = vpop.f32.mrf.mxu1 }
 0x1bc   : > { %v2510_v44 = vadd.f32 %v2509_v18, %v12204_v6 }
 0x1bd   : > { %v2606_v5 = vadd.f32 %v2605_v35, %v2557_v3  ;;  %v3835_v23 = vmax.f32 %v2461_v9, 0.0 }
 0x1bf   : > { %v12239_v55 = vpack.c.bf16 %v3835_v23, %v3823_v57  ;;  %v3824_v3 = vmax.f32 %v2606_v5, 0.0  ;;  %v10389_v23 = vld [vmem:[%s16315_s1 + $0x494] sm:$0xf]  ;;  %v8530_v5 = vld [vmem:[%s16315_s1 + $0x4c0] sm:$0xf0] }
 0x1c0   : > { %v8536_v57 = vld [vmem:[%s16315_s1 + $0x498] sm:$0xf] }
 0x1c1   : > { %v2607_v62 = vpop.f32.mrf.mxu3 }
 0x1c2   : > { %v2558_v54 = vpop.f32.mrf.mxu2  ;;  %v2463_v31 = vpop.f32.mrf.mxu0 }
 0x1c3   : > { %v2559_v15 = vadd.f32 %v2558_v54, %v2510_v44  ;;  %v2464_v14 = vadd.f32 %v2463_v31, %v11947_v48  ;;  %v2512_v58 = vpop.f32.mrf.mxu1  ;;  %v10300_v48 = vld [vmem:[%s16315_s1 + $0x1c4] sm:$0xf0]  ;;  %v8533_v44 = vor.u32 %v10389_v23, %v8530_v5  ;;  %v8537_v54 = vor.u32 %v10396_v22, %v8536_v57  ;;  %v8914_v23 = vld [vmem:[%s16315_s1 + $0x7c0] sm:$0xf0] }
 0x1c4   : > { %v2513_v33 = vadd.f32 %v2512_v58, %v12204_v6  ;;  %v8153_v18 = vor.u32 %v10300_v48, %v8152_v61  ;;  %v10485_v48 = vld [vmem:[%s16315_s1 + $0x794] sm:$0xf] }
 0x1c5   : > { %v2608_v60 = vadd.f32 %v2607_v62, %v2559_v15  ;;  %2658 = vmatmul.bf16.gmra.mxu0 %v11304_v19  ;;  %2991 = vmatpush.bf16.msra.mxu3 %v8537_v54 }
 0x1c6   : > { %2707 = vmatmul.bf16.gmra.mxu1 %v11306_v20  ;;  %2805 = vmatmul.bf16.gmra.mxu3 %v11304_v19 }
 0x1c7   : > { %v3836_v35 = vmax.f32 %v2608_v60, 0.0  ;;  %2756 = vmatmul.bf16.gmra.mxu2 %v11308_v21  ;;  %2844 = vmatpush.bf16.msra.mxu0 %v8533_v44 }
 0x1c8   : > { %2942 = vmatpush.bf16.msra.mxu2 %v8153_v18 }
 0x1c9   : > { %v12257_v9 = vpack.c.bf16 %v3836_v35, %v3824_v3  ;;  %v2610_v62 = vpop.f32.mrf.mxu3  ;;  %v3847_v35 = vmax.f32 %v2464_v14, 0.0 }
 0x1ca   : > { %v2561_v45 = vpop.f32.mrf.mxu2  ;;  %v2465_v31 = vpop.f32.mrf.mxu0 }
 0x1cb   : > { %16424 = vst [vmem:[#allocation19_spill] sm:$0xff] %v12257_v9  ;;  %v2562_v15 = vadd.f32 %v2561_v45, %v2513_v33  ;;  %v2466_v58 = vadd.f32 %v2465_v31, %v11960_v34  ;;  %v2514_v60 = vpop.f32.mrf.mxu1  ;;  %v8917_v33 = vor.u32 %v10485_v48, %v8914_v23  ;;  %v10384_v48 = vld [vmem:[%s16315_s1 + $0x464] sm:$0xf0] }
 0x1cc   : > { %v2515_v18 = vadd.f32 %v2514_v60, %v12204_v6  ;;  %v10377_v60 = vld [vmem:[%s16315_s1 + $0x434] sm:$0xf] }
 0x1cd   : > { %v2611_v3 = vadd.f32 %v2610_v62, %v2562_v15  ;;  %v3859_v61 = vmax.f32 %v2466_v58, 0.0  ;;  %2893 = vmatpush.bf16.msra.mxu1 %v8917_v33  ;;  %v8104_v58 = vld [vmem:[%s16315_s1 + $0x138] sm:$0xf] }
 0x1cf   : > { %v12275_v5 = vpack.c.bf16 %v3859_v61, %v3847_v35  ;;  %v3848_v15 = vmax.f32 %v2611_v3, 0.0  ;;  %v8482_v35 = vld [vmem:[%s16315_s1 + $0x460] sm:$0xf0]  ;;  %v8488_v61 = vld [vmem:[%s16315_s1 + $0x438] sm:$0xf] }
 0x1d1   : > { %16425 = vst [vmem:[#allocation20_spill] sm:$0xff] %v12275_v5  ;;  %v2612_v22 = vpop.f32.mrf.mxu3 }
 0x1d2   : > { %v2563_v34 = vpop.f32.mrf.mxu2  ;;  %v2468_v45 = vpop.f32.mrf.mxu0 }
 0x1d3   : > { %v2564_v57 = vadd.f32 %v2563_v34, %v2515_v18  ;;  %v2469_v14 = vadd.f32 %v2468_v45, %v11987_v30  ;;  %v2517_v44 = vpop.f32.mrf.mxu1  ;;  %v10288_v30 = vld [vmem:[%s16315_s1 + $0x164] sm:$0xf0]  ;;  %v8485_v18 = vor.u32 %v10377_v60, %v8482_v35  ;;  %v8489_v34 = vor.u32 %v10384_v48, %v8488_v61 }
 0x1d4   : > { %v2518_v31 = vadd.f32 %v2517_v44, %v12204_v6  ;;  %v8105_v3 = vor.u32 %v10288_v30, %v8104_v58 }
 0x1d5   : > { %v2613_v54 = vadd.f32 %v2612_v22, %v2564_v57  ;;  %2663 = vmatmul.bf16.gmra.mxu0 %v11344_v40  ;;  %2992 = vmatpush.bf16.msra.mxu3 %v8489_v34  ;;  %v3871_v30 = vmax.f32 %v2469_v14, 0.0 }
 0x1d6   : > { %2712 = vmatmul.bf16.gmra.mxu1 %v11346_v41  ;;  %2810 = vmatmul.bf16.gmra.mxu3 %v11344_v40 }
 0x1d7   : > { %v3860_v62 = vmax.f32 %v2613_v54, 0.0  ;;  %2761 = vmatmul.bf16.gmra.mxu2 %v11348_v42  ;;  %2845 = vmatpush.bf16.msra.mxu0 %v8485_v18 }
 0x1d8   : > { %2943 = vmatpush.bf16.msra.mxu2 %v8105_v3 }
 0x1d9   : > { %v12302_v23 = vpack.c.bf16 %v3860_v62, %v3848_v15  ;;  %v2615_v22 = vpop.f32.mrf.mxu3  ;;  %v10473_v15 = vld [vmem:[%s16315_s1 + $0x734] sm:$0xf]  ;;  %v8866_v62 = vld [vmem:[%s16315_s1 + $0x760] sm:$0xf0] }
 0x1da   : > { %v2566_v33 = vpop.f32.mrf.mxu2  ;;  %v2470_v45 = vpop.f32.mrf.mxu0 }
 0x1db   : > { %16426 = vst [vmem:[#allocation21_spill] sm:$0xff] %v12302_v23  ;;  %v2567_v57 = vadd.f32 %v2566_v33, %v2518_v31  ;;  %v2471_v44 = vadd.f32 %v2470_v45, %v12000_v63  ;;  %v2519_v54 = vpop.f32.mrf.mxu1  ;;  %v8869_v31 = vor.u32 %v10473_v15, %v8866_v62  ;;  %v10365_v45 = vld [vmem:[%s16315_s1 + $0x3d4] sm:$0xf] }
 0x1dc   : > { %v2520_v3 = vadd.f32 %v2519_v54, %v12204_v6  ;;  %v8434_v54 = vld [vmem:[%s16315_s1 + $0x400] sm:$0xf0] }
 0x1dd   : > { %v2616_v58 = vadd.f32 %v2615_v22, %v2567_v57  ;;  %v3883_v5 = vmax.f32 %v2471_v44, 0.0  ;;  %2894 = vmatpush.bf16.msra.mxu1 %v8869_v31  ;;  %v8437_v31 = vor.u32 %v10365_v45, %v8434_v54 }
 0x1df   : > { %v12311_v60 = vpack.c.bf16 %v3883_v5, %v3871_v30  ;;  %v3872_v34 = vmax.f32 %v2616_v58, 0.0  ;;  %v8056_v5 = vld [vmem:[%s16315_s1 + $0xd8] sm:$0xf]  ;;  %v10372_v30 = vld [vmem:[%s16315_s1 + $0x404] sm:$0xf0]  ;;  %2846 = vmatpush.bf16.msra.mxu0 %v8437_v31 }
 0x1e0   : > { %v8440_v58 = vld [vmem:[%s16315_s1 + $0x3d8] sm:$0xf] }
 0x1e1   : > { %16427 = vst [vmem:[#allocation22_spill] sm:$0xff] %v12311_v60  ;;  %v2617_v61 = vpop.f32.mrf.mxu3 }
 0x1e2   : > { %v2568_v63 = vpop.f32.mrf.mxu2  ;;  %v2473_v48 = vpop.f32.mrf.mxu0 }
 0x1e3   : > { %v2569_v35 = vadd.f32 %v2568_v63, %v2520_v3  ;;  %v2474_v14 = vadd.f32 %v2473_v48, %v12027_v59  ;;  %v2522_v33 = vpop.f32.mrf.mxu1  ;;  %v10276_v59 = vld [vmem:[%s16315_s1 + $0x104] sm:$0xf0]  ;;  %v8441_v3 = vor.u32 %v10372_v30, %v8440_v58 }
 0x1e4   : > { %v2523_v22 = vadd.f32 %v2522_v33, %v12204_v6  ;;  %v8057_v44 = vor.u32 %v10276_v59, %v8056_v5 }
 0x1e5   : > { %v2618_v18 = vadd.f32 %v2617_v61, %v2569_v35  ;;  %2668 = vmatmul.bf16.gmra.mxu0 %v11384_v0  ;;  %2993 = vmatpush.bf16.msra.mxu3 %v8441_v3  ;;  %v3895_v5 = vmax.f32 %v2474_v14, 0.0 }
 0x1e6   : > { %2717 = vmatmul.bf16.gmra.mxu1 %v11386_v1  ;;  %2815 = vmatmul.bf16.gmra.mxu3 %v11384_v0 }
 0x1e7   : > { %v3884_v57 = vmax.f32 %v2618_v18, 0.0  ;;  %2766 = vmatmul.bf16.gmra.mxu2 %v11388_v2 }
 0x1e8   : > { %2944 = vmatpush.bf16.msra.mxu2 %v8057_v44 }
 0x1e9   : > { %v12338_v15 = vpack.c.bf16 %v3884_v57, %v3872_v34  ;;  %v2620_v35 = vpop.f32.mrf.mxu3  ;;  %v10461_v34 = vld [vmem:[%s16315_s1 + $0x6d4] sm:$0xf]  ;;  %v8818_v57 = vld [vmem:[%s16315_s1 + $0x700] sm:$0xf0] }
 0x1ea   : > { %v2571_v62 = vpop.f32.mrf.mxu2  ;;  %v2475_v61 = vpop.f32.mrf.mxu0 }
 0x1eb   : > { %16428 = vst [vmem:[#allocation23_spill] sm:$0xff] %v12338_v15  ;;  %v2572_v63 = vadd.f32 %v2571_v62, %v2523_v22  ;;  %v2476_v48 = vadd.f32 %v2475_v61, %v12040_v16  ;;  %v2524_v33 = vpop.f32.mrf.mxu1  ;;  %v8821_v22 = vor.u32 %v10461_v34, %v8818_v57  ;;  %v8008_v61 = vld [vmem:[%s16315_s1 + $0x78] sm:$0xf] }
 0x1ec   : > { %v2525_v44 = vadd.f32 %v2524_v33, %v12204_v6 }
 0x1ed   : > { %v2621_v18 = vadd.f32 %v2620_v35, %v2572_v63  ;;  %v3907_v59 = vmax.f32 %v2476_v48, 0.0  ;;  %2895 = vmatpush.bf16.msra.mxu1 %v8821_v22  ;;  %v10353_v48 = vld [vmem:[%s16315_s1 + $0x374] sm:$0xf] }
 0x1ef   : > { %v12347_v45 = vpack.c.bf16 %v3907_v59, %v3895_v5  ;;  %v3896_v3 = vmax.f32 %v2621_v18, 0.0  ;;  %v8386_v18 = vld [vmem:[%s16315_s1 + $0x3a0] sm:$0xf0]  ;;  %v8392_v5 = vld [vmem:[%s16315_s1 + $0x378] sm:$0xf] }
 0x1f0   : > { %v10360_v59 = vld [vmem:[%s16315_s1 + $0x3a4] sm:$0xf0]  ;;  %v8389_v22 = vor.u32 %v10353_v48, %v8386_v18 }
 0x1f1   : > { %16429 = vst [vmem:[#allocation24_spill] sm:$0xff] %v12347_v45  ;;  %v2622_v58 = vpop.f32.mrf.mxu3  ;;  %v10421_v45 = vld [vmem:[%s16315_s1 + $0x58c] sm:$0xf0] }
 0x1f2   : > { %v2573_v16 = vpop.f32.mrf.mxu2  ;;  %v2478_v30 = vpop.f32.mrf.mxu0  ;;  %2847 = vmatpush.bf16.msra.mxu0 %v8389_v22 }
 0x1f3   : > { %v2574_v54 = vadd.f32 %v2573_v16, %v2525_v44  ;;  %v2479_v14 = vadd.f32 %v2478_v30, %v12067_v4  ;;  %v2527_v62 = vpop.f32.mrf.mxu1  ;;  %v10264_v4 = vld [vmem:[%s16315_s1 + $0xa4] sm:$0xf0]  ;;  %v8393_v44 = vor.u32 %v10360_v59, %v8392_v5 }
 0x1f4   : > { %v2528_v35 = vadd.f32 %v2527_v62, %v12204_v6  ;;  %v8009_v33 = vor.u32 %v10264_v4, %v8008_v61 }
 0x1f5   : > { %v2623_v31 = vadd.f32 %v2622_v58, %v2574_v54  ;;  %2673 = vmatmul.bf16.gmra.mxu0 %v11424_v24  ;;  %2994 = vmatpush.bf16.msra.mxu3 %v8393_v44  ;;  %v3919_v61 = vmax.f32 %v2479_v14, 0.0 }
 0x1f6   : > { %2722 = vmatmul.bf16.gmra.mxu1 %v11426_v25  ;;  %2820 = vmatmul.bf16.gmra.mxu3 %v11424_v24 }
 0x1f7   : > { %v3908_v63 = vmax.f32 %v2623_v31, 0.0  ;;  %2771 = vmatmul.bf16.gmra.mxu2 %v11428_v26 }
 0x1f8   : > { %2945 = vmatpush.bf16.msra.mxu2 %v8009_v33 }
 0x1f9   : > { %v12374_v34 = vpack.c.bf16 %v3908_v63, %v3896_v3  ;;  %v2625_v54 = vpop.f32.mrf.mxu3  ;;  %v10449_v3 = vld [vmem:[%s16315_s1 + $0x674] sm:$0xf]  ;;  %v8770_v63 = vld [vmem:[%s16315_s1 + $0x6a0] sm:$0xf0] }
 0x1fa   : > { %v2576_v57 = vpop.f32.mrf.mxu2  ;;  %v2480_v58 = vpop.f32.mrf.mxu0 }
 0x1fb   : > { %16430 = vst [vmem:[#allocation25_spill] sm:$0xff] %v12374_v34  ;;  %v2577_v16 = vadd.f32 %v2576_v57, %v2528_v35  ;;  %v2481_v30 = vadd.f32 %v2480_v58, %v12080_v27  ;;  %v2529_v62 = vpop.f32.mrf.mxu1  ;;  %v8773_v35 = vor.u32 %v10449_v3, %v8770_v63  ;;  %v7960_v58 = vld [vmem:[%s16315_s1 + $0x18] sm:$0xf] }
 0x1fc   : > { %v2530_v33 = vadd.f32 %v2529_v62, %v12204_v6 }
 0x1fd   : > { %v2626_v31 = vadd.f32 %v2625_v54, %v2577_v16  ;;  %v3931_v4 = vmax.f32 %v2481_v30, 0.0  ;;  %2896 = vmatpush.bf16.msra.mxu1 %v8773_v35  ;;  %v10341_v30 = vld [vmem:[%s16315_s1 + $0x314] sm:$0xf] }
 0x1ff   : > { %v12383_v48 = vpack.c.bf16 %v3931_v4, %v3919_v61  ;;  %v3920_v44 = vmax.f32 %v2626_v31, 0.0  ;;  %v8338_v31 = vld [vmem:[%s16315_s1 + $0x340] sm:$0xf0]  ;;  %v8344_v61 = vld [vmem:[%s16315_s1 + $0x318] sm:$0xf] }
 0x200   : > { %v10348_v4 = vld [vmem:[%s16315_s1 + $0x344] sm:$0xf0]  ;;  %v8341_v35 = vor.u32 %v10341_v30, %v8338_v31 }
 0x201   : > { %16431 = vst [vmem:[#allocation26_spill] sm:$0xff] %v12383_v48  ;;  %v2627_v5 = vpop.f32.mrf.mxu3  ;;  %v10433_v48 = vld [vmem:[%s16315_s1 + $0x5ec] sm:$0xf0] }
 0x202   : > { %v2578_v27 = vpop.f32.mrf.mxu2  ;;  %v2483_v59 = vpop.f32.mrf.mxu0  ;;  %2848 = vmatpush.bf16.msra.mxu0 %v8341_v35 }
 0x203   : > { %v2579_v18 = vadd.f32 %v2578_v27, %v2530_v33  ;;  %v2484_v14 = vadd.f32 %v2483_v59, %v12107_v29  ;;  %v2532_v57 = vpop.f32.mrf.mxu1  ;;  %v10252_v29 = vld [vmem:[%s16315_s1 + $0x44] sm:$0xf0]  ;;  %v8345_v33 = vor.u32 %v10348_v4, %v8344_v61 }
 0x204   : > { %v2533_v54 = vadd.f32 %v2532_v57, %v12204_v6  ;;  %v7961_v62 = vor.u32 %v10252_v29, %v7960_v58 }
 0x205   : > { %v2628_v22 = vadd.f32 %v2627_v5, %v2579_v18  ;;  %2678 = vmatmul.bf16.gmra.mxu0 %v11464_v49  ;;  %2995 = vmatpush.bf16.msra.mxu3 %v8345_v33  ;;  %v3943_v58 = vmax.f32 %v2484_v14, 0.0 }
 0x206   : > { %2727 = vmatmul.bf16.gmra.mxu1 %v11466_v50  ;;  %2825 = vmatmul.bf16.gmra.mxu3 %v11464_v49 }
 0x207   : > { %v3932_v16 = vmax.f32 %v2628_v22, 0.0  ;;  %2776 = vmatmul.bf16.gmra.mxu2 %v11468_v53 }
 0x208   : > { %2946 = vmatpush.bf16.msra.mxu2 %v7961_v62 }
 0x209   : > { %v12410_v3 = vpack.c.bf16 %v3932_v16, %v3920_v44  ;;  %v2630_v18 = vpop.f32.mrf.mxu3  ;;  %v10437_v44 = vld [vmem:[%s16315_s1 + $0x614] sm:$0xf]  ;;  %v8722_v16 = vld [vmem:[%s16315_s1 + $0x640] sm:$0xf0] }
 0x20a   : > { %v2581_v63 = vpop.f32.mrf.mxu2  ;;  %v2485_v5 = vpop.f32.mrf.mxu0 }
 0x20b   : > { %16432 = vst [vmem:[#allocation27_spill] sm:$0xff] %v12410_v3  ;;  %v2582_v27 = vadd.f32 %v2581_v63, %v2533_v54  ;;  %v2486_v59 = vadd.f32 %v2485_v5, %v12120_v47  ;;  %v2534_v57 = vpop.f32.mrf.mxu1  ;;  %v8725_v54 = vor.u32 %v10437_v44, %v8722_v16  ;;  %v10426_v5 = vld [vmem:[%s16315_s1 + $0x5bc] sm:$0xf] }
 0x20c   : > { %v2535_v62 = vadd.f32 %v2534_v57, %v12204_v6 }
 0x20d   : > { %v2631_v22 = vadd.f32 %v2630_v18, %v2582_v27  ;;  %v3955_v29 = vmax.f32 %v2486_v59, 0.0  ;;  %2897 = vmatpush.bf16.msra.mxu1 %v8725_v54  ;;  %v9064_v59 = vld [vmem:[%s16315_s1 + $0x8b8] sm:$0xf] }
 0x20f   : > { %v12419_v30 = vpack.c.bf16 %v3955_v29, %v3943_v58  ;;  %v3944_v33 = vmax.f32 %v2631_v22, 0.0  ;;  %v10528_v22 = vld [vmem:[%s16315_s1 + $0x8e4] sm:$0xf0]  ;;  %v10522_v58 = vld [vmem:[%s16315_s1 + $0x8bc] sm:$0xf] }
 0x210   : > { %v9066_v29 = vld [vmem:[%s16315_s1 + $0x8e8] sm:$0xf0]  ;;  %v9065_v54 = vor.u32 %v10528_v22, %v9064_v59 }
 0x211   : > { %16433 = vst [vmem:[#allocation28_spill] sm:$0xff] %v12419_v30  ;;  %v2632_v61 = vpop.f32.mrf.mxu3  ;;  %v7962_v30 = vld [vmem:[%s16315_s1 + $0x48] sm:$0xf0] }
 0x212   : > { %v2583_v47 = vpop.f32.mrf.mxu2  ;;  %v2488_v4 = vpop.f32.mrf.mxu0  ;;  %3037 = vmatpush.bf16.msrb.mxu0 %v9065_v54 }
 0x213   : > { %v2584_v31 = vadd.f32 %v2583_v47, %v2535_v62  ;;  %v2489_v14 = vadd.f32 %v2488_v4, %v12147_v17  ;;  %v2537_v63 = vpop.f32.mrf.mxu1  ;;  %v8682_v17 = vld [vmem:[%s16315_s1 + $0x5e8] sm:$0xf0]  ;;  %v9069_v62 = vor.u32 %v10522_v58, %v9066_v29 }
 0x214   : > { %v2538_v18 = vadd.f32 %v2537_v63, %v12204_v6  ;;  %v8685_v57 = vor.u32 %v10426_v5, %v8682_v17  ;;  %v10330_v5 = vld [vmem:[%s16315_s1 + $0x2bc] sm:$0xf] }
 0x215   : > { %v2633_v35 = vadd.f32 %v2632_v61, %v2584_v31  ;;  %2683 = vmatmul.bf16.gmra.mxu0 %v11504_v11  ;;  %3184 = vmatpush.bf16.msrb.mxu3 %v9069_v62 }
 0x216   : > { %2732 = vmatmul.bf16.gmra.mxu1 %v11506_v12  ;;  %2830 = vmatmul.bf16.gmra.mxu3 %v11504_v11 }
 0x217   : > { %v3956_v27 = vmax.f32 %v2633_v35, 0.0  ;;  %2781 = vmatmul.bf16.gmra.mxu2 %v11508_v13 }
 0x218   : > { %3135 = vmatpush.bf16.msrb.mxu2 %v8685_v57 }
 0x219   : > { %v12446_v44 = vpack.c.bf16 %v3956_v27, %v3944_v33  ;;  %v2635_v31 = vpop.f32.mrf.mxu3  ;;  %v8298_v33 = vld [vmem:[%s16315_s1 + $0x2e8] sm:$0xf0]  ;;  %v3967_v27 = vmax.f32 %v2489_v14, 0.0 }
 0x21a   : > { %v2586_v16 = vpop.f32.mrf.mxu2  ;;  %v2490_v61 = vpop.f32.mrf.mxu0 }
 0x21b   : > { %16434 = vst [vmem:[#allocation29_spill] sm:$0xff] %v12446_v44  ;;  %v2587_v47 = vadd.f32 %v2586_v16, %v2538_v18  ;;  %v2491_v4 = vadd.f32 %v2490_v61, %v12160_v28  ;;  %v2539_v63 = vpop.f32.mrf.mxu1  ;;  %v8301_v18 = vor.u32 %v10330_v5, %v8298_v33  ;;  %v10414_v61 = vld [vmem:[%s16315_s1 + $0x55c] sm:$0xf]  ;;  %v9018_v33 = vld [vmem:[%s16315_s1 + $0x888] sm:$0xf0] }
 0x21c   : > { %v2540_v28 = vadd.f32 %v2539_v63, %v12204_v6  ;;  %v10510_v5 = vld [vmem:[%s16315_s1 + $0x85c] sm:$0xf] }
 0x21d   : > { %v2636_v35 = vadd.f32 %v2635_v31, %v2587_v47  ;;  %v3979_v17 = vmax.f32 %v2491_v4, 0.0  ;;  %3086 = vmatpush.bf16.msrb.mxu1 %v8301_v18  ;;  %v9016_v4 = vld [vmem:[%s16315_s1 + $0x858] sm:$0xf] }
 0x21f   : > { %v12455_v59 = vpack.c.bf16 %v3979_v17, %v3967_v27  ;;  %v3968_v47 = vmax.f32 %v2636_v35, 0.0  ;;  %v10516_v35 = vld [vmem:[%s16315_s1 + $0x884] sm:$0xf0] }
 0x220   : > { %v9017_v18 = vor.u32 %v10516_v35, %v9016_v4  ;;  %v12492_v4 = vperm.slane %v12201_v8, 4  ;;  %v10402_v8 = vld [vmem:[%s16315_s1 + $0x4fc] sm:$0xf] }
 0x221   : > { %16435 = vst [vmem:[#allocation30_spill] sm:$0xff] %v12455_v59  ;;  %v2637_v58 = vpop.f32.mrf.mxu3  ;;  %v8010_v59 = vld [vmem:[%s16315_s1 + $0xa8] sm:$0xf0] }
 0x222   : > { %v2588_v57 = vpop.f32.mrf.mxu2  ;;  %v2493_v29 = vpop.f32.mrf.mxu0  ;;  %3038 = vmatpush.bf16.msrb.mxu0 %v9017_v18 }
 0x223   : > { %v2589_v22 = vadd.f32 %v2588_v57, %v2540_v28  ;;  %v2494_v16 = vadd.f32 %v2493_v29, %v12187_v32  ;;  %v2542_v54 = vpop.f32.mrf.mxu1  ;;  %v8634_v32 = vld [vmem:[%s16315_s1 + $0x588] sm:$0xf0]  ;;  %v9021_v28 = vor.u32 %v10510_v5, %v9018_v33 }
 0x224   : > { %v2543_v14 = vadd.f32 %v2542_v54, %v12204_v6  ;;  %v8637_v63 = vor.u32 %v10414_v61, %v8634_v32  ;;  %v10318_v61 = vld [vmem:[%s16315_s1 + $0x25c] sm:$0xf] }
 0x225   : > { %v2638_v62 = vadd.f32 %v2637_v58, %v2589_v22  ;;  %2688 = vmatmul.bf16.gmra.mxu0 %v11544_v38  ;;  %3185 = vmatpush.bf16.msrb.mxu3 %v9021_v28 }
 0x226   : > { %2737 = vmatmul.bf16.gmra.mxu1 %v11546_v39  ;;  %2835 = vmatmul.bf16.gmra.mxu3 %v11544_v38 }
 0x227   : > { %v3980_v31 = vmax.f32 %v2638_v62, 0.0  ;;  %2786 = vmatmul.bf16.gmra.mxu2 %v11548_v43 }
 0x228   : > { %3136 = vmatpush.bf16.msrb.mxu2 %v8637_v63 }
 0x229   : > { %v12482_v27 = vpack.c.bf16 %v3980_v31, %v3968_v47  ;;  %v2640_v22 = vpop.f32.mrf.mxu3  ;;  %v8250_v47 = vld [vmem:[%s16315_s1 + $0x288] sm:$0xf0]  ;;  %v3991_v31 = vmax.f32 %v2494_v16, 0.0 }
 0x22a   : > { %v2591_v17 = vpop.f32.mrf.mxu2  ;;  %v2495_v58 = vpop.f32.mrf.mxu0 }
 0x22b   : > { %16436 = vst [vmem:[#allocation31_spill] sm:$0xff] %v12482_v27  ;;  %v2592_v57 = vadd.f32 %v2591_v17, %v2543_v14  ;;  %v2496_v29 = vadd.f32 %v2495_v58, %v12207_v7  ;;  %v2544_v54 = vpop.f32.mrf.mxu1  ;;  %v8253_v14 = vor.u32 %v10318_v61, %v8250_v47  ;;  %v10498_v61 = vld [vmem:[%s16315_s1 + $0x7fc] sm:$0xf]  ;;  %v8970_v47 = vld [vmem:[%s16315_s1 + $0x828] sm:$0xf0] }
 0x22c   : > { %v2545_v63 = vadd.f32 %v2544_v54, %v12204_v6  ;;  %v8586_v6 = vld [vmem:[%s16315_s1 + $0x528] sm:$0xf0] }
 0x22d   : > { %v2641_v62 = vadd.f32 %v2640_v22, %v2592_v57  ;;  %v4003_v32 = vmax.f32 %v2496_v29, 0.0  ;;  %3087 = vmatpush.bf16.msrb.mxu1 %v8253_v14  ;;  %v8968_v29 = vld [vmem:[%s16315_s1 + $0x7f8] sm:$0xf]  ;;  %v8589_v54 = vor.u32 %v10402_v8, %v8586_v6 }
 0x22f   : > { %v12494_v7 = vpack.c.bf16 %v4003_v32, %v3991_v31  ;;  %v3992_v16 = vmax.f32 %v2641_v62, 0.0  ;;  %v10504_v62 = vld [vmem:[%s16315_s1 + $0x824] sm:$0xf0]  ;;  %3137 = vmatpush.bf16.msrb.mxu2 %v8589_v54 }
 0x230   : > { %v8969_v14 = vor.u32 %v10504_v62, %v8968_v29 }
 0x231   : > { %16437 = vst [vmem:[#allocation32_spill] sm:$0xff] %v12494_v7  ;;  %v2642_v33 = vpop.f32.mrf.mxu3  ;;  %v8058_v7 = vld [vmem:[%s16315_s1 + $0x108] sm:$0xf0] }
 0x232   : > { %v2593_v35 = vpop.f32.mrf.mxu2  ;;  %v2654_v17 = vpop.f32.mrf.mxu0  ;;  %3039 = vmatpush.bf16.msrb.mxu0 %v8969_v14 }
 0x233   : > { %v2594_v5 = vadd.f32 %v2593_v35, %v2545_v63  ;;  %v2655_v18 = vadd.f32 %v2654_v17, %v12492_v4  ;;  %v2703_v28 = vpop.f32.mrf.mxu1  ;;  %v8973_v63 = vor.u32 %v10498_v61, %v8970_v47 }
 0x235   : > { %v2643_v57 = vadd.f32 %v2642_v33, %v2594_v5  ;;  %v2704_v22 = vadd.f32 %v2703_v28, %v2655_v18  ;;  %2849 = vmatmul.bf16.vlgmr.msra.gmra.mxu0 %v11248_v51  ;;  %3186 = vmatpush.bf16.msrb.mxu3 %v8973_v63  ;;  %v10306_v28 = vld [vmem:[%s16315_s1 + $0x1fc] sm:$0xf] }
 0x236   : > { %2898 = vmatmul.bf16.vlgmr.msra.gmra.mxu1 %v11250_v52  ;;  %2996 = vmatmul.bf16.vlgmr.msra.gmra.mxu3 %v11248_v51  ;;  %v10390_v63 = vld [vmem:[%s16315_s1 + $0x49c] sm:$0xf] }
 0x237   : > { %v4004_v58 = vmax.f32 %v2643_v57, 0.0  ;;  %2947 = vmatmul.bf16.vlgmr.msra.gmra.mxu2 %v11243_v46  ;;  %v8202_v57 = vld [vmem:[%s16315_s1 + $0x228] sm:$0xf0] }
 0x239   : > { %v12520_v31 = vpack.c.bf16 %v4004_v58, %v3992_v16  ;;  %v12522_v5 = vpop.f32.mrf.mxu3  ;;  %v8205_v58 = vor.u32 %v10306_v28, %v8202_v57  ;;  %v10486_v28 = vld [vmem:[%s16315_s1 + $0x79c] sm:$0xf]  ;;  %v8922_v57 = vld [vmem:[%s16315_s1 + $0x7c8] sm:$0xf0] }
 0x23a   : > { %v2752_v32 = vpop.f32.mrf.mxu2  ;;  %v2656_v33 = vpop.f32.mrf.mxu0 }
 0x23b   : > { %16438 = vst [vmem:[#allocation33_spill] sm:$0xff] %v12520_v31  ;;  %v2753_v35 = vadd.f32 %v2752_v32, %v2704_v22  ;;  %v2657_v17 = vadd.f32 %v2656_v33, %v12492_v4  ;;  %v2705_v18 = vpop.f32.mrf.mxu1  ;;  %3088 = vmatpush.bf16.msrb.mxu1 %v8205_v58  ;;  %v8920_v33 = vld [vmem:[%s16315_s1 + $0x798] sm:$0xf] }
 0x23d   : > { %v2706_v16 = vadd.f32 %v2705_v18, %v2657_v17  ;;  %v3825_v61 = vmax.f32 %v2753_v35, 0.0  ;;  %v8538_v35 = vld [vmem:[%s16315_s1 + $0x4c8] sm:$0xf0]  ;;  %v10492_v18 = vld [vmem:[%s16315_s1 + $0x7c4] sm:$0xf0] }
 0x23e   : > { %v8541_v17 = vor.u32 %v10390_v63, %v8538_v35  ;;  %v8921_v58 = vor.u32 %v10492_v18, %v8920_v33  ;;  %v8154_v63 = vld [vmem:[%s16315_s1 + $0x1c8] sm:$0xf0] }
 0x240   : > { %3138 = vmatpush.bf16.msrb.mxu2 %v8541_v17  ;;  %3040 = vmatpush.bf16.msrb.mxu0 %v8921_v58 }
 0x241   : > { %v12531_v6 = vpop.f32.mrf.mxu3 }
 0x242   : > { %v2754_v22 = vpop.f32.mrf.mxu2  ;;  %v2659_v29 = vpop.f32.mrf.mxu0 }
 0x243   : > { %v2755_v8 = vadd.f32 %v2754_v22, %v2706_v16  ;;  %v2660_v54 = vadd.f32 %v2659_v29, %v12492_v4  ;;  %v2708_v62 = vpop.f32.mrf.mxu1  ;;  %v8925_v22 = vor.u32 %v10486_v28, %v8922_v57 }
 0x245   : > { %v3837_v47 = vmax.f32 %v2755_v8, 0.0  ;;  %v2709_v32 = vadd.f32 %v2708_v62, %v2660_v54  ;;  %2854 = vmatmul.bf16.gmra.mxu0 %v11306_v20  ;;  %3187 = vmatpush.bf16.msrb.mxu3 %v8925_v22 }
 0x246   : > { %2903 = vmatmul.bf16.gmra.mxu1 %v11308_v21  ;;  %3001 = vmatmul.bf16.gmra.mxu3 %v11306_v20 }
 0x247   : > { %v12535_v14 = vpack.c.bf16 %v3837_v47, %v3825_v61  ;;  %2952 = vmatmul.bf16.gmra.mxu2 %v11304_v19  ;;  %v10294_v47 = vld [vmem:[%s16315_s1 + $0x19c] sm:$0xf] }
 0x248   : > { %v8157_v33 = vor.u32 %v10294_v47, %v8154_v63  ;;  %v8872_v47 = vld [vmem:[%s16315_s1 + $0x738] sm:$0xf] }
 0x249   : > { %16439 = vst [vmem:[#allocation34_spill] sm:$0xff] %v12535_v14  ;;  %v12558_v29 = vpop.f32.mrf.mxu3  ;;  %v8106_v14 = vld [vmem:[%s16315_s1 + $0x168] sm:$0xf0] }
 0x24a   : > { %v2757_v16 = vpop.f32.mrf.mxu2  ;;  %v2661_v54 = vpop.f32.mrf.mxu0  ;;  %3089 = vmatpush.bf16.msrb.mxu1 %v8157_v33  ;;  %v10474_v33 = vld [vmem:[%s16315_s1 + $0x73c] sm:$0xf] }
 0x24b   : > { %v2758_v8 = vadd.f32 %v2757_v16, %v2709_v32  ;;  %v2662_v62 = vadd.f32 %v2661_v54, %v12492_v4  ;;  %v2710_v61 = vpop.f32.mrf.mxu1 }
 0x24d   : > { %v2711_v35 = vadd.f32 %v2710_v61, %v2662_v62  ;;  %v3849_v58 = vmax.f32 %v2758_v8, 0.0  ;;  %v10378_v61 = vld [vmem:[%s16315_s1 + $0x43c] sm:$0xf]  ;;  %v8490_v8 = vld [vmem:[%s16315_s1 + $0x468] sm:$0xf0] }
 0x24e   : > { %v8493_v63 = vor.u32 %v10378_v61, %v8490_v8 }
 0x250   : > { %3139 = vmatpush.bf16.msrb.mxu2 %v8493_v63 }
 0x251   : > { %v12567_v28 = vpop.f32.mrf.mxu3 }
 0x252   : > { %v2759_v32 = vpop.f32.mrf.mxu2  ;;  %v2664_v17 = vpop.f32.mrf.mxu0 }
 0x253   : > { %v2760_v18 = vadd.f32 %v2759_v32, %v2711_v35  ;;  %v2665_v57 = vadd.f32 %v2664_v17, %v12492_v4  ;;  %v2713_v16 = vpop.f32.mrf.mxu1  ;;  %v10480_v35 = vld [vmem:[%s16315_s1 + $0x764] sm:$0xf0]  ;;  %v8874_v32 = vld [vmem:[%s16315_s1 + $0x768] sm:$0xf0] }
 0x254   : > { %v8873_v17 = vor.u32 %v10480_v35, %v8872_v47 }
 0x255   : > { %v3861_v22 = vmax.f32 %v2760_v18, 0.0  ;;  %v2714_v54 = vadd.f32 %v2713_v16, %v2665_v57  ;;  %2859 = vmatmul.bf16.gmra.mxu0 %v11346_v41  ;;  %v8877_v57 = vor.u32 %v10474_v33, %v8874_v32 }
 0x256   : > { %2908 = vmatmul.bf16.gmra.mxu1 %v11348_v42  ;;  %3006 = vmatmul.bf16.gmra.mxu3 %v11346_v41 }
 0x257   : > { %2957 = vmatmul.bf16.gmra.mxu2 %v11344_v40  ;;  %v12573_v62 = vpack.c.bf16 %v3861_v22, %v3849_v58  ;;  %3041 = vmatpush.bf16.msrb.mxu0 %v8873_v17 }
 0x258   : > { %3188 = vmatpush.bf16.msrb.mxu3 %v8877_v57 }
 0x259   : > { %16440 = vst [vmem:[#allocation35_spill] sm:$0xff] %v12573_v62  ;;  %v12594_v58 = vpop.f32.mrf.mxu3  ;;  %v10282_v62 = vld [vmem:[%s16315_s1 + $0x13c] sm:$0xf] }
 0x25a   : > { %v2762_v18 = vpop.f32.mrf.mxu2  ;;  %v2666_v22 = vpop.f32.mrf.mxu0  ;;  %v8109_v35 = vor.u32 %v10282_v62, %v8106_v14  ;;  %v10366_v14 = vld [vmem:[%s16315_s1 + $0x3dc] sm:$0xf]  ;;  %v8442_v62 = vld [vmem:[%s16315_s1 + $0x408] sm:$0xf0] }
 0x25b   : > { %v2763_v16 = vadd.f32 %v2762_v18, %v2714_v54  ;;  %v2667_v61 = vadd.f32 %v2666_v22, %v12492_v4  ;;  %v2715_v8 = vpop.f32.mrf.mxu1 }
 0x25c   : > { %3090 = vmatpush.bf16.msrb.mxu1 %v8109_v35  ;;  %v10462_v35 = vld [vmem:[%s16315_s1 + $0x6dc] sm:$0xf] }
 0x25d   : > { %v2716_v47 = vadd.f32 %v2715_v8, %v2667_v61  ;;  %v3873_v57 = vmax.f32 %v2763_v16, 0.0  ;;  %v8824_v16 = vld [vmem:[%s16315_s1 + $0x6d8] sm:$0xf]  ;;  %v8445_v8 = vor.u32 %v10366_v14, %v8442_v62 }
 0x25f   : > { %3140 = vmatpush.bf16.msrb.mxu2 %v8445_v8 }
 0x261   : > { %v12603_v32 = vpop.f32.mrf.mxu3 }
 0x262   : > { %v2764_v54 = vpop.f32.mrf.mxu2  ;;  %v2669_v63 = vpop.f32.mrf.mxu0 }
 0x263   : > { %v2765_v33 = vadd.f32 %v2764_v54, %v2716_v47  ;;  %v2670_v18 = vadd.f32 %v2669_v63, %v12492_v4  ;;  %v2718_v17 = vpop.f32.mrf.mxu1  ;;  %v10468_v47 = vld [vmem:[%s16315_s1 + $0x704] sm:$0xf0]  ;;  %v8826_v54 = vld [vmem:[%s16315_s1 + $0x708] sm:$0xf0] }
 0x264   : > { %v8825_v63 = vor.u32 %v10468_v47, %v8824_v16 }
 0x265   : > { %v3885_v22 = vmax.f32 %v2765_v33, 0.0  ;;  %v2719_v31 = vadd.f32 %v2718_v17, %v2670_v18  ;;  %2864 = vmatmul.bf16.gmra.mxu0 %v11386_v1  ;;  %v8829_v18 = vor.u32 %v10462_v35, %v8826_v54 }
 0x266   : > { %2913 = vmatmul.bf16.gmra.mxu1 %v11388_v2  ;;  %3011 = vmatmul.bf16.gmra.mxu3 %v11386_v1 }
 0x267   : > { %2962 = vmatmul.bf16.gmra.mxu2 %v11384_v0  ;;  %v12609_v61 = vpack.c.bf16 %v3885_v22, %v3873_v57  ;;  %3042 = vmatpush.bf16.msrb.mxu0 %v8825_v63 }
 0x268   : > { %3189 = vmatpush.bf16.msrb.mxu3 %v8829_v18 }
 0x269   : > { %16441 = vst [vmem:[#allocation36_spill] sm:$0xff] %v12609_v61  ;;  %v12630_v57 = vpop.f32.mrf.mxu3  ;;  %v10270_v61 = vld [vmem:[%s16315_s1 + $0xdc] sm:$0xf] }
 0x26a   : > { %v2767_v33 = vpop.f32.mrf.mxu2  ;;  %v2671_v22 = vpop.f32.mrf.mxu0  ;;  %v8061_v47 = vor.u32 %v10270_v61, %v8058_v7  ;;  %v10354_v7 = vld [vmem:[%s16315_s1 + $0x37c] sm:$0xf]  ;;  %v8394_v61 = vld [vmem:[%s16315_s1 + $0x3a8] sm:$0xf0] }
 0x26b   : > { %v2768_v17 = vadd.f32 %v2767_v33, %v2719_v31  ;;  %v2672_v14 = vadd.f32 %v2671_v22, %v12492_v4  ;;  %v2720_v62 = vpop.f32.mrf.mxu1 }
 0x26c   : > { %3091 = vmatpush.bf16.msrb.mxu1 %v8061_v47  ;;  %v10450_v47 = vld [vmem:[%s16315_s1 + $0x67c] sm:$0xf] }
 0x26d   : > { %v2721_v16 = vadd.f32 %v2720_v62, %v2672_v14  ;;  %v3897_v18 = vmax.f32 %v2768_v17, 0.0  ;;  %v8776_v17 = vld [vmem:[%s16315_s1 + $0x678] sm:$0xf]  ;;  %v8397_v62 = vor.u32 %v10354_v7, %v8394_v61 }
 0x26f   : > { %3141 = vmatpush.bf16.msrb.mxu2 %v8397_v62 }
 0x271   : > { %v12639_v54 = vpop.f32.mrf.mxu3 }
 0x272   : > { %v2769_v31 = vpop.f32.mrf.mxu2  ;;  %v2674_v8 = vpop.f32.mrf.mxu0 }
 0x273   : > { %v2770_v35 = vadd.f32 %v2769_v31, %v2721_v16  ;;  %v2675_v33 = vadd.f32 %v2674_v8, %v12492_v4  ;;  %v2723_v63 = vpop.f32.mrf.mxu1  ;;  %v10456_v16 = vld [vmem:[%s16315_s1 + $0x6a4] sm:$0xf0]  ;;  %v8778_v31 = vld [vmem:[%s16315_s1 + $0x6a8] sm:$0xf0] }
 0x274   : > { %v8777_v8 = vor.u32 %v10456_v16, %v8776_v17 }
 0x275   : > { %v3909_v22 = vmax.f32 %v2770_v35, 0.0  ;;  %v2724_v27 = vadd.f32 %v2723_v63, %v2675_v33  ;;  %2869 = vmatmul.bf16.gmra.mxu0 %v11426_v25  ;;  %v8781_v33 = vor.u32 %v10450_v47, %v8778_v31 }
 0x276   : > { %2918 = vmatmul.bf16.gmra.mxu1 %v11428_v26  ;;  %3016 = vmatmul.bf16.gmra.mxu3 %v11426_v25 }
 0x277   : > { %2967 = vmatmul.bf16.gmra.mxu2 %v11424_v24  ;;  %v12645_v14 = vpack.c.bf16 %v3909_v22, %v3897_v18  ;;  %3043 = vmatpush.bf16.msrb.mxu0 %v8777_v8 }
 0x278   : > { %3190 = vmatpush.bf16.msrb.mxu3 %v8781_v33 }
 0x279   : > { %16442 = vst [vmem:[#allocation37_spill] sm:$0xff] %v12645_v14  ;;  %v12666_v18 = vpop.f32.mrf.mxu3  ;;  %v10258_v14 = vld [vmem:[%s16315_s1 + $0x7c] sm:$0xf] }
 0x27a   : > { %v2772_v35 = vpop.f32.mrf.mxu2  ;;  %v2676_v22 = vpop.f32.mrf.mxu0  ;;  %v8013_v16 = vor.u32 %v10258_v14, %v8010_v59  ;;  %v10342_v59 = vld [vmem:[%s16315_s1 + $0x31c] sm:$0xf]  ;;  %v8346_v14 = vld [vmem:[%s16315_s1 + $0x348] sm:$0xf0] }
 0x27b   : > { %v2773_v63 = vadd.f32 %v2772_v35, %v2724_v27  ;;  %v2677_v7 = vadd.f32 %v2676_v22, %v12492_v4  ;;  %v2725_v61 = vpop.f32.mrf.mxu1 }
 0x27c   : > { %3092 = vmatpush.bf16.msrb.mxu1 %v8013_v16  ;;  %v10438_v16 = vld [vmem:[%s16315_s1 + $0x61c] sm:$0xf] }
 0x27d   : > { %v2726_v17 = vadd.f32 %v2725_v61, %v2677_v7  ;;  %v3921_v33 = vmax.f32 %v2773_v63, 0.0  ;;  %v8728_v63 = vld [vmem:[%s16315_s1 + $0x618] sm:$0xf]  ;;  %v8349_v61 = vor.u32 %v10342_v59, %v8346_v14 }
 0x27f   : > { %3142 = vmatpush.bf16.msrb.mxu2 %v8349_v61 }
 0x281   : > { %v12675_v31 = vpop.f32.mrf.mxu3 }
 0x282   : > { %v2774_v27 = vpop.f32.mrf.mxu2  ;;  %v2679_v62 = vpop.f32.mrf.mxu0 }
 0x283   : > { %v2775_v47 = vadd.f32 %v2774_v27, %v2726_v17  ;;  %v2680_v35 = vadd.f32 %v2679_v62, %v12492_v4  ;;  %v2728_v8 = vpop.f32.mrf.mxu1  ;;  %v10444_v17 = vld [vmem:[%s16315_s1 + $0x644] sm:$0xf0]  ;;  %v8730_v27 = vld [vmem:[%s16315_s1 + $0x648] sm:$0xf0] }
 0x284   : > { %v8729_v62 = vor.u32 %v10444_v17, %v8728_v63 }
 0x285   : > { %v3933_v22 = vmax.f32 %v2775_v47, 0.0  ;;  %v2729_v44 = vadd.f32 %v2728_v8, %v2680_v35  ;;  %2874 = vmatmul.bf16.gmra.mxu0 %v11466_v50  ;;  %v8733_v35 = vor.u32 %v10438_v16, %v8730_v27 }
 0x286   : > { %2923 = vmatmul.bf16.gmra.mxu1 %v11468_v53  ;;  %3021 = vmatmul.bf16.gmra.mxu3 %v11466_v50 }
 0x287   : > { %2972 = vmatmul.bf16.gmra.mxu2 %v11464_v49  ;;  %v12681_v7 = vpack.c.bf16 %v3933_v22, %v3921_v33  ;;  %3044 = vmatpush.bf16.msrb.mxu0 %v8729_v62 }
 0x288   : > { %3191 = vmatpush.bf16.msrb.mxu3 %v8733_v35 }
 0x289   : > { %16443 = vst [vmem:[#allocation38_spill] sm:$0xff] %v12681_v7  ;;  %v12702_v33 = vpop.f32.mrf.mxu3  ;;  %v10246_v7 = vld [vmem:[%s16315_s1 + $0x1c] sm:$0xf] }
 0x28a   : > { %v2777_v47 = vpop.f32.mrf.mxu2  ;;  %v2681_v22 = vpop.f32.mrf.mxu0  ;;  %v7965_v17 = vor.u32 %v10246_v7, %v7962_v30  ;;  %v9072_v30 = vld [vmem:[%s16315_s1 + $0x8c0] sm:$0xf]  ;;  %v10529_v7 = vld [vmem:[%s16315_s1 + $0x8ec] sm:$0xf0] }
 0x28b   : > { %v2778_v8 = vadd.f32 %v2777_v47, %v2729_v44  ;;  %v2682_v59 = vadd.f32 %v2681_v22, %v12492_v4  ;;  %v2730_v14 = vpop.f32.mrf.mxu1 }
 0x28c   : > { %3093 = vmatpush.bf16.msrb.mxu1 %v7965_v17  ;;  %v10331_v17 = vld [vmem:[%s16315_s1 + $0x2c4] sm:$0xf] }
 0x28d   : > { %v2731_v63 = vadd.f32 %v2730_v14, %v2682_v59  ;;  %v3945_v35 = vmax.f32 %v2778_v8, 0.0  ;;  %v8304_v8 = vld [vmem:[%s16315_s1 + $0x2c0] sm:$0xf]  ;;  %v9073_v14 = vor.u32 %v10529_v7, %v9072_v30 }
 0x28f   : > { %3331 = vmatpush.bf16.msra.mxu2 %v9073_v14 }
 0x291   : > { %v12711_v27 = vpop.f32.mrf.mxu3 }
 0x292   : > { %v2779_v44 = vpop.f32.mrf.mxu2  ;;  %v2684_v61 = vpop.f32.mrf.mxu0 }
 0x293   : > { %v2780_v16 = vadd.f32 %v2779_v44, %v2731_v63  ;;  %v2685_v47 = vadd.f32 %v2684_v61, %v12492_v4  ;;  %v2733_v62 = vpop.f32.mrf.mxu1  ;;  %v10337_v63 = vld [vmem:[%s16315_s1 + $0x2ec] sm:$0xf0]  ;;  %v8306_v44 = vld [vmem:[%s16315_s1 + $0x2f0] sm:$0xf0] }
 0x294   : > { %v8305_v61 = vor.u32 %v10337_v63, %v8304_v8 }
 0x295   : > { %v3957_v22 = vmax.f32 %v2780_v16, 0.0  ;;  %v2734_v3 = vadd.f32 %v2733_v62, %v2685_v47  ;;  %2879 = vmatmul.bf16.gmra.mxu0 %v11506_v12  ;;  %v8309_v47 = vor.u32 %v10331_v17, %v8306_v44 }
 0x296   : > { %2928 = vmatmul.bf16.gmra.mxu1 %v11508_v13  ;;  %3026 = vmatmul.bf16.gmra.mxu3 %v11506_v12 }
 0x297   : > { %2977 = vmatmul.bf16.gmra.mxu2 %v11504_v11  ;;  %v12717_v59 = vpack.c.bf16 %v3957_v22, %v3945_v35  ;;  %3233 = vmatpush.bf16.msra.mxu0 %v8305_v61 }
 0x298   : > { %3380 = vmatpush.bf16.msra.mxu3 %v8309_v47 }
 0x299   : > { %16444 = vst [vmem:[#allocation39_spill] sm:$0xff] %v12717_v59  ;;  %v12738_v35 = vpop.f32.mrf.mxu3  ;;  %v8688_v59 = vld [vmem:[%s16315_s1 + $0x5c0] sm:$0xf] }
 0x29a   : > { %v2782_v16 = vpop.f32.mrf.mxu2  ;;  %v2686_v22 = vpop.f32.mrf.mxu0  ;;  %v8689_v63 = vor.u32 %v10433_v48, %v8688_v59  ;;  %v9024_v48 = vld [vmem:[%s16315_s1 + $0x860] sm:$0xf]  ;;  %v10517_v59 = vld [vmem:[%s16315_s1 + $0x88c] sm:$0xf0] }
 0x29b   : > { %v2783_v62 = vadd.f32 %v2782_v16, %v2734_v3  ;;  %v2687_v30 = vadd.f32 %v2686_v22, %v12492_v4  ;;  %v2735_v7 = vpop.f32.mrf.mxu1 }
 0x29c   : > { %3282 = vmatpush.bf16.msra.mxu1 %v8689_v63  ;;  %v10319_v63 = vld [vmem:[%s16315_s1 + $0x264] sm:$0xf] }
 0x29d   : > { %v2736_v8 = vadd.f32 %v2735_v7, %v2687_v30  ;;  %v3969_v47 = vmax.f32 %v2783_v62, 0.0  ;;  %v8256_v62 = vld [vmem:[%s16315_s1 + $0x260] sm:$0xf]  ;;  %v9025_v7 = vor.u32 %v10517_v59, %v9024_v48 }
 0x29f   : > { %3332 = vmatpush.bf16.msra.mxu2 %v9025_v7 }
 0x2a1   : > { %v12747_v44 = vpop.f32.mrf.mxu3 }
 0x2a2   : > { %v2784_v3 = vpop.f32.mrf.mxu2  ;;  %v2689_v14 = vpop.f32.mrf.mxu0 }
 0x2a3   : > { %v2785_v17 = vadd.f32 %v2784_v3, %v2736_v8  ;;  %v2690_v16 = vadd.f32 %v2689_v14, %v12492_v4  ;;  %v2738_v61 = vpop.f32.mrf.mxu1  ;;  %v10325_v8 = vld [vmem:[%s16315_s1 + $0x28c] sm:$0xf0]  ;;  %v8258_v3 = vld [vmem:[%s16315_s1 + $0x290] sm:$0xf0] }
 0x2a4   : > { %v8257_v14 = vor.u32 %v10325_v8, %v8256_v62 }
 0x2a5   : > { %v3981_v22 = vmax.f32 %v2785_v17, 0.0  ;;  %v2739_v34 = vadd.f32 %v2738_v61, %v2690_v16  ;;  %2884 = vmatmul.bf16.gmra.mxu0 %v11546_v39  ;;  %v8261_v16 = vor.u32 %v10319_v63, %v8258_v3 }
 0x2a6   : > { %2933 = vmatmul.bf16.gmra.mxu1 %v11548_v43  ;;  %3031 = vmatmul.bf16.gmra.mxu3 %v11546_v39 }
 0x2a7   : > { %2982 = vmatmul.bf16.gmra.mxu2 %v11544_v38  ;;  %v12753_v30 = vpack.c.bf16 %v3981_v22, %v3969_v47  ;;  %3234 = vmatpush.bf16.msra.mxu0 %v8257_v14 }
 0x2a8   : > { %3381 = vmatpush.bf16.msra.mxu3 %v8261_v16 }
 0x2a9   : > { %16445 = vst [vmem:[#allocation40_spill] sm:$0xff] %v12753_v30  ;;  %v12774_v47 = vpop.f32.mrf.mxu3  ;;  %v8640_v30 = vld [vmem:[%s16315_s1 + $0x560] sm:$0xf] }
 0x2aa   : > { %v2787_v17 = vpop.f32.mrf.mxu2  ;;  %v2691_v22 = vpop.f32.mrf.mxu0  ;;  %v8641_v7 = vor.u32 %v10421_v45, %v8640_v30  ;;  %v8976_v30 = vld [vmem:[%s16315_s1 + $0x800] sm:$0xf] }
 0x2ab   : > { %v2788_v61 = vadd.f32 %v2787_v17, %v2739_v34  ;;  %v2692_v48 = vadd.f32 %v2691_v22, %v12492_v4  ;;  %v2740_v59 = vpop.f32.mrf.mxu1  ;;  %v12786_v34 = vld [vmem:[%s16316_s2] sm:$0xff] }
 0x2ac   : > { %v12789_v62 = vperm.slane %v12786_v34, 5  ;;  %3283 = vmatpush.bf16.msra.mxu1 %v8641_v7  ;;  %v12799_v45 = vperm.slane %v12786_v34, 6 }
 0x2ad   : > { %v2741_v4 = vadd.f32 %v2740_v59, %v2692_v48  ;;  %v3993_v15 = vmax.f32 %v2788_v61, 0.0  ;;  %v10505_v61 = vld [vmem:[%s16315_s1 + $0x82c] sm:$0xf0]  ;;  %v8208_v59 = vld [vmem:[%s16315_s1 + $0x200] sm:$0xf] }
 0x2ae   : > { %v2802_v8 = vadd.f32 %v12522_v5, %v12789_v62  ;;  %v8977_v48 = vor.u32 %v10505_v61, %v8976_v30 }
 0x2b0   : > { %3333 = vmatpush.bf16.msra.mxu2 %v8977_v48  ;;  %v2807_v48 = vadd.f32 %v12558_v29, %v12789_v62  ;;  %v8160_v29 = vld [vmem:[%s16315_s1 + $0x1a0] sm:$0xf] }
 0x2b1   : > { %v12793_v17 = vpop.f32.mrf.mxu3 }
 0x2b2   : > { %v2789_v63 = vpop.f32.mrf.mxu2  ;;  %v2850_v14 = vpop.f32.mrf.mxu0 }
 0x2b3   : > { %v2790_v3 = vadd.f32 %v2789_v63, %v2741_v4  ;;  %v2851_v16 = vadd.f32 %v2850_v14, %v2802_v8  ;;  %v2899_v22 = vpop.f32.mrf.mxu1  ;;  %v2804_v4 = vadd.f32 %v12531_v6, %v12789_v62  ;;  %v8210_v63 = vld [vmem:[%s16315_s1 + $0x230] sm:$0xf0]  ;;  %v8592_v6 = vld [vmem:[%s16315_s1 + $0x500] sm:$0xf] }
 0x2b5   : > { %v4005_v60 = vmax.f32 %v2790_v3, 0.0  ;;  %v2900_v23 = vadd.f32 %v2899_v22, %v2851_v16  ;;  %3045 = vmatmul.bf16.vlgmr.msrb.gmra.mxu0 %v11250_v52 }
 0x2b6   : > { %3094 = vmatmul.bf16.vlgmr.msrb.gmra.mxu1 %v11243_v46  ;;  %3192 = vmatmul.bf16.vlgmr.msrb.gmra.mxu3 %v11250_v52 }
 0x2b7   : > { %3143 = vmatmul.bf16.vlgmr.msrb.gmra.mxu2 %v11248_v51  ;;  %v12801_v5 = vpack.c.bf16 %v4005_v60, %v3993_v15  ;;  %v10313_v60 = vld [vmem:[%s16315_s1 + $0x22c] sm:$0xf0]  ;;  %v10307_v15 = vld [vmem:[%s16315_s1 + $0x204] sm:$0xf]  ;;  %v3826_v37 = vmax.f32 %v2900_v23, 0.0 }
 0x2b8   : > { %v8209_v8 = vor.u32 %v10313_v60, %v8208_v59  ;;  %v8213_v22 = vor.u32 %v10307_v15, %v8210_v63  ;;  %v10409_v59 = vld [vmem:[%s16315_s1 + $0x52c] sm:$0xf0] }
 0x2b9   : > { %16446 = vst [vmem:[#allocation41_spill] sm:$0xff] %v12801_v5  ;;  %v2997_v14 = vpop.f32.mrf.mxu3 }
 0x2ba   : > { %v2948_v7 = vpop.f32.mrf.mxu2  ;;  %v2852_v16 = vpop.f32.mrf.mxu0  ;;  %3235 = vmatpush.bf16.msra.mxu0 %v8209_v8  ;;  %3382 = vmatpush.bf16.msra.mxu3 %v8213_v22 }
 0x2bb   : > { %v2949_v3 = vadd.f32 %v2948_v7, %v12799_v45  ;;  %v2853_v30 = vadd.f32 %v2852_v16, %v2804_v4  ;;  %v2901_v61 = vpop.f32.mrf.mxu1  ;;  %v8593_v7 = vor.u32 %v10409_v59, %v8592_v6  ;;  %v2809_v6 = vadd.f32 %v12567_v28, %v12789_v62  ;;  %v8544_v28 = vld [vmem:[%s16315_s1 + $0x4a0] sm:$0xf] }
 0x2bd   : > { %v12825_v5 = vadd.f32 %v2997_v14, %v2949_v3  ;;  %v2902_v60 = vadd.f32 %v2901_v61, %v2853_v30  ;;  %3284 = vmatpush.bf16.msra.mxu1 %v8593_v7  ;;  %v10301_v30 = vld [vmem:[%s16315_s1 + $0x1cc] sm:$0xf0]  ;;  %v10295_v61 = vld [vmem:[%s16315_s1 + $0x1a4] sm:$0xf]  ;;  %v8162_v7 = vld [vmem:[%s16315_s1 + $0x1d0] sm:$0xf0] }
 0x2bf   : > { %v3838_v36 = vmax.f32 %v2902_v60, 0.0  ;;  %v8161_v60 = vor.u32 %v10301_v30, %v8160_v29 }
 0x2c1   : > { %v12835_v15 = vpack.c.bf16 %v3838_v36, %v3826_v37  ;;  %v2999_v63 = vpop.f32.mrf.mxu3  ;;  %v8928_v36 = vld [vmem:[%s16315_s1 + $0x7a0] sm:$0xf]  ;;  %v10493_v37 = vld [vmem:[%s16315_s1 + $0x7cc] sm:$0xf0]  ;;  %3236 = vmatpush.bf16.msra.mxu0 %v8161_v60 }
 0x2c2   : > { %v2950_v4 = vpop.f32.mrf.mxu2  ;;  %v2855_v3 = vpop.f32.mrf.mxu0  ;;  %v8929_v23 = vor.u32 %v10493_v37, %v8928_v36  ;;  %v10397_v36 = vld [vmem:[%s16315_s1 + $0x4cc] sm:$0xf0] }
 0x2c3   : > { %16447 = vst [vmem:[#allocation42_spill] sm:$0xff] %v12835_v15  ;;  %v2951_v8 = vadd.f32 %v2950_v4, %v12799_v45  ;;  %v2856_v14 = vadd.f32 %v2855_v3, %v2807_v48  ;;  %v2904_v16 = vpop.f32.mrf.mxu1  ;;  %v8545_v29 = vor.u32 %v10397_v36, %v8544_v28  ;;  %v10289_v28 = vld [vmem:[%s16315_s1 + $0x16c] sm:$0xf0]  ;;  %v10283_v36 = vld [vmem:[%s16315_s1 + $0x144] sm:$0xf] }
 0x2c4   : > { %3334 = vmatpush.bf16.msra.mxu2 %v8929_v23  ;;  %v2812_v23 = vadd.f32 %v12594_v58, %v12789_v62  ;;  %v10481_v58 = vld [vmem:[%s16315_s1 + $0x76c] sm:$0xf0] }
 0x2c5   : > { %v12838_v22 = vadd.f32 %v2999_v63, %v2951_v8  ;;  %v2905_v9 = vadd.f32 %v2904_v16, %v2856_v14  ;;  %3050 = vmatmul.bf16.gmra.mxu0 %v11308_v21  ;;  %v8165_v63 = vor.u32 %v10295_v61, %v8162_v7  ;;  %3285 = vmatpush.bf16.msra.mxu1 %v8545_v29 }
 0x2c6   : > { %3099 = vmatmul.bf16.gmra.mxu1 %v11304_v19  ;;  %3197 = vmatmul.bf16.gmra.mxu3 %v11308_v21 }
 0x2c7   : > { %3148 = vmatmul.bf16.gmra.mxu2 %v11306_v20  ;;  %3383 = vmatpush.bf16.msra.mxu3 %v8165_v63  ;;  %v3850_v30 = vmax.f32 %v2905_v9, 0.0  ;;  %v8880_v9 = vld [vmem:[%s16315_s1 + $0x740] sm:$0xf] }
 0x2c9   : > { %v3002_v4 = vpop.f32.mrf.mxu3 }
 0x2ca   : > { %v2953_v59 = vpop.f32.mrf.mxu2  ;;  %v2857_v8 = vpop.f32.mrf.mxu0 }
 0x2cb   : > { %v2954_v48 = vadd.f32 %v2953_v59, %v12799_v45  ;;  %v2858_v3 = vadd.f32 %v2857_v8, %v2809_v6  ;;  %v2906_v14 = vpop.f32.mrf.mxu1 }
 0x2cd   : > { %v12865_v16 = vadd.f32 %v3002_v4, %v2954_v48  ;;  %v2907_v37 = vadd.f32 %v2906_v14, %v2858_v3  ;;  %v8881_v3 = vor.u32 %v10481_v58, %v8880_v9  ;;  %v8112_v14 = vld [vmem:[%s16315_s1 + $0x140] sm:$0xf]  ;;  %v10385_v9 = vld [vmem:[%s16315_s1 + $0x46c] sm:$0xf0] }
 0x2cf   : > { %v3862_v59 = vmax.f32 %v2907_v37, 0.0  ;;  %v2814_v37 = vadd.f32 %v12603_v32, %v12789_v62  ;;  %3335 = vmatpush.bf16.msra.mxu2 %v8881_v3  ;;  %v8496_v32 = vld [vmem:[%s16315_s1 + $0x440] sm:$0xf]  ;;  %v2817_v3 = vadd.f32 %v12630_v57, %v12789_v62 }
 0x2d0   : > { %v8832_v57 = vld [vmem:[%s16315_s1 + $0x6e0] sm:$0xf] }
 0x2d1   : > { %v12875_v6 = vpack.c.bf16 %v3862_v59, %v3850_v30  ;;  %v3004_v7 = vpop.f32.mrf.mxu3  ;;  %v8113_v30 = vor.u32 %v10289_v28, %v8112_v14  ;;  %v8114_v59 = vld [vmem:[%s16315_s1 + $0x170] sm:$0xf0]  ;;  %v8497_v14 = vor.u32 %v10385_v9, %v8496_v32  ;;  %v10277_v32 = vld [vmem:[%s16315_s1 + $0x10c] sm:$0xf0]  ;;  %v10271_v9 = vld [vmem:[%s16315_s1 + $0xe4] sm:$0xf] }
 0x2d2   : > { %v2955_v61 = vpop.f32.mrf.mxu2  ;;  %v2860_v48 = vpop.f32.mrf.mxu0 }
 0x2d3   : > { %16448 = vst [vmem:[#allocation43_spill] sm:$0xff] %v12875_v6  ;;  %v2956_v60 = vadd.f32 %v2955_v61, %v12799_v45  ;;  %v2861_v4 = vadd.f32 %v2860_v48, %v2812_v23  ;;  %v2909_v8 = vpop.f32.mrf.mxu1  ;;  %3237 = vmatpush.bf16.msra.mxu0 %v8113_v30  ;;  %3286 = vmatpush.bf16.msra.mxu1 %v8497_v14 }
 0x2d5   : > { %v12878_v63 = vadd.f32 %v3004_v7, %v2956_v60  ;;  %v2910_v15 = vadd.f32 %v2909_v8, %v2861_v4  ;;  %3055 = vmatmul.bf16.gmra.mxu0 %v11348_v42  ;;  %v8117_v7 = vor.u32 %v10283_v36, %v8114_v59 }
 0x2d6   : > { %3104 = vmatmul.bf16.gmra.mxu1 %v11344_v40  ;;  %3202 = vmatmul.bf16.gmra.mxu3 %v11348_v42 }
 0x2d7   : > { %3153 = vmatmul.bf16.gmra.mxu2 %v11346_v41  ;;  %3384 = vmatpush.bf16.msra.mxu3 %v8117_v7  ;;  %v3874_v28 = vmax.f32 %v2910_v15, 0.0  ;;  %v10469_v15 = vld [vmem:[%s16315_s1 + $0x70c] sm:$0xf0] }
 0x2d9   : > { %v3007_v61 = vpop.f32.mrf.mxu3 }
 0x2da   : > { %v2958_v29 = vpop.f32.mrf.mxu2  ;;  %v2862_v60 = vpop.f32.mrf.mxu0 }
 0x2db   : > { %v2959_v23 = vadd.f32 %v2958_v29, %v12799_v45  ;;  %v2863_v48 = vadd.f32 %v2862_v60, %v2814_v37  ;;  %v2911_v4 = vpop.f32.mrf.mxu1 }
 0x2dd   : > { %v12905_v8 = vadd.f32 %v3007_v61, %v2959_v23  ;;  %v2912_v58 = vadd.f32 %v2911_v4, %v2863_v48  ;;  %v8833_v48 = vor.u32 %v10469_v15, %v8832_v57  ;;  %v8064_v4 = vld [vmem:[%s16315_s1 + $0xe0] sm:$0xf]  ;;  %v10373_v57 = vld [vmem:[%s16315_s1 + $0x40c] sm:$0xf0] }
 0x2df   : > { %v3886_v29 = vmax.f32 %v2912_v58, 0.0  ;;  %v2819_v58 = vadd.f32 %v12639_v54, %v12789_v62  ;;  %3336 = vmatpush.bf16.msra.mxu2 %v8833_v48  ;;  %v8448_v54 = vld [vmem:[%s16315_s1 + $0x3e0] sm:$0xf]  ;;  %v2822_v48 = vadd.f32 %v12666_v18, %v12789_v62 }
 0x2e0   : > { %v8784_v18 = vld [vmem:[%s16315_s1 + $0x680] sm:$0xf] }
 0x2e1   : > { %v12915_v37 = vpack.c.bf16 %v3886_v29, %v3874_v28  ;;  %v3009_v59 = vpop.f32.mrf.mxu3  ;;  %v8065_v28 = vor.u32 %v10277_v32, %v8064_v4  ;;  %v8066_v29 = vld [vmem:[%s16315_s1 + $0x110] sm:$0xf0]  ;;  %v8449_v4 = vor.u32 %v10373_v57, %v8448_v54  ;;  %v10265_v54 = vld [vmem:[%s16315_s1 + $0xac] sm:$0xf0]  ;;  %v10259_v57 = vld [vmem:[%s16315_s1 + $0x84] sm:$0xf] }
 0x2e2   : > { %v2960_v36 = vpop.f32.mrf.mxu2  ;;  %v2865_v23 = vpop.f32.mrf.mxu0 }
 0x2e3   : > { %16449 = vst [vmem:[#allocation44_spill] sm:$0xff] %v12915_v37  ;;  %v2961_v30 = vadd.f32 %v2960_v36, %v12799_v45  ;;  %v2866_v61 = vadd.f32 %v2865_v23, %v2817_v3  ;;  %v2914_v60 = vpop.f32.mrf.mxu1  ;;  %3238 = vmatpush.bf16.msra.mxu0 %v8065_v28  ;;  %3287 = vmatpush.bf16.msra.mxu1 %v8449_v4 }
 0x2e5   : > { %v12918_v7 = vadd.f32 %v3009_v59, %v2961_v30  ;;  %v2915_v6 = vadd.f32 %v2914_v60, %v2866_v61  ;;  %3060 = vmatmul.bf16.gmra.mxu0 %v11388_v2  ;;  %v8069_v59 = vor.u32 %v10271_v9, %v8066_v29 }
 0x2e6   : > { %3109 = vmatmul.bf16.gmra.mxu1 %v11384_v0  ;;  %3207 = vmatmul.bf16.gmra.mxu3 %v11388_v2 }
 0x2e7   : > { %3158 = vmatmul.bf16.gmra.mxu2 %v11386_v1  ;;  %3385 = vmatpush.bf16.msra.mxu3 %v8069_v59  ;;  %v3898_v32 = vmax.f32 %v2915_v6, 0.0  ;;  %v10457_v6 = vld [vmem:[%s16315_s1 + $0x6ac] sm:$0xf0] }
 0x2e9   : > { %v3012_v36 = vpop.f32.mrf.mxu3 }
 0x2ea   : > { %v2963_v14 = vpop.f32.mrf.mxu2  ;;  %v2867_v30 = vpop.f32.mrf.mxu0 }
 0x2eb   : > { %v2964_v3 = vadd.f32 %v2963_v14, %v12799_v45  ;;  %v2868_v23 = vadd.f32 %v2867_v30, %v2819_v58  ;;  %v2916_v61 = vpop.f32.mrf.mxu1 }
 0x2ed   : > { %v12945_v60 = vadd.f32 %v3012_v36, %v2964_v3  ;;  %v2917_v15 = vadd.f32 %v2916_v61, %v2868_v23  ;;  %v8785_v23 = vor.u32 %v10457_v6, %v8784_v18  ;;  %v8016_v61 = vld [vmem:[%s16315_s1 + $0x80] sm:$0xf]  ;;  %v10361_v18 = vld [vmem:[%s16315_s1 + $0x3ac] sm:$0xf0] }
 0x2ef   : > { %v3910_v14 = vmax.f32 %v2917_v15, 0.0  ;;  %v2824_v15 = vadd.f32 %v12675_v31, %v12789_v62  ;;  %3337 = vmatpush.bf16.msra.mxu2 %v8785_v23  ;;  %v8400_v31 = vld [vmem:[%s16315_s1 + $0x380] sm:$0xf]  ;;  %v2827_v23 = vadd.f32 %v12702_v33, %v12789_v62 }
 0x2f0   : > { %v8736_v33 = vld [vmem:[%s16315_s1 + $0x620] sm:$0xf] }
 0x2f1   : > { %v12955_v58 = vpack.c.bf16 %v3910_v14, %v3898_v32  ;;  %v3014_v29 = vpop.f32.mrf.mxu3  ;;  %v8017_v32 = vor.u32 %v10265_v54, %v8016_v61  ;;  %v8018_v14 = vld [vmem:[%s16315_s1 + $0xb0] sm:$0xf0]  ;;  %v8401_v61 = vor.u32 %v10361_v18, %v8400_v31  ;;  %v10253_v31 = vld [vmem:[%s16315_s1 + $0x4c] sm:$0xf0]  ;;  %v10247_v18 = vld [vmem:[%s16315_s1 + $0x24] sm:$0xf] }
 0x2f2   : > { %v2965_v9 = vpop.f32.mrf.mxu2  ;;  %v2870_v3 = vpop.f32.mrf.mxu0 }
 0x2f3   : > { %16450 = vst [vmem:[#allocation45_spill] sm:$0xff] %v12955_v58  ;;  %v2966_v28 = vadd.f32 %v2965_v9, %v12799_v45  ;;  %v2871_v36 = vadd.f32 %v2870_v3, %v2822_v48  ;;  %v2919_v30 = vpop.f32.mrf.mxu1  ;;  %3239 = vmatpush.bf16.msra.mxu0 %v8017_v32  ;;  %3288 = vmatpush.bf16.msra.mxu1 %v8401_v61 }
 0x2f5   : > { %v12958_v59 = vadd.f32 %v3014_v29, %v2966_v28  ;;  %v2920_v37 = vadd.f32 %v2919_v30, %v2871_v36  ;;  %3065 = vmatmul.bf16.gmra.mxu0 %v11428_v26  ;;  %v8021_v29 = vor.u32 %v10259_v57, %v8018_v14 }
 0x2f6   : > { %3114 = vmatmul.bf16.gmra.mxu1 %v11424_v24  ;;  %3212 = vmatmul.bf16.gmra.mxu3 %v11428_v26 }
 0x2f7   : > { %3163 = vmatmul.bf16.gmra.mxu2 %v11426_v25  ;;  %3386 = vmatpush.bf16.msra.mxu3 %v8021_v29  ;;  %v3922_v54 = vmax.f32 %v2920_v37, 0.0  ;;  %v10445_v37 = vld [vmem:[%s16315_s1 + $0x64c] sm:$0xf0] }
 0x2f9   : > { %v3017_v9 = vpop.f32.mrf.mxu3 }
 0x2fa   : > { %v2968_v4 = vpop.f32.mrf.mxu2  ;;  %v2872_v28 = vpop.f32.mrf.mxu0 }
 0x2fb   : > { %v2969_v48 = vadd.f32 %v2968_v4, %v12799_v45  ;;  %v2873_v3 = vadd.f32 %v2872_v28, %v2824_v15  ;;  %v2921_v36 = vpop.f32.mrf.mxu1 }
 0x2fd   : > { %v12985_v30 = vadd.f32 %v3017_v9, %v2969_v48  ;;  %v2922_v6 = vadd.f32 %v2921_v36, %v2873_v3  ;;  %v8737_v3 = vor.u32 %v10445_v37, %v8736_v33  ;;  %v7968_v36 = vld [vmem:[%s16315_s1 + $0x20] sm:$0xf]  ;;  %v10349_v33 = vld [vmem:[%s16315_s1 + $0x34c] sm:$0xf0] }
 0x2ff   : > { %v3934_v4 = vmax.f32 %v2922_v6, 0.0  ;;  %v2829_v6 = vadd.f32 %v12711_v27, %v12789_v62  ;;  %3338 = vmatpush.bf16.msra.mxu2 %v8737_v3  ;;  %v8352_v27 = vld [vmem:[%s16315_s1 + $0x320] sm:$0xf]  ;;  %v2832_v3 = vadd.f32 %v12738_v35, %v12789_v62  ;;  %v8312_v35 = vld [vmem:[%s16315_s1 + $0x2c8] sm:$0xf] }
 0x301   : > { %v12995_v15 = vpack.c.bf16 %v3934_v4, %v3922_v54  ;;  %v3019_v14 = vpop.f32.mrf.mxu3  ;;  %v7969_v54 = vor.u32 %v10253_v31, %v7968_v36  ;;  %v7970_v4 = vld [vmem:[%s16315_s1 + $0x50] sm:$0xf0]  ;;  %v8353_v36 = vor.u32 %v10349_v33, %v8352_v27  ;;  %v8696_v33 = vld [vmem:[%s16315_s1 + $0x5c8] sm:$0xf] }
 0x302   : > { %v2970_v57 = vpop.f32.mrf.mxu2  ;;  %v2875_v48 = vpop.f32.mrf.mxu0  ;;  %v8690_v27 = vld [vmem:[%s16315_s1 + $0x5f0] sm:$0xf0] }
 0x303   : > { %16451 = vst [vmem:[#allocation46_spill] sm:$0xff] %v12995_v15  ;;  %v2971_v32 = vadd.f32 %v2970_v57, %v12799_v45  ;;  %v2876_v9 = vadd.f32 %v2875_v48, %v2827_v23  ;;  %v2924_v28 = vpop.f32.mrf.mxu1  ;;  %3240 = vmatpush.bf16.msra.mxu0 %v7969_v54  ;;  %3289 = vmatpush.bf16.msra.mxu1 %v8353_v36 }
 0x305   : > { %v12998_v29 = vadd.f32 %v3019_v14, %v2971_v32  ;;  %v2925_v58 = vadd.f32 %v2924_v28, %v2876_v9  ;;  %3070 = vmatmul.bf16.gmra.mxu0 %v11468_v53  ;;  %v7973_v14 = vor.u32 %v10247_v18, %v7970_v4 }
 0x306   : > { %3119 = vmatmul.bf16.gmra.mxu1 %v11464_v49  ;;  %3217 = vmatmul.bf16.gmra.mxu3 %v11468_v53 }
 0x307   : > { %3168 = vmatmul.bf16.gmra.mxu2 %v11466_v50  ;;  %3387 = vmatpush.bf16.msra.mxu3 %v7973_v14  ;;  %v3946_v31 = vmax.f32 %v2925_v58, 0.0  ;;  %v10338_v58 = vld [vmem:[%s16315_s1 + $0x2f4] sm:$0xf0] }
 0x309   : > { %v3022_v57 = vpop.f32.mrf.mxu3 }
 0x30a   : > { %v2973_v61 = vpop.f32.mrf.mxu2  ;;  %v2877_v32 = vpop.f32.mrf.mxu0 }
 0x30b   : > { %v2974_v23 = vadd.f32 %v2973_v61, %v12799_v45  ;;  %v2878_v48 = vadd.f32 %v2877_v32, %v2829_v6  ;;  %v2926_v9 = vpop.f32.mrf.mxu1 }
 0x30d   : > { %v13025_v28 = vadd.f32 %v3022_v57, %v2974_v23  ;;  %v2927_v37 = vadd.f32 %v2926_v9, %v2878_v48  ;;  %v8313_v48 = vor.u32 %v10338_v58, %v8312_v35  ;;  %v10427_v9 = vld [vmem:[%s16315_s1 + $0x5c4] sm:$0xf]  ;;  %v9074_v58 = vld [vmem:[%s16315_s1 + $0x8f0] sm:$0xf0] }
 0x30f   : > { %v3958_v61 = vmax.f32 %v2927_v37, 0.0  ;;  %v2834_v37 = vadd.f32 %v12747_v44, %v12789_v62  ;;  %3527 = vmatpush.bf16.msrb.mxu2 %v8313_v48  ;;  %v10523_v44 = vld [vmem:[%s16315_s1 + $0x8c4] sm:$0xf]  ;;  %v2837_v48 = vadd.f32 %v12774_v47, %v12789_v62  ;;  %v8264_v47 = vld [vmem:[%s16315_s1 + $0x268] sm:$0xf] }
 0x311   : > { %v13035_v6 = vpack.c.bf16 %v3958_v61, %v3946_v31  ;;  %v3024_v4 = vpop.f32.mrf.mxu3  ;;  %v8693_v31 = vor.u32 %v10427_v9, %v8690_v27  ;;  %v10434_v61 = vld [vmem:[%s16315_s1 + $0x5f4] sm:$0xf0] }
 0x312   : > { %v2975_v18 = vpop.f32.mrf.mxu2  ;;  %v2880_v23 = vpop.f32.mrf.mxu0 }
 0x313   : > { %16452 = vst [vmem:[#allocation47_spill] sm:$0xff] %v13035_v6  ;;  %v2976_v54 = vadd.f32 %v2975_v18, %v12799_v45  ;;  %v2881_v57 = vadd.f32 %v2880_v23, %v2832_v3  ;;  %v2929_v32 = vpop.f32.mrf.mxu1  ;;  %3429 = vmatpush.bf16.msrb.mxu0 %v8693_v31 }
 0x315   : > { %v13038_v14 = vadd.f32 %v3024_v4, %v2976_v54  ;;  %v2930_v15 = vadd.f32 %v2929_v32, %v2881_v57  ;;  %3075 = vmatmul.bf16.gmra.mxu0 %v11508_v13  ;;  %v8697_v4 = vor.u32 %v10434_v61, %v8696_v33 }
 0x316   : > { %3124 = vmatmul.bf16.gmra.mxu1 %v11504_v11  ;;  %3222 = vmatmul.bf16.gmra.mxu3 %v11508_v13 }
 0x317   : > { %3173 = vmatmul.bf16.gmra.mxu2 %v11506_v12  ;;  %3576 = vmatpush.bf16.msrb.mxu3 %v8697_v4  ;;  %v3970_v9 = vmax.f32 %v2930_v15, 0.0  ;;  %v10326_v15 = vld [vmem:[%s16315_s1 + $0x294] sm:$0xf0] }
 0x319   : > { %v3027_v18 = vpop.f32.mrf.mxu3 }
 0x31a   : > { %v2978_v36 = vpop.f32.mrf.mxu2  ;;  %v2882_v54 = vpop.f32.mrf.mxu0 }
 0x31b   : > { %v2979_v3 = vadd.f32 %v2978_v36, %v12799_v45  ;;  %v2883_v23 = vadd.f32 %v2882_v54, %v2834_v37  ;;  %v2931_v57 = vpop.f32.mrf.mxu1  ;;  %v9077_v36 = vor.u32 %v10523_v44, %v9074_v58  ;;  %v8265_v58 = vor.u32 %v10326_v15, %v8264_v47  ;;  %v10511_v47 = vld [vmem:[%s16315_s1 + $0x864] sm:$0xf]  ;;  %v9026_v15 = vld [vmem:[%s16315_s1 + $0x890] sm:$0xf0] }
 0x31d   : > { %v13065_v32 = vadd.f32 %v3027_v18, %v2979_v3  ;;  %v2932_v35 = vadd.f32 %v2931_v57, %v2883_v23  ;;  %3478 = vmatpush.bf16.msrb.mxu1 %v9077_v36  ;;  %v10415_v57 = vld [vmem:[%s16315_s1 + $0x564] sm:$0xf]  ;;  %v10422_v36 = vld [vmem:[%s16315_s1 + $0x594] sm:$0xf0]  ;;  %3528 = vmatpush.bf16.msrb.mxu2 %v8265_v58 }
 0x31f   : > { %v3982_v27 = vmax.f32 %v2932_v35, 0.0  ;;  %v2839_v35 = vadd.f32 %v12793_v17, %v12789_v62 }
 0x321   : > { %v13075_v37 = vpack.c.bf16 %v3982_v27, %v3970_v9  ;;  %v3029_v61 = vpop.f32.mrf.mxu3  ;;  %v8642_v9 = vld [vmem:[%s16315_s1 + $0x590] sm:$0xf0]  ;;  %v8648_v27 = vld [vmem:[%s16315_s1 + $0x568] sm:$0xf] }
 0x322   : > { %v2980_v33 = vpop.f32.mrf.mxu2  ;;  %v2885_v3 = vpop.f32.mrf.mxu0  ;;  %v8649_v62 = vor.u32 %v10422_v36, %v8648_v27 }
 0x323   : > { %16453 = vst [vmem:[#allocation48_spill] sm:$0xff] %v13075_v37  ;;  %v2981_v31 = vadd.f32 %v2980_v33, %v12799_v45  ;;  %v2886_v18 = vadd.f32 %v2885_v3, %v2837_v48  ;;  %v2934_v54 = vpop.f32.mrf.mxu1 }
 0x324   : > { %3577 = vmatpush.bf16.msrb.mxu3 %v8649_v62  ;;  %v8594_v62 = vld [vmem:[%s16315_s1 + $0x530] sm:$0xf0] }
 0x325   : > { %v13078_v4 = vadd.f32 %v3029_v61, %v2981_v31  ;;  %v2935_v23 = vadd.f32 %v2934_v54, %v2886_v18  ;;  %3080 = vmatmul.bf16.gmra.mxu0 %v11548_v43  ;;  %v8645_v61 = vor.u32 %v10415_v57, %v8642_v9  ;;  %v9029_v57 = vor.u32 %v10511_v47, %v9026_v15 }
 0x326   : > { %3129 = vmatmul.bf16.gmra.mxu1 %v11544_v38  ;;  %3227 = vmatmul.bf16.gmra.mxu3 %v11548_v43 }
 0x327   : > { %3178 = vmatmul.bf16.gmra.mxu2 %v11546_v39  ;;  %3430 = vmatpush.bf16.msrb.mxu0 %v8645_v61 }
 0x328   : > { %3479 = vmatpush.bf16.msrb.mxu1 %v9029_v57 }
 0x329   : > { %v3032_v33 = vpop.f32.mrf.mxu3 }
 0x32a   : > { %v2983_v44 = vpop.f32.mrf.mxu2  ;;  %v2887_v31 = vpop.f32.mrf.mxu0 }
 0x32b   : > { %v2984_v48 = vadd.f32 %v2983_v44, %v12799_v45  ;;  %v2888_v17 = vadd.f32 %v2887_v31, %v2839_v35  ;;  %v2936_v3 = vpop.f32.mrf.mxu1  ;;  %v3994_v44 = vmax.f32 %v2935_v23, 0.0 }
 0x32d   : > { %v13105_v18 = vadd.f32 %v3032_v33, %v2984_v48  ;;  %v2937_v54 = vadd.f32 %v2936_v3, %v2888_v17  ;;  %v13117_v48 = vperm.slane %v12786_v34, 7  ;;  %v8216_v34 = vld [vmem:[%s16315_s1 + $0x208] sm:$0xf]  ;;  %v10410_v3 = vld [vmem:[%s16315_s1 + $0x534] sm:$0xf0] }
 0x32e   : > { %v8600_v17 = vld [vmem:[%s16315_s1 + $0x508] sm:$0xf] }
 0x32f   : > { %v4006_v37 = vmax.f32 %v2937_v54, 0.0  ;;  %v8601_v15 = vor.u32 %v10410_v3, %v8600_v17 }
 0x331   : > { %v13113_v35 = vpack.c.bf16 %v4006_v37, %v3994_v44  ;;  %v3034_v27 = vpop.f32.mrf.mxu3  ;;  %3578 = vmatpush.bf16.msrb.mxu3 %v8601_v15 }
 0x332   : > { %v2985_v9 = vpop.f32.mrf.mxu2  ;;  %v3046_v36 = vpop.f32.mrf.mxu0 }
 0x333   : > { %16454 = vst [vmem:[#allocation49_spill] sm:$0xff] %v13113_v35  ;;  %v2986_v58 = vadd.f32 %v2985_v9, %v12799_v45  ;;  %v3047_v33 = vadd.f32 %v3046_v36, %v12825_v5  ;;  %v3095_v31 = vpop.f32.mrf.mxu1  ;;  %v10314_v45 = vld [vmem:[%s16315_s1 + $0x234] sm:$0xf0]  ;;  %v10403_v5 = vld [vmem:[%s16315_s1 + $0x504] sm:$0xf] }
 0x334   : > { %v3096_v23 = vadd.f32 %v3095_v31, %v13117_v48  ;;  %v8217_v37 = vor.u32 %v10314_v45, %v8216_v34  ;;  %v8597_v47 = vor.u32 %v10403_v5, %v8594_v62  ;;  %v10499_v45 = vld [vmem:[%s16315_s1 + $0x804] sm:$0xf]  ;;  %v8978_v5 = vld [vmem:[%s16315_s1 + $0x830] sm:$0xf0] }
 0x335   : > { %v13120_v61 = vadd.f32 %v3034_v27, %v2986_v58  ;;  %3241 = vmatmul.bf16.vlgmr.msra.gmra.mxu0 %v11243_v46  ;;  %v3827_v31 = vmax.f32 %v3047_v33, 0.0  ;;  %v8981_v62 = vor.u32 %v10499_v45, %v8978_v5  ;;  %v8552_v45 = vld [vmem:[%s16315_s1 + $0x4a8] sm:$0xf]  ;;  %v10398_v5 = vld [vmem:[%s16315_s1 + $0x4d4] sm:$0xf0] }
 0x336   : > { %3290 = vmatmul.bf16.vlgmr.msra.gmra.mxu1 %v11248_v51  ;;  %3388 = vmatmul.bf16.vlgmr.msra.gmra.mxu3 %v11243_v46 }
 0x337   : > { %3339 = vmatmul.bf16.vlgmr.msra.gmra.mxu2 %v11250_v52  ;;  %3431 = vmatpush.bf16.msrb.mxu0 %v8597_v47 }
 0x338   : > { %3529 = vmatpush.bf16.msrb.mxu2 %v8217_v37  ;;  %3480 = vmatpush.bf16.msrb.mxu1 %v8981_v62 }
 0x339   : > { %v3193_v57 = vpop.f32.mrf.mxu3 }
 0x33a   : > { %v3144_v54 = vpop.f32.mrf.mxu2  ;;  %v3048_v9 = vpop.f32.mrf.mxu0 }
 0x33b   : > { %v3145_v44 = vadd.f32 %v3144_v54, %v3096_v23  ;;  %v3049_v58 = vadd.f32 %v3048_v9, %v12838_v22  ;;  %v3097_v27 = vpop.f32.mrf.mxu1 }
 0x33c   : > { %v3098_v37 = vadd.f32 %v3097_v27, %v13117_v48  ;;  %v10391_v27 = vld [vmem:[%s16315_s1 + $0x4a4] sm:$0xf] }
 0x33d   : > { %v3194_v36 = vadd.f32 %v3193_v57, %v3145_v44  ;;  %v3839_v34 = vmax.f32 %v3049_v58, 0.0  ;;  %v8168_v58 = vld [vmem:[%s16315_s1 + $0x1a8] sm:$0xf] }
 0x33f   : > { %v13152_v23 = vpack.c.bf16 %v3839_v34, %v3827_v31  ;;  %v3828_v44 = vmax.f32 %v3194_v36, 0.0  ;;  %v8546_v34 = vld [vmem:[%s16315_s1 + $0x4d0] sm:$0xf0] }
 0x341   : > { %16455 = vst [vmem:[#allocation50_spill] sm:$0xff] %v13152_v23  ;;  %v3195_v3 = vpop.f32.mrf.mxu3 }
 0x342   : > { %v3146_v22 = vpop.f32.mrf.mxu2  ;;  %v3051_v54 = vpop.f32.mrf.mxu0 }
 0x343   : > { %v3147_v17 = vadd.f32 %v3146_v22, %v3098_v37  ;;  %v3052_v33 = vadd.f32 %v3051_v54, %v12865_v16  ;;  %v3100_v47 = vpop.f32.mrf.mxu1  ;;  %v10302_v16 = vld [vmem:[%s16315_s1 + $0x1d4] sm:$0xf0]  ;;  %v8549_v37 = vor.u32 %v10391_v27, %v8546_v34  ;;  %v8553_v22 = vor.u32 %v10398_v5, %v8552_v45  ;;  %v8930_v27 = vld [vmem:[%s16315_s1 + $0x7d0] sm:$0xf0] }
 0x344   : > { %v3101_v9 = vadd.f32 %v3100_v47, %v13117_v48  ;;  %v8169_v31 = vor.u32 %v10302_v16, %v8168_v58  ;;  %v10487_v16 = vld [vmem:[%s16315_s1 + $0x7a4] sm:$0xf] }
 0x345   : > { %v3196_v15 = vadd.f32 %v3195_v3, %v3147_v17  ;;  %3246 = vmatmul.bf16.gmra.mxu0 %v11304_v19  ;;  %3579 = vmatpush.bf16.msrb.mxu3 %v8553_v22 }
 0x346   : > { %3295 = vmatmul.bf16.gmra.mxu1 %v11306_v20  ;;  %3393 = vmatmul.bf16.gmra.mxu3 %v11304_v19 }
 0x347   : > { %v3840_v57 = vmax.f32 %v3196_v15, 0.0  ;;  %3344 = vmatmul.bf16.gmra.mxu2 %v11308_v21  ;;  %3432 = vmatpush.bf16.msrb.mxu0 %v8549_v37 }
 0x348   : > { %3530 = vmatpush.bf16.msrb.mxu2 %v8169_v31 }
 0x349   : > { %v13170_v36 = vpack.c.bf16 %v3840_v57, %v3828_v44  ;;  %v3198_v3 = vpop.f32.mrf.mxu3  ;;  %v3851_v57 = vmax.f32 %v3052_v33, 0.0 }
 0x34a   : > { %v3149_v62 = vpop.f32.mrf.mxu2  ;;  %v3053_v54 = vpop.f32.mrf.mxu0 }
 0x34b   : > { %16456 = vst [vmem:[#allocation51_spill] sm:$0xff] %v13170_v36  ;;  %v3150_v17 = vadd.f32 %v3149_v62, %v3101_v9  ;;  %v3054_v47 = vadd.f32 %v3053_v54, %v12878_v63  ;;  %v3102_v15 = vpop.f32.mrf.mxu1  ;;  %v8933_v9 = vor.u32 %v10487_v16, %v8930_v27  ;;  %v10386_v16 = vld [vmem:[%s16315_s1 + $0x474] sm:$0xf0] }
 0x34c   : > { %v3103_v31 = vadd.f32 %v3102_v15, %v13117_v48  ;;  %v10379_v15 = vld [vmem:[%s16315_s1 + $0x444] sm:$0xf] }
 0x34d   : > { %v3199_v44 = vadd.f32 %v3198_v3, %v3150_v17  ;;  %v3863_v58 = vmax.f32 %v3054_v47, 0.0  ;;  %3481 = vmatpush.bf16.msrb.mxu1 %v8933_v9  ;;  %v8120_v47 = vld [vmem:[%s16315_s1 + $0x148] sm:$0xf] }
 0x34f   : > { %v13188_v34 = vpack.c.bf16 %v3863_v58, %v3851_v57  ;;  %v3852_v17 = vmax.f32 %v3199_v44, 0.0  ;;  %v8498_v57 = vld [vmem:[%s16315_s1 + $0x470] sm:$0xf0]  ;;  %v8504_v58 = vld [vmem:[%s16315_s1 + $0x448] sm:$0xf] }
 0x351   : > { %16457 = vst [vmem:[#allocation52_spill] sm:$0xff] %v13188_v34  ;;  %v3200_v5 = vpop.f32.mrf.mxu3 }
 0x352   : > { %v3151_v63 = vpop.f32.mrf.mxu2  ;;  %v3056_v62 = vpop.f32.mrf.mxu0 }
 0x353   : > { %v3152_v45 = vadd.f32 %v3151_v63, %v3103_v31  ;;  %v3057_v33 = vadd.f32 %v3056_v62, %v12905_v8  ;;  %v3105_v37 = vpop.f32.mrf.mxu1  ;;  %v10290_v8 = vld [vmem:[%s16315_s1 + $0x174] sm:$0xf0]  ;;  %v8501_v31 = vor.u32 %v10379_v15, %v8498_v57  ;;  %v8505_v63 = vor.u32 %v10386_v16, %v8504_v58 }
 0x354   : > { %v3106_v54 = vadd.f32 %v3105_v37, %v13117_v48  ;;  %v8121_v44 = vor.u32 %v10290_v8, %v8120_v47 }
 0x355   : > { %v3201_v22 = vadd.f32 %v3200_v5, %v3152_v45  ;;  %3251 = vmatmul.bf16.gmra.mxu0 %v11344_v40  ;;  %3580 = vmatpush.bf16.msrb.mxu3 %v8505_v63  ;;  %v3875_v8 = vmax.f32 %v3057_v33, 0.0 }
 0x356   : > { %3300 = vmatmul.bf16.gmra.mxu1 %v11346_v41  ;;  %3398 = vmatmul.bf16.gmra.mxu3 %v11344_v40 }
 0x357   : > { %v3864_v3 = vmax.f32 %v3201_v22, 0.0  ;;  %3349 = vmatmul.bf16.gmra.mxu2 %v11348_v42  ;;  %3433 = vmatpush.bf16.msrb.mxu0 %v8501_v31 }
 0x358   : > { %3531 = vmatpush.bf16.msrb.mxu2 %v8121_v44 }
 0x359   : > { %v13215_v27 = vpack.c.bf16 %v3864_v3, %v3852_v17  ;;  %v3203_v5 = vpop.f32.mrf.mxu3  ;;  %v10475_v17 = vld [vmem:[%s16315_s1 + $0x744] sm:$0xf]  ;;  %v8882_v3 = vld [vmem:[%s16315_s1 + $0x770] sm:$0xf0] }
 0x35a   : > { %v3154_v9 = vpop.f32.mrf.mxu2  ;;  %v3058_v62 = vpop.f32.mrf.mxu0 }
 0x35b   : > { %16458 = vst [vmem:[#allocation53_spill] sm:$0xff] %v13215_v27  ;;  %v3155_v45 = vadd.f32 %v3154_v9, %v3106_v54  ;;  %v3059_v37 = vadd.f32 %v3058_v62, %v12918_v7  ;;  %v3107_v22 = vpop.f32.mrf.mxu1  ;;  %v8885_v54 = vor.u32 %v10475_v17, %v8882_v3  ;;  %v10367_v62 = vld [vmem:[%s16315_s1 + $0x3e4] sm:$0xf] }
 0x35c   : > { %v3108_v44 = vadd.f32 %v3107_v22, %v13117_v48  ;;  %v8450_v22 = vld [vmem:[%s16315_s1 + $0x410] sm:$0xf0] }
 0x35d   : > { %v3204_v47 = vadd.f32 %v3203_v5, %v3155_v45  ;;  %v3887_v35 = vmax.f32 %v3059_v37, 0.0  ;;  %3482 = vmatpush.bf16.msrb.mxu1 %v8885_v54  ;;  %v8453_v54 = vor.u32 %v10367_v62, %v8450_v22 }
 0x35f   : > { %v13224_v15 = vpack.c.bf16 %v3887_v35, %v3875_v8  ;;  %v3876_v63 = vmax.f32 %v3204_v47, 0.0  ;;  %v8072_v35 = vld [vmem:[%s16315_s1 + $0xe8] sm:$0xf]  ;;  %v10374_v8 = vld [vmem:[%s16315_s1 + $0x414] sm:$0xf0]  ;;  %3434 = vmatpush.bf16.msrb.mxu0 %v8453_v54 }
 0x360   : > { %v8456_v47 = vld [vmem:[%s16315_s1 + $0x3e8] sm:$0xf] }
 0x361   : > { %16459 = vst [vmem:[#allocation54_spill] sm:$0xff] %v13224_v15  ;;  %v3205_v58 = vpop.f32.mrf.mxu3 }
 0x362   : > { %v3156_v7 = vpop.f32.mrf.mxu2  ;;  %v3061_v16 = vpop.f32.mrf.mxu0 }
 0x363   : > { %v3157_v57 = vadd.f32 %v3156_v7, %v3108_v44  ;;  %v3062_v33 = vadd.f32 %v3061_v16, %v12945_v60  ;;  %v3110_v9 = vpop.f32.mrf.mxu1  ;;  %v10278_v60 = vld [vmem:[%s16315_s1 + $0x114] sm:$0xf0]  ;;  %v8457_v44 = vor.u32 %v10374_v8, %v8456_v47 }
 0x364   : > { %v3111_v5 = vadd.f32 %v3110_v9, %v13117_v48  ;;  %v8073_v37 = vor.u32 %v10278_v60, %v8072_v35 }
 0x365   : > { %v3206_v31 = vadd.f32 %v3205_v58, %v3157_v57  ;;  %3256 = vmatmul.bf16.gmra.mxu0 %v11384_v0  ;;  %3581 = vmatpush.bf16.msrb.mxu3 %v8457_v44  ;;  %v3899_v35 = vmax.f32 %v3062_v33, 0.0 }
 0x366   : > { %3305 = vmatmul.bf16.gmra.mxu1 %v11386_v1  ;;  %3403 = vmatmul.bf16.gmra.mxu3 %v11384_v0 }
 0x367   : > { %v3888_v45 = vmax.f32 %v3206_v31, 0.0  ;;  %3354 = vmatmul.bf16.gmra.mxu2 %v11388_v2 }
 0x368   : > { %3532 = vmatpush.bf16.msrb.mxu2 %v8073_v37 }
 0x369   : > { %v13251_v17 = vpack.c.bf16 %v3888_v45, %v3876_v63  ;;  %v3208_v57 = vpop.f32.mrf.mxu3  ;;  %v10463_v63 = vld [vmem:[%s16315_s1 + $0x6e4] sm:$0xf]  ;;  %v8834_v45 = vld [vmem:[%s16315_s1 + $0x710] sm:$0xf0] }
 0x36a   : > { %v3159_v3 = vpop.f32.mrf.mxu2  ;;  %v3063_v58 = vpop.f32.mrf.mxu0 }
 0x36b   : > { %16460 = vst [vmem:[#allocation55_spill] sm:$0xff] %v13251_v17  ;;  %v3160_v7 = vadd.f32 %v3159_v3, %v3111_v5  ;;  %v3064_v16 = vadd.f32 %v3063_v58, %v12958_v59  ;;  %v3112_v9 = vpop.f32.mrf.mxu1  ;;  %v8837_v5 = vor.u32 %v10463_v63, %v8834_v45  ;;  %v8024_v58 = vld [vmem:[%s16315_s1 + $0x88] sm:$0xf]  ;;  %v10574_v17 = vld [vmem:[%s16317_s3 + $0x158] sm:$0xf0] }
 0x36c   : > { %v3113_v37 = vadd.f32 %v3112_v9, %v13117_v48 }
 0x36d   : > { %v3209_v31 = vadd.f32 %v3208_v57, %v3160_v7  ;;  %v3911_v60 = vmax.f32 %v3064_v16, 0.0  ;;  %3483 = vmatpush.bf16.msrb.mxu1 %v8837_v5  ;;  %v10355_v16 = vld [vmem:[%s16315_s1 + $0x384] sm:$0xf] }
 0x36f   : > { %v13260_v62 = vpack.c.bf16 %v3911_v60, %v3899_v35  ;;  %v3900_v44 = vmax.f32 %v3209_v31, 0.0  ;;  %v8402_v31 = vld [vmem:[%s16315_s1 + $0x3b0] sm:$0xf0]  ;;  %v8408_v35 = vld [vmem:[%s16315_s1 + $0x388] sm:$0xf] }
 0x370   : > { %v10362_v60 = vld [vmem:[%s16315_s1 + $0x3b4] sm:$0xf0]  ;;  %v8405_v5 = vor.u32 %v10355_v16, %v8402_v31 }
 0x371   : > { %16461 = vst [vmem:[#allocation56_spill] sm:$0xff] %v13260_v62  ;;  %v3210_v47 = vpop.f32.mrf.mxu3 }
 0x372   : > { %v3161_v59 = vpop.f32.mrf.mxu2  ;;  %v3066_v8 = vpop.f32.mrf.mxu0  ;;  %3435 = vmatpush.bf16.msrb.mxu0 %v8405_v5 }
 0x373   : > { %v3162_v22 = vadd.f32 %v3161_v59, %v3113_v37  ;;  %v3067_v33 = vadd.f32 %v3066_v8, %v12985_v30  ;;  %v3115_v3 = vpop.f32.mrf.mxu1  ;;  %v10266_v30 = vld [vmem:[%s16315_s1 + $0xb4] sm:$0xf0]  ;;  %v8409_v37 = vor.u32 %v10362_v60, %v8408_v35 }
 0x374   : > { %v3116_v57 = vadd.f32 %v3115_v3, %v13117_v48  ;;  %v8025_v9 = vor.u32 %v10266_v30, %v8024_v58 }
 0x375   : > { %v3211_v54 = vadd.f32 %v3210_v47, %v3162_v22  ;;  %3261 = vmatmul.bf16.gmra.mxu0 %v11424_v24  ;;  %3582 = vmatpush.bf16.msrb.mxu3 %v8409_v37  ;;  %v3923_v58 = vmax.f32 %v3067_v33, 0.0 }
 0x376   : > { %3310 = vmatmul.bf16.gmra.mxu1 %v11426_v25  ;;  %3408 = vmatmul.bf16.gmra.mxu3 %v11424_v24 }
 0x377   : > { %v3912_v7 = vmax.f32 %v3211_v54, 0.0  ;;  %3359 = vmatmul.bf16.gmra.mxu2 %v11428_v26 }
 0x378   : > { %3533 = vmatpush.bf16.msrb.mxu2 %v8025_v9 }
 0x379   : > { %v13287_v63 = vpack.c.bf16 %v3912_v7, %v3900_v44  ;;  %v3213_v22 = vpop.f32.mrf.mxu3  ;;  %v10451_v44 = vld [vmem:[%s16315_s1 + $0x684] sm:$0xf]  ;;  %v8786_v7 = vld [vmem:[%s16315_s1 + $0x6b0] sm:$0xf0] }
 0x37a   : > { %v3164_v45 = vpop.f32.mrf.mxu2  ;;  %v3068_v47 = vpop.f32.mrf.mxu0 }
 0x37b   : > { %16462 = vst [vmem:[#allocation57_spill] sm:$0xff] %v13287_v63  ;;  %v3165_v59 = vadd.f32 %v3164_v45, %v3116_v57  ;;  %v3069_v8 = vadd.f32 %v3068_v47, %v12998_v29  ;;  %v3117_v3 = vpop.f32.mrf.mxu1  ;;  %v8789_v57 = vor.u32 %v10451_v44, %v8786_v7  ;;  %v7976_v47 = vld [vmem:[%s16315_s1 + $0x28] sm:$0xf]  ;;  %v10577_v63 = vld [vmem:[%s16317_s3 + $0x170] sm:$0xf0] }
 0x37c   : > { %v3118_v9 = vadd.f32 %v3117_v3, %v13117_v48 }
 0x37d   : > { %v3214_v54 = vadd.f32 %v3213_v22, %v3165_v59  ;;  %v3935_v30 = vmax.f32 %v3069_v8, 0.0  ;;  %3484 = vmatpush.bf16.msrb.mxu1 %v8789_v57  ;;  %v10343_v8 = vld [vmem:[%s16315_s1 + $0x324] sm:$0xf] }
 0x37f   : > { %v13296_v16 = vpack.c.bf16 %v3935_v30, %v3923_v58  ;;  %v3924_v37 = vmax.f32 %v3214_v54, 0.0  ;;  %v8354_v54 = vld [vmem:[%s16315_s1 + $0x350] sm:$0xf0]  ;;  %v8360_v58 = vld [vmem:[%s16315_s1 + $0x328] sm:$0xf] }
 0x380   : > { %v10350_v30 = vld [vmem:[%s16315_s1 + $0x354] sm:$0xf0]  ;;  %v8357_v57 = vor.u32 %v10343_v8, %v8354_v54 }
 0x381   : > { %16463 = vst [vmem:[#allocation58_spill] sm:$0xff] %v13296_v16  ;;  %v3215_v35 = vpop.f32.mrf.mxu3 }
 0x382   : > { %v3166_v29 = vpop.f32.mrf.mxu2  ;;  %v3071_v60 = vpop.f32.mrf.mxu0  ;;  %3436 = vmatpush.bf16.msrb.mxu0 %v8357_v57 }
 0x383   : > { %v3167_v31 = vadd.f32 %v3166_v29, %v3118_v9  ;;  %v3072_v33 = vadd.f32 %v3071_v60, %v13025_v28  ;;  %v3120_v45 = vpop.f32.mrf.mxu1  ;;  %v10254_v28 = vld [vmem:[%s16315_s1 + $0x54] sm:$0xf0]  ;;  %v8361_v9 = vor.u32 %v10350_v30, %v8360_v58 }
 0x384   : > { %v3121_v22 = vadd.f32 %v3120_v45, %v13117_v48  ;;  %v7977_v3 = vor.u32 %v10254_v28, %v7976_v47 }
 0x385   : > { %v3216_v5 = vadd.f32 %v3215_v35, %v3167_v31  ;;  %3266 = vmatmul.bf16.gmra.mxu0 %v11464_v49  ;;  %3583 = vmatpush.bf16.msrb.mxu3 %v8361_v9  ;;  %v3947_v47 = vmax.f32 %v3072_v33, 0.0 }
 0x386   : > { %3315 = vmatmul.bf16.gmra.mxu1 %v11466_v50  ;;  %3413 = vmatmul.bf16.gmra.mxu3 %v11464_v49 }
 0x387   : > { %v3936_v59 = vmax.f32 %v3216_v5, 0.0  ;;  %3364 = vmatmul.bf16.gmra.mxu2 %v11468_v53 }
 0x388   : > { %3534 = vmatpush.bf16.msrb.mxu2 %v7977_v3 }
 0x389   : > { %v13323_v44 = vpack.c.bf16 %v3936_v59, %v3924_v37  ;;  %v3218_v31 = vpop.f32.mrf.mxu3  ;;  %v10439_v37 = vld [vmem:[%s16315_s1 + $0x624] sm:$0xf]  ;;  %v8738_v59 = vld [vmem:[%s16315_s1 + $0x650] sm:$0xf0] }
 0x38a   : > { %v3169_v7 = vpop.f32.mrf.mxu2  ;;  %v3073_v35 = vpop.f32.mrf.mxu0 }
 0x38b   : > { %16464 = vst [vmem:[#allocation59_spill] sm:$0xff] %v13323_v44  ;;  %v3170_v29 = vadd.f32 %v3169_v7, %v3121_v22  ;;  %v3074_v60 = vadd.f32 %v3073_v35, %v13038_v14  ;;  %v3122_v45 = vpop.f32.mrf.mxu1  ;;  %v8741_v22 = vor.u32 %v10439_v37, %v8738_v59  ;;  %v10428_v35 = vld [vmem:[%s16315_s1 + $0x5cc] sm:$0xf]  ;;  %v7978_v44 = vld [vmem:[%s16315_s1 + $0x58] sm:$0xf0] }
 0x38c   : > { %v3123_v3 = vadd.f32 %v3122_v45, %v13117_v48 }
 0x38d   : > { %v3219_v5 = vadd.f32 %v3218_v31, %v3170_v29  ;;  %v3959_v28 = vmax.f32 %v3074_v60, 0.0  ;;  %3485 = vmatpush.bf16.msrb.mxu1 %v8741_v22  ;;  %v9080_v60 = vld [vmem:[%s16315_s1 + $0x8c8] sm:$0xf] }
 0x38f   : > { %v13332_v8 = vpack.c.bf16 %v3959_v28, %v3947_v47  ;;  %v3948_v9 = vmax.f32 %v3219_v5, 0.0  ;;  %v10530_v5 = vld [vmem:[%s16315_s1 + $0x8f4] sm:$0xf0]  ;;  %v10524_v47 = vld [vmem:[%s16315_s1 + $0x8cc] sm:$0xf] }
 0x390   : > { %v9082_v28 = vld [vmem:[%s16315_s1 + $0x8f8] sm:$0xf0]  ;;  %v9081_v22 = vor.u32 %v10530_v5, %v9080_v60 }
 0x391   : > { %16465 = vst [vmem:[#allocation60_spill] sm:$0xff] %v13332_v8  ;;  %v3220_v58 = vpop.f32.mrf.mxu3  ;;  %v8026_v8 = vld [vmem:[%s16315_s1 + $0xb8] sm:$0xf0] }
 0x392   : > { %v3171_v14 = vpop.f32.mrf.mxu2  ;;  %v3076_v30 = vpop.f32.mrf.mxu0  ;;  %3625 = vmatpush.bf16.msra.mxu0 %v9081_v22 }
 0x393   : > { %v3172_v54 = vadd.f32 %v3171_v14, %v3123_v3  ;;  %v3077_v33 = vadd.f32 %v3076_v30, %v13065_v32  ;;  %v3125_v7 = vpop.f32.mrf.mxu1  ;;  %v8698_v32 = vld [vmem:[%s16315_s1 + $0x5f8] sm:$0xf0]  ;;  %v9085_v3 = vor.u32 %v10524_v47, %v9082_v28 }
 0x394   : > { %v3126_v31 = vadd.f32 %v3125_v7, %v13117_v48  ;;  %v8701_v45 = vor.u32 %v10428_v35, %v8698_v32  ;;  %v10332_v35 = vld [vmem:[%s16315_s1 + $0x2cc] sm:$0xf] }
 0x395   : > { %v3221_v57 = vadd.f32 %v3220_v58, %v3172_v54  ;;  %3271 = vmatmul.bf16.gmra.mxu0 %v11504_v11  ;;  %3772 = vmatpush.bf16.msra.mxu3 %v9085_v3 }
 0x396   : > { %3320 = vmatmul.bf16.gmra.mxu1 %v11506_v12  ;;  %3418 = vmatmul.bf16.gmra.mxu3 %v11504_v11 }
 0x397   : > { %v3960_v29 = vmax.f32 %v3221_v57, 0.0  ;;  %3369 = vmatmul.bf16.gmra.mxu2 %v11508_v13 }
 0x398   : > { %3723 = vmatpush.bf16.msra.mxu2 %v8701_v45 }
 0x399   : > { %v13359_v37 = vpack.c.bf16 %v3960_v29, %v3948_v9  ;;  %v3223_v54 = vpop.f32.mrf.mxu3  ;;  %v8314_v9 = vld [vmem:[%s16315_s1 + $0x2f8] sm:$0xf0]  ;;  %v3971_v29 = vmax.f32 %v3077_v33, 0.0 }
 0x39a   : > { %v3174_v59 = vpop.f32.mrf.mxu2  ;;  %v3078_v58 = vpop.f32.mrf.mxu0 }
 0x39b   : > { %16466 = vst [vmem:[#allocation61_spill] sm:$0xff] %v13359_v37  ;;  %v3175_v14 = vadd.f32 %v3174_v59, %v3126_v31  ;;  %v3079_v30 = vadd.f32 %v3078_v58, %v13078_v4  ;;  %v3127_v7 = vpop.f32.mrf.mxu1  ;;  %v8317_v31 = vor.u32 %v10332_v35, %v8314_v9  ;;  %v10416_v58 = vld [vmem:[%s16315_s1 + $0x56c] sm:$0xf]  ;;  %v9034_v9 = vld [vmem:[%s16315_s1 + $0x898] sm:$0xf0] }
 0x39c   : > { %v3128_v4 = vadd.f32 %v3127_v7, %v13117_v48  ;;  %v10512_v35 = vld [vmem:[%s16315_s1 + $0x86c] sm:$0xf] }
 0x39d   : > { %v3224_v57 = vadd.f32 %v3223_v54, %v3175_v14  ;;  %v3983_v32 = vmax.f32 %v3079_v30, 0.0  ;;  %3674 = vmatpush.bf16.msra.mxu1 %v8317_v31  ;;  %v9032_v30 = vld [vmem:[%s16315_s1 + $0x868] sm:$0xf] }
 0x39f   : > { %v13368_v60 = vpack.c.bf16 %v3983_v32, %v3971_v29  ;;  %v3972_v14 = vmax.f32 %v3224_v57, 0.0  ;;  %v10518_v57 = vld [vmem:[%s16315_s1 + $0x894] sm:$0xf0] }
 0x3a0   : > { %v9033_v31 = vor.u32 %v10518_v57, %v9032_v30 }
 0x3a1   : > { %16467 = vst [vmem:[#allocation62_spill] sm:$0xff] %v13368_v60  ;;  %v3225_v47 = vpop.f32.mrf.mxu3  ;;  %v8074_v60 = vld [vmem:[%s16315_s1 + $0x118] sm:$0xf0] }
 0x3a2   : > { %v3176_v45 = vpop.f32.mrf.mxu2  ;;  %v3081_v28 = vpop.f32.mrf.mxu0  ;;  %3626 = vmatpush.bf16.msra.mxu0 %v9033_v31 }
 0x3a3   : > { %v3177_v5 = vadd.f32 %v3176_v45, %v3128_v4  ;;  %v3082_v59 = vadd.f32 %v3081_v28, %v13105_v18  ;;  %v3130_v22 = vpop.f32.mrf.mxu1  ;;  %v8650_v18 = vld [vmem:[%s16315_s1 + $0x598] sm:$0xf0]  ;;  %v9037_v4 = vor.u32 %v10512_v35, %v9034_v9 }
 0x3a4   : > { %v3131_v33 = vadd.f32 %v3130_v22, %v13117_v48  ;;  %v8653_v7 = vor.u32 %v10416_v58, %v8650_v18  ;;  %v13401_v58 = vld [vmem:[%s16316_s2 + $0x8] sm:$0xf] }
 0x3a5   : > { %v3226_v3 = vadd.f32 %v3225_v47, %v3177_v5  ;;  %3276 = vmatmul.bf16.gmra.mxu0 %v11544_v38  ;;  %3773 = vmatpush.bf16.msra.mxu3 %v9037_v4  ;;  %v13410_v30 = vperm.slane %v13401_v58, 0 }
 0x3a6   : > { %3325 = vmatmul.bf16.gmra.mxu1 %v11546_v39  ;;  %3423 = vmatmul.bf16.gmra.mxu3 %v11544_v38 }
 0x3a7   : > { %v3984_v54 = vmax.f32 %v3226_v3, 0.0  ;;  %3374 = vmatmul.bf16.gmra.mxu2 %v11548_v43 }
 0x3a8   : > { %3724 = vmatpush.bf16.msra.mxu2 %v8653_v7 }
 0x3a9   : > { %v13395_v29 = vpack.c.bf16 %v3984_v54, %v3972_v14  ;;  %v3228_v5 = vpop.f32.mrf.mxu3  ;;  %v10320_v14 = vld [vmem:[%s16315_s1 + $0x26c] sm:$0xf]  ;;  %v8266_v54 = vld [vmem:[%s16315_s1 + $0x298] sm:$0xf0] }
 0x3aa   : > { %v3179_v32 = vpop.f32.mrf.mxu2  ;;  %v3083_v47 = vpop.f32.mrf.mxu0 }
 0x3ab   : > { %16468 = vst [vmem:[#allocation63_spill] sm:$0xff] %v13395_v29  ;;  %v3180_v45 = vadd.f32 %v3179_v32, %v3131_v33  ;;  %v3084_v28 = vadd.f32 %v3083_v47, %v13120_v61  ;;  %v3132_v22 = vpop.f32.mrf.mxu1  ;;  %v3995_v33 = vmax.f32 %v3082_v59, 0.0  ;;  %v8269_v61 = vor.u32 %v10320_v14, %v8266_v54  ;;  %v8984_v14 = vld [vmem:[%s16315_s1 + $0x808] sm:$0xf]  ;;  %v10506_v54 = vld [vmem:[%s16315_s1 + $0x834] sm:$0xf0] }
 0x3ac   : > { %v3133_v57 = vadd.f32 %v3132_v22, %v13117_v48  ;;  %v10404_v48 = vld [vmem:[%s16315_s1 + $0x50c] sm:$0xf]  ;;  %v8602_v22 = vld [vmem:[%s16315_s1 + $0x538] sm:$0xf0] }
 0x3ad   : > { %v3229_v3 = vadd.f32 %v3228_v5, %v3180_v45  ;;  %v4007_v18 = vmax.f32 %v3084_v28, 0.0  ;;  %3675 = vmatpush.bf16.msra.mxu1 %v8269_v61 }
 0x3af   : > { %v13412_v7 = vpack.c.bf16 %v4007_v18, %v3995_v33  ;;  %v3996_v59 = vmax.f32 %v3229_v3, 0.0  ;;  %v8605_v3 = vor.u32 %v10404_v48, %v8602_v22  ;;  %v10500_v33 = vld [vmem:[%s16315_s1 + $0x80c] sm:$0xf]  ;;  %v8986_v18 = vld [vmem:[%s16315_s1 + $0x838] sm:$0xf0] }
 0x3b0   : > { %v10308_v48 = vld [vmem:[%s16315_s1 + $0x20c] sm:$0xf] }
 0x3b1   : > { %16469 = vst [vmem:[#allocation64_spill] sm:$0xff] %v13412_v7  ;;  %v3230_v32 = vpop.f32.mrf.mxu3  ;;  %3725 = vmatpush.bf16.msra.mxu2 %v8605_v3  ;;  %v8122_v7 = vld [vmem:[%s16315_s1 + $0x178] sm:$0xf0] }
 0x3b2   : > { %v3181_v35 = vpop.f32.mrf.mxu2  ;;  %v3242_v31 = vpop.f32.mrf.mxu0 }
 0x3b3   : > { %v3182_v9 = vadd.f32 %v3181_v35, %v3133_v57  ;;  %v3243_v4 = vadd.f32 %v3242_v31, %v13410_v30  ;;  %v3291_v45 = vpop.f32.mrf.mxu1  ;;  %v8985_v35 = vor.u32 %v10506_v54, %v8984_v14 }
 0x3b5   : > { %v3231_v5 = vadd.f32 %v3230_v32, %v3182_v9  ;;  %v3292_v47 = vadd.f32 %v3291_v45, %v3243_v4  ;;  %3437 = vmatmul.bf16.vlgmr.msrb.gmra.mxu0 %v11248_v51  ;;  %v8989_v9 = vor.u32 %v10500_v33, %v8986_v18 }
 0x3b6   : > { %3486 = vmatmul.bf16.vlgmr.msrb.gmra.mxu1 %v11250_v52  ;;  %3584 = vmatmul.bf16.vlgmr.msrb.gmra.mxu3 %v11248_v51 }
 0x3b7   : > { %v4008_v28 = vmax.f32 %v3231_v5, 0.0  ;;  %3535 = vmatmul.bf16.vlgmr.msrb.gmra.mxu2 %v11243_v46  ;;  %3627 = vmatpush.bf16.msra.mxu0 %v8985_v35 }
 0x3b8   : > { %3774 = vmatpush.bf16.msra.mxu3 %v8989_v9 }
 0x3b9   : > { %v13438_v61 = vpack.c.bf16 %v4008_v28, %v3996_v59  ;;  %v13440_v31 = vpop.f32.mrf.mxu3  ;;  %v8218_v59 = vld [vmem:[%s16315_s1 + $0x238] sm:$0xf0] }
 0x3ba   : > { %v3340_v57 = vpop.f32.mrf.mxu2  ;;  %v3244_v4 = vpop.f32.mrf.mxu0  ;;  %v8221_v22 = vor.u32 %v10308_v48, %v8218_v59  ;;  %v10494_v59 = vld [vmem:[%s16315_s1 + $0x7d4] sm:$0xf0] }
 0x3bb   : > { %16470 = vst [vmem:[#allocation65_spill] sm:$0xff] %v13438_v61  ;;  %v3341_v32 = vadd.f32 %v3340_v57, %v3292_v47  ;;  %v3245_v45 = vadd.f32 %v3244_v4, %v13410_v30  ;;  %v3293_v5 = vpop.f32.mrf.mxu1 }
 0x3bc   : > { %3676 = vmatpush.bf16.msra.mxu1 %v8221_v22  ;;  %v8938_v22 = vld [vmem:[%s16315_s1 + $0x7d8] sm:$0xf0] }
 0x3bd   : > { %v3294_v28 = vadd.f32 %v3293_v5, %v3245_v45  ;;  %v3829_v57 = vmax.f32 %v3341_v32, 0.0  ;;  %v10392_v45 = vld [vmem:[%s16315_s1 + $0x4ac] sm:$0xf]  ;;  %v8554_v32 = vld [vmem:[%s16315_s1 + $0x4d8] sm:$0xf0] }
 0x3be   : > { %v8936_v5 = vld [vmem:[%s16315_s1 + $0x7a8] sm:$0xf]  ;;  %v8557_v48 = vor.u32 %v10392_v45, %v8554_v32  ;;  %v10296_v32 = vld [vmem:[%s16315_s1 + $0x1ac] sm:$0xf] }
 0x3c0   : > { %3726 = vmatpush.bf16.msra.mxu2 %v8557_v48 }
 0x3c1   : > { %v13449_v54 = vpop.f32.mrf.mxu3 }
 0x3c2   : > { %v3342_v47 = vpop.f32.mrf.mxu2  ;;  %v3247_v3 = vpop.f32.mrf.mxu0 }
 0x3c3   : > { %v3343_v14 = vadd.f32 %v3342_v47, %v3294_v28  ;;  %v3248_v33 = vadd.f32 %v3247_v3, %v13410_v30  ;;  %v3296_v18 = vpop.f32.mrf.mxu1  ;;  %v10488_v28 = vld [vmem:[%s16315_s1 + $0x7ac] sm:$0xf] }
 0x3c4   : > { %v8941_v3 = vor.u32 %v10488_v28, %v8938_v22 }
 0x3c5   : > { %v3841_v35 = vmax.f32 %v3343_v14, 0.0  ;;  %v3297_v9 = vadd.f32 %v3296_v18, %v3248_v33  ;;  %3442 = vmatmul.bf16.gmra.mxu0 %v11306_v20  ;;  %v8937_v14 = vor.u32 %v10494_v59, %v8936_v5 }
 0x3c6   : > { %3491 = vmatmul.bf16.gmra.mxu1 %v11308_v21  ;;  %3589 = vmatmul.bf16.gmra.mxu3 %v11306_v20 }
 0x3c7   : > { %v13453_v4 = vpack.c.bf16 %v3841_v35, %v3829_v57  ;;  %3540 = vmatmul.bf16.gmra.mxu2 %v11304_v19  ;;  %3628 = vmatpush.bf16.msra.mxu0 %v8937_v14 }
 0x3c8   : > { %3775 = vmatpush.bf16.msra.mxu3 %v8941_v3 }
 0x3c9   : > { %16471 = vst [vmem:[#allocation66_spill] sm:$0xff] %v13453_v4  ;;  %v13476_v18 = vpop.f32.mrf.mxu3  ;;  %v8170_v4 = vld [vmem:[%s16315_s1 + $0x1d8] sm:$0xf0] }
 0x3ca   : > { %v3345_v47 = vpop.f32.mrf.mxu2  ;;  %v3249_v57 = vpop.f32.mrf.mxu0  ;;  %v8173_v59 = vor.u32 %v10296_v32, %v8170_v4  ;;  %v10380_v4 = vld [vmem:[%s16315_s1 + $0x44c] sm:$0xf] }
 0x3cb   : > { %v3346_v33 = vadd.f32 %v3345_v47, %v3297_v9  ;;  %v3250_v35 = vadd.f32 %v3249_v57, %v13410_v30  ;;  %v3298_v45 = vpop.f32.mrf.mxu1 }
 0x3cc   : > { %3677 = vmatpush.bf16.msra.mxu1 %v8173_v59  ;;  %v10476_v59 = vld [vmem:[%s16315_s1 + $0x74c] sm:$0xf] }
 0x3cd   : > { %v3299_v5 = vadd.f32 %v3298_v45, %v3250_v35  ;;  %v3853_v3 = vmax.f32 %v3346_v33, 0.0  ;;  %v8506_v33 = vld [vmem:[%s16315_s1 + $0x478] sm:$0xf0]  ;;  %v8888_v45 = vld [vmem:[%s16315_s1 + $0x748] sm:$0xf] }
 0x3ce   : > { %v8509_v32 = vor.u32 %v10380_v4, %v8506_v33 }
 0x3d0   : > { %3727 = vmatpush.bf16.msra.mxu2 %v8509_v32 }
 0x3d1   : > { %v13485_v22 = vpop.f32.mrf.mxu3 }
 0x3d2   : > { %v3347_v9 = vpop.f32.mrf.mxu2  ;;  %v3252_v48 = vpop.f32.mrf.mxu0 }
 0x3d3   : > { %v3348_v28 = vadd.f32 %v3347_v9, %v3299_v5  ;;  %v3253_v47 = vadd.f32 %v3252_v48, %v13410_v30  ;;  %v3301_v14 = vpop.f32.mrf.mxu1  ;;  %v10482_v5 = vld [vmem:[%s16315_s1 + $0x774] sm:$0xf0]  ;;  %v8890_v9 = vld [vmem:[%s16315_s1 + $0x778] sm:$0xf0] }
 0x3d4   : > { %v8889_v48 = vor.u32 %v10482_v5, %v8888_v45 }
 0x3d5   : > { %v3865_v57 = vmax.f32 %v3348_v28, 0.0  ;;  %v3302_v61 = vadd.f32 %v3301_v14, %v3253_v47  ;;  %3447 = vmatmul.bf16.gmra.mxu0 %v11346_v41  ;;  %v8893_v47 = vor.u32 %v10476_v59, %v8890_v9 }
 0x3d6   : > { %3496 = vmatmul.bf16.gmra.mxu1 %v11348_v42  ;;  %3594 = vmatmul.bf16.gmra.mxu3 %v11346_v41 }
 0x3d7   : > { %3545 = vmatmul.bf16.gmra.mxu2 %v11344_v40  ;;  %v13491_v35 = vpack.c.bf16 %v3865_v57, %v3853_v3  ;;  %3629 = vmatpush.bf16.msra.mxu0 %v8889_v48 }
 0x3d8   : > { %3776 = vmatpush.bf16.msra.mxu3 %v8893_v47 }
 0x3d9   : > { %16472 = vst [vmem:[#allocation67_spill] sm:$0xff] %v13491_v35  ;;  %v13512_v3 = vpop.f32.mrf.mxu3  ;;  %v10284_v35 = vld [vmem:[%s16315_s1 + $0x14c] sm:$0xf] }
 0x3da   : > { %v3350_v28 = vpop.f32.mrf.mxu2  ;;  %v3254_v57 = vpop.f32.mrf.mxu0  ;;  %v8125_v5 = vor.u32 %v10284_v35, %v8122_v7  ;;  %v10368_v7 = vld [vmem:[%s16315_s1 + $0x3ec] sm:$0xf]  ;;  %v8458_v35 = vld [vmem:[%s16315_s1 + $0x418] sm:$0xf0] }
 0x3db   : > { %v3351_v14 = vadd.f32 %v3350_v28, %v3302_v61  ;;  %v3255_v4 = vadd.f32 %v3254_v57, %v13410_v30  ;;  %v3303_v33 = vpop.f32.mrf.mxu1 }
 0x3dc   : > { %3678 = vmatpush.bf16.msra.mxu1 %v8125_v5  ;;  %v10464_v5 = vld [vmem:[%s16315_s1 + $0x6ec] sm:$0xf] }
 0x3dd   : > { %v3304_v45 = vadd.f32 %v3303_v33, %v3255_v4  ;;  %v3877_v47 = vmax.f32 %v3351_v14, 0.0  ;;  %v8840_v14 = vld [vmem:[%s16315_s1 + $0x6e8] sm:$0xf]  ;;  %v8461_v33 = vor.u32 %v10368_v7, %v8458_v35 }
 0x3df   : > { %3728 = vmatpush.bf16.msra.mxu2 %v8461_v33 }
 0x3e1   : > { %v13521_v9 = vpop.f32.mrf.mxu3 }
 0x3e2   : > { %v3352_v61 = vpop.f32.mrf.mxu2  ;;  %v3257_v32 = vpop.f32.mrf.mxu0 }
 0x3e3   : > { %v3353_v59 = vadd.f32 %v3352_v61, %v3304_v45  ;;  %v3258_v28 = vadd.f32 %v3257_v32, %v13410_v30  ;;  %v3306_v48 = vpop.f32.mrf.mxu1  ;;  %v10470_v45 = vld [vmem:[%s16315_s1 + $0x714] sm:$0xf0]  ;;  %v8842_v61 = vld [vmem:[%s16315_s1 + $0x718] sm:$0xf0] }
 0x3e4   : > { %v8841_v32 = vor.u32 %v10470_v45, %v8840_v14 }
 0x3e5   : > { %v3889_v57 = vmax.f32 %v3353_v59, 0.0  ;;  %v3307_v29 = vadd.f32 %v3306_v48, %v3258_v28  ;;  %3452 = vmatmul.bf16.gmra.mxu0 %v11386_v1  ;;  %v8845_v28 = vor.u32 %v10464_v5, %v8842_v61 }
 0x3e6   : > { %3501 = vmatmul.bf16.gmra.mxu1 %v11388_v2  ;;  %3599 = vmatmul.bf16.gmra.mxu3 %v11386_v1 }
 0x3e7   : > { %3550 = vmatmul.bf16.gmra.mxu2 %v11384_v0  ;;  %v13527_v4 = vpack.c.bf16 %v3889_v57, %v3877_v47  ;;  %3630 = vmatpush.bf16.msra.mxu0 %v8841_v32 }
 0x3e8   : > { %3777 = vmatpush.bf16.msra.mxu3 %v8845_v28 }
 0x3e9   : > { %16473 = vst [vmem:[#allocation68_spill] sm:$0xff] %v13527_v4  ;;  %v13548_v47 = vpop.f32.mrf.mxu3  ;;  %v10272_v4 = vld [vmem:[%s16315_s1 + $0xec] sm:$0xf] }
 0x3ea   : > { %v3355_v59 = vpop.f32.mrf.mxu2  ;;  %v3259_v57 = vpop.f32.mrf.mxu0  ;;  %v8077_v45 = vor.u32 %v10272_v4, %v8074_v60  ;;  %v10356_v60 = vld [vmem:[%s16315_s1 + $0x38c] sm:$0xf]  ;;  %v8410_v4 = vld [vmem:[%s16315_s1 + $0x3b8] sm:$0xf0] }
 0x3eb   : > { %v3356_v48 = vadd.f32 %v3355_v59, %v3307_v29  ;;  %v3260_v7 = vadd.f32 %v3259_v57, %v13410_v30  ;;  %v3308_v35 = vpop.f32.mrf.mxu1 }
 0x3ec   : > { %3679 = vmatpush.bf16.msra.mxu1 %v8077_v45  ;;  %v10452_v45 = vld [vmem:[%s16315_s1 + $0x68c] sm:$0xf] }
 0x3ed   : > { %v3309_v14 = vadd.f32 %v3308_v35, %v3260_v7  ;;  %v3901_v28 = vmax.f32 %v3356_v48, 0.0  ;;  %v8792_v48 = vld [vmem:[%s16315_s1 + $0x688] sm:$0xf]  ;;  %v8413_v35 = vor.u32 %v10356_v60, %v8410_v4 }
 0x3ef   : > { %3729 = vmatpush.bf16.msra.mxu2 %v8413_v35 }
 0x3f1   : > { %v13557_v61 = vpop.f32.mrf.mxu3 }
 0x3f2   : > { %v3357_v29 = vpop.f32.mrf.mxu2  ;;  %v3262_v33 = vpop.f32.mrf.mxu0 }
 0x3f3   : > { %v3358_v5 = vadd.f32 %v3357_v29, %v3309_v14  ;;  %v3263_v59 = vadd.f32 %v3262_v33, %v13410_v30  ;;  %v3311_v32 = vpop.f32.mrf.mxu1  ;;  %v10458_v14 = vld [vmem:[%s16315_s1 + $0x6b4] sm:$0xf0]  ;;  %v8794_v29 = vld [vmem:[%s16315_s1 + $0x6b8] sm:$0xf0] }
 0x3f4   : > { %v8793_v33 = vor.u32 %v10458_v14, %v8792_v48 }
 0x3f5   : > { %v3913_v57 = vmax.f32 %v3358_v5, 0.0  ;;  %v3312_v37 = vadd.f32 %v3311_v32, %v3263_v59  ;;  %3457 = vmatmul.bf16.gmra.mxu0 %v11426_v25  ;;  %v8797_v59 = vor.u32 %v10452_v45, %v8794_v29 }
 0x3f6   : > { %3506 = vmatmul.bf16.gmra.mxu1 %v11428_v26  ;;  %3604 = vmatmul.bf16.gmra.mxu3 %v11426_v25 }
 0x3f7   : > { %3555 = vmatmul.bf16.gmra.mxu2 %v11424_v24  ;;  %v13563_v7 = vpack.c.bf16 %v3913_v57, %v3901_v28  ;;  %3631 = vmatpush.bf16.msra.mxu0 %v8793_v33 }
 0x3f8   : > { %3778 = vmatpush.bf16.msra.mxu3 %v8797_v59 }
 0x3f9   : > { %16474 = vst [vmem:[#allocation69_spill] sm:$0xff] %v13563_v7  ;;  %v13584_v28 = vpop.f32.mrf.mxu3  ;;  %v10260_v7 = vld [vmem:[%s16315_s1 + $0x8c] sm:$0xf] }
 0x3fa   : > { %v3360_v5 = vpop.f32.mrf.mxu2  ;;  %v3264_v57 = vpop.f32.mrf.mxu0  ;;  %v8029_v14 = vor.u32 %v10260_v7, %v8026_v8  ;;  %v10344_v8 = vld [vmem:[%s16315_s1 + $0x32c] sm:$0xf]  ;;  %v8362_v7 = vld [vmem:[%s16315_s1 + $0x358] sm:$0xf0] }
 0x3fb   : > { %v3361_v32 = vadd.f32 %v3360_v5, %v3312_v37  ;;  %v3265_v60 = vadd.f32 %v3264_v57, %v13410_v30  ;;  %v3313_v4 = vpop.f32.mrf.mxu1 }
 0x3fc   : > { %3680 = vmatpush.bf16.msra.mxu1 %v8029_v14  ;;  %v10440_v14 = vld [vmem:[%s16315_s1 + $0x62c] sm:$0xf] }
 0x3fd   : > { %v3314_v48 = vadd.f32 %v3313_v4, %v3265_v60  ;;  %v3925_v59 = vmax.f32 %v3361_v32, 0.0  ;;  %v8744_v32 = vld [vmem:[%s16315_s1 + $0x628] sm:$0xf]  ;;  %v8365_v4 = vor.u32 %v10344_v8, %v8362_v7 }
 0x3ff   : > { %3730 = vmatpush.bf16.msra.mxu2 %v8365_v4 }
 0x401   : > { %v13593_v29 = vpop.f32.mrf.mxu3 }
 0x402   : > { %v3362_v37 = vpop.f32.mrf.mxu2  ;;  %v3267_v35 = vpop.f32.mrf.mxu0 }
 0x403   : > { %v3363_v45 = vadd.f32 %v3362_v37, %v3314_v48  ;;  %v3268_v5 = vadd.f32 %v3267_v35, %v13410_v30  ;;  %v3316_v33 = vpop.f32.mrf.mxu1  ;;  %v10446_v48 = vld [vmem:[%s16315_s1 + $0x654] sm:$0xf0]  ;;  %v8746_v37 = vld [vmem:[%s16315_s1 + $0x658] sm:$0xf0] }
 0x404   : > { %v8745_v35 = vor.u32 %v10446_v48, %v8744_v32 }
 0x405   : > { %v3937_v57 = vmax.f32 %v3363_v45, 0.0  ;;  %v3317_v6 = vadd.f32 %v3316_v33, %v3268_v5  ;;  %3462 = vmatmul.bf16.gmra.mxu0 %v11466_v50  ;;  %v8749_v5 = vor.u32 %v10440_v14, %v8746_v37 }
 0x406   : > { %3511 = vmatmul.bf16.gmra.mxu1 %v11468_v53  ;;  %3609 = vmatmul.bf16.gmra.mxu3 %v11466_v50 }
 0x407   : > { %3560 = vmatmul.bf16.gmra.mxu2 %v11464_v49  ;;  %v13599_v60 = vpack.c.bf16 %v3937_v57, %v3925_v59  ;;  %3632 = vmatpush.bf16.msra.mxu0 %v8745_v35 }
 0x408   : > { %3779 = vmatpush.bf16.msra.mxu3 %v8749_v5 }
 0x409   : > { %16475 = vst [vmem:[#allocation70_spill] sm:$0xff] %v13599_v60  ;;  %v13620_v59 = vpop.f32.mrf.mxu3  ;;  %v10248_v60 = vld [vmem:[%s16315_s1 + $0x2c] sm:$0xf] }
 0x40a   : > { %v3365_v45 = vpop.f32.mrf.mxu2  ;;  %v3269_v57 = vpop.f32.mrf.mxu0  ;;  %v7981_v48 = vor.u32 %v10248_v60, %v7978_v44  ;;  %v9364_v44 = vld [vmem:[%s16317_s3 + $0x228] sm:$0xf]  ;;  %v10601_v60 = vld [vmem:[%s16317_s3 + $0x230] sm:$0xf0] }
 0x40b   : > { %v3366_v33 = vadd.f32 %v3365_v45, %v3317_v6  ;;  %v3270_v8 = vadd.f32 %v3269_v57, %v13410_v30  ;;  %v3318_v7 = vpop.f32.mrf.mxu1 }
 0x40c   : > { %3681 = vmatpush.bf16.msra.mxu1 %v7981_v48  ;;  %v9460_v48 = vld [vmem:[%s16317_s3 + $0x2e8] sm:$0xf] }
 0x40d   : > { %v3319_v32 = vadd.f32 %v3318_v7, %v3270_v8  ;;  %v3949_v5 = vmax.f32 %v3366_v33, 0.0  ;;  %v9172_v33 = vld [vmem:[%s16317_s3 + $0xa8] sm:$0xf]  ;;  %v9365_v7 = vor.u32 %v10601_v60, %v9364_v44 }
 0x40f   : > { %6135 = vmatpush.bf16.msrb.mxu2 %v9365_v7 }
 0x411   : > { %v13629_v37 = vpop.f32.mrf.mxu3 }
 0x412   : > { %v3367_v6 = vpop.f32.mrf.mxu2  ;;  %v3272_v4 = vpop.f32.mrf.mxu0 }
 0x413   : > { %v3368_v14 = vadd.f32 %v3367_v6, %v3319_v32  ;;  %v3273_v45 = vadd.f32 %v3272_v4, %v13410_v30  ;;  %v3321_v35 = vpop.f32.mrf.mxu1  ;;  %v10553_v32 = vld [vmem:[%s16317_s3 + $0xb0] sm:$0xf0] }
 0x414   : > { %v10625_v6 = vld [vmem:[%s16317_s3 + $0x2f0] sm:$0xf0]  ;;  %v9173_v4 = vor.u32 %v10553_v32, %v9172_v33 }
 0x415   : > { %v3961_v57 = vmax.f32 %v3368_v14, 0.0  ;;  %v3322_v16 = vadd.f32 %v3321_v35, %v3273_v45  ;;  %3467 = vmatmul.bf16.gmra.mxu0 %v11506_v12  ;;  %v9461_v45 = vor.u32 %v10625_v6, %v9460_v48 }
 0x416   : > { %3516 = vmatmul.bf16.gmra.mxu1 %v11508_v13  ;;  %3614 = vmatmul.bf16.gmra.mxu3 %v11506_v12 }
 0x417   : > { %3565 = vmatmul.bf16.gmra.mxu2 %v11504_v11  ;;  %v13635_v8 = vpack.c.bf16 %v3961_v57, %v3949_v5  ;;  %6037 = vmatpush.bf16.msrb.mxu0 %v9173_v4 }
 0x418   : > { %6184 = vmatpush.bf16.msrb.mxu3 %v9461_v45 }
 0x419   : > { %16476 = vst [vmem:[#allocation71_spill] sm:$0xff] %v13635_v8  ;;  %v13656_v5 = vpop.f32.mrf.mxu3  ;;  %v9268_v8 = vld [vmem:[%s16317_s3 + $0x168] sm:$0xf] }
 0x41a   : > { %v3370_v14 = vpop.f32.mrf.mxu2  ;;  %v3274_v57 = vpop.f32.mrf.mxu0  ;;  %v9269_v32 = vor.u32 %v10577_v63, %v9268_v8  ;;  %v9352_v63 = vld [vmem:[%s16317_s3 + $0x210] sm:$0xf]  ;;  %v10598_v8 = vld [vmem:[%s16317_s3 + $0x218] sm:$0xf0] }
 0x41b   : > { %v3371_v35 = vadd.f32 %v3370_v14, %v3322_v16  ;;  %v3275_v44 = vadd.f32 %v3274_v57, %v13410_v30  ;;  %v3323_v60 = vpop.f32.mrf.mxu1 }
 0x41c   : > { %6086 = vmatpush.bf16.msrb.mxu1 %v9269_v32  ;;  %v9448_v32 = vld [vmem:[%s16317_s3 + $0x2d0] sm:$0xf] }
 0x41d   : > { %v3324_v33 = vadd.f32 %v3323_v60, %v3275_v44  ;;  %v3973_v45 = vmax.f32 %v3371_v35, 0.0  ;;  %v9160_v35 = vld [vmem:[%s16317_s3 + $0x90] sm:$0xf]  ;;  %v9353_v60 = vor.u32 %v10598_v8, %v9352_v63 }
 0x41f   : > { %6136 = vmatpush.bf16.msrb.mxu2 %v9353_v60 }
 0x421   : > { %v13665_v6 = vpop.f32.mrf.mxu3 }
 0x422   : > { %v3372_v16 = vpop.f32.mrf.mxu2  ;;  %v3277_v7 = vpop.f32.mrf.mxu0 }
 0x423   : > { %v3373_v48 = vadd.f32 %v3372_v16, %v3324_v33  ;;  %v3278_v14 = vadd.f32 %v3277_v7, %v13410_v30  ;;  %v3326_v4 = vpop.f32.mrf.mxu1  ;;  %v10550_v33 = vld [vmem:[%s16317_s3 + $0x98] sm:$0xf0] }
 0x424   : > { %v10622_v16 = vld [vmem:[%s16317_s3 + $0x2d8] sm:$0xf0]  ;;  %v9161_v7 = vor.u32 %v10550_v33, %v9160_v35  ;;  %v13702_v35 = vperm.slane %v13401_v58, 1 }
 0x425   : > { %v3985_v57 = vmax.f32 %v3373_v48, 0.0  ;;  %v3327_v62 = vadd.f32 %v3326_v4, %v3278_v14  ;;  %3472 = vmatmul.bf16.gmra.mxu0 %v11546_v39  ;;  %v9449_v14 = vor.u32 %v10622_v16, %v9448_v32 }
 0x426   : > { %3521 = vmatmul.bf16.gmra.mxu1 %v11548_v43  ;;  %3619 = vmatmul.bf16.gmra.mxu3 %v11546_v39 }
 0x427   : > { %3570 = vmatmul.bf16.gmra.mxu2 %v11544_v38  ;;  %v13671_v44 = vpack.c.bf16 %v3985_v57, %v3973_v45  ;;  %6038 = vmatpush.bf16.msrb.mxu0 %v9161_v7 }
 0x428   : > { %6185 = vmatpush.bf16.msrb.mxu3 %v9449_v14 }
 0x429   : > { %16477 = vst [vmem:[#allocation72_spill] sm:$0xff] %v13671_v44  ;;  %v13692_v45 = vpop.f32.mrf.mxu3  ;;  %v9256_v44 = vld [vmem:[%s16317_s3 + $0x150] sm:$0xf] }
 0x42a   : > { %v3375_v48 = vpop.f32.mrf.mxu2  ;;  %v3279_v57 = vpop.f32.mrf.mxu0  ;;  %v9257_v33 = vor.u32 %v10574_v17, %v9256_v44  ;;  %v13712_v17 = vperm.slane %v13401_v58, 2  ;;  %v9340_v44 = vld [vmem:[%s16317_s3 + $0x1f8] sm:$0xf] }
 0x42b   : > { %v3376_v4 = vadd.f32 %v3375_v48, %v3327_v62  ;;  %v3280_v63 = vadd.f32 %v3279_v57, %v13410_v30  ;;  %v3328_v8 = vpop.f32.mrf.mxu1  ;;  %v3390_v30 = vadd.f32 %v13440_v31, %v13702_v35 }
 0x42c   : > { %6087 = vmatpush.bf16.msrb.mxu1 %v9257_v33 }
 0x42d   : > { %v3329_v62 = vadd.f32 %v3328_v8, %v3280_v63  ;;  %v3997_v57 = vmax.f32 %v3376_v4, 0.0  ;;  %v10595_v4 = vld [vmem:[%s16317_s3 + $0x200] sm:$0xf0] }
 0x42e   : > { %v9341_v63 = vor.u32 %v10595_v4, %v9340_v44 }
 0x430   : > { %6137 = vmatpush.bf16.msrb.mxu2 %v9341_v63  ;;  %v3395_v63 = vadd.f32 %v13476_v18, %v13702_v35  ;;  %v10592_v18 = vld [vmem:[%s16317_s3 + $0x1e8] sm:$0xf0] }
 0x431   : > { %v13706_v16 = vpop.f32.mrf.mxu3 }
 0x432   : > { %v3377_v60 = vpop.f32.mrf.mxu2  ;;  %v3438_v48 = vpop.f32.mrf.mxu0 }
 0x433   : > { %v3378_v32 = vadd.f32 %v3377_v60, %v3329_v62  ;;  %v3439_v7 = vadd.f32 %v3438_v48, %v3390_v30  ;;  %v3487_v14 = vpop.f32.mrf.mxu1  ;;  %v10619_v62 = vld [vmem:[%s16317_s3 + $0x2c0] sm:$0xf0] }
 0x435   : > { %v4009_v15 = vmax.f32 %v3378_v32, 0.0  ;;  %v3488_v27 = vadd.f32 %v3487_v14, %v3439_v7  ;;  %3633 = vmatmul.bf16.vlgmr.msra.gmra.mxu0 %v11250_v52 }
 0x436   : > { %3682 = vmatmul.bf16.vlgmr.msra.gmra.mxu1 %v11243_v46  ;;  %3780 = vmatmul.bf16.vlgmr.msra.gmra.mxu3 %v11250_v52  ;;  %v9148_v46 = vld [vmem:[%s16317_s3 + $0x78] sm:$0xf] }
 0x437   : > { %3731 = vmatmul.bf16.vlgmr.msra.gmra.mxu2 %v11248_v51  ;;  %v13714_v31 = vpack.c.bf16 %v4009_v15, %v3997_v57  ;;  %v10547_v51 = vld [vmem:[%s16317_s3 + $0x80] sm:$0xf0]  ;;  %v9436_v52 = vld [vmem:[%s16317_s3 + $0x2b8] sm:$0xf]  ;;  %v3392_v15 = vadd.f32 %v13449_v54, %v13702_v35 }
 0x438   : > { %v9149_v8 = vor.u32 %v10547_v51, %v9148_v46  ;;  %v9437_v32 = vor.u32 %v10619_v62, %v9436_v52  ;;  %v9244_v54 = vld [vmem:[%s16317_s3 + $0x138] sm:$0xf]  ;;  %v10571_v57 = vld [vmem:[%s16317_s3 + $0x140] sm:$0xf0]  ;;  %v3830_v46 = vmax.f32 %v3488_v27, 0.0 }
 0x439   : > { %v3585_v30 = vpop.f32.mrf.mxu3  ;;  %v9245_v4 = vor.u32 %v10571_v57, %v9244_v54  ;;  %v9328_v27 = vld [vmem:[%s16317_s3 + $0x1e0] sm:$0xf] }
 0x43a   : > { %v3536_v58 = vpop.f32.mrf.mxu2  ;;  %v3440_v60 = vpop.f32.mrf.mxu0  ;;  %6039 = vmatpush.bf16.msrb.mxu0 %v9149_v8  ;;  %6186 = vmatpush.bf16.msrb.mxu3 %v9437_v32 }
 0x43b   : > { %v3537_v33 = vadd.f32 %v3536_v58, %v13712_v17  ;;  %v3441_v48 = vadd.f32 %v3440_v60, %v3392_v15  ;;  %v3489_v7 = vpop.f32.mrf.mxu1  ;;  %6088 = vmatpush.bf16.msrb.mxu1 %v9245_v4 }
 0x43d   : > { %v13738_v14 = vadd.f32 %v3585_v30, %v3537_v33  ;;  %v3490_v44 = vadd.f32 %v3489_v7, %v3441_v48  ;;  %v9329_v48 = vor.u32 %v10592_v18, %v9328_v27  ;;  %v9136_v7 = vld [vmem:[%s16317_s3 + $0x60] sm:$0xf] }
 0x43f   : > { %v3842_v51 = vmax.f32 %v3490_v44, 0.0  ;;  %v10616_v44 = vld [vmem:[%s16317_s3 + $0x2a8] sm:$0xf0]  ;;  %6138 = vmatpush.bf16.msrb.mxu2 %v9329_v48  ;;  %v3400_v48 = vadd.f32 %v13512_v3, %v13702_v35  ;;  %v9316_v3 = vld [vmem:[%s16317_s3 + $0x1c8] sm:$0xf] }
 0x441   : > { %v13748_v52 = vpack.c.bf16 %v3842_v51, %v3830_v46  ;;  %v3587_v8 = vpop.f32.mrf.mxu3 }
 0x442   : > { %v3538_v15 = vpop.f32.mrf.mxu2  ;;  %v3443_v62 = vpop.f32.mrf.mxu0 }
 0x443   : > { %v3539_v58 = vadd.f32 %v3538_v15, %v13712_v17  ;;  %v3444_v33 = vadd.f32 %v3443_v62, %v3395_v63  ;;  %v3492_v30 = vpop.f32.mrf.mxu1  ;;  %v10568_v62 = vld [vmem:[%s16317_s3 + $0x128] sm:$0xf0] }
 0x445   : > { %v13751_v60 = vadd.f32 %v3587_v8, %v3539_v58  ;;  %v3493_v32 = vadd.f32 %v3492_v30, %v3444_v33  ;;  %3638 = vmatmul.bf16.gmra.mxu0 %v11308_v21 }
 0x446   : > { %3687 = vmatmul.bf16.gmra.mxu1 %v11304_v19  ;;  %3785 = vmatmul.bf16.gmra.mxu3 %v11308_v21  ;;  %v10544_v19 = vld [vmem:[%s16317_s3 + $0x68] sm:$0xf0]  ;;  %v3397_v21 = vadd.f32 %v13485_v22, %v13702_v35  ;;  %v9232_v22 = vld [vmem:[%s16317_s3 + $0x120] sm:$0xf] }
 0x447   : > { %3736 = vmatmul.bf16.gmra.mxu2 %v11306_v20  ;;  %v9424_v20 = vld [vmem:[%s16317_s3 + $0x2a0] sm:$0xf]  ;;  %v9137_v57 = vor.u32 %v10544_v19, %v9136_v7  ;;  %v9233_v30 = vor.u32 %v10568_v62, %v9232_v22  ;;  %v3854_v27 = vmax.f32 %v3493_v32, 0.0  ;;  %v10589_v32 = vld [vmem:[%s16317_s3 + $0x1d0] sm:$0xf0] }
 0x448   : > { %v9425_v63 = vor.u32 %v10616_v44, %v9424_v20  ;;  %v10613_v22 = vld [vmem:[%s16317_s3 + $0x290] sm:$0xf0] }
 0x449   : > { %v3590_v46 = vpop.f32.mrf.mxu3  ;;  %6040 = vmatpush.bf16.msrb.mxu0 %v9137_v57  ;;  %6089 = vmatpush.bf16.msrb.mxu1 %v9233_v30 }
 0x44a   : > { %v3541_v54 = vpop.f32.mrf.mxu2  ;;  %v3445_v51 = vpop.f32.mrf.mxu0  ;;  %6187 = vmatpush.bf16.msrb.mxu3 %v9425_v63  ;;  %v9124_v63 = vld [vmem:[%s16317_s3 + $0x48] sm:$0xf] }
 0x44b   : > { %v3542_v4 = vadd.f32 %v3541_v54, %v13712_v17  ;;  %v3446_v15 = vadd.f32 %v3445_v51, %v3397_v21  ;;  %v3494_v58 = vpop.f32.mrf.mxu1  ;;  %v9317_v51 = vor.u32 %v10589_v32, %v9316_v3  ;;  %v3405_v3 = vadd.f32 %v13548_v47, %v13702_v35  ;;  %v9304_v47 = vld [vmem:[%s16317_s3 + $0x1b0] sm:$0xf] }
 0x44d   : > { %v13778_v8 = vadd.f32 %v3590_v46, %v3542_v4  ;;  %v3495_v33 = vadd.f32 %v3494_v58, %v3446_v15  ;;  %6139 = vmatpush.bf16.msrb.mxu2 %v9317_v51 }
 0x44f   : > { %v3866_v18 = vmax.f32 %v3495_v33, 0.0 }
 0x451   : > { %v13788_v19 = vpack.c.bf16 %v3866_v18, %v3854_v27  ;;  %v3592_v21 = vpop.f32.mrf.mxu3 }
 0x452   : > { %v3543_v7 = vpop.f32.mrf.mxu2  ;;  %v3448_v54 = vpop.f32.mrf.mxu0 }
 0x453   : > { %v3544_v20 = vadd.f32 %v3543_v7, %v13712_v17  ;;  %v3449_v57 = vadd.f32 %v3448_v54, %v3400_v48  ;;  %v3497_v44 = vpop.f32.mrf.mxu1 }
 0x455   : > { %v13791_v4 = vadd.f32 %v3592_v21, %v3544_v20  ;;  %v3498_v46 = vadd.f32 %v3497_v44, %v3449_v57  ;;  %3643 = vmatmul.bf16.gmra.mxu0 %v11348_v42  ;;  %v10565_v20 = vld [vmem:[%s16317_s3 + $0x110] sm:$0xf0] }
 0x456   : > { %3692 = vmatmul.bf16.gmra.mxu1 %v11344_v40  ;;  %3790 = vmatmul.bf16.gmra.mxu3 %v11348_v42  ;;  %v10541_v40 = vld [vmem:[%s16317_s3 + $0x50] sm:$0xf0]  ;;  %v3402_v42 = vadd.f32 %v13521_v9, %v13702_v35  ;;  %v9220_v9 = vld [vmem:[%s16317_s3 + $0x108] sm:$0xf] }
 0x457   : > { %3741 = vmatmul.bf16.gmra.mxu2 %v11346_v41  ;;  %v9412_v41 = vld [vmem:[%s16317_s3 + $0x288] sm:$0xf]  ;;  %v9125_v58 = vor.u32 %v10541_v40, %v9124_v63  ;;  %v9221_v54 = vor.u32 %v10565_v20, %v9220_v9  ;;  %v3878_v57 = vmax.f32 %v3498_v46, 0.0  ;;  %v10586_v46 = vld [vmem:[%s16317_s3 + $0x1b8] sm:$0xf0] }
 0x458   : > { %v9413_v27 = vor.u32 %v10613_v22, %v9412_v41 }
 0x459   : > { %v3595_v33 = vpop.f32.mrf.mxu3  ;;  %6041 = vmatpush.bf16.msrb.mxu0 %v9125_v58  ;;  %6090 = vmatpush.bf16.msrb.mxu1 %v9221_v54 }
 0x45a   : > { %v3546_v15 = vpop.f32.mrf.mxu2  ;;  %v3450_v30 = vpop.f32.mrf.mxu0  ;;  %6188 = vmatpush.bf16.msrb.mxu3 %v9413_v27 }
 0x45b   : > { %v3547_v62 = vadd.f32 %v3546_v15, %v13712_v17  ;;  %v3451_v18 = vadd.f32 %v3450_v30, %v3402_v42  ;;  %v3499_v48 = vpop.f32.mrf.mxu1 }
 0x45d   : > { %v13818_v7 = vadd.f32 %v3595_v33, %v3547_v62  ;;  %v3500_v21 = vadd.f32 %v3499_v48, %v3451_v18  ;;  %v9305_v62 = vor.u32 %v10586_v46, %v9304_v47  ;;  %v9112_v33 = vld [vmem:[%s16317_s3 + $0x30] sm:$0xf]  ;;  %v10610_v18 = vld [vmem:[%s16317_s3 + $0x278] sm:$0xf0] }
 0x45f   : > { %v3890_v44 = vmax.f32 %v3500_v21, 0.0  ;;  %6140 = vmatpush.bf16.msrb.mxu2 %v9305_v62 }
 0x461   : > { %v13828_v51 = vpack.c.bf16 %v3890_v44, %v3878_v57  ;;  %v3597_v40 = vpop.f32.mrf.mxu3 }
 0x462   : > { %v3548_v32 = vpop.f32.mrf.mxu2  ;;  %v3453_v41 = vpop.f32.mrf.mxu0 }
 0x463   : > { %v3549_v63 = vadd.f32 %v3548_v32, %v13712_v17  ;;  %v3454_v42 = vadd.f32 %v3453_v41, %v3405_v3  ;;  %v3502_v15 = vpop.f32.mrf.mxu1  ;;  %v10562_v3 = vld [vmem:[%s16317_s3 + $0xf8] sm:$0xf0] }
 0x465   : > { %v13831_v58 = vadd.f32 %v3597_v40, %v3549_v63  ;;  %v3503_v22 = vadd.f32 %v3502_v15, %v3454_v42  ;;  %3648 = vmatmul.bf16.gmra.mxu0 %v11388_v2  ;;  %v3410_v42 = vadd.f32 %v13584_v28, %v13702_v35  ;;  %v9292_v28 = vld [vmem:[%s16317_s3 + $0x198] sm:$0xf] }
 0x466   : > { %3697 = vmatmul.bf16.gmra.mxu1 %v11384_v0  ;;  %3795 = vmatmul.bf16.gmra.mxu3 %v11388_v2  ;;  %v10538_v0 = vld [vmem:[%s16317_s3 + $0x38] sm:$0xf0]  ;;  %v3407_v2 = vadd.f32 %v13557_v61, %v13702_v35  ;;  %v9208_v61 = vld [vmem:[%s16317_s3 + $0xf0] sm:$0xf] }
 0x467   : > { %3746 = vmatmul.bf16.gmra.mxu2 %v11386_v1  ;;  %v9400_v1 = vld [vmem:[%s16317_s3 + $0x270] sm:$0xf]  ;;  %v9113_v27 = vor.u32 %v10538_v0, %v9112_v33  ;;  %v9209_v63 = vor.u32 %v10562_v3, %v9208_v61  ;;  %v3902_v40 = vmax.f32 %v3503_v22, 0.0  ;;  %v10583_v22 = vld [vmem:[%s16317_s3 + $0x1a0] sm:$0xf0] }
 0x468   : > { %v9401_v21 = vor.u32 %v10610_v18, %v9400_v1  ;;  %v9100_v18 = vld [vmem:[%s16317_s3 + $0x18] sm:$0xf] }
 0x469   : > { %v3600_v9 = vpop.f32.mrf.mxu3  ;;  %6042 = vmatpush.bf16.msrb.mxu0 %v9113_v27  ;;  %6091 = vmatpush.bf16.msrb.mxu1 %v9209_v63  ;;  %v9293_v27 = vor.u32 %v10583_v22, %v9292_v28 }
 0x46a   : > { %v3551_v30 = vpop.f32.mrf.mxu2  ;;  %v3455_v20 = vpop.f32.mrf.mxu0  ;;  %6189 = vmatpush.bf16.msrb.mxu3 %v9401_v21 }
 0x46b   : > { %v3552_v48 = vadd.f32 %v3551_v30, %v13712_v17  ;;  %v3456_v54 = vadd.f32 %v3455_v20, %v3407_v2  ;;  %v3504_v57 = vpop.f32.mrf.mxu1  ;;  %v10607_v20 = vld [vmem:[%s16317_s3 + $0x260] sm:$0xf0]  ;;  %6141 = vmatpush.bf16.msrb.mxu2 %v9293_v27 }
 0x46d   : > { %v13858_v44 = vadd.f32 %v3600_v9, %v3552_v48  ;;  %v3505_v32 = vadd.f32 %v3504_v57, %v3456_v54 }
 0x46f   : > { %v3914_v41 = vmax.f32 %v3505_v32, 0.0 }
 0x471   : > { %v13868_v47 = vpack.c.bf16 %v3914_v41, %v3902_v40  ;;  %v3602_v62 = vpop.f32.mrf.mxu3  ;;  %v10559_v40 = vld [vmem:[%s16317_s3 + $0xe0] sm:$0xf0] }
 0x472   : > { %v3553_v15 = vpop.f32.mrf.mxu2  ;;  %v3458_v33 = vpop.f32.mrf.mxu0 }
 0x473   : > { %v3554_v46 = vadd.f32 %v3553_v15, %v13712_v17  ;;  %v3459_v0 = vadd.f32 %v3458_v33, %v3410_v42  ;;  %v3507_v1 = vpop.f32.mrf.mxu1 }
 0x475   : > { %v13871_v2 = vadd.f32 %v3602_v62, %v3554_v46  ;;  %v3508_v30 = vadd.f32 %v3507_v1, %v3459_v0  ;;  %3653 = vmatmul.bf16.gmra.mxu0 %v11428_v26  ;;  %v3415_v62 = vadd.f32 %v13620_v59, %v13702_v35  ;;  %v9280_v59 = vld [vmem:[%s16317_s3 + $0x180] sm:$0xf] }
 0x476   : > { %3702 = vmatmul.bf16.gmra.mxu1 %v11424_v24  ;;  %3800 = vmatmul.bf16.gmra.mxu3 %v11428_v26  ;;  %v10535_v24 = vld [vmem:[%s16317_s3 + $0x20] sm:$0xf0]  ;;  %v3412_v26 = vadd.f32 %v13593_v29, %v13702_v35  ;;  %v9196_v29 = vld [vmem:[%s16317_s3 + $0xd8] sm:$0xf] }
 0x477   : > { %3751 = vmatmul.bf16.gmra.mxu2 %v11426_v25  ;;  %v9388_v25 = vld [vmem:[%s16317_s3 + $0x258] sm:$0xf]  ;;  %v9101_v9 = vor.u32 %v10535_v24, %v9100_v18  ;;  %v9197_v42 = vor.u32 %v10559_v40, %v9196_v29  ;;  %v3926_v15 = vmax.f32 %v3508_v30, 0.0  ;;  %v10580_v30 = vld [vmem:[%s16317_s3 + $0x188] sm:$0xf0] }
 0x478   : > { %v9389_v61 = vor.u32 %v10607_v20, %v9388_v25 }
 0x479   : > { %v3605_v54 = vpop.f32.mrf.mxu3  ;;  %6043 = vmatpush.bf16.msrb.mxu0 %v9101_v9  ;;  %6092 = vmatpush.bf16.msrb.mxu1 %v9197_v42 }
 0x47a   : > { %v3556_v48 = vpop.f32.mrf.mxu2  ;;  %v3460_v57 = vpop.f32.mrf.mxu0  ;;  %6190 = vmatpush.bf16.msrb.mxu3 %v9389_v61 }
 0x47b   : > { %v3557_v21 = vadd.f32 %v3556_v48, %v13712_v17  ;;  %v3461_v3 = vadd.f32 %v3460_v57, %v3412_v26  ;;  %v3509_v32 = vpop.f32.mrf.mxu1  ;;  %v9281_v26 = vor.u32 %v10580_v30, %v9280_v59  ;;  %v9088_v48 = vld [vmem:[%s16317_s3] sm:$0xf] }
 0x47d   : > { %v13898_v63 = vadd.f32 %v3605_v54, %v3557_v21  ;;  %v3510_v41 = vadd.f32 %v3509_v32, %v3461_v3  ;;  %v10604_v21 = vld [vmem:[%s16317_s3 + $0x248] sm:$0xf0]  ;;  %6142 = vmatpush.bf16.msrb.mxu2 %v9281_v26 }
 0x47f   : > { %v3938_v46 = vmax.f32 %v3510_v41, 0.0  ;;  %v10556_v41 = vld [vmem:[%s16317_s3 + $0xc8] sm:$0xf0] }
 0x481   : > { %v13908_v0 = vpack.c.bf16 %v3938_v46, %v3926_v15  ;;  %v3607_v28 = vpop.f32.mrf.mxu3 }
 0x482   : > { %v3558_v33 = vpop.f32.mrf.mxu2  ;;  %v3463_v22 = vpop.f32.mrf.mxu0 }
 0x483   : > { %v3559_v1 = vadd.f32 %v3558_v33, %v13712_v17  ;;  %v3464_v27 = vadd.f32 %v3463_v22, %v3415_v62  ;;  %v3512_v18 = vpop.f32.mrf.mxu1  ;;  %v3420_v33 = vadd.f32 %v13656_v5, %v13702_v35  ;;  %v9748_v5 = vld [vmem:[%s16317_s3 + $0x528] sm:$0xf] }
 0x485   : > { %v13911_v24 = vadd.f32 %v3607_v28, %v3559_v1  ;;  %v3513_v25 = vadd.f32 %v3512_v18, %v3464_v27  ;;  %3658 = vmatmul.bf16.gmra.mxu0 %v11468_v53 }
 0x486   : > { %3707 = vmatmul.bf16.gmra.mxu1 %v11464_v49  ;;  %3805 = vmatmul.bf16.gmra.mxu3 %v11468_v53  ;;  %v10532_v49 = vld [vmem:[%s16317_s3 + $0x8] sm:$0xf0]  ;;  %v3417_v53 = vadd.f32 %v13629_v37, %v13702_v35  ;;  %v9184_v37 = vld [vmem:[%s16317_s3 + $0xc0] sm:$0xf] }
 0x487   : > { %3756 = vmatmul.bf16.gmra.mxu2 %v11466_v50  ;;  %v9376_v50 = vld [vmem:[%s16317_s3 + $0x240] sm:$0xf]  ;;  %v9089_v20 = vor.u32 %v10532_v49, %v9088_v48  ;;  %v9185_v15 = vor.u32 %v10556_v41, %v9184_v37  ;;  %v3950_v46 = vmax.f32 %v3513_v25, 0.0  ;;  %v10697_v25 = vld [vmem:[%s16317_s3 + $0x530] sm:$0xf0] }
 0x488   : > { %v9377_v3 = vor.u32 %v10604_v21, %v9376_v50  ;;  %v9749_v49 = vor.u32 %v10697_v25, %v9748_v5  ;;  %v9556_v50 = vld [vmem:[%s16317_s3 + $0x3a8] sm:$0xf]  ;;  %v10673_v41 = vld [vmem:[%s16317_s3 + $0x470] sm:$0xf0] }
 0x489   : > { %v3610_v57 = vpop.f32.mrf.mxu3  ;;  %6044 = vmatpush.bf16.msrb.mxu0 %v9089_v20  ;;  %6093 = vmatpush.bf16.msrb.mxu1 %v9185_v15  ;;  %v10721_v20 = vld [vmem:[%s16317_s3 + $0x5f0] sm:$0xf0] }
 0x48a   : > { %v3561_v9 = vpop.f32.mrf.mxu2  ;;  %v3465_v61 = vpop.f32.mrf.mxu0  ;;  %6191 = vmatpush.bf16.msrb.mxu3 %v9377_v3  ;;  %6331 = vmatpush.bf16.msra.mxu2 %v9749_v49  ;;  %v9544_v49 = vld [vmem:[%s16317_s3 + $0x390] sm:$0xf] }
 0x48b   : > { %v3562_v54 = vadd.f32 %v3561_v9, %v13712_v17  ;;  %v3466_v32 = vadd.f32 %v3465_v61, %v3417_v53  ;;  %v3514_v29 = vpop.f32.mrf.mxu1 }
 0x48d   : > { %v13938_v40 = vadd.f32 %v3610_v57, %v3562_v54  ;;  %v3515_v42 = vadd.f32 %v3514_v29, %v3466_v32 }
 0x48f   : > { %v3962_v62 = vmax.f32 %v3515_v42, 0.0 }
 0x491   : > { %v13948_v28 = vpack.c.bf16 %v3962_v62, %v3950_v46  ;;  %v3612_v27 = vpop.f32.mrf.mxu3  ;;  %v3425_v62 = vadd.f32 %v13692_v45, %v13702_v35  ;;  %v9736_v45 = vld [vmem:[%s16317_s3 + $0x510] sm:$0xf] }
 0x492   : > { %v3563_v1 = vpop.f32.mrf.mxu2  ;;  %v3468_v18 = vpop.f32.mrf.mxu0 }
 0x493   : > { %v3564_v22 = vadd.f32 %v3563_v1, %v13712_v17  ;;  %v3469_v59 = vadd.f32 %v3468_v18, %v3420_v33  ;;  %v3517_v30 = vpop.f32.mrf.mxu1 }
 0x495   : > { %v13951_v26 = vadd.f32 %v3612_v27, %v3564_v22  ;;  %v3518_v48 = vadd.f32 %v3517_v30, %v3469_v59  ;;  %3663 = vmatmul.bf16.gmra.mxu0 %v11508_v13 }
 0x496   : > { %3712 = vmatmul.bf16.gmra.mxu1 %v11504_v11  ;;  %3810 = vmatmul.bf16.gmra.mxu3 %v11508_v13  ;;  %v10649_v11 = vld [vmem:[%s16317_s3 + $0x3b0] sm:$0xf0]  ;;  %v3422_v13 = vadd.f32 %v13665_v6, %v13702_v35  ;;  %v9652_v6 = vld [vmem:[%s16317_s3 + $0x468] sm:$0xf] }
 0x497   : > { %3761 = vmatmul.bf16.gmra.mxu2 %v11506_v12  ;;  %v9844_v12 = vld [vmem:[%s16317_s3 + $0x5e8] sm:$0xf]  ;;  %v9557_v9 = vor.u32 %v10649_v11, %v9556_v50  ;;  %v3974_v42 = vmax.f32 %v3518_v48, 0.0  ;;  %v9653_v46 = vor.u32 %v10673_v41, %v9652_v6  ;;  %v10694_v48 = vld [vmem:[%s16317_s3 + $0x518] sm:$0xf0]  ;;  %v3427_v50 = vadd.f32 %v13706_v16, %v13702_v35 }
 0x498   : > { %v9845_v61 = vor.u32 %v10721_v20, %v9844_v12  ;;  %v9737_v11 = vor.u32 %v10694_v48, %v9736_v45  ;;  %v10718_v12 = vld [vmem:[%s16317_s3 + $0x5d8] sm:$0xf0]  ;;  %v9532_v45 = vld [vmem:[%s16317_s3 + $0x378] sm:$0xf] }
 0x499   : > { %v3615_v54 = vpop.f32.mrf.mxu3  ;;  %6233 = vmatpush.bf16.msra.mxu0 %v9557_v9  ;;  %6282 = vmatpush.bf16.msra.mxu1 %v9653_v46 }
 0x49a   : > { %v3566_v53 = vpop.f32.mrf.mxu2  ;;  %v3470_v57 = vpop.f32.mrf.mxu0  ;;  %6380 = vmatpush.bf16.msra.mxu3 %v9845_v61  ;;  %6332 = vmatpush.bf16.msra.mxu2 %v9737_v11  ;;  %v9640_v61 = vld [vmem:[%s16317_s3 + $0x450] sm:$0xf] }
 0x49b   : > { %v3567_v21 = vadd.f32 %v3566_v53, %v13712_v17  ;;  %v3471_v3 = vadd.f32 %v3470_v57, %v3422_v13  ;;  %v3519_v32 = vpop.f32.mrf.mxu1 }
 0x49d   : > { %v13978_v29 = vadd.f32 %v3615_v54, %v3567_v21  ;;  %v3520_v37 = vadd.f32 %v3519_v32, %v3471_v3  ;;  %v10670_v3 = vld [vmem:[%s16317_s3 + $0x458] sm:$0xf0] }
 0x49e   : > { %v9641_v6 = vor.u32 %v10670_v3, %v9640_v61  ;;  %v10667_v61 = vld [vmem:[%s16317_s3 + $0x440] sm:$0xf0] }
 0x49f   : > { %v3986_v15 = vmax.f32 %v3520_v37, 0.0 }
 0x4a0   : > { %6283 = vmatpush.bf16.msra.mxu1 %v9641_v6 }
 0x4a1   : > { %v13988_v1 = vpack.c.bf16 %v3986_v15, %v3974_v42  ;;  %v3617_v27 = vpop.f32.mrf.mxu3 }
 0x4a2   : > { %v3568_v33 = vpop.f32.mrf.mxu2  ;;  %v3473_v18 = vpop.f32.mrf.mxu0 }
 0x4a3   : > { %16478 = vst [vmem:[#allocation73_spill] sm:$0xff] %v13988_v1  ;;  %v3569_v22 = vadd.f32 %v3568_v33, %v13712_v17  ;;  %v3474_v59 = vadd.f32 %v3473_v18, %v3425_v62  ;;  %v3522_v30 = vpop.f32.mrf.mxu1  ;;  %v10865_v33 = vld [vmem:[%s16316_s2 + $0x8] sm:$0xf] }
 0x4a5   : > { %v13991_v5 = vadd.f32 %v3617_v27, %v3569_v22  ;;  %v3523_v25 = vadd.f32 %v3522_v30, %v3474_v59  ;;  %3668 = vmatmul.bf16.gmra.mxu0 %v11548_v43  ;;  %v14032_v22 = vperm.slane %v10865_v33, 3 }
 0x4a6   : > { %3717 = vmatmul.bf16.gmra.mxu1 %v11544_v38  ;;  %3815 = vmatmul.bf16.gmra.mxu3 %v11548_v43  ;;  %v9832_v43 = vld [vmem:[%s16317_s3 + $0x5d0] sm:$0xf] }
 0x4a7   : > { %3766 = vmatmul.bf16.gmra.mxu2 %v11546_v39  ;;  %v10646_v39 = vld [vmem:[%s16317_s3 + $0x398] sm:$0xf0]  ;;  %v9833_v35 = vor.u32 %v10718_v12, %v9832_v43  ;;  %v3998_v32 = vmax.f32 %v3523_v25, 0.0  ;;  %v9724_v25 = vld [vmem:[%s16317_s3 + $0x4f8] sm:$0xf] }
 0x4a8   : > { %v9545_v20 = vor.u32 %v10646_v39, %v9544_v49  ;;  %v10643_v49 = vld [vmem:[%s16317_s3 + $0x380] sm:$0xf0] }
 0x4a9   : > { %v3620_v53 = vpop.f32.mrf.mxu3  ;;  %6381 = vmatpush.bf16.msra.mxu3 %v9833_v35  ;;  %v9533_v39 = vor.u32 %v10643_v49, %v9532_v45  ;;  %v16482_v45 = vld [vmem:[#allocation20_spill] sm:$0xff]  ;;  %v9712_v49 = vld [vmem:[%s16317_s3 + $0x4e0] sm:$0xf] }
 0x4aa   : > { %v3571_v38 = vpop.f32.mrf.mxu2  ;;  %v3475_v9 = vpop.f32.mrf.mxu0  ;;  %6234 = vmatpush.bf16.msra.mxu0 %v9545_v20 }
 0x4ab   : > { %v3572_v13 = vadd.f32 %v3571_v38, %v13712_v17  ;;  %v3476_v16 = vadd.f32 %v3475_v9, %v3427_v50  ;;  %v3524_v21 = vpop.f32.mrf.mxu1  ;;  %v9820_v50 = vld [vmem:[%s16317_s3 + $0x5b8] sm:$0xf]  ;;  %v10715_v38 = vld [vmem:[%s16317_s3 + $0x5c0] sm:$0xf0] }
 0x4ac   : > { %v9821_v43 = vor.u32 %v10715_v38, %v9820_v50  ;;  %v9520_v50 = vld [vmem:[%s16317_s3 + $0x360] sm:$0xf] }
 0x4ad   : > { %v14018_v54 = vadd.f32 %v3620_v53, %v3572_v13  ;;  %v3525_v57 = vadd.f32 %v3524_v21, %v3476_v16 }
 0x4ae   : > { %6235 = vmatpush.bf16.msra.mxu0 %v9533_v39  ;;  %6382 = vmatpush.bf16.msra.mxu3 %v9821_v43  ;;  %v10640_v39 = vld [vmem:[%s16317_s3 + $0x368] sm:$0xf0]  ;;  %v9808_v43 = vld [vmem:[%s16317_s3 + $0x5a0] sm:$0xf] }
 0x4af   : > { %v4010_v37 = vmax.f32 %v3525_v57, 0.0  ;;  %v9628_v57 = vld [vmem:[%s16317_s3 + $0x438] sm:$0xf] }
 0x4b1   : > { %v14026_v42 = vpack.c.bf16 %v4010_v37, %v3998_v32  ;;  %v3622_v46 = vpop.f32.mrf.mxu3  ;;  %v9629_v32 = vor.u32 %v10667_v61, %v9628_v57 }
 0x4b2   : > { %v3573_v41 = vpop.f32.mrf.mxu2  ;;  %v3634_v62 = vpop.f32.mrf.mxu0 }
 0x4b3   : > { %v3574_v15 = vadd.f32 %v3573_v41, %v13712_v17  ;;  %v3635_v27 = vadd.f32 %v3634_v62, %v13738_v14  ;;  %v3683_v18 = vpop.f32.mrf.mxu1  ;;  %v16479_v17 = vld [vmem:[#allocation19_spill] sm:$0xff]  ;;  %v10691_v14 = vld [vmem:[%s16317_s3 + $0x500] sm:$0xf0]  ;;  %6284 = vmatpush.bf16.msra.mxu1 %v9629_v32 }
 0x4b4   : > { %v3684_v30 = vadd.f32 %v3683_v18, %v14032_v22  ;;  %v9725_v48 = vor.u32 %v10691_v14, %v9724_v25  ;;  %v16481_v14 = vld [vmem:[#allocation12_spill] sm:$0xff] }
 0x4b5   : > { %v14035_v59 = vadd.f32 %v3622_v46, %v3574_v15  ;;  %6045 = vmatmul.bf16.vlgmr.msrb.gmra.mxu0 %v11622_v56  ;;  %v3831_v16 = vmax.f32 %v3635_v27, 0.0  ;;  %v16480_v27 = vld [vmem:[#allocation5_spill] sm:$0xff] }
 0x4b6   : > { %6094 = vmatmul.bf16.vlgmr.msrb.gmra.mxu1 %v11917_v10  ;;  %6192 = vmatmul.bf16.vlgmr.msrb.gmra.mxu3 %v16479_v17 }
 0x4b7   : > { %6143 = vmatmul.bf16.vlgmr.msrb.gmra.mxu2 %v12239_v55 }
 0x4b8   : > { %6333 = vmatpush.bf16.msra.mxu2 %v9725_v48  ;;  %v16483_v48 = vld [vmem:[#allocation21_spill] sm:$0xff] }
 0x4b9   : > { %v3781_v13 = vpop.f32.mrf.mxu3 }
 0x4ba   : > { %v3732_v11 = vpop.f32.mrf.mxu2  ;;  %v3636_v53 = vpop.f32.mrf.mxu0 }
 0x4bb   : > { %v3733_v12 = vadd.f32 %v3732_v11, %v3684_v30  ;;  %v3637_v9 = vadd.f32 %v3636_v53, %v13751_v60  ;;  %v3685_v20 = vpop.f32.mrf.mxu1  ;;  %v9521_v53 = vor.u32 %v10640_v39, %v9520_v50 }
 0x4bc   : > { %v3686_v37 = vadd.f32 %v3685_v20, %v14032_v22 }
 0x4bd   : > { %v3782_v35 = vadd.f32 %v3781_v13, %v3733_v12  ;;  %v3843_v21 = vmax.f32 %v3637_v9, 0.0  ;;  %v10712_v12 = vld [vmem:[%s16317_s3 + $0x5a8] sm:$0xf0]  ;;  %6236 = vmatpush.bf16.msra.mxu0 %v9521_v53  ;;  %v9700_v53 = vld [vmem:[%s16317_s3 + $0x4c8] sm:$0xf] }
 0x4be   : > { %v9809_v9 = vor.u32 %v10712_v12, %v9808_v43  ;;  %v16486_v43 = vld [vmem:[#allocation13_spill] sm:$0xff]  ;;  %v16487_v12 = vld [vmem:[#allocation22_spill] sm:$0xff] }
 0x4bf   : > { %v14067_v3 = vpack.c.bf16 %v3843_v21, %v3831_v16  ;;  %v3832_v18 = vmax.f32 %v3782_v35, 0.0 }
 0x4c0   : > { %6383 = vmatpush.bf16.msra.mxu3 %v9809_v9  ;;  %v9508_v9 = vld [vmem:[%s16317_s3 + $0x348] sm:$0xf] }
 0x4c1   : > { %v3783_v41 = vpop.f32.mrf.mxu3 }
 0x4c2   : > { %v3734_v60 = vpop.f32.mrf.mxu2  ;;  %v3639_v15 = vpop.f32.mrf.mxu0 }
 0x4c3   : > { %v3735_v6 = vadd.f32 %v3734_v60, %v3686_v37  ;;  %v3640_v46 = vadd.f32 %v3639_v15, %v13778_v8  ;;  %v3688_v62 = vpop.f32.mrf.mxu1  ;;  %v10688_v8 = vld [vmem:[%s16317_s3 + $0x4e8] sm:$0xf0]  ;;  %v9616_v60 = vld [vmem:[%s16317_s3 + $0x420] sm:$0xf] }
 0x4c4   : > { %v3689_v25 = vadd.f32 %v3688_v62, %v14032_v22  ;;  %v9713_v11 = vor.u32 %v10688_v8, %v9712_v49  ;;  %v16485_v8 = vld [vmem:[#allocation6_spill] sm:$0xff] }
 0x4c5   : > { %v3784_v33 = vadd.f32 %v3783_v41, %v3735_v6  ;;  %6050 = vmatmul.bf16.gmra.mxu0 %v16480_v27  ;;  %v3855_v32 = vmax.f32 %v3640_v46, 0.0  ;;  %v10664_v6 = vld [vmem:[%s16317_s3 + $0x428] sm:$0xf0] }
 0x4c6   : > { %6099 = vmatmul.bf16.gmra.mxu1 %v16481_v14  ;;  %6197 = vmatmul.bf16.gmra.mxu3 %v16483_v48  ;;  %v9617_v41 = vor.u32 %v10664_v6, %v9616_v60  ;;  %v16544_v48 = vld [vmem:[#allocation65_spill] sm:$0xff] }
 0x4c7   : > { %v3844_v30 = vmax.f32 %v3784_v33, 0.0  ;;  %6148 = vmatmul.bf16.gmra.mxu2 %v16482_v45 }
 0x4c8   : > { %6334 = vmatpush.bf16.msra.mxu2 %v9713_v11  ;;  %6285 = vmatpush.bf16.msra.mxu1 %v9617_v41 }
 0x4c9   : > { %v14085_v38 = vpack.c.bf16 %v3844_v30, %v3832_v18  ;;  %v3786_v35 = vpop.f32.mrf.mxu3 }
 0x4ca   : > { %v3737_v13 = vpop.f32.mrf.mxu2  ;;  %v3641_v16 = vpop.f32.mrf.mxu0 }
 0x4cb   : > { %16484 = vst [vmem:[#allocation19_spill] sm:$0xff] %v14085_v38  ;;  %v3738_v20 = vadd.f32 %v3737_v13, %v3689_v25  ;;  %v3642_v21 = vadd.f32 %v3641_v16, %v13791_v4  ;;  %v3690_v57 = vpop.f32.mrf.mxu1  ;;  %v16488_v13 = vld [vmem:[#allocation23_spill] sm:$0xff]  ;;  %v9796_v16 = vld [vmem:[%s16317_s3 + $0x588] sm:$0xf] }
 0x4cc   : > { %v3691_v62 = vadd.f32 %v3690_v57, %v14032_v22 }
 0x4cd   : > { %v3787_v61 = vadd.f32 %v3786_v35, %v3738_v20  ;;  %v3867_v37 = vmax.f32 %v3642_v21, 0.0  ;;  %v10637_v35 = vld [vmem:[%s16317_s3 + $0x350] sm:$0xf0] }
 0x4ce   : > { %v10709_v21 = vld [vmem:[%s16317_s3 + $0x590] sm:$0xf0] }
 0x4cf   : > { %v14103_v15 = vpack.c.bf16 %v3867_v37, %v3855_v32  ;;  %v3856_v50 = vmax.f32 %v3787_v61, 0.0  ;;  %v9509_v32 = vor.u32 %v10637_v35, %v9508_v9  ;;  %v9797_v37 = vor.u32 %v10709_v21, %v9796_v16  ;;  %v16490_v16 = vld [vmem:[#allocation7_spill] sm:$0xff] }
 0x4d1   : > { %v3788_v18 = vpop.f32.mrf.mxu3  ;;  %6237 = vmatpush.bf16.msra.mxu0 %v9509_v32  ;;  %6384 = vmatpush.bf16.msra.mxu3 %v9797_v37  ;;  %v16491_v37 = vld [vmem:[#allocation14_spill] sm:$0xff] }
 0x4d2   : > { %v3739_v4 = vpop.f32.mrf.mxu2  ;;  %v3644_v30 = vpop.f32.mrf.mxu0 }
 0x4d3   : > { %v3740_v33 = vadd.f32 %v3739_v4, %v3691_v62  ;;  %v3645_v46 = vadd.f32 %v3644_v30, %v13818_v7  ;;  %v3693_v25 = vpop.f32.mrf.mxu1  ;;  %v10685_v7 = vld [vmem:[%s16317_s3 + $0x4d0] sm:$0xf0] }
 0x4d4   : > { %v3694_v39 = vadd.f32 %v3693_v25, %v14032_v22  ;;  %v9701_v20 = vor.u32 %v10685_v7, %v9700_v53  ;;  %v9604_v25 = vld [vmem:[%s16317_s3 + $0x408] sm:$0xf] }
 0x4d5   : > { %v3789_v49 = vadd.f32 %v3788_v18, %v3740_v33  ;;  %6055 = vmatmul.bf16.gmra.mxu0 %v16485_v8  ;;  %v3879_v18 = vmax.f32 %v3645_v46, 0.0  ;;  %v16543_v8 = vld [vmem:[#allocation64_spill] sm:$0xff] }
 0x4d6   : > { %6104 = vmatmul.bf16.gmra.mxu1 %v16486_v43  ;;  %6202 = vmatmul.bf16.gmra.mxu3 %v16488_v13  ;;  %v16536_v13 = vld [vmem:[#allocation61_spill] sm:$0xff]  ;;  %v16540_v43 = vld [vmem:[#allocation63_spill] sm:$0xff] }
 0x4d7   : > { %v3868_v11 = vmax.f32 %v3789_v49, 0.0  ;;  %6153 = vmatmul.bf16.gmra.mxu2 %v16487_v12  ;;  %v10661_v49 = vld [vmem:[%s16317_s3 + $0x410] sm:$0xf0]  ;;  %v16539_v12 = vld [vmem:[#allocation62_spill] sm:$0xff] }
 0x4d8   : > { %6335 = vmatpush.bf16.msra.mxu2 %v9701_v20 }
 0x4d9   : > { %v14130_v57 = vpack.c.bf16 %v3868_v11, %v3856_v50  ;;  %v3791_v6 = vpop.f32.mrf.mxu3  ;;  %v9605_v50 = vor.u32 %v10661_v49, %v9604_v25 }
 0x4da   : > { %v3742_v61 = vpop.f32.mrf.mxu2  ;;  %v3646_v41 = vpop.f32.mrf.mxu0 }
 0x4db   : > { %16489 = vst [vmem:[#allocation5_spill] sm:$0xff] %v14130_v57  ;;  %v3743_v60 = vadd.f32 %v3742_v61, %v3694_v39  ;;  %v3647_v62 = vadd.f32 %v3646_v41, %v13831_v58  ;;  %v3695_v4 = vpop.f32.mrf.mxu1  ;;  %6286 = vmatpush.bf16.msra.mxu1 %v9605_v50  ;;  %v9688_v41 = vld [vmem:[%s16317_s3 + $0x4b0] sm:$0xf] }
 0x4dc   : > { %v3696_v39 = vadd.f32 %v3695_v4, %v14032_v22 }
 0x4dd   : > { %v3792_v33 = vadd.f32 %v3791_v6, %v3743_v60  ;;  %v3891_v30 = vmax.f32 %v3647_v62, 0.0  ;;  %v16492_v60 = vld [vmem:[#allocation24_spill] sm:$0xff]  ;;  %v16493_v6 = vld [vmem:[#allocation25_spill] sm:$0xff]  ;;  %v9496_v62 = vld [vmem:[%s16317_s3 + $0x330] sm:$0xf] }
 0x4df   : > { %v14139_v11 = vpack.c.bf16 %v3891_v30, %v3879_v18  ;;  %v3880_v21 = vmax.f32 %v3792_v33, 0.0  ;;  %v10634_v33 = vld [vmem:[%s16317_s3 + $0x338] sm:$0xf0]  ;;  %v9784_v18 = vld [vmem:[%s16317_s3 + $0x570] sm:$0xf] }
 0x4e0   : > { %v10706_v30 = vld [vmem:[%s16317_s3 + $0x578] sm:$0xf0]  ;;  %v9497_v50 = vor.u32 %v10634_v33, %v9496_v62 }
 0x4e1   : > { %v3793_v7 = vpop.f32.mrf.mxu3 }
 0x4e2   : > { %v3744_v58 = vpop.f32.mrf.mxu2  ;;  %v3649_v9 = vpop.f32.mrf.mxu0  ;;  %6238 = vmatpush.bf16.msra.mxu0 %v9497_v50 }
 0x4e3   : > { %v3745_v53 = vadd.f32 %v3744_v58, %v3696_v39  ;;  %v3650_v46 = vadd.f32 %v3649_v9, %v13858_v44  ;;  %v3698_v20 = vpop.f32.mrf.mxu1  ;;  %v10682_v44 = vld [vmem:[%s16317_s3 + $0x4b8] sm:$0xf0]  ;;  %v9785_v39 = vor.u32 %v10706_v30, %v9784_v18 }
 0x4e4   : > { %v3699_v32 = vadd.f32 %v3698_v20, %v14032_v22  ;;  %v9689_v4 = vor.u32 %v10682_v44, %v9688_v41 }
 0x4e5   : > { %v3794_v35 = vadd.f32 %v3793_v7, %v3745_v53  ;;  %6060 = vmatmul.bf16.gmra.mxu0 %v16490_v16  ;;  %6385 = vmatpush.bf16.msra.mxu3 %v9785_v39  ;;  %v3903_v41 = vmax.f32 %v3650_v46, 0.0  ;;  %v16495_v39 = vld [vmem:[#allocation8_spill] sm:$0xff] }
 0x4e6   : > { %6109 = vmatmul.bf16.gmra.mxu1 %v16491_v37  ;;  %6207 = vmatmul.bf16.gmra.mxu3 %v16493_v6  ;;  %v16516_v6 = vld [vmem:[#allocation34_spill] sm:$0xff]  ;;  %v16532_v37 = vld [vmem:[#allocation59_spill] sm:$0xff]  ;;  %v16535_v16 = vld [vmem:[#allocation60_spill] sm:$0xff] }
 0x4e7   : > { %v3892_v61 = vmax.f32 %v3794_v35, 0.0  ;;  %6158 = vmatmul.bf16.gmra.mxu2 %v16492_v60  ;;  %v16531_v60 = vld [vmem:[#allocation58_spill] sm:$0xff] }
 0x4e8   : > { %6336 = vmatpush.bf16.msra.mxu2 %v9689_v4 }
 0x4e9   : > { %v14166_v25 = vpack.c.bf16 %v3892_v61, %v3880_v21  ;;  %v3796_v53 = vpop.f32.mrf.mxu3  ;;  %v9592_v21 = vld [vmem:[%s16317_s3 + $0x3f0] sm:$0xf]  ;;  %v10658_v61 = vld [vmem:[%s16317_s3 + $0x3f8] sm:$0xf0] }
 0x4ea   : > { %v3747_v49 = vpop.f32.mrf.mxu2  ;;  %v3651_v7 = vpop.f32.mrf.mxu0 }
 0x4eb   : > { %16494 = vst [vmem:[#allocation12_spill] sm:$0xff] %v14166_v25  ;;  %v3748_v58 = vadd.f32 %v3747_v49, %v3699_v32  ;;  %v3652_v9 = vadd.f32 %v3651_v7, %v13871_v2  ;;  %v3700_v20 = vpop.f32.mrf.mxu1  ;;  %v9593_v32 = vor.u32 %v10658_v61, %v9592_v21  ;;  %v10631_v61 = vld [vmem:[%s16317_s3 + $0x320] sm:$0xf0] }
 0x4ec   : > { %v3701_v4 = vadd.f32 %v3700_v20, %v14032_v22  ;;  %v16498_v20 = vld [vmem:[#allocation27_spill] sm:$0xff] }
 0x4ed   : > { %v3797_v35 = vadd.f32 %v3796_v53, %v3748_v58  ;;  %v3915_v44 = vmax.f32 %v3652_v9, 0.0  ;;  %6287 = vmatpush.bf16.msra.mxu1 %v9593_v32  ;;  %v16496_v9 = vld [vmem:[#allocation15_spill] sm:$0xff]  ;;  %v9772_v32 = vld [vmem:[%s16317_s3 + $0x558] sm:$0xf] }
 0x4ef   : > { %v14175_v62 = vpack.c.bf16 %v3915_v44, %v3903_v41  ;;  %v3904_v58 = vmax.f32 %v3797_v35, 0.0  ;;  %v16497_v41 = vld [vmem:[#allocation26_spill] sm:$0xff]  ;;  %v9676_v44 = vld [vmem:[%s16317_s3 + $0x498] sm:$0xf] }
 0x4f0   : > { %v9484_v35 = vld [vmem:[%s16317_s3 + $0x318] sm:$0xf] }
 0x4f1   : > { %v3798_v18 = vpop.f32.mrf.mxu3 }
 0x4f2   : > { %v3749_v2 = vpop.f32.mrf.mxu2  ;;  %v3654_v30 = vpop.f32.mrf.mxu0 }
 0x4f3   : > { %v3750_v33 = vadd.f32 %v3749_v2, %v3701_v4  ;;  %v3655_v46 = vadd.f32 %v3654_v30, %v13898_v63  ;;  %v3703_v49 = vpop.f32.mrf.mxu1  ;;  %v10679_v63 = vld [vmem:[%s16317_s3 + $0x4a0] sm:$0xf0] }
 0x4f4   : > { %v3704_v7 = vadd.f32 %v3703_v49, %v14032_v22  ;;  %v9677_v21 = vor.u32 %v10679_v63, %v9676_v44  ;;  %v10703_v4 = vld [vmem:[%s16317_s3 + $0x560] sm:$0xf0] }
 0x4f5   : > { %v3799_v50 = vadd.f32 %v3798_v18, %v3750_v33  ;;  %6065 = vmatmul.bf16.gmra.mxu0 %v16495_v39  ;;  %v9485_v18 = vor.u32 %v10631_v61, %v9484_v35  ;;  %v9773_v30 = vor.u32 %v10703_v4, %v9772_v32 }
 0x4f6   : > { %6114 = vmatmul.bf16.gmra.mxu1 %v16496_v9  ;;  %6212 = vmatmul.bf16.gmra.mxu3 %v16498_v20  ;;  %v3927_v9 = vmax.f32 %v3655_v46, 0.0 }
 0x4f7   : > { %v3916_v53 = vmax.f32 %v3799_v50, 0.0  ;;  %6163 = vmatmul.bf16.gmra.mxu2 %v16497_v41  ;;  %6239 = vmatpush.bf16.msra.mxu0 %v9485_v18 }
 0x4f8   : > { %6337 = vmatpush.bf16.msra.mxu2 %v9677_v21  ;;  %6386 = vmatpush.bf16.msra.mxu3 %v9773_v30  ;;  %v16500_v30 = vld [vmem:[#allocation9_spill] sm:$0xff] }
 0x4f9   : > { %v14202_v2 = vpack.c.bf16 %v3916_v53, %v3904_v58  ;;  %v3801_v50 = vpop.f32.mrf.mxu3  ;;  %v9580_v58 = vld [vmem:[%s16317_s3 + $0x3d8] sm:$0xf]  ;;  %v10655_v53 = vld [vmem:[%s16317_s3 + $0x3e0] sm:$0xf0] }
 0x4fa   : > { %v3752_v33 = vpop.f32.mrf.mxu2  ;;  %v3656_v44 = vpop.f32.mrf.mxu0 }
 0x4fb   : > { %16499 = vst [vmem:[#allocation20_spill] sm:$0xff] %v14202_v2  ;;  %v3753_v49 = vadd.f32 %v3752_v33, %v3704_v7  ;;  %v3657_v63 = vadd.f32 %v3656_v44, %v13911_v24  ;;  %v3705_v20 = vpop.f32.mrf.mxu1  ;;  %v9581_v7 = vor.u32 %v10655_v53, %v9580_v58  ;;  %v10628_v53 = vld [vmem:[%s16317_s3 + $0x308] sm:$0xf0] }
 0x4fc   : > { %v3706_v21 = vadd.f32 %v3705_v20, %v14032_v22  ;;  %v9664_v20 = vld [vmem:[%s16317_s3 + $0x480] sm:$0xf] }
 0x4fd   : > { %v3802_v41 = vadd.f32 %v3801_v50, %v3753_v49  ;;  %v3939_v39 = vmax.f32 %v3657_v63, 0.0  ;;  %6288 = vmatpush.bf16.msra.mxu1 %v9581_v7  ;;  %v16501_v63 = vld [vmem:[#allocation16_spill] sm:$0xff]  ;;  %v9760_v7 = vld [vmem:[%s16317_s3 + $0x540] sm:$0xf] }
 0x4ff   : > { %v14211_v35 = vpack.c.bf16 %v3939_v39, %v3927_v9  ;;  %v3928_v49 = vmax.f32 %v3802_v41, 0.0  ;;  %v16502_v39 = vld [vmem:[#allocation28_spill] sm:$0xff]  ;;  %v16503_v9 = vld [vmem:[#allocation29_spill] sm:$0xff] }
 0x500   : > { %v9472_v41 = vld [vmem:[%s16317_s3 + $0x300] sm:$0xf] }
 0x501   : > { %v3803_v32 = vpop.f32.mrf.mxu3 }
 0x502   : > { %v3754_v24 = vpop.f32.mrf.mxu2  ;;  %v3659_v4 = vpop.f32.mrf.mxu0 }
 0x503   : > { %v3755_v61 = vadd.f32 %v3754_v24, %v3706_v21  ;;  %v3660_v46 = vadd.f32 %v3659_v4, %v13938_v40  ;;  %v3708_v33 = vpop.f32.mrf.mxu1  ;;  %v10676_v40 = vld [vmem:[%s16317_s3 + $0x488] sm:$0xf0] }
 0x504   : > { %v3709_v44 = vadd.f32 %v3708_v33, %v14032_v22  ;;  %v9665_v58 = vor.u32 %v10676_v40, %v9664_v20  ;;  %v10700_v21 = vld [vmem:[%s16317_s3 + $0x548] sm:$0xf0] }
 0x505   : > { %v3804_v18 = vadd.f32 %v3803_v32, %v3755_v61  ;;  %6070 = vmatmul.bf16.gmra.mxu0 %v16500_v30  ;;  %v9473_v32 = vor.u32 %v10628_v53, %v9472_v41  ;;  %v9761_v4 = vor.u32 %v10700_v21, %v9760_v7 }
 0x506   : > { %6119 = vmatmul.bf16.gmra.mxu1 %v16501_v63  ;;  %6217 = vmatmul.bf16.gmra.mxu3 %v16503_v9  ;;  %v3951_v63 = vmax.f32 %v3660_v46, 0.0 }
 0x507   : > { %v3940_v50 = vmax.f32 %v3804_v18, 0.0  ;;  %6168 = vmatmul.bf16.gmra.mxu2 %v16502_v39  ;;  %6240 = vmatpush.bf16.msra.mxu0 %v9473_v32 }
 0x508   : > { %6338 = vmatpush.bf16.msra.mxu2 %v9665_v58  ;;  %6387 = vmatpush.bf16.msra.mxu3 %v9761_v4  ;;  %v16505_v4 = vld [vmem:[#allocation10_spill] sm:$0xff] }
 0x509   : > { %v14238_v24 = vpack.c.bf16 %v3940_v50, %v3928_v49  ;;  %v3806_v18 = vpop.f32.mrf.mxu3  ;;  %v9568_v49 = vld [vmem:[%s16317_s3 + $0x3c0] sm:$0xf]  ;;  %v10652_v50 = vld [vmem:[%s16317_s3 + $0x3c8] sm:$0xf0] }
 0x50a   : > { %v3757_v61 = vpop.f32.mrf.mxu2  ;;  %v3661_v20 = vpop.f32.mrf.mxu0 }
 0x50b   : > { %16504 = vst [vmem:[#allocation74_spill] sm:$0xff] %v14238_v24  ;;  %v3758_v33 = vadd.f32 %v3757_v61, %v3709_v44  ;;  %v3662_v40 = vadd.f32 %v3661_v20, %v13951_v26  ;;  %v3710_v9 = vpop.f32.mrf.mxu1  ;;  %v9569_v44 = vor.u32 %v10652_v50, %v9568_v49  ;;  %v10745_v50 = vld [vmem:[%s16317_s3 + $0x6b0] sm:$0xf0] }
 0x50c   : > { %v3711_v58 = vadd.f32 %v3710_v9, %v14032_v22  ;;  %v10132_v9 = vld [vmem:[%s16317_s3 + $0x828] sm:$0xf] }
 0x50d   : > { %v3807_v39 = vadd.f32 %v3806_v18, %v3758_v33  ;;  %v3963_v30 = vmax.f32 %v3662_v40, 0.0  ;;  %6289 = vmatpush.bf16.msra.mxu1 %v9569_v44  ;;  %v16506_v40 = vld [vmem:[#allocation17_spill] sm:$0xff]  ;;  %v10228_v44 = vld [vmem:[%s16317_s3 + $0x8e8] sm:$0xf] }
 0x50f   : > { %v14247_v41 = vpack.c.bf16 %v3963_v30, %v3951_v63  ;;  %v3952_v33 = vmax.f32 %v3807_v39, 0.0  ;;  %v16507_v30 = vld [vmem:[#allocation30_spill] sm:$0xff]  ;;  %v16508_v63 = vld [vmem:[#allocation31_spill] sm:$0xff] }
 0x510   : > { %v9940_v39 = vld [vmem:[%s16317_s3 + $0x6a8] sm:$0xf] }
 0x511   : > { %v3808_v7 = vpop.f32.mrf.mxu3 }
 0x512   : > { %v3759_v26 = vpop.f32.mrf.mxu2  ;;  %v3664_v21 = vpop.f32.mrf.mxu0 }
 0x513   : > { %v3760_v53 = vadd.f32 %v3759_v26, %v3711_v58  ;;  %v3665_v46 = vadd.f32 %v3664_v21, %v13978_v29  ;;  %v3713_v61 = vpop.f32.mrf.mxu1  ;;  %v10793_v29 = vld [vmem:[%s16317_s3 + $0x830] sm:$0xf0] }
 0x514   : > { %v3714_v20 = vadd.f32 %v3713_v61, %v14032_v22  ;;  %v10133_v49 = vor.u32 %v10793_v29, %v10132_v9  ;;  %v10817_v58 = vld [vmem:[%s16317_s3 + $0x8f0] sm:$0xf0] }
 0x515   : > { %v3809_v32 = vadd.f32 %v3808_v7, %v3760_v53  ;;  %6075 = vmatmul.bf16.gmra.mxu0 %v16505_v4  ;;  %v9941_v7 = vor.u32 %v10745_v50, %v9940_v39  ;;  %v10229_v21 = vor.u32 %v10817_v58, %v10228_v44 }
 0x516   : > { %6124 = vmatmul.bf16.gmra.mxu1 %v16506_v40  ;;  %6222 = vmatmul.bf16.gmra.mxu3 %v16508_v63  ;;  %v10036_v40 = vld [vmem:[%s16317_s3 + $0x768] sm:$0xf] }
 0x517   : > { %v3964_v18 = vmax.f32 %v3809_v32, 0.0  ;;  %6173 = vmatmul.bf16.gmra.mxu2 %v16507_v30  ;;  %6429 = vmatpush.bf16.msrb.mxu0 %v9941_v7 }
 0x518   : > { %6527 = vmatpush.bf16.msrb.mxu2 %v10133_v49  ;;  %6576 = vmatpush.bf16.msrb.mxu3 %v10229_v21 }
 0x519   : > { %v14274_v26 = vpack.c.bf16 %v3964_v18, %v3952_v33  ;;  %v3811_v32 = vpop.f32.mrf.mxu3  ;;  %v10769_v33 = vld [vmem:[%s16317_s3 + $0x770] sm:$0xf0]  ;;  %v3975_v18 = vmax.f32 %v3665_v46, 0.0 }
 0x51a   : > { %v3762_v53 = vpop.f32.mrf.mxu2  ;;  %v3666_v9 = vpop.f32.mrf.mxu0 }
 0x51b   : > { %16509 = vst [vmem:[#allocation75_spill] sm:$0xff] %v14274_v26  ;;  %v3763_v61 = vadd.f32 %v3762_v53, %v3714_v20  ;;  %v3667_v29 = vadd.f32 %v3666_v9, %v13991_v5  ;;  %v3715_v63 = vpop.f32.mrf.mxu1  ;;  %v10037_v20 = vor.u32 %v10769_v33, %v10036_v40  ;;  %v16512_v40 = vld [vmem:[#allocation18_spill] sm:$0xff]  ;;  %v16514_v33 = vld [vmem:[#allocation33_spill] sm:$0xff] }
 0x51c   : > { %v3716_v5 = vadd.f32 %v3715_v63, %v14032_v22  ;;  %v10120_v63 = vld [vmem:[%s16317_s3 + $0x810] sm:$0xf] }
 0x51d   : > { %v3812_v30 = vadd.f32 %v3811_v32, %v3763_v61  ;;  %v3987_v39 = vmax.f32 %v3667_v29, 0.0  ;;  %6478 = vmatpush.bf16.msrb.mxu1 %v10037_v20  ;;  %v16511_v32 = vld [vmem:[#allocation11_spill] sm:$0xff]  ;;  %v16513_v29 = vld [vmem:[#allocation32_spill] sm:$0xff] }
 0x51e   : > { %v10216_v20 = vld [vmem:[%s16317_s3 + $0x8d0] sm:$0xf] }
 0x51f   : > { %v14283_v50 = vpack.c.bf16 %v3987_v39, %v3975_v18  ;;  %v3976_v9 = vmax.f32 %v3812_v30, 0.0  ;;  %v9928_v30 = vld [vmem:[%s16317_s3 + $0x690] sm:$0xf]  ;;  %v10742_v39 = vld [vmem:[%s16317_s3 + $0x698] sm:$0xf0] }
 0x521   : > { %16510 = vst [vmem:[#allocation76_spill] sm:$0xff] %v14283_v50  ;;  %v3813_v58 = vpop.f32.mrf.mxu3 }
 0x522   : > { %v3764_v49 = vpop.f32.mrf.mxu2  ;;  %v3669_v53 = vpop.f32.mrf.mxu0 }
 0x523   : > { %v3765_v44 = vadd.f32 %v3764_v49, %v3716_v5  ;;  %v3670_v7 = vadd.f32 %v3669_v53, %v14018_v54  ;;  %v3718_v21 = vpop.f32.mrf.mxu1  ;;  %v10790_v54 = vld [vmem:[%s16317_s3 + $0x818] sm:$0xf0] }
 0x524   : > { %v3719_v46 = vadd.f32 %v3718_v21, %v14032_v22  ;;  %v10121_v18 = vor.u32 %v10790_v54, %v10120_v63  ;;  %v10814_v5 = vld [vmem:[%s16317_s3 + $0x8d8] sm:$0xf0] }
 0x525   : > { %v3814_v61 = vadd.f32 %v3813_v58, %v3765_v44  ;;  %6080 = vmatmul.bf16.gmra.mxu0 %v16511_v32  ;;  %v9929_v58 = vor.u32 %v10742_v39, %v9928_v30  ;;  %v10217_v53 = vor.u32 %v10814_v5, %v10216_v20 }
 0x526   : > { %6129 = vmatmul.bf16.gmra.mxu1 %v16512_v40  ;;  %6227 = vmatmul.bf16.gmra.mxu3 %v16514_v33  ;;  %v4493_v40 = vld [vmem:[%s16318_s4] sm:$0x7] }
 0x527   : > { %v3988_v4 = vmax.f32 %v3814_v61, 0.0  ;;  %6178 = vmatmul.bf16.gmra.mxu2 %v16513_v29  ;;  %6430 = vmatpush.bf16.msrb.mxu0 %v9929_v58 }
 0x528   : > { %6528 = vmatpush.bf16.msrb.mxu2 %v10121_v18  ;;  %6577 = vmatpush.bf16.msrb.mxu3 %v10217_v53 }
 0x529   : > { %v14310_v49 = vpack.c.bf16 %v3988_v4, %v3976_v9  ;;  %v3816_v61 = vpop.f32.mrf.mxu3  ;;  %v10024_v4 = vld [vmem:[%s16317_s3 + $0x750] sm:$0xf]  ;;  %v10766_v9 = vld [vmem:[%s16317_s3 + $0x758] sm:$0xf0] }
 0x52a   : > { %v3767_v44 = vpop.f32.mrf.mxu2  ;;  %v3671_v63 = vpop.f32.mrf.mxu0  ;;  %v10025_v18 = vor.u32 %v10766_v9, %v10024_v4  ;;  %v9916_v4 = vld [vmem:[%s16317_s3 + $0x678] sm:$0xf]  ;;  %v10739_v9 = vld [vmem:[%s16317_s3 + $0x680] sm:$0xf0] }
 0x52b   : > { %16515 = vst [vmem:[#allocation77_spill] sm:$0xff] %v14310_v49  ;;  %v3768_v21 = vadd.f32 %v3767_v44, %v3719_v46  ;;  %v3672_v54 = vadd.f32 %v3671_v63, %v14035_v59  ;;  %v3720_v33 = vpop.f32.mrf.mxu1  ;;  %v3999_v46 = vmax.f32 %v3670_v7, 0.0  ;;  %v14322_v59 = vperm.slane %v4493_v40, 0  ;;  %v16517_v40 = vld [vmem:[#allocation42_spill] sm:$0xff] }
 0x52c   : > { %6479 = vmatpush.bf16.msrb.mxu1 %v10025_v18  ;;  %v3721_v20 = vadd.f32 %v3720_v33, %v14032_v22  ;;  %v10108_v22 = vld [vmem:[%s16317_s3 + $0x7f8] sm:$0xf]  ;;  %v10787_v33 = vld [vmem:[%s16317_s3 + $0x800] sm:$0xf0] }
 0x52d   : > { %v3817_v29 = vadd.f32 %v3816_v61, %v3768_v21  ;;  %v4011_v30 = vmax.f32 %v3672_v54, 0.0 }
 0x52f   : > { %v14324_v39 = vpack.c.bf16 %v4011_v30, %v3999_v46  ;;  %v4000_v7 = vmax.f32 %v3817_v29, 0.0  ;;  %v10109_v29 = vor.u32 %v10787_v33, %v10108_v22  ;;  %v10204_v46 = vld [vmem:[%s16317_s3 + $0x8b8] sm:$0xf]  ;;  %v10811_v30 = vld [vmem:[%s16317_s3 + $0x8c0] sm:$0xf0] }
 0x530   : > { %v10012_v33 = vld [vmem:[%s16317_s3 + $0x738] sm:$0xf] }
 0x531   : > { %v3818_v58 = vpop.f32.mrf.mxu3  ;;  %6529 = vmatpush.bf16.msrb.mxu2 %v10109_v29 }
 0x532   : > { %v3769_v5 = vpop.f32.mrf.mxu2  ;;  %v6046_v53 = vpop.f32.mrf.mxu0 }
 0x533   : > { %v3770_v44 = vadd.f32 %v3769_v5, %v3721_v20  ;;  %v6047_v21 = vadd.f32 %v6046_v53, %v14322_v59  ;;  %v6095_v61 = vpop.f32.mrf.mxu1  ;;  %v9917_v5 = vor.u32 %v10739_v9, %v9916_v4 }
 0x535   : > { %v3819_v63 = vadd.f32 %v3818_v58, %v3770_v44  ;;  %v6096_v32 = vadd.f32 %v6095_v61, %v6047_v21  ;;  %6241 = vmatmul.bf16.vlgmr.msra.gmra.mxu0 %v16516_v6  ;;  %v10205_v44 = vor.u32 %v10811_v30, %v10204_v46  ;;  %v16528_v6 = vld [vmem:[#allocation57_spill] sm:$0xff] }
 0x536   : > { %6290 = vmatmul.bf16.vlgmr.msra.gmra.mxu1 %v16517_v40  ;;  %6388 = vmatmul.bf16.vlgmr.msra.gmra.mxu3 %v13170_v36  ;;  %v16523_v36 = vld [vmem:[#allocation54_spill] sm:$0xff]  ;;  %v16527_v40 = vld [vmem:[#allocation56_spill] sm:$0xff] }
 0x537   : > { %v4012_v54 = vmax.f32 %v3819_v63, 0.0  ;;  %6339 = vmatmul.bf16.vlgmr.msra.gmra.mxu2 %v13152_v23  ;;  %6431 = vmatpush.bf16.msrb.mxu0 %v9917_v5  ;;  %v16524_v23 = vld [vmem:[#allocation55_spill] sm:$0xff] }
 0x538   : > { %6578 = vmatpush.bf16.msrb.mxu3 %v10205_v44 }
 0x539   : > { %v14350_v18 = vpack.c.bf16 %v4012_v54, %v4000_v7  ;;  %v6193_v53 = vpop.f32.mrf.mxu3  ;;  %v10763_v7 = vld [vmem:[%s16317_s3 + $0x740] sm:$0xf0] }
 0x53a   : > { %v6144_v20 = vpop.f32.mrf.mxu2  ;;  %v6048_v21 = vpop.f32.mrf.mxu0 }
 0x53b   : > { %v6145_v58 = vadd.f32 %v6144_v20, %v6096_v32  ;;  %v6049_v61 = vadd.f32 %v6048_v21, %v14322_v59  ;;  %v6097_v63 = vpop.f32.mrf.mxu1  ;;  %v10013_v32 = vor.u32 %v10763_v7, %v10012_v33  ;;  %v16520_v21 = vld [vmem:[#allocation53_spill] sm:$0xff] }
 0x53c   : > { %v9904_v33 = vld [vmem:[%s16317_s3 + $0x660] sm:$0xf] }
 0x53d   : > { %v14353_v22 = vadd.f32 %v6193_v53, %v6145_v58  ;;  %v6098_v54 = vadd.f32 %v6097_v63, %v6049_v61  ;;  %6480 = vmatpush.bf16.msrb.mxu1 %v10013_v32  ;;  %v16518_v58 = vld [vmem:[#allocation35_spill] sm:$0xff]  ;;  %v10096_v61 = vld [vmem:[%s16317_s3 + $0x7e0] sm:$0xf]  ;;  %v10784_v63 = vld [vmem:[%s16317_s3 + $0x7e8] sm:$0xf0] }
 0x53e   : > { %v16519_v53 = vld [vmem:[#allocation43_spill] sm:$0xff]  ;;  %v10097_v7 = vor.u32 %v10784_v63, %v10096_v61  ;;  %v10192_v32 = vld [vmem:[%s16317_s3 + $0x8a0] sm:$0xf] }
 0x540   : > { %6530 = vmatpush.bf16.msrb.mxu2 %v10097_v7 }
 0x541   : > { %v6195_v9 = vpop.f32.mrf.mxu3 }
 0x542   : > { %v6146_v4 = vpop.f32.mrf.mxu2  ;;  %v6051_v46 = vpop.f32.mrf.mxu0 }
 0x543   : > { %v6147_v29 = vadd.f32 %v6146_v4, %v6098_v54  ;;  %v6052_v30 = vadd.f32 %v6051_v46, %v14322_v59  ;;  %v6100_v20 = vpop.f32.mrf.mxu1  ;;  %v10736_v54 = vld [vmem:[%s16317_s3 + $0x668] sm:$0xf0] }
 0x544   : > { %v10808_v4 = vld [vmem:[%s16317_s3 + $0x8a8] sm:$0xf0] }
 0x545   : > { %v14362_v5 = vadd.f32 %v6195_v9, %v6147_v29  ;;  %v6101_v44 = vadd.f32 %v6100_v20, %v6052_v30  ;;  %6246 = vmatmul.bf16.gmra.mxu0 %v16518_v58  ;;  %v9905_v9 = vor.u32 %v10736_v54, %v9904_v33  ;;  %v10193_v46 = vor.u32 %v10808_v4, %v10192_v32  ;;  %v10760_v33 = vld [vmem:[%s16317_s3 + $0x728] sm:$0xf0]  ;;  %v16522_v58 = vld [vmem:[#allocation44_spill] sm:$0xff] }
 0x546   : > { %6295 = vmatmul.bf16.gmra.mxu1 %v16519_v53  ;;  %6393 = vmatmul.bf16.gmra.mxu3 %v16520_v21  ;;  %v10000_v53 = vld [vmem:[%s16317_s3 + $0x720] sm:$0xf] }
 0x547   : > { %6344 = vmatmul.bf16.gmra.mxu2 %v13188_v34  ;;  %6432 = vmatpush.bf16.msrb.mxu0 %v9905_v9 }
 0x548   : > { %6579 = vmatpush.bf16.msrb.mxu3 %v10193_v46 }
 0x549   : > { %v6198_v20 = vpop.f32.mrf.mxu3 }
 0x54a   : > { %v6149_v29 = vpop.f32.mrf.mxu2  ;;  %v6053_v21 = vpop.f32.mrf.mxu0 }
 0x54b   : > { %v6150_v30 = vadd.f32 %v6149_v29, %v6101_v44  ;;  %v6054_v61 = vadd.f32 %v6053_v21, %v14322_v59  ;;  %v6102_v63 = vpop.f32.mrf.mxu1  ;;  %v10001_v44 = vor.u32 %v10760_v33, %v10000_v53  ;;  %v10084_v53 = vld [vmem:[%s16317_s3 + $0x7c8] sm:$0xf] }
 0x54d   : > { %v14387_v34 = vadd.f32 %v6198_v20, %v6150_v30  ;;  %v6103_v54 = vadd.f32 %v6102_v63, %v6054_v61  ;;  %6481 = vmatpush.bf16.msrb.mxu1 %v10001_v44  ;;  %v16521_v20 = vld [vmem:[#allocation36_spill] sm:$0xff]  ;;  %v10781_v61 = vld [vmem:[%s16317_s3 + $0x7d0] sm:$0xf0]  ;;  %v9892_v63 = vld [vmem:[%s16317_s3 + $0x648] sm:$0xf] }
 0x54e   : > { %v10085_v33 = vor.u32 %v10781_v61, %v10084_v53  ;;  %v10180_v44 = vld [vmem:[%s16317_s3 + $0x888] sm:$0xf] }
 0x550   : > { %6531 = vmatpush.bf16.msrb.mxu2 %v10085_v33 }
 0x551   : > { %v6200_v4 = vpop.f32.mrf.mxu3 }
 0x552   : > { %v6151_v32 = vpop.f32.mrf.mxu2  ;;  %v6056_v21 = vpop.f32.mrf.mxu0 }
 0x553   : > { %v6152_v7 = vadd.f32 %v6151_v32, %v6103_v54  ;;  %v6057_v29 = vadd.f32 %v6056_v21, %v14322_v59  ;;  %v6105_v9 = vpop.f32.mrf.mxu1  ;;  %v10733_v54 = vld [vmem:[%s16317_s3 + $0x650] sm:$0xf0] }
 0x554   : > { %v10805_v32 = vld [vmem:[%s16317_s3 + $0x890] sm:$0xf0] }
 0x555   : > { %v14396_v46 = vadd.f32 %v6200_v4, %v6152_v7  ;;  %v6106_v30 = vadd.f32 %v6105_v9, %v6057_v29  ;;  %6251 = vmatmul.bf16.gmra.mxu0 %v16521_v20  ;;  %v9893_v4 = vor.u32 %v10733_v54, %v9892_v63  ;;  %v10181_v21 = vor.u32 %v10805_v32, %v10180_v44  ;;  %v10757_v63 = vld [vmem:[%s16317_s3 + $0x710] sm:$0xf0]  ;;  %v16526_v20 = vld [vmem:[#allocation45_spill] sm:$0xff] }
 0x556   : > { %6300 = vmatmul.bf16.gmra.mxu1 %v16522_v58  ;;  %6398 = vmatmul.bf16.gmra.mxu3 %v16524_v23  ;;  %v9988_v58 = vld [vmem:[%s16317_s3 + $0x708] sm:$0xf] }
 0x557   : > { %6349 = vmatmul.bf16.gmra.mxu2 %v16523_v36  ;;  %6433 = vmatpush.bf16.msrb.mxu0 %v9893_v4 }
 0x558   : > { %6580 = vmatpush.bf16.msrb.mxu3 %v10181_v21 }
 0x559   : > { %v6203_v9 = vpop.f32.mrf.mxu3 }
 0x55a   : > { %v6154_v7 = vpop.f32.mrf.mxu2  ;;  %v6058_v23 = vpop.f32.mrf.mxu0 }
 0x55b   : > { %v6155_v29 = vadd.f32 %v6154_v7, %v6106_v30  ;;  %v6059_v53 = vadd.f32 %v6058_v23, %v14322_v59  ;;  %v6107_v61 = vpop.f32.mrf.mxu1  ;;  %v9989_v30 = vor.u32 %v10757_v63, %v9988_v58  ;;  %v10072_v58 = vld [vmem:[%s16317_s3 + $0x7b0] sm:$0xf] }
 0x55d   : > { %v14421_v36 = vadd.f32 %v6203_v9, %v6155_v29  ;;  %v6108_v54 = vadd.f32 %v6107_v61, %v6059_v53  ;;  %6482 = vmatpush.bf16.msrb.mxu1 %v9989_v30  ;;  %v16525_v9 = vld [vmem:[#allocation37_spill] sm:$0xff]  ;;  %v10778_v53 = vld [vmem:[%s16317_s3 + $0x7b8] sm:$0xf0]  ;;  %v9880_v61 = vld [vmem:[%s16317_s3 + $0x630] sm:$0xf] }
 0x55e   : > { %v10073_v63 = vor.u32 %v10778_v53, %v10072_v58  ;;  %v10168_v30 = vld [vmem:[%s16317_s3 + $0x870] sm:$0xf] }
 0x560   : > { %6532 = vmatpush.bf16.msrb.mxu2 %v10073_v63 }
 0x561   : > { %v6205_v32 = vpop.f32.mrf.mxu3 }
 0x562   : > { %v6156_v44 = vpop.f32.mrf.mxu2  ;;  %v6061_v23 = vpop.f32.mrf.mxu0 }
 0x563   : > { %v6157_v33 = vadd.f32 %v6156_v44, %v6108_v54  ;;  %v6062_v7 = vadd.f32 %v6061_v23, %v14322_v59  ;;  %v6110_v4 = vpop.f32.mrf.mxu1  ;;  %v10730_v54 = vld [vmem:[%s16317_s3 + $0x638] sm:$0xf0] }
 0x564   : > { %v10802_v44 = vld [vmem:[%s16317_s3 + $0x878] sm:$0xf0] }
 0x565   : > { %v14430_v21 = vadd.f32 %v6205_v32, %v6157_v33  ;;  %v6111_v29 = vadd.f32 %v6110_v4, %v6062_v7  ;;  %6256 = vmatmul.bf16.gmra.mxu0 %v16525_v9  ;;  %v9881_v32 = vor.u32 %v10730_v54, %v9880_v61  ;;  %v10169_v23 = vor.u32 %v10802_v44, %v10168_v30  ;;  %v10754_v61 = vld [vmem:[%s16317_s3 + $0x6f8] sm:$0xf0]  ;;  %v16530_v9 = vld [vmem:[#allocation46_spill] sm:$0xff] }
 0x566   : > { %6305 = vmatmul.bf16.gmra.mxu1 %v16526_v20  ;;  %6403 = vmatmul.bf16.gmra.mxu3 %v16528_v6  ;;  %v9976_v20 = vld [vmem:[%s16317_s3 + $0x6f0] sm:$0xf] }
 0x567   : > { %6354 = vmatmul.bf16.gmra.mxu2 %v16527_v40  ;;  %6434 = vmatpush.bf16.msrb.mxu0 %v9881_v32 }
 0x568   : > { %6581 = vmatpush.bf16.msrb.mxu3 %v10169_v23 }
 0x569   : > { %v6208_v4 = vpop.f32.mrf.mxu3 }
 0x56a   : > { %v6159_v33 = vpop.f32.mrf.mxu2  ;;  %v6063_v6 = vpop.f32.mrf.mxu0 }
 0x56b   : > { %v6160_v7 = vadd.f32 %v6159_v33, %v6111_v29  ;;  %v6064_v58 = vadd.f32 %v6063_v6, %v14322_v59  ;;  %v6112_v53 = vpop.f32.mrf.mxu1  ;;  %v9977_v29 = vor.u32 %v10754_v61, %v9976_v20  ;;  %v10060_v20 = vld [vmem:[%s16317_s3 + $0x798] sm:$0xf] }
 0x56d   : > { %v14455_v40 = vadd.f32 %v6208_v4, %v6160_v7  ;;  %v6113_v54 = vadd.f32 %v6112_v53, %v6064_v58  ;;  %6483 = vmatpush.bf16.msrb.mxu1 %v9977_v29  ;;  %v16529_v4 = vld [vmem:[#allocation38_spill] sm:$0xff]  ;;  %v10775_v58 = vld [vmem:[%s16317_s3 + $0x7a0] sm:$0xf0]  ;;  %v9868_v53 = vld [vmem:[%s16317_s3 + $0x618] sm:$0xf] }
 0x56e   : > { %v10061_v61 = vor.u32 %v10775_v58, %v10060_v20  ;;  %v10156_v29 = vld [vmem:[%s16317_s3 + $0x858] sm:$0xf] }
 0x570   : > { %6533 = vmatpush.bf16.msrb.mxu2 %v10061_v61 }
 0x571   : > { %v6210_v44 = vpop.f32.mrf.mxu3 }
 0x572   : > { %v6161_v30 = vpop.f32.mrf.mxu2  ;;  %v6066_v6 = vpop.f32.mrf.mxu0 }
 0x573   : > { %v6162_v63 = vadd.f32 %v6161_v30, %v6113_v54  ;;  %v6067_v33 = vadd.f32 %v6066_v6, %v14322_v59  ;;  %v6115_v32 = vpop.f32.mrf.mxu1  ;;  %v10727_v54 = vld [vmem:[%s16317_s3 + $0x620] sm:$0xf0] }
 0x574   : > { %v10799_v30 = vld [vmem:[%s16317_s3 + $0x860] sm:$0xf0] }
 0x575   : > { %v14464_v23 = vadd.f32 %v6210_v44, %v6162_v63  ;;  %v6116_v7 = vadd.f32 %v6115_v32, %v6067_v33  ;;  %6261 = vmatmul.bf16.gmra.mxu0 %v16529_v4  ;;  %v9869_v44 = vor.u32 %v10727_v54, %v9868_v53  ;;  %v10157_v6 = vor.u32 %v10799_v30, %v10156_v29  ;;  %v10751_v53 = vld [vmem:[%s16317_s3 + $0x6e0] sm:$0xf0]  ;;  %v16534_v4 = vld [vmem:[#allocation47_spill] sm:$0xff] }
 0x576   : > { %6310 = vmatmul.bf16.gmra.mxu1 %v16530_v9  ;;  %6408 = vmatmul.bf16.gmra.mxu3 %v16532_v37  ;;  %v9964_v9 = vld [vmem:[%s16317_s3 + $0x6d8] sm:$0xf] }
 0x577   : > { %6359 = vmatmul.bf16.gmra.mxu2 %v16531_v60  ;;  %6435 = vmatpush.bf16.msrb.mxu0 %v9869_v44 }
 0x578   : > { %6582 = vmatpush.bf16.msrb.mxu3 %v10157_v6 }
 0x579   : > { %v6213_v32 = vpop.f32.mrf.mxu3 }
 0x57a   : > { %v6164_v63 = vpop.f32.mrf.mxu2  ;;  %v6068_v37 = vpop.f32.mrf.mxu0 }
 0x57b   : > { %v6165_v33 = vadd.f32 %v6164_v63, %v6116_v7  ;;  %v6069_v20 = vadd.f32 %v6068_v37, %v14322_v59  ;;  %v6117_v58 = vpop.f32.mrf.mxu1  ;;  %v9965_v7 = vor.u32 %v10751_v53, %v9964_v9  ;;  %v10048_v9 = vld [vmem:[%s16317_s3 + $0x780] sm:$0xf] }
 0x57d   : > { %v14489_v60 = vadd.f32 %v6213_v32, %v6165_v33  ;;  %v6118_v54 = vadd.f32 %v6117_v58, %v6069_v20  ;;  %6484 = vmatpush.bf16.msrb.mxu1 %v9965_v7  ;;  %v16533_v32 = vld [vmem:[#allocation39_spill] sm:$0xff]  ;;  %v10772_v20 = vld [vmem:[%s16317_s3 + $0x788] sm:$0xf0]  ;;  %v9856_v58 = vld [vmem:[%s16317_s3 + $0x600] sm:$0xf] }
 0x57e   : > { %v10049_v53 = vor.u32 %v10772_v20, %v10048_v9  ;;  %v10144_v7 = vld [vmem:[%s16317_s3 + $0x840] sm:$0xf] }
 0x580   : > { %6534 = vmatpush.bf16.msrb.mxu2 %v10049_v53 }
 0x581   : > { %v6215_v30 = vpop.f32.mrf.mxu3 }
 0x582   : > { %v6166_v29 = vpop.f32.mrf.mxu2  ;;  %v6071_v37 = vpop.f32.mrf.mxu0 }
 0x583   : > { %v6167_v61 = vadd.f32 %v6166_v29, %v6118_v54  ;;  %v6072_v63 = vadd.f32 %v6071_v37, %v14322_v59  ;;  %v6120_v44 = vpop.f32.mrf.mxu1  ;;  %v10724_v54 = vld [vmem:[%s16317_s3 + $0x608] sm:$0xf0] }
 0x584   : > { %v10796_v29 = vld [vmem:[%s16317_s3 + $0x848] sm:$0xf0] }
 0x585   : > { %v14498_v6 = vadd.f32 %v6215_v30, %v6167_v61  ;;  %v6121_v33 = vadd.f32 %v6120_v44, %v6072_v63  ;;  %6266 = vmatmul.bf16.gmra.mxu0 %v16533_v32  ;;  %v9857_v30 = vor.u32 %v10724_v54, %v9856_v58  ;;  %v10145_v37 = vor.u32 %v10796_v29, %v10144_v7  ;;  %v10748_v58 = vld [vmem:[%s16317_s3 + $0x6c8] sm:$0xf0]  ;;  %v16538_v32 = vld [vmem:[#allocation48_spill] sm:$0xff] }
 0x586   : > { %6315 = vmatmul.bf16.gmra.mxu1 %v16534_v4  ;;  %6413 = vmatmul.bf16.gmra.mxu3 %v16536_v13  ;;  %v9952_v4 = vld [vmem:[%s16317_s3 + $0x6c0] sm:$0xf] }
 0x587   : > { %6364 = vmatmul.bf16.gmra.mxu2 %v16535_v16  ;;  %6436 = vmatpush.bf16.msrb.mxu0 %v9857_v30 }
 0x588   : > { %6583 = vmatpush.bf16.msrb.mxu3 %v10145_v37 }
 0x589   : > { %v6218_v44 = vpop.f32.mrf.mxu3 }
 0x58a   : > { %v6169_v61 = vpop.f32.mrf.mxu2  ;;  %v6073_v13 = vpop.f32.mrf.mxu0 }
 0x58b   : > { %v6170_v63 = vadd.f32 %v6169_v61, %v6121_v33  ;;  %v6074_v9 = vadd.f32 %v6073_v13, %v14322_v59  ;;  %v6122_v20 = vpop.f32.mrf.mxu1  ;;  %v9953_v33 = vor.u32 %v10748_v58, %v9952_v4  ;;  %v10600_v4 = vld [vmem:[%s16317_s3 + $0x22c] sm:$0xf] }
 0x58d   : > { %v14523_v16 = vadd.f32 %v6218_v44, %v6170_v63  ;;  %v6123_v54 = vadd.f32 %v6122_v20, %v6074_v9  ;;  %6485 = vmatpush.bf16.msrb.mxu1 %v9953_v33  ;;  %v16537_v44 = vld [vmem:[#allocation40_spill] sm:$0xff]  ;;  %v10552_v20 = vld [vmem:[%s16317_s3 + $0xac] sm:$0xf] }
 0x58e   : > { %v9366_v9 = vld [vmem:[%s16317_s3 + $0x234] sm:$0xf0]  ;;  %v10624_v33 = vld [vmem:[%s16317_s3 + $0x2ec] sm:$0xf] }
 0x58f   : > { %v9369_v58 = vor.u32 %v10600_v4, %v9366_v9 }
 0x591   : > { %v6220_v29 = vpop.f32.mrf.mxu3  ;;  %6723 = vmatpush.bf16.msra.mxu2 %v9369_v58 }
 0x592   : > { %v6171_v7 = vpop.f32.mrf.mxu2  ;;  %v6076_v13 = vpop.f32.mrf.mxu0 }
 0x593   : > { %v6172_v53 = vadd.f32 %v6171_v7, %v6123_v54  ;;  %v6077_v61 = vadd.f32 %v6076_v13, %v14322_v59  ;;  %v6125_v30 = vpop.f32.mrf.mxu1  ;;  %v9174_v54 = vld [vmem:[%s16317_s3 + $0xb4] sm:$0xf0] }
 0x594   : > { %v9462_v7 = vld [vmem:[%s16317_s3 + $0x2f4] sm:$0xf0] }
 0x595   : > { %v14532_v37 = vadd.f32 %v6220_v29, %v6172_v53  ;;  %v6126_v63 = vadd.f32 %v6125_v30, %v6077_v61  ;;  %6271 = vmatmul.bf16.gmra.mxu0 %v16537_v44  ;;  %v9177_v29 = vor.u32 %v10552_v20, %v9174_v54  ;;  %v9465_v13 = vor.u32 %v10624_v33, %v9462_v7  ;;  %v9270_v20 = vld [vmem:[%s16317_s3 + $0x174] sm:$0xf0]  ;;  %v16542_v44 = vld [vmem:[#allocation49_spill] sm:$0xff] }
 0x596   : > { %6320 = vmatmul.bf16.gmra.mxu1 %v16538_v32  ;;  %6418 = vmatmul.bf16.gmra.mxu3 %v16540_v43  ;;  %v10576_v32 = vld [vmem:[%s16317_s3 + $0x16c] sm:$0xf] }
 0x597   : > { %6369 = vmatmul.bf16.gmra.mxu2 %v16539_v12  ;;  %6625 = vmatpush.bf16.msra.mxu0 %v9177_v29 }
 0x598   : > { %6772 = vmatpush.bf16.msra.mxu3 %v9465_v13 }
 0x599   : > { %v6223_v30 = vpop.f32.mrf.mxu3 }
 0x59a   : > { %v6174_v53 = vpop.f32.mrf.mxu2  ;;  %v6078_v43 = vpop.f32.mrf.mxu0 }
 0x59b   : > { %v6175_v61 = vadd.f32 %v6174_v53, %v6126_v63  ;;  %v6079_v4 = vadd.f32 %v6078_v43, %v14322_v59  ;;  %v6127_v9 = vpop.f32.mrf.mxu1  ;;  %v9273_v63 = vor.u32 %v10576_v32, %v9270_v20  ;;  %v10597_v32 = vld [vmem:[%s16317_s3 + $0x214] sm:$0xf] }
 0x59d   : > { %v14557_v12 = vadd.f32 %v6223_v30, %v6175_v61  ;;  %v6128_v54 = vadd.f32 %v6127_v9, %v6079_v4  ;;  %6674 = vmatpush.bf16.msra.mxu1 %v9273_v63  ;;  %v16541_v30 = vld [vmem:[#allocation41_spill] sm:$0xff]  ;;  %v10549_v9 = vld [vmem:[%s16317_s3 + $0x94] sm:$0xf] }
 0x59e   : > { %v9354_v4 = vld [vmem:[%s16317_s3 + $0x21c] sm:$0xf0]  ;;  %v10621_v63 = vld [vmem:[%s16317_s3 + $0x2d4] sm:$0xf] }
 0x59f   : > { %v9357_v20 = vor.u32 %v10597_v32, %v9354_v4 }
 0x5a1   : > { %v6225_v7 = vpop.f32.mrf.mxu3  ;;  %6724 = vmatpush.bf16.msra.mxu2 %v9357_v20 }
 0x5a2   : > { %v6176_v33 = vpop.f32.mrf.mxu2  ;;  %v6081_v43 = vpop.f32.mrf.mxu0 }
 0x5a3   : > { %v6177_v58 = vadd.f32 %v6176_v33, %v6128_v54  ;;  %v6082_v53 = vadd.f32 %v6081_v43, %v14322_v59  ;;  %v6130_v29 = vpop.f32.mrf.mxu1  ;;  %v9162_v54 = vld [vmem:[%s16317_s3 + $0x9c] sm:$0xf0] }
 0x5a4   : > { %v9450_v33 = vld [vmem:[%s16317_s3 + $0x2dc] sm:$0xf0] }
 0x5a5   : > { %v14566_v13 = vadd.f32 %v6225_v7, %v6177_v58  ;;  %v6131_v61 = vadd.f32 %v6130_v29, %v6082_v53  ;;  %6276 = vmatmul.bf16.gmra.mxu0 %v16541_v30  ;;  %v9165_v7 = vor.u32 %v10549_v9, %v9162_v54  ;;  %v9453_v43 = vor.u32 %v10621_v63, %v9450_v33  ;;  %v9258_v9 = vld [vmem:[%s16317_s3 + $0x15c] sm:$0xf0] }
 0x5a6   : > { %6325 = vmatmul.bf16.gmra.mxu1 %v16542_v44  ;;  %6423 = vmatmul.bf16.gmra.mxu3 %v16544_v48  ;;  %v10573_v44 = vld [vmem:[%s16317_s3 + $0x154] sm:$0xf] }
 0x5a7   : > { %6374 = vmatmul.bf16.gmra.mxu2 %v16543_v8  ;;  %6626 = vmatpush.bf16.msra.mxu0 %v9165_v7 }
 0x5a8   : > { %6773 = vmatpush.bf16.msra.mxu3 %v9453_v43 }
 0x5a9   : > { %v6228_v29 = vpop.f32.mrf.mxu3 }
 0x5aa   : > { %v6179_v58 = vpop.f32.mrf.mxu2  ;;  %v6083_v48 = vpop.f32.mrf.mxu0 }
 0x5ab   : > { %v6180_v53 = vadd.f32 %v6179_v58, %v6131_v61  ;;  %v6084_v32 = vadd.f32 %v6083_v48, %v14322_v59  ;;  %v6132_v4 = vpop.f32.mrf.mxu1  ;;  %v9261_v61 = vor.u32 %v10573_v44, %v9258_v9  ;;  %v10594_v44 = vld [vmem:[%s16317_s3 + $0x1fc] sm:$0xf] }
 0x5ac   : > { %v10618_v9 = vld [vmem:[%s16317_s3 + $0x2bc] sm:$0xf] }
 0x5ad   : > { %v14591_v8 = vadd.f32 %v6228_v29, %v6180_v53  ;;  %v6133_v54 = vadd.f32 %v6132_v4, %v6084_v32  ;;  %6675 = vmatpush.bf16.msra.mxu1 %v9261_v61  ;;  %v16545_v53 = vld [vmem:[#allocation66_spill] sm:$0xff]  ;;  %v10546_v29 = vld [vmem:[%s16317_s3 + $0x7c] sm:$0xf] }
 0x5ae   : > { %v9150_v4 = vld [vmem:[%s16317_s3 + $0x84] sm:$0xf0] }
 0x5b1   : > { %v6230_v33 = vpop.f32.mrf.mxu3 }
 0x5b2   : > { %v6181_v63 = vpop.f32.mrf.mxu2  ;;  %v6242_v48 = vpop.f32.mrf.mxu0 }
 0x5b3   : > { %v6182_v20 = vadd.f32 %v6181_v63, %v6133_v54  ;;  %v6243_v59 = vadd.f32 %v6242_v48, %v14353_v22  ;;  %v6291_v58 = vpop.f32.mrf.mxu1  ;;  %v9342_v22 = vld [vmem:[%s16317_s3 + $0x204] sm:$0xf0]  ;;  %v9153_v63 = vor.u32 %v10546_v29, %v9150_v4 }
 0x5b4   : > { %v9345_v32 = vor.u32 %v10594_v44, %v9342_v22  ;;  %v9438_v54 = vld [vmem:[%s16317_s3 + $0x2c4] sm:$0xf0] }
 0x5b5   : > { %v14600_v7 = vadd.f32 %v6230_v33, %v6182_v20  ;;  %v6292_v43 = vadd.f32 %v6291_v58, %v6243_v59  ;;  %6437 = vmatmul.bf16.vlgmr.msrb.gmra.mxu0 %v16545_v53  ;;  %v9441_v20 = vor.u32 %v10618_v9, %v9438_v54  ;;  %v9246_v29 = vld [vmem:[%s16317_s3 + $0x144] sm:$0xf0] }
 0x5b6   : > { %6486 = vmatmul.bf16.vlgmr.msrb.gmra.mxu1 %v13748_v52  ;;  %6584 = vmatmul.bf16.vlgmr.msrb.gmra.mxu3 %v14085_v38  ;;  %v10570_v38 = vld [vmem:[%s16317_s3 + $0x13c] sm:$0xf] }
 0x5b7   : > { %6535 = vmatmul.bf16.vlgmr.msrb.gmra.mxu2 %v14067_v3  ;;  %6627 = vmatpush.bf16.msra.mxu0 %v9153_v63 }
 0x5b8   : > { %6725 = vmatpush.bf16.msra.mxu2 %v9345_v32  ;;  %6774 = vmatpush.bf16.msra.mxu3 %v9441_v20 }
 0x5b9   : > { %v6389_v48 = vpop.f32.mrf.mxu3 }
 0x5ba   : > { %v6340_v61 = vpop.f32.mrf.mxu2  ;;  %v6244_v59 = vpop.f32.mrf.mxu0 }
 0x5bb   : > { %v6341_v33 = vadd.f32 %v6340_v61, %v6292_v43  ;;  %v6245_v58 = vadd.f32 %v6244_v59, %v14362_v5  ;;  %v6293_v44 = vpop.f32.mrf.mxu1  ;;  %v9249_v43 = vor.u32 %v10570_v38, %v9246_v29  ;;  %v10591_v38 = vld [vmem:[%s16317_s3 + $0x1e4] sm:$0xf] }
 0x5bc   : > { %v10543_v59 = vld [vmem:[%s16317_s3 + $0x64] sm:$0xf] }
 0x5bd   : > { %v14625_v22 = vadd.f32 %v6389_v48, %v6341_v33  ;;  %v6294_v4 = vadd.f32 %v6293_v44, %v6245_v58  ;;  %6676 = vmatpush.bf16.msra.mxu1 %v9249_v43  ;;  %v16546_v48 = vld [vmem:[#allocation67_spill] sm:$0xff]  ;;  %v10615_v29 = vld [vmem:[%s16317_s3 + $0x2a4] sm:$0xf] }
 0x5be   : > { %v9138_v44 = vld [vmem:[%s16317_s3 + $0x6c] sm:$0xf0] }
 0x5c1   : > { %v6391_v54 = vpop.f32.mrf.mxu3 }
 0x5c2   : > { %v6342_v9 = vpop.f32.mrf.mxu2  ;;  %v6247_v5 = vpop.f32.mrf.mxu0 }
 0x5c3   : > { %v6343_v32 = vadd.f32 %v6342_v9, %v6294_v4  ;;  %v6248_v61 = vadd.f32 %v6247_v5, %v14387_v34  ;;  %v6296_v63 = vpop.f32.mrf.mxu1  ;;  %v9330_v34 = vld [vmem:[%s16317_s3 + $0x1ec] sm:$0xf0]  ;;  %v9141_v9 = vor.u32 %v10543_v59, %v9138_v44 }
 0x5c4   : > { %v9333_v58 = vor.u32 %v10591_v38, %v9330_v34  ;;  %v9426_v4 = vld [vmem:[%s16317_s3 + $0x2ac] sm:$0xf0] }
 0x5c5   : > { %v14634_v20 = vadd.f32 %v6391_v54, %v6343_v32  ;;  %v6297_v33 = vadd.f32 %v6296_v63, %v6248_v61  ;;  %6442 = vmatmul.bf16.gmra.mxu0 %v16546_v48  ;;  %v9429_v32 = vor.u32 %v10615_v29, %v9426_v4  ;;  %v9234_v59 = vld [vmem:[%s16317_s3 + $0x12c] sm:$0xf0] }
 0x5c6   : > { %6491 = vmatmul.bf16.gmra.mxu1 %v13788_v19  ;;  %6589 = vmatmul.bf16.gmra.mxu3 %v14130_v57  ;;  %v10567_v57 = vld [vmem:[%s16317_s3 + $0x124] sm:$0xf] }
 0x5c7   : > { %6540 = vmatmul.bf16.gmra.mxu2 %v14103_v15  ;;  %6628 = vmatpush.bf16.msra.mxu0 %v9141_v9 }
 0x5c8   : > { %6726 = vmatpush.bf16.msra.mxu2 %v9333_v58  ;;  %6775 = vmatpush.bf16.msra.mxu3 %v9429_v32 }
 0x5c9   : > { %v6394_v5 = vpop.f32.mrf.mxu3 }
 0x5ca   : > { %v6345_v43 = vpop.f32.mrf.mxu2  ;;  %v6249_v61 = vpop.f32.mrf.mxu0 }
 0x5cb   : > { %v6346_v54 = vadd.f32 %v6345_v43, %v6297_v33  ;;  %v6250_v63 = vadd.f32 %v6249_v61, %v14396_v46  ;;  %v6298_v38 = vpop.f32.mrf.mxu1  ;;  %v9237_v33 = vor.u32 %v10567_v57, %v9234_v59  ;;  %v10588_v57 = vld [vmem:[%s16317_s3 + $0x1cc] sm:$0xf] }
 0x5cc   : > { %v10540_v61 = vld [vmem:[%s16317_s3 + $0x4c] sm:$0xf] }
 0x5cd   : > { %v14659_v34 = vadd.f32 %v6394_v5, %v6346_v54  ;;  %v6299_v44 = vadd.f32 %v6298_v38, %v6250_v63  ;;  %6677 = vmatpush.bf16.msra.mxu1 %v9237_v33  ;;  %v16547_v5 = vld [vmem:[#allocation68_spill] sm:$0xff]  ;;  %v10612_v59 = vld [vmem:[%s16317_s3 + $0x28c] sm:$0xf] }
 0x5ce   : > { %v9126_v38 = vld [vmem:[%s16317_s3 + $0x54] sm:$0xf0] }
 0x5d1   : > { %v6396_v4 = vpop.f32.mrf.mxu3 }
 0x5d2   : > { %v6347_v29 = vpop.f32.mrf.mxu2  ;;  %v6252_v46 = vpop.f32.mrf.mxu0 }
 0x5d3   : > { %v6348_v58 = vadd.f32 %v6347_v29, %v6299_v44  ;;  %v6253_v43 = vadd.f32 %v6252_v46, %v14421_v36  ;;  %v6301_v9 = vpop.f32.mrf.mxu1  ;;  %v9318_v36 = vld [vmem:[%s16317_s3 + $0x1d4] sm:$0xf0]  ;;  %v9129_v29 = vor.u32 %v10540_v61, %v9126_v38 }
 0x5d4   : > { %v9321_v63 = vor.u32 %v10588_v57, %v9318_v36  ;;  %v9414_v44 = vld [vmem:[%s16317_s3 + $0x294] sm:$0xf0] }
 0x5d5   : > { %v14668_v32 = vadd.f32 %v6396_v4, %v6348_v58  ;;  %v6302_v54 = vadd.f32 %v6301_v9, %v6253_v43  ;;  %6447 = vmatmul.bf16.gmra.mxu0 %v16547_v5  ;;  %v9417_v58 = vor.u32 %v10612_v59, %v9414_v44  ;;  %v9222_v61 = vld [vmem:[%s16317_s3 + $0x114] sm:$0xf0] }
 0x5d6   : > { %6496 = vmatmul.bf16.gmra.mxu1 %v13828_v51  ;;  %6594 = vmatmul.bf16.gmra.mxu3 %v14166_v25  ;;  %v10564_v25 = vld [vmem:[%s16317_s3 + $0x10c] sm:$0xf] }
 0x5d7   : > { %6545 = vmatmul.bf16.gmra.mxu2 %v14139_v11  ;;  %6629 = vmatpush.bf16.msra.mxu0 %v9129_v29 }
 0x5d8   : > { %6727 = vmatpush.bf16.msra.mxu2 %v9321_v63  ;;  %6776 = vmatpush.bf16.msra.mxu3 %v9417_v58 }
 0x5d9   : > { %v6399_v46 = vpop.f32.mrf.mxu3 }
 0x5da   : > { %v6350_v33 = vpop.f32.mrf.mxu2  ;;  %v6254_v43 = vpop.f32.mrf.mxu0 }
 0x5db   : > { %v6351_v4 = vadd.f32 %v6350_v33, %v6302_v54  ;;  %v6255_v9 = vadd.f32 %v6254_v43, %v14430_v21  ;;  %v6303_v57 = vpop.f32.mrf.mxu1  ;;  %v9225_v54 = vor.u32 %v10564_v25, %v9222_v61  ;;  %v10585_v25 = vld [vmem:[%s16317_s3 + $0x1b4] sm:$0xf] }
 0x5dc   : > { %v10537_v43 = vld [vmem:[%s16317_s3 + $0x34] sm:$0xf] }
 0x5dd   : > { %v14693_v36 = vadd.f32 %v6399_v46, %v6351_v4  ;;  %v6304_v38 = vadd.f32 %v6303_v57, %v6255_v9  ;;  %6678 = vmatpush.bf16.msra.mxu1 %v9225_v54  ;;  %v16548_v46 = vld [vmem:[#allocation69_spill] sm:$0xff]  ;;  %v10609_v61 = vld [vmem:[%s16317_s3 + $0x274] sm:$0xf] }
 0x5de   : > { %v9114_v57 = vld [vmem:[%s16317_s3 + $0x3c] sm:$0xf0] }
 0x5e1   : > { %v6401_v44 = vpop.f32.mrf.mxu3 }
 0x5e2   : > { %v6352_v59 = vpop.f32.mrf.mxu2  ;;  %v6257_v21 = vpop.f32.mrf.mxu0 }
 0x5e3   : > { %v6353_v63 = vadd.f32 %v6352_v59, %v6304_v38  ;;  %v6258_v33 = vadd.f32 %v6257_v21, %v14455_v40  ;;  %v6306_v29 = vpop.f32.mrf.mxu1  ;;  %v9306_v40 = vld [vmem:[%s16317_s3 + $0x1bc] sm:$0xf0]  ;;  %v9117_v59 = vor.u32 %v10537_v43, %v9114_v57 }
 0x5e4   : > { %v9309_v9 = vor.u32 %v10585_v25, %v9306_v40  ;;  %v9402_v38 = vld [vmem:[%s16317_s3 + $0x27c] sm:$0xf0] }
 0x5e5   : > { %v14702_v58 = vadd.f32 %v6401_v44, %v6353_v63  ;;  %v6307_v4 = vadd.f32 %v6306_v29, %v6258_v33  ;;  %6452 = vmatmul.bf16.gmra.mxu0 %v16548_v46  ;;  %v9405_v63 = vor.u32 %v10609_v61, %v9402_v38  ;;  %v9210_v43 = vld [vmem:[%s16317_s3 + $0xfc] sm:$0xf0] }
 0x5e6   : > { %6501 = vmatmul.bf16.gmra.mxu1 %v13868_v47  ;;  %6599 = vmatmul.bf16.gmra.mxu3 %v14202_v2  ;;  %v10561_v2 = vld [vmem:[%s16317_s3 + $0xf4] sm:$0xf] }
 0x5e7   : > { %6550 = vmatmul.bf16.gmra.mxu2 %v14175_v62  ;;  %6630 = vmatpush.bf16.msra.mxu0 %v9117_v59 }
 0x5e8   : > { %6728 = vmatpush.bf16.msra.mxu2 %v9309_v9  ;;  %6777 = vmatpush.bf16.msra.mxu3 %v9405_v63 }
 0x5e9   : > { %v6404_v21 = vpop.f32.mrf.mxu3 }
 0x5ea   : > { %v6355_v54 = vpop.f32.mrf.mxu2  ;;  %v6259_v33 = vpop.f32.mrf.mxu0 }
 0x5eb   : > { %v6356_v44 = vadd.f32 %v6355_v54, %v6307_v4  ;;  %v6260_v29 = vadd.f32 %v6259_v33, %v14464_v23  ;;  %v6308_v25 = vpop.f32.mrf.mxu1  ;;  %v9213_v4 = vor.u32 %v10561_v2, %v9210_v43  ;;  %v10582_v2 = vld [vmem:[%s16317_s3 + $0x19c] sm:$0xf] }
 0x5ec   : > { %v10534_v33 = vld [vmem:[%s16317_s3 + $0x1c] sm:$0xf] }
 0x5ed   : > { %v14727_v40 = vadd.f32 %v6404_v21, %v6356_v44  ;;  %v6309_v57 = vadd.f32 %v6308_v25, %v6260_v29  ;;  %6679 = vmatpush.bf16.msra.mxu1 %v9213_v4  ;;  %v16549_v21 = vld [vmem:[#allocation70_spill] sm:$0xff]  ;;  %v10606_v43 = vld [vmem:[%s16317_s3 + $0x25c] sm:$0xf] }
 0x5ee   : > { %v9102_v25 = vld [vmem:[%s16317_s3 + $0x24] sm:$0xf0] }
 0x5f1   : > { %v6406_v38 = vpop.f32.mrf.mxu3 }
 0x5f2   : > { %v6357_v61 = vpop.f32.mrf.mxu2  ;;  %v6262_v23 = vpop.f32.mrf.mxu0 }
 0x5f3   : > { %v6358_v9 = vadd.f32 %v6357_v61, %v6309_v57  ;;  %v6263_v54 = vadd.f32 %v6262_v23, %v14489_v60  ;;  %v6311_v59 = vpop.f32.mrf.mxu1  ;;  %v9294_v60 = vld [vmem:[%s16317_s3 + $0x1a4] sm:$0xf0]  ;;  %v9105_v61 = vor.u32 %v10534_v33, %v9102_v25 }
 0x5f4   : > { %v9297_v29 = vor.u32 %v10582_v2, %v9294_v60  ;;  %v9390_v57 = vld [vmem:[%s16317_s3 + $0x264] sm:$0xf0] }
 0x5f5   : > { %v14736_v63 = vadd.f32 %v6406_v38, %v6358_v9  ;;  %v6312_v44 = vadd.f32 %v6311_v59, %v6263_v54  ;;  %6457 = vmatmul.bf16.gmra.mxu0 %v16549_v21  ;;  %v9393_v9 = vor.u32 %v10606_v43, %v9390_v57  ;;  %v9198_v33 = vld [vmem:[%s16317_s3 + $0xe4] sm:$0xf0] }
 0x5f6   : > { %6506 = vmatmul.bf16.gmra.mxu1 %v13908_v0  ;;  %6604 = vmatmul.bf16.gmra.mxu3 %v14238_v24  ;;  %v10558_v24 = vld [vmem:[%s16317_s3 + $0xdc] sm:$0xf] }
 0x5f7   : > { %6555 = vmatmul.bf16.gmra.mxu2 %v14211_v35  ;;  %6631 = vmatpush.bf16.msra.mxu0 %v9105_v61 }
 0x5f8   : > { %6729 = vmatpush.bf16.msra.mxu2 %v9297_v29  ;;  %6778 = vmatpush.bf16.msra.mxu3 %v9393_v9 }
 0x5f9   : > { %v6409_v23 = vpop.f32.mrf.mxu3 }
 0x5fa   : > { %v6360_v4 = vpop.f32.mrf.mxu2  ;;  %v6264_v54 = vpop.f32.mrf.mxu0 }
 0x5fb   : > { %v6361_v38 = vadd.f32 %v6360_v4, %v6312_v44  ;;  %v6265_v59 = vadd.f32 %v6264_v54, %v14498_v6  ;;  %v6313_v2 = vpop.f32.mrf.mxu1  ;;  %v9201_v44 = vor.u32 %v10558_v24, %v9198_v33  ;;  %v10579_v24 = vld [vmem:[%s16317_s3 + $0x184] sm:$0xf] }
 0x5fc   : > { %v10531_v54 = vld [vmem:[%s16317_s3 + $0x4] sm:$0xf] }
 0x5fd   : > { %v14761_v60 = vadd.f32 %v6409_v23, %v6361_v38  ;;  %v6314_v25 = vadd.f32 %v6313_v2, %v6265_v59  ;;  %6680 = vmatpush.bf16.msra.mxu1 %v9201_v44  ;;  %v16550_v23 = vld [vmem:[#allocation71_spill] sm:$0xff]  ;;  %v10603_v33 = vld [vmem:[%s16317_s3 + $0x244] sm:$0xf] }
 0x5fe   : > { %v9090_v2 = vld [vmem:[%s16317_s3 + $0xc] sm:$0xf0] }
 0x601   : > { %v6411_v57 = vpop.f32.mrf.mxu3 }
 0x602   : > { %v6362_v43 = vpop.f32.mrf.mxu2  ;;  %v6267_v6 = vpop.f32.mrf.mxu0 }
 0x603   : > { %v6363_v29 = vadd.f32 %v6362_v43, %v6314_v25  ;;  %v6268_v4 = vadd.f32 %v6267_v6, %v14523_v16  ;;  %v6316_v61 = vpop.f32.mrf.mxu1  ;;  %v9282_v16 = vld [vmem:[%s16317_s3 + $0x18c] sm:$0xf0]  ;;  %v9093_v43 = vor.u32 %v10531_v54, %v9090_v2 }
 0x604   : > { %v9285_v59 = vor.u32 %v10579_v24, %v9282_v16  ;;  %v9378_v25 = vld [vmem:[%s16317_s3 + $0x24c] sm:$0xf0] }
 0x605   : > { %v14770_v9 = vadd.f32 %v6411_v57, %v6363_v29  ;;  %v6317_v38 = vadd.f32 %v6316_v61, %v6268_v4  ;;  %6462 = vmatmul.bf16.gmra.mxu0 %v16550_v23  ;;  %v9381_v29 = vor.u32 %v10603_v33, %v9378_v25  ;;  %v9186_v54 = vld [vmem:[%s16317_s3 + $0xcc] sm:$0xf0] }
 0x606   : > { %6511 = vmatmul.bf16.gmra.mxu1 %v13948_v28  ;;  %6609 = vmatmul.bf16.gmra.mxu3 %v14274_v26  ;;  %v10555_v26 = vld [vmem:[%s16317_s3 + $0xc4] sm:$0xf] }
 0x607   : > { %6560 = vmatmul.bf16.gmra.mxu2 %v14247_v41  ;;  %6632 = vmatpush.bf16.msra.mxu0 %v9093_v43 }
 0x608   : > { %6730 = vmatpush.bf16.msra.mxu2 %v9285_v59  ;;  %6779 = vmatpush.bf16.msra.mxu3 %v9381_v29 }
 0x609   : > { %v6414_v6 = vpop.f32.mrf.mxu3 }
 0x60a   : > { %v6365_v44 = vpop.f32.mrf.mxu2  ;;  %v6269_v4 = vpop.f32.mrf.mxu0 }
 0x60b   : > { %v6366_v57 = vadd.f32 %v6365_v44, %v6317_v38  ;;  %v6270_v61 = vadd.f32 %v6269_v4, %v14532_v37  ;;  %v6318_v24 = vpop.f32.mrf.mxu1  ;;  %v9189_v38 = vor.u32 %v10555_v26, %v9186_v54  ;;  %v10696_v26 = vld [vmem:[%s16317_s3 + $0x52c] sm:$0xf] }
 0x60c   : > { %v10648_v4 = vld [vmem:[%s16317_s3 + $0x3ac] sm:$0xf] }
 0x60d   : > { %v14795_v16 = vadd.f32 %v6414_v6, %v6366_v57  ;;  %v6319_v2 = vadd.f32 %v6318_v24, %v6270_v61  ;;  %6681 = vmatpush.bf16.msra.mxu1 %v9189_v38  ;;  %v16551_v6 = vld [vmem:[#allocation72_spill] sm:$0xff]  ;;  %v10720_v54 = vld [vmem:[%s16317_s3 + $0x5ec] sm:$0xf] }
 0x60e   : > { %v9558_v24 = vld [vmem:[%s16317_s3 + $0x3b4] sm:$0xf0] }
 0x611   : > { %v6416_v25 = vpop.f32.mrf.mxu3 }
 0x612   : > { %v6367_v33 = vpop.f32.mrf.mxu2  ;;  %v6272_v37 = vpop.f32.mrf.mxu0 }
 0x613   : > { %v6368_v59 = vadd.f32 %v6367_v33, %v6319_v2  ;;  %v6273_v44 = vadd.f32 %v6272_v37, %v14557_v12  ;;  %v6321_v43 = vpop.f32.mrf.mxu1  ;;  %v9750_v12 = vld [vmem:[%s16317_s3 + $0x534] sm:$0xf0]  ;;  %v9561_v33 = vor.u32 %v10648_v4, %v9558_v24 }
 0x614   : > { %v9753_v61 = vor.u32 %v10696_v26, %v9750_v12  ;;  %v9846_v2 = vld [vmem:[%s16317_s3 + $0x5f4] sm:$0xf0] }
 0x615   : > { %v14804_v29 = vadd.f32 %v6416_v25, %v6368_v59  ;;  %v6322_v57 = vadd.f32 %v6321_v43, %v6273_v44  ;;  %6467 = vmatmul.bf16.gmra.mxu0 %v16551_v6  ;;  %v9849_v59 = vor.u32 %v10720_v54, %v9846_v2  ;;  %v9654_v4 = vld [vmem:[%s16317_s3 + $0x474] sm:$0xf0] }
 0x616   : > { %6516 = vmatmul.bf16.gmra.mxu1 %v13988_v1  ;;  %6614 = vmatmul.bf16.gmra.mxu3 %v14310_v49 }
 0x617   : > { %6565 = vmatmul.bf16.gmra.mxu2 %v14283_v50  ;;  %6821 = vmatpush.bf16.msrb.mxu0 %v9561_v33  ;;  %v10672_v50 = vld [vmem:[%s16317_s3 + $0x46c] sm:$0xf] }
 0x618   : > { %6919 = vmatpush.bf16.msrb.mxu2 %v9753_v61  ;;  %6968 = vmatpush.bf16.msrb.mxu3 %v9849_v59 }
 0x619   : > { %v6419_v37 = vpop.f32.mrf.mxu3 }
 0x61a   : > { %v6370_v38 = vpop.f32.mrf.mxu2  ;;  %v6274_v44 = vpop.f32.mrf.mxu0 }
 0x61b   : > { %v6371_v25 = vadd.f32 %v6370_v38, %v6322_v57  ;;  %v6275_v43 = vadd.f32 %v6274_v44, %v14566_v13  ;;  %v6323_v26 = vpop.f32.mrf.mxu1  ;;  %v9657_v57 = vor.u32 %v10672_v50, %v9654_v4  ;;  %v10693_v50 = vld [vmem:[%s16317_s3 + $0x514] sm:$0xf] }
 0x61c   : > { %v10717_v44 = vld [vmem:[%s16317_s3 + $0x5d4] sm:$0xf] }
 0x61d   : > { %v14829_v12 = vadd.f32 %v6419_v37, %v6371_v25  ;;  %v6324_v49 = vadd.f32 %v6323_v26, %v6275_v43  ;;  %6870 = vmatpush.bf16.msrb.mxu1 %v9657_v57  ;;  %v9546_v37 = vld [vmem:[%s16317_s3 + $0x39c] sm:$0xf0] }
 0x61e   : > { %v9834_v43 = vld [vmem:[%s16317_s3 + $0x5dc] sm:$0xf0] }
 0x61f   : > { %v9837_v57 = vor.u32 %v10717_v44, %v9834_v43 }
 0x621   : > { %v6421_v54 = vpop.f32.mrf.mxu3  ;;  %6969 = vmatpush.bf16.msrb.mxu3 %v9837_v57  ;;  %v10690_v57 = vld [vmem:[%s16317_s3 + $0x4fc] sm:$0xf] }
 0x622   : > { %v6372_v24 = vpop.f32.mrf.mxu2  ;;  %v6277_v13 = vpop.f32.mrf.mxu0 }
 0x623   : > { %v6373_v61 = vadd.f32 %v6372_v24, %v6324_v49  ;;  %v6278_v2 = vadd.f32 %v6277_v13, %v14591_v8  ;;  %v6326_v38 = vpop.f32.mrf.mxu1  ;;  %v9738_v8 = vld [vmem:[%s16317_s3 + $0x51c] sm:$0xf0]  ;;  %v10645_v49 = vld [vmem:[%s16317_s3 + $0x394] sm:$0xf] }
 0x624   : > { %v9741_v25 = vor.u32 %v10693_v50, %v9738_v8  ;;  %v9549_v4 = vor.u32 %v10645_v49, %v9546_v37  ;;  %v10669_v8 = vld [vmem:[%s16317_s3 + $0x454] sm:$0xf] }
 0x625   : > { %v14838_v33 = vadd.f32 %v6421_v54, %v6373_v61  ;;  %v6327_v59 = vadd.f32 %v6326_v38, %v6278_v2  ;;  %6472 = vmatmul.bf16.gmra.mxu0 %v13714_v31 }
 0x626   : > { %6521 = vmatmul.bf16.gmra.mxu1 %v14026_v42  ;;  %6619 = vmatmul.bf16.gmra.mxu3 %v14350_v18 }
 0x627   : > { %6570 = vmatmul.bf16.gmra.mxu2 %v14324_v39  ;;  %6822 = vmatpush.bf16.msrb.mxu0 %v9549_v4 }
 0x628   : > { %6920 = vmatpush.bf16.msrb.mxu2 %v9741_v25 }
 0x629   : > { %v6424_v61 = vpop.f32.mrf.mxu3 }
 0x62a   : > { %v6375_v26 = vpop.f32.mrf.mxu2  ;;  %v6279_v54 = vpop.f32.mrf.mxu0 }
 0x62b   : > { %v6376_v24 = vadd.f32 %v6375_v26, %v6327_v59  ;;  %v6280_v13 = vadd.f32 %v6279_v54, %v14600_v7  ;;  %v6328_v2 = vpop.f32.mrf.mxu1  ;;  %v9642_v59 = vld [vmem:[%s16317_s3 + $0x45c] sm:$0xf0] }
 0x62c   : > { %v9645_v49 = vor.u32 %v10669_v8, %v9642_v59 }
 0x62d   : > { %v14863_v38 = vadd.f32 %v6424_v61, %v6376_v24  ;;  %v6329_v50 = vadd.f32 %v6328_v2, %v6280_v13  ;;  %v9726_v24 = vld [vmem:[%s16317_s3 + $0x504] sm:$0xf0]  ;;  %v10714_v2 = vld [vmem:[%s16317_s3 + $0x5bc] sm:$0xf] }
 0x62e   : > { %6871 = vmatpush.bf16.msrb.mxu1 %v9645_v49  ;;  %v9729_v54 = vor.u32 %v10690_v57, %v9726_v24  ;;  %v9534_v13 = vld [vmem:[%s16317_s3 + $0x384] sm:$0xf0]  ;;  %v10666_v57 = vld [vmem:[%s16317_s3 + $0x43c] sm:$0xf] }
 0x62f   : > { %v9630_v24 = vld [vmem:[%s16317_s3 + $0x444] sm:$0xf0] }
 0x630   : > { %6921 = vmatpush.bf16.msrb.mxu2 %v9729_v54 }
 0x631   : > { %v6426_v7 = vpop.f32.mrf.mxu3 }
 0x632   : > { %v6377_v25 = vpop.f32.mrf.mxu2  ;;  %v6438_v44 = vpop.f32.mrf.mxu0 }
 0x633   : > { %v6378_v37 = vadd.f32 %v6377_v25, %v6329_v50  ;;  %v6487_v43 = vpop.f32.mrf.mxu1  ;;  %v6439_v4 = vadd.f32 %v6438_v44, %v14625_v22  ;;  %v10642_v22 = vld [vmem:[%s16317_s3 + $0x37c] sm:$0xf]  ;;  %v9822_v50 = vld [vmem:[%s16317_s3 + $0x5c4] sm:$0xf0] }
 0x634   : > { %v9537_v59 = vor.u32 %v10642_v22, %v9534_v13  ;;  %v9825_v49 = vor.u32 %v10714_v2, %v9822_v50  ;;  %v9633_v22 = vor.u32 %v10666_v57, %v9630_v24  ;;  %v9810_v57 = vld [vmem:[%s16317_s3 + $0x5ac] sm:$0xf0] }
 0x635   : > { %v14872_v26 = vadd.f32 %v6426_v7, %v6378_v37  ;;  %6633 = vmatmul.bf16.vlgmr.msra.gmra.mxu0 %v11622_v56  ;;  %v6488_v61 = vadd.f32 %v6487_v43, %v6439_v4 }
 0x636   : > { %6682 = vmatmul.bf16.vlgmr.msra.gmra.mxu1 %v11917_v10  ;;  %6780 = vmatmul.bf16.vlgmr.msra.gmra.mxu3 %v16479_v17 }
 0x637   : > { %6731 = vmatmul.bf16.vlgmr.msra.gmra.mxu2 %v12239_v55  ;;  %6823 = vmatpush.bf16.msrb.mxu0 %v9537_v59 }
 0x638   : > { %6970 = vmatpush.bf16.msrb.mxu3 %v9825_v49  ;;  %6872 = vmatpush.bf16.msrb.mxu1 %v9633_v22  ;;  %v16552_v49 = vld [vmem:[#allocation21_spill] sm:$0xff] }
 0x639   : > { %v6585_v37 = vpop.f32.mrf.mxu3 }
 0x63a   : > { %v6536_v8 = vpop.f32.mrf.mxu2  ;;  %v6440_v7 = vpop.f32.mrf.mxu0 }
 0x63b   : > { %v6537_v25 = vadd.f32 %v6536_v8, %v6488_v61  ;;  %v6489_v44 = vpop.f32.mrf.mxu1  ;;  %v6441_v4 = vadd.f32 %v6440_v7, %v14634_v20 }
 0x63d   : > { %v6586_v43 = vadd.f32 %v6585_v37, %v6537_v25  ;;  %v6490_v61 = vadd.f32 %v6489_v44, %v6441_v4  ;;  %v10687_v25 = vld [vmem:[%s16317_s3 + $0x4e4] sm:$0xf]  ;;  %v9714_v37 = vld [vmem:[%s16317_s3 + $0x4ec] sm:$0xf0] }
 0x63e   : > { %v9717_v44 = vor.u32 %v10687_v25, %v9714_v37  ;;  %v10711_v4 = vld [vmem:[%s16317_s3 + $0x5a4] sm:$0xf]  ;;  %v9618_v25 = vld [vmem:[%s16317_s3 + $0x42c] sm:$0xf0] }
 0x63f   : > { %7801 = vst [vmem:[%s14900_s7] sm:$0xff] %v6586_v43  ;;  %v9522_v43 = vld [vmem:[%s16317_s3 + $0x36c] sm:$0xf0] }
 0x640   : > { %6922 = vmatpush.bf16.msrb.mxu2 %v9717_v44 }
 0x641   : > { %v6587_v2 = vpop.f32.mrf.mxu3 }
 0x642   : > { %v6538_v54 = vpop.f32.mrf.mxu2  ;;  %v6443_v20 = vpop.f32.mrf.mxu0 }
 0x643   : > { %v6539_v13 = vadd.f32 %v6538_v54, %v6490_v61  ;;  %v6492_v50 = vpop.f32.mrf.mxu1  ;;  %v6444_v59 = vadd.f32 %v6443_v20, %v14659_v34  ;;  %v10639_v34 = vld [vmem:[%s16317_s3 + $0x364] sm:$0xf]  ;;  %v9813_v61 = vor.u32 %v10711_v4, %v9810_v57 }
 0x644   : > { %v9525_v22 = vor.u32 %v10639_v34, %v9522_v43 }
 0x645   : > { %v6588_v8 = vadd.f32 %v6587_v2, %v6539_v13  ;;  %6638 = vmatmul.bf16.gmra.mxu0 %v16480_v27  ;;  %v6493_v7 = vadd.f32 %v6492_v50, %v6444_v59  ;;  %6971 = vmatpush.bf16.msrb.mxu3 %v9813_v61  ;;  %v10663_v59 = vld [vmem:[%s16317_s3 + $0x424] sm:$0xf] }
 0x646   : > { %6687 = vmatmul.bf16.gmra.mxu1 %v16481_v14  ;;  %6785 = vmatmul.bf16.gmra.mxu3 %v16552_v49  ;;  %v9621_v37 = vor.u32 %v10663_v59, %v9618_v25  ;;  %v16554_v61 = vld [vmem:[#allocation13_spill] sm:$0xff]  ;;  %v9510_v59 = vld [vmem:[%s16317_s3 + $0x354] sm:$0xf0]  ;;  %v10708_v25 = vld [vmem:[%s16317_s3 + $0x58c] sm:$0xf] }
 0x647   : > { %7804 = vst [vmem:[%s14900_s7 + $0x18] sm:$0xff] %v6588_v8  ;;  %6736 = vmatmul.bf16.gmra.mxu2 %v16482_v45  ;;  %6824 = vmatpush.bf16.msrb.mxu0 %v9525_v22  ;;  %v16553_v22 = vld [vmem:[#allocation6_spill] sm:$0xff] }
 0x648   : > { %6873 = vmatpush.bf16.msrb.mxu1 %v9621_v37  ;;  %v9798_v37 = vld [vmem:[%s16317_s3 + $0x594] sm:$0xf0] }
 0x649   : > { %v6590_v13 = vpop.f32.mrf.mxu3 }
 0x64a   : > { %v6541_v24 = vpop.f32.mrf.mxu2  ;;  %v6445_v2 = vpop.f32.mrf.mxu0 }
 0x64b   : > { %v6542_v54 = vadd.f32 %v6541_v24, %v6493_v7  ;;  %v6494_v20 = vpop.f32.mrf.mxu1  ;;  %v6446_v8 = vadd.f32 %v6445_v2, %v14668_v32  ;;  %v10684_v2 = vld [vmem:[%s16317_s3 + $0x4cc] sm:$0xf] }
 0x64d   : > { %v6591_v50 = vadd.f32 %v6590_v13, %v6542_v54  ;;  %v6495_v34 = vadd.f32 %v6494_v20, %v6446_v8  ;;  %v16555_v54 = vld [vmem:[#allocation22_spill] sm:$0xff]  ;;  %v16556_v13 = vld [vmem:[#allocation23_spill] sm:$0xff]  ;;  %v9702_v20 = vld [vmem:[%s16317_s3 + $0x4d4] sm:$0xf0] }
 0x64e   : > { %v9705_v8 = vor.u32 %v10684_v2, %v9702_v20  ;;  %v10660_v20 = vld [vmem:[%s16317_s3 + $0x40c] sm:$0xf] }
 0x64f   : > { %7807 = vst [vmem:[%s14900_s7 + $0x30] sm:$0xff] %v6591_v50 }
 0x650   : > { %6923 = vmatpush.bf16.msrb.mxu2 %v9705_v8 }
 0x651   : > { %v6592_v43 = vpop.f32.mrf.mxu3 }
 0x652   : > { %v6543_v7 = vpop.f32.mrf.mxu2  ;;  %v6448_v4 = vpop.f32.mrf.mxu0 }
 0x653   : > { %v6544_v44 = vadd.f32 %v6543_v7, %v6495_v34  ;;  %v6497_v57 = vpop.f32.mrf.mxu1  ;;  %v6449_v32 = vadd.f32 %v6448_v4, %v14693_v36  ;;  %v10636_v36 = vld [vmem:[%s16317_s3 + $0x34c] sm:$0xf] }
 0x654   : > { %v9513_v7 = vor.u32 %v10636_v36, %v9510_v59  ;;  %v9606_v36 = vld [vmem:[%s16317_s3 + $0x414] sm:$0xf0] }
 0x655   : > { %v6593_v24 = vadd.f32 %v6592_v43, %v6544_v44  ;;  %6643 = vmatmul.bf16.gmra.mxu0 %v16553_v22  ;;  %v6498_v50 = vadd.f32 %v6497_v57, %v6449_v32  ;;  %v9801_v44 = vor.u32 %v10708_v25, %v9798_v37  ;;  %v16607_v22 = vld [vmem:[#allocation65_spill] sm:$0xff] }
 0x656   : > { %6692 = vmatmul.bf16.gmra.mxu1 %v16554_v61  ;;  %6790 = vmatmul.bf16.gmra.mxu3 %v16556_v13  ;;  %v16600_v13 = vld [vmem:[#allocation61_spill] sm:$0xff]  ;;  %v16604_v61 = vld [vmem:[#allocation63_spill] sm:$0xff] }
 0x657   : > { %7810 = vst [vmem:[%s14900_s7 + $0x48] sm:$0xff] %v6593_v24  ;;  %6741 = vmatmul.bf16.gmra.mxu2 %v16555_v54  ;;  %6825 = vmatpush.bf16.msrb.mxu0 %v9513_v7  ;;  %v16603_v54 = vld [vmem:[#allocation62_spill] sm:$0xff] }
 0x658   : > { %6972 = vmatpush.bf16.msrb.mxu3 %v9801_v44 }
 0x659   : > { %v6595_v4 = vpop.f32.mrf.mxu3 }
 0x65a   : > { %v6546_v34 = vpop.f32.mrf.mxu2  ;;  %v6450_v57 = vpop.f32.mrf.mxu0 }
 0x65b   : > { %v6547_v43 = vadd.f32 %v6546_v34, %v6498_v50  ;;  %v6499_v24 = vpop.f32.mrf.mxu1  ;;  %v6451_v2 = vadd.f32 %v6450_v57, %v14702_v58  ;;  %v9609_v50 = vor.u32 %v10660_v20, %v9606_v36  ;;  %v16559_v57 = vld [vmem:[#allocation24_spill] sm:$0xff] }
 0x65d   : > { %v6596_v32 = vadd.f32 %v6595_v4, %v6547_v43  ;;  %v6500_v59 = vadd.f32 %v6499_v24, %v6451_v2  ;;  %6874 = vmatpush.bf16.msrb.mxu1 %v9609_v50  ;;  %v16557_v43 = vld [vmem:[#allocation7_spill] sm:$0xff]  ;;  %v16558_v4 = vld [vmem:[#allocation14_spill] sm:$0xff]  ;;  %v9690_v2 = vld [vmem:[%s16317_s3 + $0x4bc] sm:$0xf0] }
 0x65e   : > { %v10681_v24 = vld [vmem:[%s16317_s3 + $0x4b4] sm:$0xf]  ;;  %v9498_v50 = vld [vmem:[%s16317_s3 + $0x33c] sm:$0xf0] }
 0x65f   : > { %7813 = vst [vmem:[%s14900_s7 + $0x60] sm:$0xff] %v6596_v32  ;;  %v16560_v32 = vld [vmem:[#allocation25_spill] sm:$0xff]  ;;  %v9693_v36 = vor.u32 %v10681_v24, %v9690_v2 }
 0x661   : > { %v6597_v37 = vpop.f32.mrf.mxu3  ;;  %6924 = vmatpush.bf16.msrb.mxu2 %v9693_v36 }
 0x662   : > { %v6548_v25 = vpop.f32.mrf.mxu2  ;;  %v6453_v34 = vpop.f32.mrf.mxu0 }
 0x663   : > { %v6549_v8 = vadd.f32 %v6548_v25, %v6500_v59  ;;  %v6502_v7 = vpop.f32.mrf.mxu1  ;;  %v6454_v58 = vadd.f32 %v6453_v34, %v14727_v40  ;;  %v10633_v40 = vld [vmem:[%s16317_s3 + $0x334] sm:$0xf]  ;;  %v9786_v25 = vld [vmem:[%s16317_s3 + $0x57c] sm:$0xf0] }
 0x664   : > { %v10705_v59 = vld [vmem:[%s16317_s3 + $0x574] sm:$0xf] }
 0x665   : > { %v6598_v44 = vadd.f32 %v6597_v37, %v6549_v8  ;;  %6648 = vmatmul.bf16.gmra.mxu0 %v16557_v43  ;;  %v6503_v20 = vadd.f32 %v6502_v7, %v6454_v58  ;;  %v9501_v37 = vor.u32 %v10633_v40, %v9498_v50  ;;  %v9789_v34 = vor.u32 %v10705_v59, %v9786_v25  ;;  %v9594_v40 = vld [vmem:[%s16317_s3 + $0x3fc] sm:$0xf0]  ;;  %v16599_v43 = vld [vmem:[#allocation60_spill] sm:$0xff] }
 0x666   : > { %6697 = vmatmul.bf16.gmra.mxu1 %v16558_v4  ;;  %6795 = vmatmul.bf16.gmra.mxu3 %v16560_v32  ;;  %v16596_v4 = vld [vmem:[#allocation59_spill] sm:$0xff] }
 0x667   : > { %7816 = vst [vmem:[%s14900_s7 + $0x78] sm:$0xff] %v6598_v44  ;;  %6746 = vmatmul.bf16.gmra.mxu2 %v16559_v57  ;;  %6826 = vmatpush.bf16.msrb.mxu0 %v9501_v37  ;;  %v10657_v57 = vld [vmem:[%s16317_s3 + $0x3f4] sm:$0xf] }
 0x668   : > { %6973 = vmatpush.bf16.msrb.mxu3 %v9789_v34  ;;  %v16561_v34 = vld [vmem:[#allocation8_spill] sm:$0xff] }
 0x669   : > { %v6600_v32 = vpop.f32.mrf.mxu3 }
 0x66a   : > { %v6551_v8 = vpop.f32.mrf.mxu2  ;;  %v6455_v7 = vpop.f32.mrf.mxu0 }
 0x66b   : > { %v6552_v44 = vadd.f32 %v6551_v8, %v6503_v20  ;;  %v6504_v58 = vpop.f32.mrf.mxu1  ;;  %v6456_v2 = vadd.f32 %v6455_v7, %v14736_v63  ;;  %v9597_v20 = vor.u32 %v10657_v57, %v9594_v40  ;;  %v16563_v7 = vld [vmem:[#allocation26_spill] sm:$0xff]  ;;  %v10678_v57 = vld [vmem:[%s16317_s3 + $0x49c] sm:$0xf] }
 0x66d   : > { %v6601_v24 = vadd.f32 %v6600_v32, %v6552_v44  ;;  %v6505_v50 = vadd.f32 %v6504_v58, %v6456_v2  ;;  %6875 = vmatpush.bf16.msrb.mxu1 %v9597_v20  ;;  %v16562_v44 = vld [vmem:[#allocation15_spill] sm:$0xff]  ;;  %v9678_v58 = vld [vmem:[%s16317_s3 + $0x4a4] sm:$0xf0] }
 0x66e   : > { %v9681_v40 = vor.u32 %v10678_v57, %v9678_v58  ;;  %v9486_v20 = vld [vmem:[%s16317_s3 + $0x324] sm:$0xf0] }
 0x66f   : > { %7819 = vst [vmem:[%s14900_s7 + $0x90] sm:$0xff] %v6601_v24  ;;  %v16564_v24 = vld [vmem:[#allocation27_spill] sm:$0xff] }
 0x670   : > { %6925 = vmatpush.bf16.msrb.mxu2 %v9681_v40 }
 0x671   : > { %v6602_v25 = vpop.f32.mrf.mxu3 }
 0x672   : > { %v6553_v59 = vpop.f32.mrf.mxu2  ;;  %v6458_v8 = vpop.f32.mrf.mxu0 }
 0x673   : > { %v6554_v36 = vadd.f32 %v6553_v59, %v6505_v50  ;;  %v6507_v32 = vpop.f32.mrf.mxu1  ;;  %v6459_v63 = vadd.f32 %v6458_v8, %v14761_v60  ;;  %v10630_v60 = vld [vmem:[%s16317_s3 + $0x31c] sm:$0xf]  ;;  %v9774_v59 = vld [vmem:[%s16317_s3 + $0x564] sm:$0xf0] }
 0x674   : > { %v10702_v50 = vld [vmem:[%s16317_s3 + $0x55c] sm:$0xf] }
 0x675   : > { %v6603_v37 = vadd.f32 %v6602_v25, %v6554_v36  ;;  %6653 = vmatmul.bf16.gmra.mxu0 %v16561_v34  ;;  %v6508_v2 = vadd.f32 %v6507_v32, %v6459_v63  ;;  %v9489_v25 = vor.u32 %v10630_v60, %v9486_v20  ;;  %v9777_v8 = vor.u32 %v10702_v50, %v9774_v59  ;;  %v9582_v60 = vld [vmem:[%s16317_s3 + $0x3e4] sm:$0xf0] }
 0x676   : > { %6702 = vmatmul.bf16.gmra.mxu1 %v16562_v44  ;;  %6800 = vmatmul.bf16.gmra.mxu3 %v16564_v24  ;;  %v16592_v44 = vld [vmem:[#allocation57_spill] sm:$0xff]  ;;  %v16595_v34 = vld [vmem:[#allocation58_spill] sm:$0xff] }
 0x677   : > { %7822 = vst [vmem:[%s14900_s7 + $0xa8] sm:$0xff] %v6603_v37  ;;  %6751 = vmatmul.bf16.gmra.mxu2 %v16563_v7  ;;  %6827 = vmatpush.bf16.msrb.mxu0 %v9489_v25  ;;  %v10654_v7 = vld [vmem:[%s16317_s3 + $0x3dc] sm:$0xf] }
 0x678   : > { %6974 = vmatpush.bf16.msrb.mxu3 %v9777_v8  ;;  %v16565_v8 = vld [vmem:[#allocation9_spill] sm:$0xff] }
 0x679   : > { %v6605_v24 = vpop.f32.mrf.mxu3 }
 0x67a   : > { %v6556_v36 = vpop.f32.mrf.mxu2  ;;  %v6460_v32 = vpop.f32.mrf.mxu0 }
 0x67b   : > { %v6557_v37 = vadd.f32 %v6556_v36, %v6508_v2  ;;  %v6509_v63 = vpop.f32.mrf.mxu1  ;;  %v6461_v58 = vadd.f32 %v6460_v32, %v14770_v9  ;;  %v9585_v2 = vor.u32 %v10654_v7, %v9582_v60  ;;  %v16567_v32 = vld [vmem:[#allocation28_spill] sm:$0xff]  ;;  %v10675_v7 = vld [vmem:[%s16317_s3 + $0x484] sm:$0xf] }
 0x67d   : > { %v6606_v57 = vadd.f32 %v6605_v24, %v6557_v37  ;;  %v6510_v20 = vadd.f32 %v6509_v63, %v6461_v58  ;;  %6876 = vmatpush.bf16.msrb.mxu1 %v9585_v2  ;;  %v16566_v37 = vld [vmem:[#allocation16_spill] sm:$0xff]  ;;  %v9666_v63 = vld [vmem:[%s16317_s3 + $0x48c] sm:$0xf0] }
 0x67e   : > { %v9669_v60 = vor.u32 %v10675_v7, %v9666_v63  ;;  %v9474_v2 = vld [vmem:[%s16317_s3 + $0x30c] sm:$0xf0] }
 0x67f   : > { %7825 = vst [vmem:[%s14900_s7 + $0xc0] sm:$0xff] %v6606_v57  ;;  %v16568_v57 = vld [vmem:[#allocation29_spill] sm:$0xff] }
 0x680   : > { %6926 = vmatpush.bf16.msrb.mxu2 %v9669_v60 }
 0x681   : > { %v6607_v59 = vpop.f32.mrf.mxu3 }
 0x682   : > { %v6558_v50 = vpop.f32.mrf.mxu2  ;;  %v6463_v36 = vpop.f32.mrf.mxu0 }
 0x683   : > { %v6559_v40 = vadd.f32 %v6558_v50, %v6510_v20  ;;  %v6512_v24 = vpop.f32.mrf.mxu1  ;;  %v6464_v9 = vadd.f32 %v6463_v36, %v14795_v16  ;;  %v10627_v16 = vld [vmem:[%s16317_s3 + $0x304] sm:$0xf]  ;;  %v9762_v50 = vld [vmem:[%s16317_s3 + $0x54c] sm:$0xf0] }
 0x684   : > { %v10699_v20 = vld [vmem:[%s16317_s3 + $0x544] sm:$0xf] }
 0x685   : > { %v6608_v25 = vadd.f32 %v6607_v59, %v6559_v40  ;;  %6658 = vmatmul.bf16.gmra.mxu0 %v16565_v8  ;;  %v6513_v58 = vadd.f32 %v6512_v24, %v6464_v9  ;;  %v9477_v59 = vor.u32 %v10627_v16, %v9474_v2  ;;  %v9765_v36 = vor.u32 %v10699_v20, %v9762_v50  ;;  %v9570_v16 = vld [vmem:[%s16317_s3 + $0x3cc] sm:$0xf0]  ;;  %v16591_v8 = vld [vmem:[#allocation56_spill] sm:$0xff] }
 0x686   : > { %6707 = vmatmul.bf16.gmra.mxu1 %v16566_v37  ;;  %6805 = vmatmul.bf16.gmra.mxu3 %v16568_v57  ;;  %v16588_v37 = vld [vmem:[#allocation55_spill] sm:$0xff] }
 0x687   : > { %7828 = vst [vmem:[%s14900_s7 + $0xd8] sm:$0xff] %v6608_v25  ;;  %6756 = vmatmul.bf16.gmra.mxu2 %v16567_v32  ;;  %6828 = vmatpush.bf16.msrb.mxu0 %v9477_v59  ;;  %v10651_v32 = vld [vmem:[%s16317_s3 + $0x3c4] sm:$0xf] }
 0x688   : > { %6975 = vmatpush.bf16.msrb.mxu3 %v9765_v36  ;;  %v16569_v36 = vld [vmem:[#allocation10_spill] sm:$0xff] }
 0x689   : > { %v6610_v57 = vpop.f32.mrf.mxu3 }
 0x68a   : > { %v6561_v40 = vpop.f32.mrf.mxu2  ;;  %v6465_v24 = vpop.f32.mrf.mxu0 }
 0x68b   : > { %v6562_v25 = vadd.f32 %v6561_v40, %v6513_v58  ;;  %v6514_v9 = vpop.f32.mrf.mxu1  ;;  %v6466_v63 = vadd.f32 %v6465_v24, %v14804_v29  ;;  %v9573_v58 = vor.u32 %v10651_v32, %v9570_v16  ;;  %v16571_v24 = vld [vmem:[#allocation30_spill] sm:$0xff] }
 0x68c   : > { %v10792_v32 = vld [vmem:[%s16317_s3 + $0x82c] sm:$0xf] }
 0x68d   : > { %v6611_v7 = vadd.f32 %v6610_v57, %v6562_v25  ;;  %v6515_v2 = vadd.f32 %v6514_v9, %v6466_v63  ;;  %6877 = vmatpush.bf16.msrb.mxu1 %v9573_v58  ;;  %v16570_v25 = vld [vmem:[#allocation17_spill] sm:$0xff]  ;;  %v10134_v9 = vld [vmem:[%s16317_s3 + $0x834] sm:$0xf0] }
 0x68e   : > { %v10137_v16 = vor.u32 %v10792_v32, %v10134_v9  ;;  %v9942_v58 = vld [vmem:[%s16317_s3 + $0x6b4] sm:$0xf0] }
 0x68f   : > { %7831 = vst [vmem:[%s14900_s7 + $0xf0] sm:$0xff] %v6611_v7  ;;  %v16572_v7 = vld [vmem:[#allocation31_spill] sm:$0xff] }
 0x690   : > { %7115 = vmatpush.bf16.msra.mxu2 %v10137_v16 }
 0x691   : > { %v6612_v50 = vpop.f32.mrf.mxu3 }
 0x692   : > { %v6563_v20 = vpop.f32.mrf.mxu2  ;;  %v6468_v40 = vpop.f32.mrf.mxu0 }
 0x693   : > { %v6564_v60 = vadd.f32 %v6563_v20, %v6515_v2  ;;  %v6517_v57 = vpop.f32.mrf.mxu1  ;;  %v6469_v29 = vadd.f32 %v6468_v40, %v14829_v12  ;;  %v10744_v12 = vld [vmem:[%s16317_s3 + $0x6ac] sm:$0xf]  ;;  %v10230_v20 = vld [vmem:[%s16317_s3 + $0x8f4] sm:$0xf0] }
 0x694   : > { %v10816_v2 = vld [vmem:[%s16317_s3 + $0x8ec] sm:$0xf] }
 0x695   : > { %v6613_v59 = vadd.f32 %v6612_v50, %v6564_v60  ;;  %6663 = vmatmul.bf16.gmra.mxu0 %v16569_v36  ;;  %v6518_v63 = vadd.f32 %v6517_v57, %v6469_v29  ;;  %v9945_v50 = vor.u32 %v10744_v12, %v9942_v58  ;;  %v10233_v40 = vor.u32 %v10816_v2, %v10230_v20  ;;  %v10038_v12 = vld [vmem:[%s16317_s3 + $0x774] sm:$0xf0]  ;;  %v16587_v36 = vld [vmem:[#allocation54_spill] sm:$0xff] }
 0x696   : > { %6712 = vmatmul.bf16.gmra.mxu1 %v16570_v25  ;;  %6810 = vmatmul.bf16.gmra.mxu3 %v16572_v7  ;;  %v16576_v25 = vld [vmem:[#allocation33_spill] sm:$0xff] }
 0x697   : > { %7834 = vst [vmem:[%s14900_s7 + $0x108] sm:$0xff] %v6613_v59  ;;  %6761 = vmatmul.bf16.gmra.mxu2 %v16571_v24  ;;  %7017 = vmatpush.bf16.msra.mxu0 %v9945_v50  ;;  %v10768_v24 = vld [vmem:[%s16317_s3 + $0x76c] sm:$0xf] }
 0x698   : > { %7164 = vmatpush.bf16.msra.mxu3 %v10233_v40  ;;  %v10041_v58 = vor.u32 %v10768_v24, %v10038_v12  ;;  %v16573_v40 = vld [vmem:[#allocation11_spill] sm:$0xff]  ;;  %v9930_v12 = vld [vmem:[%s16317_s3 + $0x69c] sm:$0xf0] }
 0x699   : > { %v6615_v7 = vpop.f32.mrf.mxu3  ;;  %v10789_v24 = vld [vmem:[%s16317_s3 + $0x814] sm:$0xf] }
 0x69a   : > { %v6566_v60 = vpop.f32.mrf.mxu2  ;;  %v6470_v57 = vpop.f32.mrf.mxu0  ;;  %7066 = vmatpush.bf16.msra.mxu1 %v10041_v58  ;;  %v10813_v58 = vld [vmem:[%s16317_s3 + $0x8d4] sm:$0xf] }
 0x69b   : > { %v6567_v59 = vadd.f32 %v6566_v60, %v6518_v63  ;;  %v6519_v29 = vpop.f32.mrf.mxu1  ;;  %v6471_v9 = vadd.f32 %v6470_v57, %v14838_v33  ;;  %v16575_v57 = vld [vmem:[#allocation32_spill] sm:$0xff] }
 0x69d   : > { %v6616_v32 = vadd.f32 %v6615_v7, %v6567_v59  ;;  %v6520_v63 = vadd.f32 %v6519_v29, %v6471_v9  ;;  %v16574_v59 = vld [vmem:[#allocation18_spill] sm:$0xff]  ;;  %v10122_v29 = vld [vmem:[%s16317_s3 + $0x81c] sm:$0xf0] }
 0x69e   : > { %v10125_v9 = vor.u32 %v10789_v24, %v10122_v29 }
 0x69f   : > { %7837 = vst [vmem:[%s14900_s7 + $0x120] sm:$0xff] %v6616_v32 }
 0x6a0   : > { %7116 = vmatpush.bf16.msra.mxu2 %v10125_v9 }
 0x6a1   : > { %v6617_v20 = vpop.f32.mrf.mxu3 }
 0x6a2   : > { %v6568_v16 = vpop.f32.mrf.mxu2  ;;  %v6473_v60 = vpop.f32.mrf.mxu0 }
 0x6a3   : > { %v6569_v2 = vadd.f32 %v6568_v16, %v6520_v63  ;;  %v6522_v7 = vpop.f32.mrf.mxu1  ;;  %v6474_v33 = vadd.f32 %v6473_v60, %v14863_v38  ;;  %v10741_v38 = vld [vmem:[%s16317_s3 + $0x694] sm:$0xf]  ;;  %v10218_v63 = vld [vmem:[%s16317_s3 + $0x8dc] sm:$0xf0] }
 0x6a5   : > { %v6618_v50 = vadd.f32 %v6617_v20, %v6569_v2  ;;  %6668 = vmatmul.bf16.gmra.mxu0 %v16573_v40  ;;  %v6523_v32 = vadd.f32 %v6522_v7, %v6474_v33  ;;  %v9933_v2 = vor.u32 %v10741_v38, %v9930_v12  ;;  %v10221_v20 = vor.u32 %v10813_v58, %v10218_v63  ;;  %v16584_v40 = vld [vmem:[#allocation53_spill] sm:$0xff] }
 0x6a6   : > { %6717 = vmatmul.bf16.gmra.mxu1 %v16574_v59  ;;  %6815 = vmatmul.bf16.gmra.mxu3 %v16576_v25  ;;  %v10765_v25 = vld [vmem:[%s16317_s3 + $0x754] sm:$0xf]  ;;  %v16583_v59 = vld [vmem:[#allocation52_spill] sm:$0xff] }
 0x6a7   : > { %7840 = vst [vmem:[%s14900_s7 + $0x138] sm:$0xff] %v6618_v50  ;;  %6766 = vmatmul.bf16.gmra.mxu2 %v16575_v57  ;;  %7018 = vmatpush.bf16.msra.mxu0 %v9933_v2  ;;  %v10026_v57 = vld [vmem:[%s16317_s3 + $0x75c] sm:$0xf0] }
 0x6a8   : > { %7165 = vmatpush.bf16.msra.mxu3 %v10221_v20  ;;  %v10029_v38 = vor.u32 %v10765_v25, %v10026_v57  ;;  %v16578_v25 = vld [vmem:[#allocation42_spill] sm:$0xff] }
 0x6a9   : > { %v6620_v50 = vpop.f32.mrf.mxu3  ;;  %v16579_v57 = vld [vmem:[#allocation50_spill] sm:$0xff] }
 0x6aa   : > { %v6571_v16 = vpop.f32.mrf.mxu2  ;;  %v6475_v7 = vpop.f32.mrf.mxu0  ;;  %7067 = vmatpush.bf16.msra.mxu1 %v10029_v38  ;;  %v10738_v38 = vld [vmem:[%s16317_s3 + $0x67c] sm:$0xf] }
 0x6ab   : > { %v6572_v60 = vadd.f32 %v6571_v16, %v6523_v32  ;;  %v6524_v33 = vpop.f32.mrf.mxu1  ;;  %v6476_v29 = vadd.f32 %v6475_v7, %v14872_v26  ;;  %v10866_v32 = vld [vmem:[%s16318_s4] sm:$0x7]  ;;  %v16577_v7 = vld [vmem:[#allocation34_spill] sm:$0xff] }
 0x6ac   : > { %v15136_v9 = vperm.slane %v10866_v32, 1 }
 0x6ad   : > { %v6621_v24 = vadd.f32 %v6620_v50, %v6572_v60  ;;  %v6525_v12 = vadd.f32 %v6524_v33, %v6476_v29  ;;  %v10786_v33 = vld [vmem:[%s16317_s3 + $0x7fc] sm:$0xf]  ;;  %v10110_v29 = vld [vmem:[%s16317_s3 + $0x804] sm:$0xf0] }
 0x6ae   : > { %v10113_v32 = vor.u32 %v10786_v33, %v10110_v29 }
 0x6af   : > { %7843 = vst [vmem:[%s14900_s7 + $0x150] sm:$0xff] %v6621_v24  ;;  %v16580_v24 = vld [vmem:[#allocation51_spill] sm:$0xff] }
 0x6b0   : > { %7117 = vmatpush.bf16.msra.mxu2 %v10113_v32 }
 0x6b1   : > { %v6622_v63 = vpop.f32.mrf.mxu3 }
 0x6b2   : > { %v6573_v26 = vpop.f32.mrf.mxu2  ;;  %v6634_v16 = vpop.f32.mrf.mxu0 }
 0x6b3   : > { %v6574_v58 = vadd.f32 %v6573_v26, %v6525_v12  ;;  %v6635_v2 = vadd.f32 %v6634_v16, %v15136_v9  ;;  %v6683_v20 = vpop.f32.mrf.mxu1  ;;  %v9918_v12 = vld [vmem:[%s16317_s3 + $0x684] sm:$0xf0]  ;;  %v10810_v26 = vld [vmem:[%s16317_s3 + $0x8bc] sm:$0xf] }
 0x6b4   : > { %v9921_v16 = vor.u32 %v10738_v38, %v9918_v12  ;;  %v10014_v38 = vld [vmem:[%s16317_s3 + $0x744] sm:$0xf0] }
 0x6b5   : > { %v6623_v60 = vadd.f32 %v6622_v63, %v6574_v58  ;;  %v6684_v50 = vadd.f32 %v6683_v20, %v6635_v2  ;;  %6829 = vmatmul.bf16.vlgmr.msrb.gmra.mxu0 %v16577_v7  ;;  %v10206_v58 = vld [vmem:[%s16317_s3 + $0x8c4] sm:$0xf0]  ;;  %v16582_v7 = vld [vmem:[#allocation43_spill] sm:$0xff] }
 0x6b6   : > { %6878 = vmatmul.bf16.vlgmr.msrb.gmra.mxu1 %v16578_v25  ;;  %6976 = vmatmul.bf16.vlgmr.msrb.gmra.mxu3 %v16580_v24  ;;  %v10209_v2 = vor.u32 %v10810_v26, %v10206_v58  ;;  %v10762_v25 = vld [vmem:[%s16317_s3 + $0x73c] sm:$0xf] }
 0x6b7   : > { %7846 = vst [vmem:[%s14900_s7 + $0x168] sm:$0xff] %v6623_v60  ;;  %6927 = vmatmul.bf16.vlgmr.msrb.gmra.mxu2 %v16579_v57  ;;  %7019 = vmatpush.bf16.msra.mxu0 %v9921_v16 }
 0x6b8   : > { %7166 = vmatpush.bf16.msra.mxu3 %v10209_v2 }
 0x6b9   : > { %v6781_v60 = vpop.f32.mrf.mxu3 }
 0x6ba   : > { %v6732_v63 = vpop.f32.mrf.mxu2  ;;  %v6636_v24 = vpop.f32.mrf.mxu0 }
 0x6bb   : > { %v6733_v20 = vadd.f32 %v6732_v63, %v6684_v50  ;;  %v6637_v33 = vadd.f32 %v6636_v24, %v15136_v9  ;;  %v6685_v29 = vpop.f32.mrf.mxu1  ;;  %v10017_v50 = vor.u32 %v10762_v25, %v10014_v38  ;;  %v10783_v25 = vld [vmem:[%s16317_s3 + $0x7e4] sm:$0xf] }
 0x6bd   : > { %v15163_v57 = vadd.f32 %v6781_v60, %v6733_v20  ;;  %v6686_v12 = vadd.f32 %v6685_v29, %v6637_v33  ;;  %7068 = vmatpush.bf16.msra.mxu1 %v10017_v50  ;;  %v16581_v60 = vld [vmem:[#allocation35_spill] sm:$0xff]  ;;  %v10735_v29 = vld [vmem:[%s16317_s3 + $0x664] sm:$0xf] }
 0x6be   : > { %v10098_v33 = vld [vmem:[%s16317_s3 + $0x7ec] sm:$0xf0]  ;;  %v10807_v50 = vld [vmem:[%s16317_s3 + $0x8a4] sm:$0xf] }
 0x6bf   : > { %v10101_v38 = vor.u32 %v10783_v25, %v10098_v33 }
 0x6c1   : > { %v6783_v58 = vpop.f32.mrf.mxu3  ;;  %7118 = vmatpush.bf16.msra.mxu2 %v10101_v38 }
 0x6c2   : > { %v6734_v26 = vpop.f32.mrf.mxu2  ;;  %v6639_v24 = vpop.f32.mrf.mxu0 }
 0x6c3   : > { %v6735_v32 = vadd.f32 %v6734_v26, %v6686_v12  ;;  %v6640_v63 = vadd.f32 %v6639_v24, %v15136_v9  ;;  %v6688_v16 = vpop.f32.mrf.mxu1  ;;  %v9906_v12 = vld [vmem:[%s16317_s3 + $0x66c] sm:$0xf0] }
 0x6c4   : > { %v10194_v26 = vld [vmem:[%s16317_s3 + $0x8ac] sm:$0xf0] }
 0x6c5   : > { %v15172_v2 = vadd.f32 %v6783_v58, %v6735_v32  ;;  %v6689_v20 = vadd.f32 %v6688_v16, %v6640_v63  ;;  %6834 = vmatmul.bf16.gmra.mxu0 %v16581_v60  ;;  %v9909_v58 = vor.u32 %v10735_v29, %v9906_v12  ;;  %v10197_v24 = vor.u32 %v10807_v50, %v10194_v26  ;;  %v10002_v29 = vld [vmem:[%s16317_s3 + $0x72c] sm:$0xf0]  ;;  %v16586_v60 = vld [vmem:[#allocation44_spill] sm:$0xff] }
 0x6c6   : > { %6883 = vmatmul.bf16.gmra.mxu1 %v16582_v7  ;;  %6981 = vmatmul.bf16.gmra.mxu3 %v16584_v40  ;;  %v10759_v7 = vld [vmem:[%s16317_s3 + $0x724] sm:$0xf] }
 0x6c7   : > { %6932 = vmatmul.bf16.gmra.mxu2 %v16583_v59  ;;  %7020 = vmatpush.bf16.msra.mxu0 %v9909_v58 }
 0x6c8   : > { %7167 = vmatpush.bf16.msra.mxu3 %v10197_v24 }
 0x6c9   : > { %v6786_v16 = vpop.f32.mrf.mxu3 }
 0x6ca   : > { %v6737_v32 = vpop.f32.mrf.mxu2  ;;  %v6641_v40 = vpop.f32.mrf.mxu0 }
 0x6cb   : > { %v6738_v63 = vadd.f32 %v6737_v32, %v6689_v20  ;;  %v6642_v25 = vadd.f32 %v6641_v40, %v15136_v9  ;;  %v6690_v33 = vpop.f32.mrf.mxu1  ;;  %v10005_v20 = vor.u32 %v10759_v7, %v10002_v29  ;;  %v10780_v7 = vld [vmem:[%s16317_s3 + $0x7cc] sm:$0xf] }
 0x6cd   : > { %v15197_v59 = vadd.f32 %v6786_v16, %v6738_v63  ;;  %v6691_v12 = vadd.f32 %v6690_v33, %v6642_v25  ;;  %7069 = vmatpush.bf16.msra.mxu1 %v10005_v20  ;;  %v16585_v16 = vld [vmem:[#allocation36_spill] sm:$0xff]  ;;  %v10732_v33 = vld [vmem:[%s16317_s3 + $0x64c] sm:$0xf] }
 0x6ce   : > { %v10086_v25 = vld [vmem:[%s16317_s3 + $0x7d4] sm:$0xf0]  ;;  %v10804_v20 = vld [vmem:[%s16317_s3 + $0x88c] sm:$0xf] }
 0x6cf   : > { %v10089_v29 = vor.u32 %v10780_v7, %v10086_v25 }
 0x6d1   : > { %v6788_v26 = vpop.f32.mrf.mxu3  ;;  %7119 = vmatpush.bf16.msra.mxu2 %v10089_v29 }
 0x6d2   : > { %v6739_v50 = vpop.f32.mrf.mxu2  ;;  %v6644_v40 = vpop.f32.mrf.mxu0 }
 0x6d3   : > { %v6740_v38 = vadd.f32 %v6739_v50, %v6691_v12  ;;  %v6645_v32 = vadd.f32 %v6644_v40, %v15136_v9  ;;  %v6693_v58 = vpop.f32.mrf.mxu1  ;;  %v9894_v12 = vld [vmem:[%s16317_s3 + $0x654] sm:$0xf0] }
 0x6d4   : > { %v10182_v50 = vld [vmem:[%s16317_s3 + $0x894] sm:$0xf0] }
 0x6d5   : > { %v15206_v24 = vadd.f32 %v6788_v26, %v6740_v38  ;;  %v6694_v63 = vadd.f32 %v6693_v58, %v6645_v32  ;;  %6839 = vmatmul.bf16.gmra.mxu0 %v16585_v16  ;;  %v9897_v26 = vor.u32 %v10732_v33, %v9894_v12  ;;  %v10185_v40 = vor.u32 %v10804_v20, %v10182_v50  ;;  %v9990_v33 = vld [vmem:[%s16317_s3 + $0x714] sm:$0xf0]  ;;  %v16590_v16 = vld [vmem:[#allocation45_spill] sm:$0xff] }
 0x6d6   : > { %6888 = vmatmul.bf16.gmra.mxu1 %v16586_v60  ;;  %6986 = vmatmul.bf16.gmra.mxu3 %v16588_v37  ;;  %v10756_v60 = vld [vmem:[%s16317_s3 + $0x70c] sm:$0xf] }
 0x6d7   : > { %6937 = vmatmul.bf16.gmra.mxu2 %v16587_v36  ;;  %7021 = vmatpush.bf16.msra.mxu0 %v9897_v26 }
 0x6d8   : > { %7168 = vmatpush.bf16.msra.mxu3 %v10185_v40 }
 0x6d9   : > { %v6791_v58 = vpop.f32.mrf.mxu3 }
 0x6da   : > { %v6742_v38 = vpop.f32.mrf.mxu2  ;;  %v6646_v37 = vpop.f32.mrf.mxu0 }
 0x6db   : > { %v6743_v32 = vadd.f32 %v6742_v38, %v6694_v63  ;;  %v6647_v7 = vadd.f32 %v6646_v37, %v15136_v9  ;;  %v6695_v25 = vpop.f32.mrf.mxu1  ;;  %v9993_v63 = vor.u32 %v10756_v60, %v9990_v33  ;;  %v10777_v60 = vld [vmem:[%s16317_s3 + $0x7b4] sm:$0xf] }
 0x6dd   : > { %v15231_v36 = vadd.f32 %v6791_v58, %v6743_v32  ;;  %v6696_v12 = vadd.f32 %v6695_v25, %v6647_v7  ;;  %7070 = vmatpush.bf16.msra.mxu1 %v9993_v63  ;;  %v16589_v58 = vld [vmem:[#allocation37_spill] sm:$0xff]  ;;  %v10729_v25 = vld [vmem:[%s16317_s3 + $0x634] sm:$0xf] }
 0x6de   : > { %v10074_v7 = vld [vmem:[%s16317_s3 + $0x7bc] sm:$0xf0]  ;;  %v10801_v63 = vld [vmem:[%s16317_s3 + $0x874] sm:$0xf] }
 0x6df   : > { %v10077_v33 = vor.u32 %v10777_v60, %v10074_v7 }
 0x6e1   : > { %v6793_v50 = vpop.f32.mrf.mxu3  ;;  %7120 = vmatpush.bf16.msra.mxu2 %v10077_v33 }
 0x6e2   : > { %v6744_v20 = vpop.f32.mrf.mxu2  ;;  %v6649_v37 = vpop.f32.mrf.mxu0 }
 0x6e3   : > { %v6745_v29 = vadd.f32 %v6744_v20, %v6696_v12  ;;  %v6650_v38 = vadd.f32 %v6649_v37, %v15136_v9  ;;  %v6698_v26 = vpop.f32.mrf.mxu1  ;;  %v9882_v12 = vld [vmem:[%s16317_s3 + $0x63c] sm:$0xf0] }
 0x6e4   : > { %v10170_v20 = vld [vmem:[%s16317_s3 + $0x87c] sm:$0xf0] }
 0x6e5   : > { %v15240_v40 = vadd.f32 %v6793_v50, %v6745_v29  ;;  %v6699_v32 = vadd.f32 %v6698_v26, %v6650_v38  ;;  %6844 = vmatmul.bf16.gmra.mxu0 %v16589_v58  ;;  %v9885_v50 = vor.u32 %v10729_v25, %v9882_v12  ;;  %v10173_v37 = vor.u32 %v10801_v63, %v10170_v20  ;;  %v9978_v25 = vld [vmem:[%s16317_s3 + $0x6fc] sm:$0xf0]  ;;  %v16594_v58 = vld [vmem:[#allocation46_spill] sm:$0xff] }
 0x6e6   : > { %6893 = vmatmul.bf16.gmra.mxu1 %v16590_v16  ;;  %6991 = vmatmul.bf16.gmra.mxu3 %v16592_v44  ;;  %v10753_v16 = vld [vmem:[%s16317_s3 + $0x6f4] sm:$0xf] }
 0x6e7   : > { %6942 = vmatmul.bf16.gmra.mxu2 %v16591_v8  ;;  %7022 = vmatpush.bf16.msra.mxu0 %v9885_v50 }
 0x6e8   : > { %7169 = vmatpush.bf16.msra.mxu3 %v10173_v37 }
 0x6e9   : > { %v6796_v26 = vpop.f32.mrf.mxu3 }
 0x6ea   : > { %v6747_v29 = vpop.f32.mrf.mxu2  ;;  %v6651_v44 = vpop.f32.mrf.mxu0 }
 0x6eb   : > { %v6748_v38 = vadd.f32 %v6747_v29, %v6699_v32  ;;  %v6652_v60 = vadd.f32 %v6651_v44, %v15136_v9  ;;  %v6700_v7 = vpop.f32.mrf.mxu1  ;;  %v9981_v32 = vor.u32 %v10753_v16, %v9978_v25  ;;  %v10774_v16 = vld [vmem:[%s16317_s3 + $0x79c] sm:$0xf] }
 0x6ed   : > { %v15265_v8 = vadd.f32 %v6796_v26, %v6748_v38  ;;  %v6701_v12 = vadd.f32 %v6700_v7, %v6652_v60  ;;  %7071 = vmatpush.bf16.msra.mxu1 %v9981_v32  ;;  %v16593_v26 = vld [vmem:[#allocation38_spill] sm:$0xff]  ;;  %v10726_v7 = vld [vmem:[%s16317_s3 + $0x61c] sm:$0xf] }
 0x6ee   : > { %v10062_v60 = vld [vmem:[%s16317_s3 + $0x7a4] sm:$0xf0]  ;;  %v10798_v32 = vld [vmem:[%s16317_s3 + $0x85c] sm:$0xf] }
 0x6ef   : > { %v10065_v25 = vor.u32 %v10774_v16, %v10062_v60 }
 0x6f1   : > { %v6798_v20 = vpop.f32.mrf.mxu3  ;;  %7121 = vmatpush.bf16.msra.mxu2 %v10065_v25 }
 0x6f2   : > { %v6749_v63 = vpop.f32.mrf.mxu2  ;;  %v6654_v44 = vpop.f32.mrf.mxu0 }
 0x6f3   : > { %v6750_v33 = vadd.f32 %v6749_v63, %v6701_v12  ;;  %v6655_v29 = vadd.f32 %v6654_v44, %v15136_v9  ;;  %v6703_v50 = vpop.f32.mrf.mxu1  ;;  %v9870_v12 = vld [vmem:[%s16317_s3 + $0x624] sm:$0xf0] }
 0x6f4   : > { %v10158_v63 = vld [vmem:[%s16317_s3 + $0x864] sm:$0xf0] }
 0x6f5   : > { %v15274_v37 = vadd.f32 %v6798_v20, %v6750_v33  ;;  %v6704_v38 = vadd.f32 %v6703_v50, %v6655_v29  ;;  %6849 = vmatmul.bf16.gmra.mxu0 %v16593_v26  ;;  %v9873_v20 = vor.u32 %v10726_v7, %v9870_v12  ;;  %v10161_v44 = vor.u32 %v10798_v32, %v10158_v63  ;;  %v9966_v7 = vld [vmem:[%s16317_s3 + $0x6e4] sm:$0xf0]  ;;  %v16598_v26 = vld [vmem:[#allocation47_spill] sm:$0xff] }
 0x6f6   : > { %6898 = vmatmul.bf16.gmra.mxu1 %v16594_v58  ;;  %6996 = vmatmul.bf16.gmra.mxu3 %v16596_v4  ;;  %v10750_v58 = vld [vmem:[%s16317_s3 + $0x6dc] sm:$0xf] }
 0x6f7   : > { %6947 = vmatmul.bf16.gmra.mxu2 %v16595_v34  ;;  %7023 = vmatpush.bf16.msra.mxu0 %v9873_v20 }
 0x6f8   : > { %7170 = vmatpush.bf16.msra.mxu3 %v10161_v44 }
 0x6f9   : > { %v6801_v50 = vpop.f32.mrf.mxu3 }
 0x6fa   : > { %v6752_v33 = vpop.f32.mrf.mxu2  ;;  %v6656_v4 = vpop.f32.mrf.mxu0 }
 0x6fb   : > { %v6753_v29 = vadd.f32 %v6752_v33, %v6704_v38  ;;  %v6657_v16 = vadd.f32 %v6656_v4, %v15136_v9  ;;  %v6705_v60 = vpop.f32.mrf.mxu1  ;;  %v9969_v38 = vor.u32 %v10750_v58, %v9966_v7  ;;  %v10771_v58 = vld [vmem:[%s16317_s3 + $0x784] sm:$0xf] }
 0x6fd   : > { %v15299_v34 = vadd.f32 %v6801_v50, %v6753_v29  ;;  %v6706_v12 = vadd.f32 %v6705_v60, %v6657_v16  ;;  %7072 = vmatpush.bf16.msra.mxu1 %v9969_v38  ;;  %v16597_v50 = vld [vmem:[#allocation39_spill] sm:$0xff]  ;;  %v10723_v60 = vld [vmem:[%s16317_s3 + $0x604] sm:$0xf] }
 0x6fe   : > { %v10050_v16 = vld [vmem:[%s16317_s3 + $0x78c] sm:$0xf0]  ;;  %v10795_v38 = vld [vmem:[%s16317_s3 + $0x844] sm:$0xf] }
 0x6ff   : > { %v10053_v7 = vor.u32 %v10771_v58, %v10050_v16 }
 0x701   : > { %v6803_v63 = vpop.f32.mrf.mxu3  ;;  %7122 = vmatpush.bf16.msra.mxu2 %v10053_v7 }
 0x702   : > { %v6754_v32 = vpop.f32.mrf.mxu2  ;;  %v6659_v4 = vpop.f32.mrf.mxu0 }
 0x703   : > { %v6755_v25 = vadd.f32 %v6754_v32, %v6706_v12  ;;  %v6660_v33 = vadd.f32 %v6659_v4, %v15136_v9  ;;  %v6708_v20 = vpop.f32.mrf.mxu1  ;;  %v9858_v12 = vld [vmem:[%s16317_s3 + $0x60c] sm:$0xf0] }
 0x704   : > { %v10146_v32 = vld [vmem:[%s16317_s3 + $0x84c] sm:$0xf0] }
 0x705   : > { %v15308_v44 = vadd.f32 %v6803_v63, %v6755_v25  ;;  %v6709_v29 = vadd.f32 %v6708_v20, %v6660_v33  ;;  %6854 = vmatmul.bf16.gmra.mxu0 %v16597_v50  ;;  %v9861_v63 = vor.u32 %v10723_v60, %v9858_v12  ;;  %v10149_v4 = vor.u32 %v10795_v38, %v10146_v32  ;;  %v9954_v60 = vld [vmem:[%s16317_s3 + $0x6cc] sm:$0xf0]  ;;  %v16602_v50 = vld [vmem:[#allocation48_spill] sm:$0xff] }
 0x706   : > { %6903 = vmatmul.bf16.gmra.mxu1 %v16598_v26  ;;  %7001 = vmatmul.bf16.gmra.mxu3 %v16600_v13  ;;  %v10747_v26 = vld [vmem:[%s16317_s3 + $0x6c4] sm:$0xf] }
 0x707   : > { %6952 = vmatmul.bf16.gmra.mxu2 %v16599_v43  ;;  %7024 = vmatpush.bf16.msra.mxu0 %v9861_v63 }
 0x708   : > { %7171 = vmatpush.bf16.msra.mxu3 %v10149_v4 }
 0x709   : > { %v6806_v20 = vpop.f32.mrf.mxu3 }
 0x70a   : > { %v6757_v25 = vpop.f32.mrf.mxu2  ;;  %v6661_v13 = vpop.f32.mrf.mxu0 }
 0x70b   : > { %v6758_v33 = vadd.f32 %v6757_v25, %v6709_v29  ;;  %v6662_v58 = vadd.f32 %v6661_v13, %v15136_v9  ;;  %v6710_v16 = vpop.f32.mrf.mxu1  ;;  %v9957_v29 = vor.u32 %v10747_v26, %v9954_v60  ;;  %v9372_v26 = vld [vmem:[%s16317_s3 + $0x230] sm:$0xf] }
 0x70d   : > { %v15333_v43 = vadd.f32 %v6806_v20, %v6758_v33  ;;  %v6711_v12 = vadd.f32 %v6710_v16, %v6662_v58  ;;  %7073 = vmatpush.bf16.msra.mxu1 %v9957_v29  ;;  %v16601_v20 = vld [vmem:[#allocation40_spill] sm:$0xff]  ;;  %v9180_v16 = vld [vmem:[%s16317_s3 + $0xb0] sm:$0xf] }
 0x70e   : > { %v10602_v58 = vld [vmem:[%s16317_s3 + $0x238] sm:$0xf0]  ;;  %v9468_v29 = vld [vmem:[%s16317_s3 + $0x2f0] sm:$0xf] }
 0x70f   : > { %v9373_v60 = vor.u32 %v10602_v58, %v9372_v26 }
 0x711   : > { %v6808_v32 = vpop.f32.mrf.mxu3  ;;  %7311 = vmatpush.bf16.msrb.mxu2 %v9373_v60 }
 0x712   : > { %v6759_v38 = vpop.f32.mrf.mxu2  ;;  %v6664_v13 = vpop.f32.mrf.mxu0 }
 0x713   : > { %v6760_v7 = vadd.f32 %v6759_v38, %v6711_v12  ;;  %v6665_v25 = vadd.f32 %v6664_v13, %v15136_v9  ;;  %v6713_v63 = vpop.f32.mrf.mxu1  ;;  %v10554_v12 = vld [vmem:[%s16317_s3 + $0xb8] sm:$0xf0] }
 0x714   : > { %v10626_v38 = vld [vmem:[%s16317_s3 + $0x2f8] sm:$0xf0] }
 0x715   : > { %v15342_v4 = vadd.f32 %v6808_v32, %v6760_v7  ;;  %v6714_v33 = vadd.f32 %v6713_v63, %v6665_v25  ;;  %6859 = vmatmul.bf16.gmra.mxu0 %v16601_v20  ;;  %v9181_v32 = vor.u32 %v10554_v12, %v9180_v16  ;;  %v9469_v13 = vor.u32 %v10626_v38, %v9468_v29  ;;  %v10578_v16 = vld [vmem:[%s16317_s3 + $0x178] sm:$0xf0] }
 0x716   : > { %6908 = vmatmul.bf16.gmra.mxu1 %v16602_v50  ;;  %7006 = vmatmul.bf16.gmra.mxu3 %v16604_v61  ;;  %v9276_v50 = vld [vmem:[%s16317_s3 + $0x170] sm:$0xf]  ;;  %v16606_v20 = vld [vmem:[#allocation64_spill] sm:$0xff] }
 0x717   : > { %6957 = vmatmul.bf16.gmra.mxu2 %v16603_v54  ;;  %7213 = vmatpush.bf16.msrb.mxu0 %v9181_v32 }
 0x718   : > { %7360 = vmatpush.bf16.msrb.mxu3 %v9469_v13 }
 0x719   : > { %v6811_v63 = vpop.f32.mrf.mxu3 }
 0x71a   : > { %v6762_v7 = vpop.f32.mrf.mxu2  ;;  %v6666_v61 = vpop.f32.mrf.mxu0 }
 0x71b   : > { %v6763_v25 = vadd.f32 %v6762_v7, %v6714_v33  ;;  %v6667_v26 = vadd.f32 %v6666_v61, %v15136_v9  ;;  %v6715_v58 = vpop.f32.mrf.mxu1  ;;  %v9277_v33 = vor.u32 %v10578_v16, %v9276_v50  ;;  %v9360_v50 = vld [vmem:[%s16317_s3 + $0x218] sm:$0xf] }
 0x71d   : > { %v15367_v54 = vadd.f32 %v6811_v63, %v6763_v25  ;;  %v6716_v12 = vadd.f32 %v6715_v58, %v6667_v26  ;;  %7262 = vmatpush.bf16.msrb.mxu1 %v9277_v33  ;;  %v16605_v63 = vld [vmem:[#allocation49_spill] sm:$0xff]  ;;  %v9168_v58 = vld [vmem:[%s16317_s3 + $0x98] sm:$0xf] }
 0x71e   : > { %v10599_v26 = vld [vmem:[%s16317_s3 + $0x220] sm:$0xf0]  ;;  %v9456_v33 = vld [vmem:[%s16317_s3 + $0x2d8] sm:$0xf] }
 0x71f   : > { %v9361_v16 = vor.u32 %v10599_v26, %v9360_v50 }
 0x721   : > { %v6813_v38 = vpop.f32.mrf.mxu3  ;;  %7312 = vmatpush.bf16.msrb.mxu2 %v9361_v16 }
 0x722   : > { %v6764_v29 = vpop.f32.mrf.mxu2  ;;  %v6669_v61 = vpop.f32.mrf.mxu0 }
 0x723   : > { %v6765_v60 = vadd.f32 %v6764_v29, %v6716_v12  ;;  %v6670_v7 = vadd.f32 %v6669_v61, %v15136_v9  ;;  %v6718_v32 = vpop.f32.mrf.mxu1  ;;  %v10551_v12 = vld [vmem:[%s16317_s3 + $0xa0] sm:$0xf0] }
 0x724   : > { %v10623_v29 = vld [vmem:[%s16317_s3 + $0x2e0] sm:$0xf0] }
 0x725   : > { %v15376_v13 = vadd.f32 %v6813_v38, %v6765_v60  ;;  %v6719_v25 = vadd.f32 %v6718_v32, %v6670_v7  ;;  %6864 = vmatmul.bf16.gmra.mxu0 %v16541_v30  ;;  %v9169_v38 = vor.u32 %v10551_v12, %v9168_v58  ;;  %v9457_v61 = vor.u32 %v10623_v29, %v9456_v33  ;;  %v10575_v58 = vld [vmem:[%s16317_s3 + $0x160] sm:$0xf0] }
 0x726   : > { %6913 = vmatmul.bf16.gmra.mxu1 %v16605_v63  ;;  %7011 = vmatmul.bf16.gmra.mxu3 %v16607_v22  ;;  %v9264_v63 = vld [vmem:[%s16317_s3 + $0x158] sm:$0xf] }
 0x727   : > { %6962 = vmatmul.bf16.gmra.mxu2 %v16606_v20  ;;  %7214 = vmatpush.bf16.msrb.mxu0 %v9169_v38 }
 0x728   : > { %7361 = vmatpush.bf16.msrb.mxu3 %v9457_v61 }
 0x729   : > { %v6816_v32 = vpop.f32.mrf.mxu3 }
 0x72a   : > { %v6767_v60 = vpop.f32.mrf.mxu2  ;;  %v6671_v22 = vpop.f32.mrf.mxu0 }
 0x72b   : > { %v6768_v7 = vadd.f32 %v6767_v60, %v6719_v25  ;;  %v6672_v50 = vadd.f32 %v6671_v22, %v15136_v9  ;;  %v6720_v26 = vpop.f32.mrf.mxu1  ;;  %v9265_v25 = vor.u32 %v10575_v58, %v9264_v63  ;;  %v9348_v63 = vld [vmem:[%s16317_s3 + $0x200] sm:$0xf] }
 0x72c   : > { %v9444_v58 = vld [vmem:[%s16317_s3 + $0x2c0] sm:$0xf] }
 0x72d   : > { %v15401_v20 = vadd.f32 %v6816_v32, %v6768_v7  ;;  %v6721_v12 = vadd.f32 %v6720_v26, %v6672_v50  ;;  %7263 = vmatpush.bf16.msrb.mxu1 %v9265_v25  ;;  %v16608_v7 = vld [vmem:[#allocation19_spill] sm:$0xff]  ;;  %v9156_v32 = vld [vmem:[%s16317_s3 + $0x80] sm:$0xf]  ;;  %v10548_v26 = vld [vmem:[%s16317_s3 + $0x88] sm:$0xf0] }
 0x731   : > { %v6818_v29 = vpop.f32.mrf.mxu3 }
 0x732   : > { %v6769_v33 = vpop.f32.mrf.mxu2  ;;  %v6830_v22 = vpop.f32.mrf.mxu0 }
 0x733   : > { %v6770_v16 = vadd.f32 %v6769_v33, %v6721_v12  ;;  %v6831_v9 = vadd.f32 %v6830_v22, %v15163_v57  ;;  %v6879_v60 = vpop.f32.mrf.mxu1  ;;  %v10596_v57 = vld [vmem:[%s16317_s3 + $0x208] sm:$0xf0]  ;;  %v9157_v33 = vor.u32 %v10548_v26, %v9156_v32 }
 0x734   : > { %v9349_v50 = vor.u32 %v10596_v57, %v9348_v63  ;;  %v10620_v12 = vld [vmem:[%s16317_s3 + $0x2c8] sm:$0xf0] }
 0x735   : > { %v15410_v38 = vadd.f32 %v6818_v29, %v6770_v16  ;;  %v6880_v61 = vadd.f32 %v6879_v60, %v6831_v9  ;;  %7025 = vmatmul.bf16.vlgmr.msra.gmra.mxu0 %v16545_v53  ;;  %v9445_v16 = vor.u32 %v10620_v12, %v9444_v58  ;;  %v10572_v32 = vld [vmem:[%s16317_s3 + $0x148] sm:$0xf0] }
 0x736   : > { %7074 = vmatmul.bf16.vlgmr.msra.gmra.mxu1 %v13748_v52  ;;  %7172 = vmatmul.bf16.vlgmr.msra.gmra.mxu3 %v16608_v7  ;;  %v9252_v7 = vld [vmem:[%s16317_s3 + $0x140] sm:$0xf] }
 0x737   : > { %7123 = vmatmul.bf16.vlgmr.msra.gmra.mxu2 %v14067_v3  ;;  %7215 = vmatpush.bf16.msrb.mxu0 %v9157_v33 }
 0x738   : > { %7313 = vmatpush.bf16.msrb.mxu2 %v9349_v50  ;;  %7362 = vmatpush.bf16.msrb.mxu3 %v9445_v16 }
 0x739   : > { %v6977_v22 = vpop.f32.mrf.mxu3 }
 0x73a   : > { %v6928_v25 = vpop.f32.mrf.mxu2  ;;  %v6832_v9 = vpop.f32.mrf.mxu0 }
 0x73b   : > { %v6929_v29 = vadd.f32 %v6928_v25, %v6880_v61  ;;  %v6833_v60 = vadd.f32 %v6832_v9, %v15172_v2  ;;  %v6881_v63 = vpop.f32.mrf.mxu1  ;;  %v9253_v61 = vor.u32 %v10572_v32, %v9252_v7  ;;  %v9336_v7 = vld [vmem:[%s16317_s3 + $0x1e8] sm:$0xf] }
 0x73c   : > { %v9144_v9 = vld [vmem:[%s16317_s3 + $0x68] sm:$0xf] }
 0x73d   : > { %v15435_v57 = vadd.f32 %v6977_v22, %v6929_v29  ;;  %v6882_v26 = vadd.f32 %v6881_v63, %v6833_v60  ;;  %7264 = vmatpush.bf16.msrb.mxu1 %v9253_v61  ;;  %v16609_v22 = vld [vmem:[#allocation5_spill] sm:$0xff]  ;;  %v10545_v63 = vld [vmem:[%s16317_s3 + $0x70] sm:$0xf0]  ;;  %v9432_v32 = vld [vmem:[%s16317_s3 + $0x2a8] sm:$0xf] }
 0x741   : > { %v6979_v12 = vpop.f32.mrf.mxu3 }
 0x742   : > { %v6930_v58 = vpop.f32.mrf.mxu2  ;;  %v6835_v2 = vpop.f32.mrf.mxu0 }
 0x743   : > { %v6931_v50 = vadd.f32 %v6930_v58, %v6882_v26  ;;  %v6836_v25 = vadd.f32 %v6835_v2, %v15197_v59  ;;  %v6884_v33 = vpop.f32.mrf.mxu1  ;;  %v10593_v59 = vld [vmem:[%s16317_s3 + $0x1f0] sm:$0xf0]  ;;  %v9145_v58 = vor.u32 %v10545_v63, %v9144_v9 }
 0x744   : > { %v9337_v60 = vor.u32 %v10593_v59, %v9336_v7  ;;  %v10617_v26 = vld [vmem:[%s16317_s3 + $0x2b0] sm:$0xf0] }
 0x745   : > { %v15444_v16 = vadd.f32 %v6979_v12, %v6931_v50  ;;  %v6885_v29 = vadd.f32 %v6884_v33, %v6836_v25  ;;  %7030 = vmatmul.bf16.gmra.mxu0 %v16546_v48  ;;  %v9433_v50 = vor.u32 %v10617_v26, %v9432_v32  ;;  %v10569_v9 = vld [vmem:[%s16317_s3 + $0x130] sm:$0xf0] }
 0x746   : > { %7079 = vmatmul.bf16.gmra.mxu1 %v13788_v19  ;;  %7177 = vmatmul.bf16.gmra.mxu3 %v16609_v22  ;;  %v9240_v22 = vld [vmem:[%s16317_s3 + $0x128] sm:$0xf] }
 0x747   : > { %7128 = vmatmul.bf16.gmra.mxu2 %v14103_v15  ;;  %7216 = vmatpush.bf16.msrb.mxu0 %v9145_v58 }
 0x748   : > { %7314 = vmatpush.bf16.msrb.mxu2 %v9337_v60  ;;  %7363 = vmatpush.bf16.msrb.mxu3 %v9433_v50 }
 0x749   : > { %v6982_v2 = vpop.f32.mrf.mxu3 }
 0x74a   : > { %v6933_v61 = vpop.f32.mrf.mxu2  ;;  %v6837_v25 = vpop.f32.mrf.mxu0 }
 0x74b   : > { %v6934_v12 = vadd.f32 %v6933_v61, %v6885_v29  ;;  %v6838_v33 = vadd.f32 %v6837_v25, %v15206_v24  ;;  %v6886_v7 = vpop.f32.mrf.mxu1  ;;  %v9241_v29 = vor.u32 %v10569_v9, %v9240_v22  ;;  %v9324_v22 = vld [vmem:[%s16317_s3 + $0x1d0] sm:$0xf] }
 0x74c   : > { %v9132_v25 = vld [vmem:[%s16317_s3 + $0x50] sm:$0xf] }
 0x74d   : > { %v15469_v59 = vadd.f32 %v6982_v2, %v6934_v12  ;;  %v6887_v63 = vadd.f32 %v6886_v7, %v6838_v33  ;;  %7265 = vmatpush.bf16.msrb.mxu1 %v9241_v29  ;;  %v16610_v2 = vld [vmem:[#allocation12_spill] sm:$0xff]  ;;  %v9420_v9 = vld [vmem:[%s16317_s3 + $0x290] sm:$0xf] }
 0x74e   : > { %v10542_v7 = vld [vmem:[%s16317_s3 + $0x58] sm:$0xf0] }
 0x751   : > { %v6984_v26 = vpop.f32.mrf.mxu3 }
 0x752   : > { %v6935_v32 = vpop.f32.mrf.mxu2  ;;  %v6840_v24 = vpop.f32.mrf.mxu0 }
 0x753   : > { %v6936_v60 = vadd.f32 %v6935_v32, %v6887_v63  ;;  %v6841_v61 = vadd.f32 %v6840_v24, %v15231_v36  ;;  %v6889_v58 = vpop.f32.mrf.mxu1  ;;  %v10590_v36 = vld [vmem:[%s16317_s3 + $0x1d8] sm:$0xf0]  ;;  %v9133_v32 = vor.u32 %v10542_v7, %v9132_v25 }
 0x754   : > { %v9325_v33 = vor.u32 %v10590_v36, %v9324_v22  ;;  %v10614_v63 = vld [vmem:[%s16317_s3 + $0x298] sm:$0xf0] }
 0x755   : > { %v15478_v50 = vadd.f32 %v6984_v26, %v6936_v60  ;;  %v6890_v12 = vadd.f32 %v6889_v58, %v6841_v61  ;;  %7035 = vmatmul.bf16.gmra.mxu0 %v16547_v5  ;;  %v9421_v60 = vor.u32 %v10614_v63, %v9420_v9  ;;  %v10566_v25 = vld [vmem:[%s16317_s3 + $0x118] sm:$0xf0] }
 0x756   : > { %7084 = vmatmul.bf16.gmra.mxu1 %v13828_v51  ;;  %7182 = vmatmul.bf16.gmra.mxu3 %v16610_v2  ;;  %v9228_v2 = vld [vmem:[%s16317_s3 + $0x110] sm:$0xf] }
 0x757   : > { %7133 = vmatmul.bf16.gmra.mxu2 %v14139_v11  ;;  %7217 = vmatpush.bf16.msrb.mxu0 %v9133_v32 }
 0x758   : > { %7315 = vmatpush.bf16.msrb.mxu2 %v9325_v33  ;;  %7364 = vmatpush.bf16.msrb.mxu3 %v9421_v60 }
 0x759   : > { %v6987_v24 = vpop.f32.mrf.mxu3 }
 0x75a   : > { %v6938_v29 = vpop.f32.mrf.mxu2  ;;  %v6842_v61 = vpop.f32.mrf.mxu0 }
 0x75b   : > { %v6939_v26 = vadd.f32 %v6938_v29, %v6890_v12  ;;  %v6843_v58 = vadd.f32 %v6842_v61, %v15240_v40  ;;  %v6891_v22 = vpop.f32.mrf.mxu1  ;;  %v9229_v12 = vor.u32 %v10566_v25, %v9228_v2  ;;  %v9312_v2 = vld [vmem:[%s16317_s3 + $0x1b8] sm:$0xf] }
 0x75c   : > { %v9120_v61 = vld [vmem:[%s16317_s3 + $0x38] sm:$0xf] }
 0x75d   : > { %v15503_v36 = vadd.f32 %v6987_v24, %v6939_v26  ;;  %v6892_v7 = vadd.f32 %v6891_v22, %v6843_v58  ;;  %7266 = vmatpush.bf16.msrb.mxu1 %v9229_v12  ;;  %v16611_v24 = vld [vmem:[#allocation20_spill] sm:$0xff]  ;;  %v10539_v22 = vld [vmem:[%s16317_s3 + $0x40] sm:$0xf0] }
 0x75e   : > { %v9408_v25 = vld [vmem:[%s16317_s3 + $0x278] sm:$0xf] }
 0x761   : > { %v6989_v63 = vpop.f32.mrf.mxu3 }
 0x762   : > { %v6940_v9 = vpop.f32.mrf.mxu2  ;;  %v6845_v40 = vpop.f32.mrf.mxu0 }
 0x763   : > { %v6941_v33 = vadd.f32 %v6940_v9, %v6892_v7  ;;  %v6846_v29 = vadd.f32 %v6845_v40, %v15265_v8  ;;  %v6894_v32 = vpop.f32.mrf.mxu1  ;;  %v10587_v8 = vld [vmem:[%s16317_s3 + $0x1c0] sm:$0xf0]  ;;  %v9121_v9 = vor.u32 %v10539_v22, %v9120_v61 }
 0x764   : > { %v9313_v58 = vor.u32 %v10587_v8, %v9312_v2  ;;  %v10611_v7 = vld [vmem:[%s16317_s3 + $0x280] sm:$0xf0] }
 0x765   : > { %v15512_v60 = vadd.f32 %v6989_v63, %v6941_v33  ;;  %v6895_v26 = vadd.f32 %v6894_v32, %v6846_v29  ;;  %7040 = vmatmul.bf16.gmra.mxu0 %v16548_v46  ;;  %v9409_v33 = vor.u32 %v10611_v7, %v9408_v25  ;;  %v10563_v61 = vld [vmem:[%s16317_s3 + $0x100] sm:$0xf0] }
 0x766   : > { %7089 = vmatmul.bf16.gmra.mxu1 %v13868_v47  ;;  %7187 = vmatmul.bf16.gmra.mxu3 %v16611_v24  ;;  %v9216_v24 = vld [vmem:[%s16317_s3 + $0xf8] sm:$0xf] }
 0x767   : > { %7138 = vmatmul.bf16.gmra.mxu2 %v14175_v62  ;;  %7218 = vmatpush.bf16.msrb.mxu0 %v9121_v9 }
 0x768   : > { %7316 = vmatpush.bf16.msrb.mxu2 %v9313_v58  ;;  %7365 = vmatpush.bf16.msrb.mxu3 %v9409_v33 }
 0x769   : > { %v6992_v40 = vpop.f32.mrf.mxu3 }
 0x76a   : > { %v6943_v12 = vpop.f32.mrf.mxu2  ;;  %v6847_v29 = vpop.f32.mrf.mxu0 }
 0x76b   : > { %v6944_v63 = vadd.f32 %v6943_v12, %v6895_v26  ;;  %v6848_v32 = vadd.f32 %v6847_v29, %v15274_v37  ;;  %v6896_v2 = vpop.f32.mrf.mxu1  ;;  %v9217_v26 = vor.u32 %v10563_v61, %v9216_v24  ;;  %v9300_v24 = vld [vmem:[%s16317_s3 + $0x1a0] sm:$0xf] }
 0x76c   : > { %v9108_v29 = vld [vmem:[%s16317_s3 + $0x20] sm:$0xf] }
 0x76d   : > { %v15537_v8 = vadd.f32 %v6992_v40, %v6944_v63  ;;  %v6897_v22 = vadd.f32 %v6896_v2, %v6848_v32  ;;  %7267 = vmatpush.bf16.msrb.mxu1 %v9217_v26  ;;  %v16612_v40 = vld [vmem:[#allocation74_spill] sm:$0xff]  ;;  %v9396_v61 = vld [vmem:[%s16317_s3 + $0x260] sm:$0xf] }
 0x76e   : > { %v10536_v2 = vld [vmem:[%s16317_s3 + $0x28] sm:$0xf0] }
 0x771   : > { %v6994_v7 = vpop.f32.mrf.mxu3 }
 0x772   : > { %v6945_v25 = vpop.f32.mrf.mxu2  ;;  %v6850_v37 = vpop.f32.mrf.mxu0 }
 0x773   : > { %v6946_v58 = vadd.f32 %v6945_v25, %v6897_v22  ;;  %v6851_v12 = vadd.f32 %v6850_v37, %v15299_v34  ;;  %v6899_v9 = vpop.f32.mrf.mxu1  ;;  %v10584_v34 = vld [vmem:[%s16317_s3 + $0x1a8] sm:$0xf0]  ;;  %v9109_v25 = vor.u32 %v10536_v2, %v9108_v29 }
 0x774   : > { %v9301_v32 = vor.u32 %v10584_v34, %v9300_v24  ;;  %v10608_v22 = vld [vmem:[%s16317_s3 + $0x268] sm:$0xf0] }
 0x775   : > { %v15546_v33 = vadd.f32 %v6994_v7, %v6946_v58  ;;  %v6900_v63 = vadd.f32 %v6899_v9, %v6851_v12  ;;  %7045 = vmatmul.bf16.gmra.mxu0 %v16549_v21  ;;  %v9397_v58 = vor.u32 %v10608_v22, %v9396_v61  ;;  %v10560_v29 = vld [vmem:[%s16317_s3 + $0xe8] sm:$0xf0] }
 0x776   : > { %7094 = vmatmul.bf16.gmra.mxu1 %v13908_v0  ;;  %7192 = vmatmul.bf16.gmra.mxu3 %v16612_v40  ;;  %v9204_v40 = vld [vmem:[%s16317_s3 + $0xe0] sm:$0xf] }
 0x777   : > { %7143 = vmatmul.bf16.gmra.mxu2 %v14211_v35  ;;  %7219 = vmatpush.bf16.msrb.mxu0 %v9109_v25 }
 0x778   : > { %7317 = vmatpush.bf16.msrb.mxu2 %v9301_v32  ;;  %7366 = vmatpush.bf16.msrb.mxu3 %v9397_v58 }
 0x779   : > { %v6997_v37 = vpop.f32.mrf.mxu3 }
 0x77a   : > { %v6948_v26 = vpop.f32.mrf.mxu2  ;;  %v6852_v12 = vpop.f32.mrf.mxu0 }
 0x77b   : > { %v6949_v7 = vadd.f32 %v6948_v26, %v6900_v63  ;;  %v6853_v9 = vadd.f32 %v6852_v12, %v15308_v44  ;;  %v6901_v24 = vpop.f32.mrf.mxu1  ;;  %v9205_v63 = vor.u32 %v10560_v29, %v9204_v40  ;;  %v9288_v40 = vld [vmem:[%s16317_s3 + $0x188] sm:$0xf] }
 0x77c   : > { %v9096_v12 = vld [vmem:[%s16317_s3 + $0x8] sm:$0xf] }
 0x77d   : > { %v15571_v34 = vadd.f32 %v6997_v37, %v6949_v7  ;;  %v6902_v2 = vadd.f32 %v6901_v24, %v6853_v9  ;;  %7268 = vmatpush.bf16.msrb.mxu1 %v9205_v63  ;;  %v16613_v37 = vld [vmem:[#allocation75_spill] sm:$0xff]  ;;  %v9384_v29 = vld [vmem:[%s16317_s3 + $0x248] sm:$0xf] }
 0x77e   : > { %v10533_v24 = vld [vmem:[%s16317_s3 + $0x10] sm:$0xf0] }
 0x781   : > { %v6999_v22 = vpop.f32.mrf.mxu3 }
 0x782   : > { %v6950_v61 = vpop.f32.mrf.mxu2  ;;  %v6855_v44 = vpop.f32.mrf.mxu0 }
 0x783   : > { %v6951_v32 = vadd.f32 %v6950_v61, %v6902_v2  ;;  %v6856_v26 = vadd.f32 %v6855_v44, %v15333_v43  ;;  %v6904_v25 = vpop.f32.mrf.mxu1  ;;  %v10581_v43 = vld [vmem:[%s16317_s3 + $0x190] sm:$0xf0]  ;;  %v9097_v61 = vor.u32 %v10533_v24, %v9096_v12 }
 0x784   : > { %v9289_v9 = vor.u32 %v10581_v43, %v9288_v40  ;;  %v10605_v2 = vld [vmem:[%s16317_s3 + $0x250] sm:$0xf0] }
 0x785   : > { %v15580_v58 = vadd.f32 %v6999_v22, %v6951_v32  ;;  %v6905_v7 = vadd.f32 %v6904_v25, %v6856_v26  ;;  %7050 = vmatmul.bf16.gmra.mxu0 %v16550_v23  ;;  %v9385_v32 = vor.u32 %v10605_v2, %v9384_v29  ;;  %v10557_v12 = vld [vmem:[%s16317_s3 + $0xd0] sm:$0xf0] }
 0x786   : > { %7099 = vmatmul.bf16.gmra.mxu1 %v13948_v28  ;;  %7197 = vmatmul.bf16.gmra.mxu3 %v16613_v37  ;;  %v9192_v37 = vld [vmem:[%s16317_s3 + $0xc8] sm:$0xf] }
 0x787   : > { %7148 = vmatmul.bf16.gmra.mxu2 %v14247_v41  ;;  %7220 = vmatpush.bf16.msrb.mxu0 %v9097_v61 }
 0x788   : > { %7318 = vmatpush.bf16.msrb.mxu2 %v9289_v9  ;;  %7367 = vmatpush.bf16.msrb.mxu3 %v9385_v32 }
 0x789   : > { %v7002_v44 = vpop.f32.mrf.mxu3 }
 0x78a   : > { %v6953_v63 = vpop.f32.mrf.mxu2  ;;  %v6857_v26 = vpop.f32.mrf.mxu0 }
 0x78b   : > { %v6954_v22 = vadd.f32 %v6953_v63, %v6905_v7  ;;  %v6858_v25 = vadd.f32 %v6857_v26, %v15342_v4  ;;  %v6906_v40 = vpop.f32.mrf.mxu1  ;;  %v9193_v7 = vor.u32 %v10557_v12, %v9192_v37  ;;  %v16615_v26 = vld [vmem:[#allocation77_spill] sm:$0xff]  ;;  %v9756_v37 = vld [vmem:[%s16317_s3 + $0x530] sm:$0xf]  ;;  %v10650_v12 = vld [vmem:[%s16317_s3 + $0x3b8] sm:$0xf0] }
 0x78d   : > { %v15605_v43 = vadd.f32 %v7002_v44, %v6954_v22  ;;  %v6907_v24 = vadd.f32 %v6906_v40, %v6858_v25  ;;  %7269 = vmatpush.bf16.msrb.mxu1 %v9193_v7  ;;  %v16614_v44 = vld [vmem:[#allocation76_spill] sm:$0xff]  ;;  %v9564_v25 = vld [vmem:[%s16317_s3 + $0x3b0] sm:$0xf] }
 0x78e   : > { %v10722_v7 = vld [vmem:[%s16317_s3 + $0x5f8] sm:$0xf0] }
 0x791   : > { %v7004_v2 = vpop.f32.mrf.mxu3 }
 0x792   : > { %v6955_v29 = vpop.f32.mrf.mxu2  ;;  %v6860_v4 = vpop.f32.mrf.mxu0 }
 0x793   : > { %v6956_v9 = vadd.f32 %v6955_v29, %v6907_v24  ;;  %v6861_v63 = vadd.f32 %v6860_v4, %v15367_v54  ;;  %v6909_v61 = vpop.f32.mrf.mxu1  ;;  %v10698_v54 = vld [vmem:[%s16317_s3 + $0x538] sm:$0xf0]  ;;  %v9852_v24 = vld [vmem:[%s16317_s3 + $0x5f0] sm:$0xf] }
 0x794   : > { %v9757_v40 = vor.u32 %v10698_v54, %v9756_v37 }
 0x795   : > { %v15614_v32 = vadd.f32 %v7004_v2, %v6956_v9  ;;  %v6910_v22 = vadd.f32 %v6909_v61, %v6861_v63  ;;  %7055 = vmatmul.bf16.gmra.mxu0 %v16551_v6  ;;  %v9565_v9 = vor.u32 %v10650_v12, %v9564_v25  ;;  %v9853_v2 = vor.u32 %v10722_v7, %v9852_v24  ;;  %v10674_v25 = vld [vmem:[%s16317_s3 + $0x478] sm:$0xf0] }
 0x796   : > { %7104 = vmatmul.bf16.gmra.mxu1 %v13988_v1  ;;  %7202 = vmatmul.bf16.gmra.mxu3 %v16615_v26  ;;  %v9660_v1 = vld [vmem:[%s16317_s3 + $0x470] sm:$0xf] }
 0x797   : > { %7153 = vmatmul.bf16.gmra.mxu2 %v16614_v44  ;;  %7409 = vmatpush.bf16.msra.mxu0 %v9565_v9 }
 0x798   : > { %7507 = vmatpush.bf16.msra.mxu2 %v9757_v40  ;;  %7556 = vmatpush.bf16.msra.mxu3 %v9853_v2 }
 0x799   : > { %v7007_v63 = vpop.f32.mrf.mxu3 }
 0x79a   : > { %v6958_v29 = vpop.f32.mrf.mxu2  ;;  %v6862_v61 = vpop.f32.mrf.mxu0 }
 0x79b   : > { %v6959_v4 = vadd.f32 %v6958_v29, %v6910_v22  ;;  %v6863_v37 = vadd.f32 %v6862_v61, %v15376_v13  ;;  %v6911_v54 = vpop.f32.mrf.mxu1  ;;  %v9661_v22 = vor.u32 %v10674_v25, %v9660_v1  ;;  %v9744_v1 = vld [vmem:[%s16317_s3 + $0x518] sm:$0xf] }
 0x79c   : > { %v9840_v61 = vld [vmem:[%s16317_s3 + $0x5d8] sm:$0xf] }
 0x79d   : > { %v15639_v26 = vadd.f32 %v7007_v63, %v6959_v4  ;;  %v6912_v44 = vadd.f32 %v6911_v54, %v6863_v37  ;;  %7458 = vmatpush.bf16.msra.mxu1 %v9661_v22  ;;  %v10647_v63 = vld [vmem:[%s16317_s3 + $0x3a0] sm:$0xf0] }
 0x79e   : > { %v10719_v37 = vld [vmem:[%s16317_s3 + $0x5e0] sm:$0xf0] }
 0x79f   : > { %v9841_v22 = vor.u32 %v10719_v37, %v9840_v61 }
 0x7a1   : > { %v7009_v24 = vpop.f32.mrf.mxu3  ;;  %7557 = vmatpush.bf16.msra.mxu3 %v9841_v22  ;;  %v9732_v22 = vld [vmem:[%s16317_s3 + $0x500] sm:$0xf] }
 0x7a2   : > { %v6960_v12 = vpop.f32.mrf.mxu2  ;;  %v6865_v13 = vpop.f32.mrf.mxu0 }
 0x7a3   : > { %v6961_v40 = vadd.f32 %v6960_v12, %v6912_v44  ;;  %v6866_v7 = vadd.f32 %v6865_v13, %v15401_v20  ;;  %v6914_v29 = vpop.f32.mrf.mxu1  ;;  %v10695_v20 = vld [vmem:[%s16317_s3 + $0x520] sm:$0xf0]  ;;  %v9552_v44 = vld [vmem:[%s16317_s3 + $0x398] sm:$0xf] }
 0x7a4   : > { %v9745_v4 = vor.u32 %v10695_v20, %v9744_v1  ;;  %v9553_v25 = vor.u32 %v10647_v63, %v9552_v44  ;;  %v9648_v20 = vld [vmem:[%s16317_s3 + $0x458] sm:$0xf]  ;;  %v10671_v44 = vld [vmem:[%s16317_s3 + $0x460] sm:$0xf0] }
 0x7a5   : > { %v15648_v9 = vadd.f32 %v7009_v24, %v6961_v40  ;;  %v6915_v2 = vadd.f32 %v6914_v29, %v6866_v7  ;;  %7060 = vmatmul.bf16.gmra.mxu0 %v13714_v31 }
 0x7a6   : > { %7109 = vmatmul.bf16.gmra.mxu1 %v14026_v42  ;;  %7207 = vmatmul.bf16.gmra.mxu3 %v14350_v18 }
 0x7a7   : > { %7158 = vmatmul.bf16.gmra.mxu2 %v14324_v39  ;;  %7410 = vmatpush.bf16.msra.mxu0 %v9553_v25 }
 0x7a8   : > { %7508 = vmatpush.bf16.msra.mxu2 %v9745_v4 }
 0x7a9   : > { %v7012_v40 = vpop.f32.mrf.mxu3 }
 0x7aa   : > { %v6963_v54 = vpop.f32.mrf.mxu2  ;;  %v6867_v24 = vpop.f32.mrf.mxu0 }
 0x7ab   : > { %v6964_v12 = vadd.f32 %v6963_v54, %v6915_v2  ;;  %v6868_v13 = vadd.f32 %v6867_v24, %v15410_v38  ;;  %v6916_v7 = vpop.f32.mrf.mxu1  ;;  %v9649_v2 = vor.u32 %v10671_v44, %v9648_v20 }
 0x7ad   : > { %v15673_v29 = vadd.f32 %v7012_v40, %v6964_v12  ;;  %v6917_v1 = vadd.f32 %v6916_v7, %v6868_v13  ;;  %7459 = vmatpush.bf16.msra.mxu1 %v9649_v2  ;;  %v10692_v12 = vld [vmem:[%s16317_s3 + $0x508] sm:$0xf0] }
 0x7b1   : > { %v7014_v61 = vpop.f32.mrf.mxu3 }
 0x7b2   : > { %v6965_v63 = vpop.f32.mrf.mxu2  ;;  %v7026_v38 = vpop.f32.mrf.mxu0 }
 0x7b3   : > { %v6966_v4 = vadd.f32 %v6965_v63, %v6917_v1  ;;  %v7075_v37 = vpop.f32.mrf.mxu1  ;;  %v7027_v25 = vadd.f32 %v7026_v38, %v15435_v57  ;;  %v9540_v57 = vld [vmem:[%s16317_s3 + $0x380] sm:$0xf]  ;;  %v10668_v38 = vld [vmem:[%s16317_s3 + $0x448] sm:$0xf0] }
 0x7b5   : > { %v15681_v54 = vadd.f32 %v7014_v61, %v6966_v4  ;;  %7221 = vmatmul.bf16.vlgmr.msrb.gmra.mxu0 %v11622_v56  ;;  %v7076_v40 = vadd.f32 %v7075_v37, %v7027_v25  ;;  %v9733_v56 = vor.u32 %v10692_v12, %v9732_v22  ;;  %v9636_v61 = vld [vmem:[%s16317_s3 + $0x440] sm:$0xf] }
 0x7b6   : > { %7270 = vmatmul.bf16.vlgmr.msrb.gmra.mxu1 %v11917_v10  ;;  %7368 = vmatmul.bf16.vlgmr.msrb.gmra.mxu3 %v16479_v17  ;;  %v10644_v10 = vld [vmem:[%s16317_s3 + $0x388] sm:$0xf0]  ;;  %v9637_v37 = vor.u32 %v10668_v38, %v9636_v61  ;;  %v9624_v38 = vld [vmem:[%s16317_s3 + $0x428] sm:$0xf] }
 0x7b7   : > { %7319 = vmatmul.bf16.vlgmr.msrb.gmra.mxu2 %v12239_v55  ;;  %v9828_v55 = vld [vmem:[%s16317_s3 + $0x5c0] sm:$0xf]  ;;  %v10716_v17 = vld [vmem:[%s16317_s3 + $0x5c8] sm:$0xf0]  ;;  %v9541_v13 = vor.u32 %v10644_v10, %v9540_v57 }
 0x7b8   : > { %v9829_v7 = vor.u32 %v10716_v17, %v9828_v55  ;;  %7509 = vmatpush.bf16.msra.mxu2 %v9733_v56  ;;  %7460 = vmatpush.bf16.msra.mxu1 %v9637_v37  ;;  %v9720_v55 = vld [vmem:[%s16317_s3 + $0x4e8] sm:$0xf]  ;;  %v10689_v17 = vld [vmem:[%s16317_s3 + $0x4f0] sm:$0xf0] }
 0x7b9   : > { %v7173_v20 = vpop.f32.mrf.mxu3  ;;  %7411 = vmatpush.bf16.msra.mxu0 %v9541_v13  ;;  %v10665_v37 = vld [vmem:[%s16317_s3 + $0x430] sm:$0xf0] }
 0x7ba   : > { %v7124_v24 = vpop.f32.mrf.mxu2  ;;  %v7028_v44 = vpop.f32.mrf.mxu0  ;;  %7558 = vmatpush.bf16.msra.mxu3 %v9829_v7 }
 0x7bb   : > { %v7125_v1 = vadd.f32 %v7124_v24, %v7076_v40  ;;  %v7077_v2 = vpop.f32.mrf.mxu1  ;;  %v7029_v4 = vadd.f32 %v7028_v44, %v15444_v16  ;;  %v9721_v24 = vor.u32 %v10689_v17, %v9720_v55  ;;  %v16616_v55 = vld [vmem:[#allocation6_spill] sm:$0xff]  ;;  %v16617_v17 = vld [vmem:[#allocation13_spill] sm:$0xff] }
 0x7bd   : > { %v7174_v63 = vadd.f32 %v7173_v20, %v7125_v1  ;;  %v7078_v25 = vadd.f32 %v7077_v2, %v7029_v4  ;;  %7510 = vmatpush.bf16.msra.mxu2 %v9721_v24  ;;  %v9708_v24 = vld [vmem:[%s16317_s3 + $0x4d0] sm:$0xf] }
 0x7bf   : > { %7802 = vst [vmem:[%s14900_s7 + $0x8] sm:$0xff] %v7174_v63 }
 0x7c1   : > { %v7175_v57 = vpop.f32.mrf.mxu3 }
 0x7c2   : > { %v7126_v22 = vpop.f32.mrf.mxu2  ;;  %v7031_v40 = vpop.f32.mrf.mxu0 }
 0x7c3   : > { %v7127_v12 = vadd.f32 %v7126_v22, %v7078_v25  ;;  %v7080_v56 = vpop.f32.mrf.mxu1  ;;  %v7032_v16 = vadd.f32 %v7031_v40, %v15469_v59  ;;  %v9528_v59 = vld [vmem:[%s16317_s3 + $0x368] sm:$0xf]  ;;  %v9625_v25 = vor.u32 %v10665_v37, %v9624_v38 }
 0x7c5   : > { %v7176_v10 = vadd.f32 %v7175_v57, %v7127_v12  ;;  %7226 = vmatmul.bf16.gmra.mxu0 %v16480_v27  ;;  %v7081_v27 = vadd.f32 %v7080_v56, %v7032_v16  ;;  %7461 = vmatpush.bf16.msra.mxu1 %v9625_v25 }
 0x7c6   : > { %7275 = vmatmul.bf16.gmra.mxu1 %v16481_v14  ;;  %7373 = vmatmul.bf16.gmra.mxu3 %v16552_v49  ;;  %v10641_v14 = vld [vmem:[%s16317_s3 + $0x370] sm:$0xf0] }
 0x7c7   : > { %7805 = vst [vmem:[%s14900_s7 + $0x20] sm:$0xff] %v7176_v10  ;;  %7324 = vmatmul.bf16.gmra.mxu2 %v16482_v45  ;;  %v9816_v45 = vld [vmem:[%s16317_s3 + $0x5a8] sm:$0xf]  ;;  %v10713_v49 = vld [vmem:[%s16317_s3 + $0x5b0] sm:$0xf0]  ;;  %v9529_v7 = vor.u32 %v10641_v14, %v9528_v59 }
 0x7c8   : > { %v9817_v1 = vor.u32 %v10713_v49, %v9816_v45  ;;  %v16618_v59 = vld [vmem:[#allocation22_spill] sm:$0xff]  ;;  %v10686_v14 = vld [vmem:[%s16317_s3 + $0x4d8] sm:$0xf0] }
 0x7c9   : > { %v7178_v44 = vpop.f32.mrf.mxu3  ;;  %7412 = vmatpush.bf16.msra.mxu0 %v9529_v7  ;;  %v9709_v49 = vor.u32 %v10686_v14, %v9708_v24  ;;  %v9804_v7 = vld [vmem:[%s16317_s3 + $0x590] sm:$0xf]  ;;  %v16622_v24 = vld [vmem:[#allocation24_spill] sm:$0xff]  ;;  %v16623_v14 = vld [vmem:[#allocation25_spill] sm:$0xff] }
 0x7ca   : > { %v7129_v13 = vpop.f32.mrf.mxu2  ;;  %v7033_v2 = vpop.f32.mrf.mxu0  ;;  %7559 = vmatpush.bf16.msra.mxu3 %v9817_v1  ;;  %v10710_v1 = vld [vmem:[%s16317_s3 + $0x598] sm:$0xf0] }
 0x7cb   : > { %v7130_v20 = vadd.f32 %v7129_v13, %v7081_v27  ;;  %v7082_v63 = vpop.f32.mrf.mxu1  ;;  %v7034_v61 = vadd.f32 %v7033_v2, %v15478_v50  ;;  %v16619_v27 = vld [vmem:[#allocation23_spill] sm:$0xff]  ;;  %v10638_v13 = vld [vmem:[%s16317_s3 + $0x358] sm:$0xf0]  ;;  %v9805_v2 = vor.u32 %v10710_v1, %v9804_v7  ;;  %7511 = vmatpush.bf16.msra.mxu2 %v9709_v49  ;;  %v10635_v7 = vld [vmem:[%s16317_s3 + $0x340] sm:$0xf0] }
 0x7cc   : > { %v9792_v1 = vld [vmem:[%s16317_s3 + $0x578] sm:$0xf] }
 0x7cd   : > { %v7179_v4 = vadd.f32 %v7178_v44, %v7130_v20  ;;  %v7083_v22 = vadd.f32 %v7082_v63, %v7034_v61 }
 0x7ce   : > { %7560 = vmatpush.bf16.msra.mxu3 %v9805_v2 }
 0x7cf   : > { %7808 = vst [vmem:[%s14900_s7 + $0x38] sm:$0xff] %v7179_v4 }
 0x7d1   : > { %v7180_v40 = vpop.f32.mrf.mxu3 }
 0x7d2   : > { %v7131_v12 = vpop.f32.mrf.mxu2  ;;  %v7036_v56 = vpop.f32.mrf.mxu0 }
 0x7d3   : > { %v7132_v57 = vadd.f32 %v7131_v12, %v7083_v22  ;;  %v7085_v10 = vpop.f32.mrf.mxu1  ;;  %v7037_v50 = vadd.f32 %v7036_v56, %v15503_v36  ;;  %v9516_v36 = vld [vmem:[%s16317_s3 + $0x350] sm:$0xf]  ;;  %v10662_v12 = vld [vmem:[%s16317_s3 + $0x418] sm:$0xf0] }
 0x7d4   : > { %v9517_v44 = vor.u32 %v10638_v13, %v9516_v36  ;;  %v9612_v22 = vld [vmem:[%s16317_s3 + $0x410] sm:$0xf]  ;;  %v9696_v36 = vld [vmem:[%s16317_s3 + $0x4b8] sm:$0xf] }
 0x7d5   : > { %v7181_v16 = vadd.f32 %v7180_v40, %v7132_v57  ;;  %7231 = vmatmul.bf16.gmra.mxu0 %v16616_v55  ;;  %v7086_v45 = vadd.f32 %v7085_v10, %v7037_v50  ;;  %v9613_v57 = vor.u32 %v10662_v12, %v9612_v22  ;;  %v9600_v12 = vld [vmem:[%s16317_s3 + $0x3f8] sm:$0xf] }
 0x7d6   : > { %7280 = vmatmul.bf16.gmra.mxu1 %v16617_v17  ;;  %7378 = vmatmul.bf16.gmra.mxu3 %v16619_v27  ;;  %v16621_v27 = vld [vmem:[#allocation14_spill] sm:$0xff] }
 0x7d7   : > { %7811 = vst [vmem:[%s14900_s7 + $0x50] sm:$0xff] %v7181_v16  ;;  %7329 = vmatmul.bf16.gmra.mxu2 %v16618_v59  ;;  %7413 = vmatpush.bf16.msra.mxu0 %v9517_v44  ;;  %v16620_v59 = vld [vmem:[#allocation7_spill] sm:$0xff] }
 0x7d8   : > { %7462 = vmatpush.bf16.msra.mxu1 %v9613_v57  ;;  %v10659_v57 = vld [vmem:[%s16317_s3 + $0x400] sm:$0xf0] }
 0x7d9   : > { %v7183_v4 = vpop.f32.mrf.mxu3 }
 0x7da   : > { %v7134_v20 = vpop.f32.mrf.mxu2  ;;  %v7038_v61 = vpop.f32.mrf.mxu0 }
 0x7db   : > { %v7135_v63 = vadd.f32 %v7134_v20, %v7086_v45  ;;  %v7087_v38 = vpop.f32.mrf.mxu1  ;;  %v7039_v25 = vadd.f32 %v7038_v61, %v15512_v60  ;;  %v10683_v45 = vld [vmem:[%s16317_s3 + $0x4c0] sm:$0xf0] }
 0x7dc   : > { %v9697_v13 = vor.u32 %v10683_v45, %v9696_v36  ;;  %v10707_v20 = vld [vmem:[%s16317_s3 + $0x580] sm:$0xf0]  ;;  %v9684_v36 = vld [vmem:[%s16317_s3 + $0x4a0] sm:$0xf]  ;;  %v10680_v45 = vld [vmem:[%s16317_s3 + $0x4a8] sm:$0xf0] }
 0x7dd   : > { %v7184_v37 = vadd.f32 %v7183_v4, %v7135_v63  ;;  %v7088_v40 = vadd.f32 %v7087_v38, %v7039_v25  ;;  %v9793_v63 = vor.u32 %v10707_v20, %v9792_v1  ;;  %v10704_v1 = vld [vmem:[%s16317_s3 + $0x568] sm:$0xf0] }
 0x7de   : > { %7512 = vmatpush.bf16.msra.mxu2 %v9697_v13  ;;  %v10632_v13 = vld [vmem:[%s16317_s3 + $0x328] sm:$0xf0] }
 0x7df   : > { %7814 = vst [vmem:[%s14900_s7 + $0x68] sm:$0xff] %v7184_v37  ;;  %7561 = vmatpush.bf16.msra.mxu3 %v9793_v63 }
 0x7e1   : > { %v7185_v16 = vpop.f32.mrf.mxu3 }
 0x7e2   : > { %v7136_v56 = vpop.f32.mrf.mxu2  ;;  %v7041_v50 = vpop.f32.mrf.mxu0 }
 0x7e3   : > { %v7137_v10 = vadd.f32 %v7136_v56, %v7088_v40  ;;  %v7090_v55 = vpop.f32.mrf.mxu1  ;;  %v7042_v60 = vadd.f32 %v7041_v50, %v15537_v8  ;;  %v9504_v8 = vld [vmem:[%s16317_s3 + $0x338] sm:$0xf]  ;;  %v9601_v40 = vor.u32 %v10659_v57, %v9600_v12  ;;  %v10656_v12 = vld [vmem:[%s16317_s3 + $0x3e8] sm:$0xf0] }
 0x7e4   : > { %v9505_v2 = vor.u32 %v10635_v7, %v9504_v8  ;;  %v9780_v7 = vld [vmem:[%s16317_s3 + $0x560] sm:$0xf] }
 0x7e5   : > { %v7186_v17 = vadd.f32 %v7185_v16, %v7137_v10  ;;  %7236 = vmatmul.bf16.gmra.mxu0 %v16620_v59  ;;  %v7091_v49 = vadd.f32 %v7090_v55, %v7042_v60  ;;  %7463 = vmatpush.bf16.msra.mxu1 %v9601_v40  ;;  %v16624_v59 = vld [vmem:[#allocation8_spill] sm:$0xff] }
 0x7e6   : > { %7285 = vmatmul.bf16.gmra.mxu1 %v16621_v27  ;;  %7383 = vmatmul.bf16.gmra.mxu3 %v16623_v14  ;;  %v16625_v27 = vld [vmem:[#allocation15_spill] sm:$0xff] }
 0x7e7   : > { %7817 = vst [vmem:[%s14900_s7 + $0x80] sm:$0xff] %v7186_v17  ;;  %7334 = vmatmul.bf16.gmra.mxu2 %v16622_v24  ;;  %7414 = vmatpush.bf16.msra.mxu0 %v9505_v2  ;;  %v16626_v24 = vld [vmem:[#allocation26_spill] sm:$0xff]  ;;  %v16627_v14 = vld [vmem:[#allocation27_spill] sm:$0xff]  ;;  %v9781_v2 = vor.u32 %v10704_v1, %v9780_v7 }
 0x7e9   : > { %v7188_v61 = vpop.f32.mrf.mxu3  ;;  %7562 = vmatpush.bf16.msra.mxu3 %v9781_v2 }
 0x7ea   : > { %v7139_v44 = vpop.f32.mrf.mxu2  ;;  %v7043_v38 = vpop.f32.mrf.mxu0 }
 0x7eb   : > { %v7140_v4 = vadd.f32 %v7139_v44, %v7091_v49  ;;  %v7092_v37 = vpop.f32.mrf.mxu1  ;;  %v7044_v22 = vadd.f32 %v7043_v38, %v15546_v33  ;;  %v9685_v49 = vor.u32 %v10680_v45, %v9684_v36 }
 0x7ed   : > { %v7189_v25 = vadd.f32 %v7188_v61, %v7140_v4  ;;  %v7093_v56 = vadd.f32 %v7092_v37, %v7044_v22  ;;  %7513 = vmatpush.bf16.msra.mxu2 %v9685_v49  ;;  %v9588_v22 = vld [vmem:[%s16317_s3 + $0x3e0] sm:$0xf]  ;;  %v10701_v49 = vld [vmem:[%s16317_s3 + $0x550] sm:$0xf0] }
 0x7ee   : > { %v9589_v57 = vor.u32 %v10656_v12, %v9588_v22 }
 0x7ef   : > { %7820 = vst [vmem:[%s14900_s7 + $0x98] sm:$0xff] %v7189_v25 }
 0x7f0   : > { %7464 = vmatpush.bf16.msra.mxu1 %v9589_v57 }
 0x7f1   : > { %v7190_v50 = vpop.f32.mrf.mxu3 }
 0x7f2   : > { %v7141_v10 = vpop.f32.mrf.mxu2  ;;  %v7046_v55 = vpop.f32.mrf.mxu0 }
 0x7f3   : > { %v7142_v16 = vadd.f32 %v7141_v10, %v7093_v56  ;;  %v7095_v17 = vpop.f32.mrf.mxu1  ;;  %v7047_v33 = vadd.f32 %v7046_v55, %v15571_v34  ;;  %v9492_v34 = vld [vmem:[%s16317_s3 + $0x320] sm:$0xf] }
 0x7f4   : > { %v9493_v44 = vor.u32 %v10632_v13, %v9492_v34  ;;  %v10629_v34 = vld [vmem:[%s16317_s3 + $0x310] sm:$0xf0] }
 0x7f5   : > { %v7191_v60 = vadd.f32 %v7190_v50, %v7142_v16  ;;  %7241 = vmatmul.bf16.gmra.mxu0 %v16624_v59  ;;  %v7096_v8 = vadd.f32 %v7095_v17, %v7047_v33  ;;  %v16629_v33 = vld [vmem:[#allocation16_spill] sm:$0xff] }
 0x7f6   : > { %7290 = vmatmul.bf16.gmra.mxu1 %v16625_v27  ;;  %7388 = vmatmul.bf16.gmra.mxu3 %v16627_v14  ;;  %v16630_v59 = vld [vmem:[#allocation28_spill] sm:$0xff]  ;;  %v16631_v27 = vld [vmem:[#allocation29_spill] sm:$0xff]  ;;  %v10677_v14 = vld [vmem:[%s16317_s3 + $0x490] sm:$0xf0] }
 0x7f7   : > { %7823 = vst [vmem:[%s14900_s7 + $0xb0] sm:$0xff] %v7191_v60  ;;  %7339 = vmatmul.bf16.gmra.mxu2 %v16626_v24  ;;  %7415 = vmatpush.bf16.msra.mxu0 %v9493_v44  ;;  %v16628_v60 = vld [vmem:[#allocation9_spill] sm:$0xff]  ;;  %v9672_v24 = vld [vmem:[%s16317_s3 + $0x488] sm:$0xf] }
 0x7f8   : > { %v9673_v45 = vor.u32 %v10677_v14, %v9672_v24  ;;  %v10746_v24 = vld [vmem:[%s16317_s3 + $0x6b8] sm:$0xf0]  ;;  %v10236_v14 = vld [vmem:[%s16317_s3 + $0x8f0] sm:$0xf] }
 0x7f9   : > { %v7193_v4 = vpop.f32.mrf.mxu3 }
 0x7fa   : > { %v7144_v20 = vpop.f32.mrf.mxu2  ;;  %v7048_v61 = vpop.f32.mrf.mxu0  ;;  %7514 = vmatpush.bf16.msra.mxu2 %v9673_v45 }
 0x7fb   : > { %v7145_v63 = vadd.f32 %v7144_v20, %v7096_v8  ;;  %v7097_v38 = vpop.f32.mrf.mxu1  ;;  %v7049_v25 = vadd.f32 %v7048_v61, %v15580_v58  ;;  %v9768_v8 = vld [vmem:[%s16317_s3 + $0x548] sm:$0xf] }
 0x7fc   : > { %v9769_v1 = vor.u32 %v10701_v49, %v9768_v8 }
 0x7fd   : > { %v7194_v37 = vadd.f32 %v7193_v4, %v7145_v63  ;;  %v7098_v40 = vadd.f32 %v7097_v38, %v7049_v25  ;;  %v9576_v38 = vld [vmem:[%s16317_s3 + $0x3c8] sm:$0xf] }
 0x7fe   : > { %7563 = vmatpush.bf16.msra.mxu3 %v9769_v1 }
 0x7ff   : > { %7826 = vst [vmem:[%s14900_s7 + $0xc8] sm:$0xff] %v7194_v37  ;;  %v10653_v37 = vld [vmem:[%s16317_s3 + $0x3d0] sm:$0xf0] }
 0x800   : > { %v9577_v25 = vor.u32 %v10653_v37, %v9576_v38 }
 0x801   : > { %v7195_v16 = vpop.f32.mrf.mxu3 }
 0x802   : > { %v7146_v56 = vpop.f32.mrf.mxu2  ;;  %v7051_v50 = vpop.f32.mrf.mxu0  ;;  %7465 = vmatpush.bf16.msra.mxu1 %v9577_v25 }
 0x803   : > { %v7147_v10 = vadd.f32 %v7146_v56, %v7098_v40  ;;  %v7100_v55 = vpop.f32.mrf.mxu1  ;;  %v7052_v58 = vadd.f32 %v7051_v50, %v15605_v43  ;;  %v9480_v43 = vld [vmem:[%s16317_s3 + $0x308] sm:$0xf] }
 0x804   : > { %v9481_v7 = vor.u32 %v10629_v34, %v9480_v43  ;;  %v16632_v50 = vld [vmem:[#allocation10_spill] sm:$0xff]  ;;  %v10818_v43 = vld [vmem:[%s16317_s3 + $0x8f8] sm:$0xf0] }
 0x805   : > { %v7196_v17 = vadd.f32 %v7195_v16, %v7147_v10  ;;  %7246 = vmatmul.bf16.gmra.mxu0 %v16628_v60  ;;  %v7101_v36 = vadd.f32 %v7100_v55, %v7052_v58  ;;  %v16633_v55 = vld [vmem:[#allocation17_spill] sm:$0xff]  ;;  %v16635_v58 = vld [vmem:[#allocation31_spill] sm:$0xff]  ;;  %v10237_v34 = vor.u32 %v10818_v43, %v10236_v14 }
 0x806   : > { %7295 = vmatmul.bf16.gmra.mxu1 %v16629_v33  ;;  %7393 = vmatmul.bf16.gmra.mxu3 %v16631_v27  ;;  %v10140_v60 = vld [vmem:[%s16317_s3 + $0x830] sm:$0xf]  ;;  %v10794_v33 = vld [vmem:[%s16317_s3 + $0x838] sm:$0xf0] }
 0x807   : > { %7829 = vst [vmem:[%s14900_s7 + $0xe0] sm:$0xff] %v7196_v17  ;;  %7344 = vmatmul.bf16.gmra.mxu2 %v16630_v59  ;;  %7416 = vmatpush.bf16.msra.mxu0 %v9481_v7  ;;  %v16634_v17 = vld [vmem:[#allocation30_spill] sm:$0xff]  ;;  %v10141_v27 = vor.u32 %v10794_v33, %v10140_v60  ;;  %v10815_v60 = vld [vmem:[%s16317_s3 + $0x8e0] sm:$0xf0] }
 0x808   : > { %7752 = vmatpush.bf16.msrb.mxu3 %v10237_v34  ;;  %v10032_v34 = vld [vmem:[%s16317_s3 + $0x758] sm:$0xf] }
 0x809   : > { %v7198_v44 = vpop.f32.mrf.mxu3  ;;  %7703 = vmatpush.bf16.msrb.mxu2 %v10141_v27 }
 0x80a   : > { %v7149_v13 = vpop.f32.mrf.mxu2  ;;  %v7053_v2 = vpop.f32.mrf.mxu0 }
 0x80b   : > { %v7150_v20 = vadd.f32 %v7149_v13, %v7101_v36  ;;  %v7102_v63 = vpop.f32.mrf.mxu1  ;;  %v7054_v61 = vadd.f32 %v7053_v2, %v15614_v32  ;;  %v10770_v2 = vld [vmem:[%s16317_s3 + $0x778] sm:$0xf0] }
 0x80d   : > { %v7199_v4 = vadd.f32 %v7198_v44, %v7150_v20  ;;  %v7103_v22 = vadd.f32 %v7102_v63, %v7054_v61  ;;  %v10044_v44 = vld [vmem:[%s16317_s3 + $0x770] sm:$0xf] }
 0x80e   : > { %v10045_v63 = vor.u32 %v10770_v2, %v10044_v44 }
 0x80f   : > { %7832 = vst [vmem:[%s14900_s7 + $0xf8] sm:$0xff] %v7199_v4 }
 0x810   : > { %7654 = vmatpush.bf16.msrb.mxu1 %v10045_v63 }
 0x811   : > { %v7200_v40 = vpop.f32.mrf.mxu3 }
 0x812   : > { %v7151_v12 = vpop.f32.mrf.mxu2  ;;  %v7056_v56 = vpop.f32.mrf.mxu0 }
 0x813   : > { %v7152_v57 = vadd.f32 %v7151_v12, %v7103_v22  ;;  %v7105_v10 = vpop.f32.mrf.mxu1  ;;  %v7057_v32 = vadd.f32 %v7056_v56, %v15639_v26  ;;  %v9948_v26 = vld [vmem:[%s16317_s3 + $0x6b0] sm:$0xf]  ;;  %v16638_v56 = vld [vmem:[#allocation32_spill] sm:$0xff] }
 0x814   : > { %v9949_v45 = vor.u32 %v10746_v24, %v9948_v26 }
 0x815   : > { %v7201_v16 = vadd.f32 %v7200_v40, %v7152_v57  ;;  %7251 = vmatmul.bf16.gmra.mxu0 %v16632_v50  ;;  %v7106_v59 = vadd.f32 %v7105_v10, %v7057_v32  ;;  %v16636_v57 = vld [vmem:[#allocation11_spill] sm:$0xff]  ;;  %v16637_v40 = vld [vmem:[#allocation18_spill] sm:$0xff]  ;;  %v16639_v10 = vld [vmem:[#allocation33_spill] sm:$0xff] }
 0x816   : > { %7300 = vmatmul.bf16.gmra.mxu1 %v16633_v55  ;;  %7398 = vmatmul.bf16.gmra.mxu3 %v16635_v58  ;;  %v10791_v32 = vld [vmem:[%s16317_s3 + $0x820] sm:$0xf0]  ;;  %v10224_v58 = vld [vmem:[%s16317_s3 + $0x8d8] sm:$0xf] }
 0x817   : > { %7835 = vst [vmem:[%s14900_s7 + $0x110] sm:$0xff] %v7201_v16  ;;  %7349 = vmatmul.bf16.gmra.mxu2 %v16634_v17  ;;  %7605 = vmatpush.bf16.msrb.mxu0 %v9949_v45  ;;  %v10128_v16 = vld [vmem:[%s16317_s3 + $0x818] sm:$0xf]  ;;  %v10743_v17 = vld [vmem:[%s16317_s3 + $0x6a0] sm:$0xf0] }
 0x818   : > { %v10129_v55 = vor.u32 %v10791_v32, %v10128_v16  ;;  %v10212_v16 = vld [vmem:[%s16317_s3 + $0x8c0] sm:$0xf]  ;;  %v10812_v32 = vld [vmem:[%s16317_s3 + $0x8c8] sm:$0xf0] }
 0x819   : > { %v7203_v49 = vpop.f32.mrf.mxu3 }
 0x81a   : > { %v7154_v36 = vpop.f32.mrf.mxu2  ;;  %v7058_v13 = vpop.f32.mrf.mxu0  ;;  %7704 = vmatpush.bf16.msrb.mxu2 %v10129_v55  ;;  %v10213_v55 = vor.u32 %v10812_v32, %v10212_v16 }
 0x81b   : > { %v7155_v8 = vadd.f32 %v7154_v36, %v7106_v59  ;;  %v7107_v7 = vpop.f32.mrf.mxu1  ;;  %v7059_v20 = vadd.f32 %v7058_v13, %v15648_v9  ;;  %v10225_v59 = vor.u32 %v10815_v60, %v10224_v58  ;;  %v10867_v13 = vld [vmem:[%s16318_s4] sm:$0x7] }
 0x81d   : > { %v7204_v1 = vadd.f32 %v7203_v49, %v7155_v8  ;;  %v7108_v4 = vadd.f32 %v7107_v7, %v7059_v20  ;;  %7753 = vmatpush.bf16.msrb.mxu3 %v10225_v59  ;;  %v10767_v8 = vld [vmem:[%s16317_s3 + $0x760] sm:$0xf0]  ;;  %v15941_v7 = vperm.slane %v10867_v13, 2 }
 0x81e   : > { %v10033_v49 = vor.u32 %v10767_v8, %v10032_v34 }
 0x81f   : > { %7838 = vst [vmem:[%s14900_s7 + $0x128] sm:$0xff] %v7204_v1 }
 0x820   : > { %7655 = vmatpush.bf16.msrb.mxu1 %v10033_v49 }
 0x821   : > { %v7205_v37 = vpop.f32.mrf.mxu3  ;;  %7754 = vmatpush.bf16.msrb.mxu3 %v10213_v55  ;;  %v10008_v55 = vld [vmem:[%s16317_s3 + $0x728] sm:$0xf] }
 0x822   : > { %v7156_v61 = vpop.f32.mrf.mxu2  ;;  %v7061_v25 = vpop.f32.mrf.mxu0 }
 0x823   : > { %v7157_v38 = vadd.f32 %v7156_v61, %v7108_v4  ;;  %v7110_v22 = vpop.f32.mrf.mxu1  ;;  %v7062_v9 = vadd.f32 %v7061_v25, %v15673_v29  ;;  %v9936_v29 = vld [vmem:[%s16317_s3 + $0x698] sm:$0xf]  ;;  %v16641_v25 = vld [vmem:[#allocation42_spill] sm:$0xff] }
 0x824   : > { %v9937_v26 = vor.u32 %v10743_v17, %v9936_v29 }
 0x825   : > { %v7206_v12 = vadd.f32 %v7205_v37, %v7157_v38  ;;  %7256 = vmatmul.bf16.gmra.mxu0 %v16636_v57  ;;  %v7111_v50 = vadd.f32 %v7110_v22, %v7062_v9  ;;  %v16640_v37 = vld [vmem:[#allocation34_spill] sm:$0xff]  ;;  %v10116_v9 = vld [vmem:[%s16317_s3 + $0x800] sm:$0xf] }
 0x826   : > { %7305 = vmatmul.bf16.gmra.mxu1 %v16637_v40  ;;  %7403 = vmatmul.bf16.gmra.mxu3 %v16639_v10  ;;  %v16642_v22 = vld [vmem:[#allocation50_spill] sm:$0xff]  ;;  %v9924_v40 = vld [vmem:[%s16317_s3 + $0x680] sm:$0xf] }
 0x827   : > { %7841 = vst [vmem:[%s14900_s7 + $0x140] sm:$0xff] %v7206_v12  ;;  %7354 = vmatmul.bf16.gmra.mxu2 %v16638_v56  ;;  %7606 = vmatpush.bf16.msrb.mxu0 %v9937_v26  ;;  %v16643_v12 = vld [vmem:[#allocation51_spill] sm:$0xff]  ;;  %v10788_v57 = vld [vmem:[%s16317_s3 + $0x808] sm:$0xf0] }
 0x828   : > { %v10117_v56 = vor.u32 %v10788_v57, %v10116_v9  ;;  %v10740_v10 = vld [vmem:[%s16317_s3 + $0x688] sm:$0xf0] }
 0x829   : > { %v7208_v24 = vpop.f32.mrf.mxu3 }
 0x82a   : > { %v7159_v33 = vpop.f32.mrf.mxu2  ;;  %v7063_v14 = vpop.f32.mrf.mxu0  ;;  %7705 = vmatpush.bf16.msrb.mxu2 %v10117_v56 }
 0x82b   : > { %v7160_v27 = vadd.f32 %v7159_v33, %v7111_v50  ;;  %v7112_v43 = vpop.f32.mrf.mxu1  ;;  %v7064_v45 = vadd.f32 %v7063_v14, %v15681_v54  ;;  %v9925_v50 = vor.u32 %v10740_v10, %v9924_v40 }
 0x82d   : > { %v7209_v36 = vadd.f32 %v7208_v24, %v7160_v27  ;;  %v7113_v1 = vadd.f32 %v7112_v43, %v7064_v45  ;;  %7607 = vmatpush.bf16.msrb.mxu0 %v9925_v50  ;;  %v10020_v27 = vld [vmem:[%s16317_s3 + $0x740] sm:$0xf]  ;;  %v10764_v24 = vld [vmem:[%s16317_s3 + $0x748] sm:$0xf0] }
 0x82e   : > { %v10021_v43 = vor.u32 %v10764_v24, %v10020_v27 }
 0x82f   : > { %7844 = vst [vmem:[%s14900_s7 + $0x158] sm:$0xff] %v7209_v36 }
 0x830   : > { %7656 = vmatpush.bf16.msrb.mxu1 %v10021_v43 }
 0x831   : > { %v7210_v44 = vpop.f32.mrf.mxu3 }
 0x832   : > { %v7161_v54 = vpop.f32.mrf.mxu2  ;;  %v7222_v2 = vpop.f32.mrf.mxu0 }
 0x833   : > { %v7162_v20 = vadd.f32 %v7161_v54, %v7113_v1  ;;  %v7223_v63 = vadd.f32 %v7222_v2, %v15941_v7  ;;  %v7271_v4 = vpop.f32.mrf.mxu1  ;;  %v16646_v2 = vld [vmem:[#allocation52_spill] sm:$0xff] }
 0x835   : > { %v7211_v61 = vadd.f32 %v7210_v44, %v7162_v20  ;;  %v7272_v38 = vadd.f32 %v7271_v4, %v7223_v63  ;;  %7417 = vmatmul.bf16.vlgmr.msra.gmra.mxu0 %v16640_v37  ;;  %v16644_v20 = vld [vmem:[#allocation35_spill] sm:$0xff]  ;;  %v16647_v63 = vld [vmem:[#allocation53_spill] sm:$0xff]  ;;  %v10104_v4 = vld [vmem:[%s16317_s3 + $0x7e8] sm:$0xf] }
 0x836   : > { %7466 = vmatmul.bf16.vlgmr.msra.gmra.mxu1 %v16641_v25  ;;  %7564 = vmatmul.bf16.vlgmr.msra.gmra.mxu3 %v16643_v12  ;;  %v16645_v44 = vld [vmem:[#allocation43_spill] sm:$0xff] }
 0x837   : > { %7847 = vst [vmem:[%s14900_s7 + $0x170] sm:$0xff] %v7211_v61  ;;  %7515 = vmatmul.bf16.vlgmr.msra.gmra.mxu2 %v16642_v22  ;;  %v10785_v61 = vld [vmem:[%s16317_s3 + $0x7f0] sm:$0xf0]  ;;  %v10200_v22 = vld [vmem:[%s16317_s3 + $0x8a8] sm:$0xf] }
 0x838   : > { %v10105_v37 = vor.u32 %v10785_v61, %v10104_v4  ;;  %v10737_v25 = vld [vmem:[%s16317_s3 + $0x670] sm:$0xf0]  ;;  %v10188_v4 = vld [vmem:[%s16317_s3 + $0x890] sm:$0xf]  ;;  %v10806_v61 = vld [vmem:[%s16317_s3 + $0x898] sm:$0xf0] }
 0x839   : > { %v7369_v58 = vpop.f32.mrf.mxu3  ;;  %v10809_v12 = vld [vmem:[%s16317_s3 + $0x8b0] sm:$0xf0] }
 0x83a   : > { %v7320_v29 = vpop.f32.mrf.mxu2  ;;  %v7224_v60 = vpop.f32.mrf.mxu0  ;;  %v10201_v40 = vor.u32 %v10809_v12, %v10200_v22  ;;  %7706 = vmatpush.bf16.msrb.mxu2 %v10105_v37 }
 0x83b   : > { %v7321_v17 = vadd.f32 %v7320_v29, %v7272_v38  ;;  %v7225_v33 = vadd.f32 %v7224_v60, %v15941_v7  ;;  %v7273_v26 = vpop.f32.mrf.mxu1  ;;  %v9912_v38 = vld [vmem:[%s16317_s3 + $0x668] sm:$0xf] }
 0x83c   : > { %v9913_v57 = vor.u32 %v10737_v25, %v9912_v38  ;;  %7755 = vmatpush.bf16.msrb.mxu3 %v10201_v40  ;;  %v10189_v25 = vor.u32 %v10806_v61, %v10188_v4 }
 0x83d   : > { %v15968_v59 = vadd.f32 %v7369_v58, %v7321_v17  ;;  %v7274_v14 = vadd.f32 %v7273_v26, %v7225_v33  ;;  %v10761_v17 = vld [vmem:[%s16317_s3 + $0x730] sm:$0xf0] }
 0x83e   : > { %7608 = vmatpush.bf16.msrb.mxu0 %v9913_v57  ;;  %v10009_v60 = vor.u32 %v10761_v17, %v10008_v55 }
 0x840   : > { %7657 = vmatpush.bf16.msrb.mxu1 %v10009_v60  ;;  %7756 = vmatpush.bf16.msrb.mxu3 %v10189_v25 }
 0x841   : > { %v7371_v34 = vpop.f32.mrf.mxu3 }
 0x842   : > { %v7322_v36 = vpop.f32.mrf.mxu2  ;;  %v7227_v8 = vpop.f32.mrf.mxu0 }
 0x843   : > { %v7323_v45 = vadd.f32 %v7322_v36, %v7274_v14  ;;  %v7228_v49 = vadd.f32 %v7227_v8, %v15941_v7  ;;  %v7276_v13 = vpop.f32.mrf.mxu1  ;;  %v16649_v8 = vld [vmem:[#allocation44_spill] sm:$0xff] }
 0x845   : > { %v15977_v1 = vadd.f32 %v7371_v34, %v7323_v45  ;;  %v7277_v54 = vadd.f32 %v7276_v13, %v7228_v49  ;;  %7422 = vmatmul.bf16.gmra.mxu0 %v16644_v20  ;;  %v16648_v34 = vld [vmem:[#allocation36_spill] sm:$0xff]  ;;  %v16650_v49 = vld [vmem:[#allocation54_spill] sm:$0xff]  ;;  %v16651_v13 = vld [vmem:[#allocation55_spill] sm:$0xff] }
 0x846   : > { %7471 = vmatmul.bf16.gmra.mxu1 %v16645_v44  ;;  %7569 = vmatmul.bf16.gmra.mxu3 %v16647_v63  ;;  %v10782_v20 = vld [vmem:[%s16317_s3 + $0x7d8] sm:$0xf0]  ;;  %v9900_v44 = vld [vmem:[%s16317_s3 + $0x650] sm:$0xf] }
 0x847   : > { %7520 = vmatmul.bf16.gmra.mxu2 %v16646_v2  ;;  %v10734_v63 = vld [vmem:[%s16317_s3 + $0x658] sm:$0xf0] }
 0x848   : > { %v9901_v37 = vor.u32 %v10734_v63, %v9900_v44  ;;  %v10176_v44 = vld [vmem:[%s16317_s3 + $0x878] sm:$0xf] }
 0x849   : > { %v7374_v10 = vpop.f32.mrf.mxu3 }
 0x84a   : > { %v7325_v9 = vpop.f32.mrf.mxu2  ;;  %v7229_v16 = vpop.f32.mrf.mxu0  ;;  %7609 = vmatpush.bf16.msrb.mxu0 %v9901_v37 }
 0x84b   : > { %v7326_v56 = vadd.f32 %v7325_v9, %v7277_v54  ;;  %v7230_v32 = vadd.f32 %v7229_v16, %v15941_v7  ;;  %v7278_v29 = vpop.f32.mrf.mxu1  ;;  %v10092_v54 = vld [vmem:[%s16317_s3 + $0x7d0] sm:$0xf]  ;;  %v10758_v16 = vld [vmem:[%s16317_s3 + $0x718] sm:$0xf0] }
 0x84c   : > { %v10093_v2 = vor.u32 %v10782_v20, %v10092_v54  ;;  %v10731_v20 = vld [vmem:[%s16317_s3 + $0x640] sm:$0xf0] }
 0x84d   : > { %v16002_v50 = vadd.f32 %v7374_v10, %v7326_v56  ;;  %v7279_v58 = vadd.f32 %v7278_v29, %v7230_v32  ;;  %v9996_v10 = vld [vmem:[%s16317_s3 + $0x710] sm:$0xf] }
 0x84e   : > { %7707 = vmatpush.bf16.msrb.mxu2 %v10093_v2  ;;  %v9997_v29 = vor.u32 %v10758_v16, %v9996_v10  ;;  %v10803_v2 = vld [vmem:[%s16317_s3 + $0x880] sm:$0xf0] }
 0x84f   : > { %v10177_v61 = vor.u32 %v10803_v2, %v10176_v44  ;;  %v10800_v44 = vld [vmem:[%s16317_s3 + $0x868] sm:$0xf0] }
 0x850   : > { %7658 = vmatpush.bf16.msrb.mxu1 %v9997_v29 }
 0x851   : > { %v7376_v27 = vpop.f32.mrf.mxu3  ;;  %7757 = vmatpush.bf16.msrb.mxu3 %v10177_v61 }
 0x852   : > { %v7327_v33 = vpop.f32.mrf.mxu2  ;;  %v7232_v24 = vpop.f32.mrf.mxu0 }
 0x853   : > { %v7328_v26 = vadd.f32 %v7327_v33, %v7279_v58  ;;  %v7233_v14 = vadd.f32 %v7232_v24, %v15941_v7  ;;  %v7281_v43 = vpop.f32.mrf.mxu1 }
 0x855   : > { %v16011_v36 = vadd.f32 %v7376_v27, %v7328_v26  ;;  %v7282_v45 = vadd.f32 %v7281_v43, %v7233_v14  ;;  %7427 = vmatmul.bf16.gmra.mxu0 %v16648_v34  ;;  %v16652_v14 = vld [vmem:[#allocation37_spill] sm:$0xff] }
 0x856   : > { %7476 = vmatmul.bf16.gmra.mxu1 %v16649_v8  ;;  %7574 = vmatmul.bf16.gmra.mxu3 %v16651_v13  ;;  %v16653_v43 = vld [vmem:[#allocation45_spill] sm:$0xff]  ;;  %v10080_v8 = vld [vmem:[%s16317_s3 + $0x7b8] sm:$0xf] }
 0x857   : > { %7525 = vmatmul.bf16.gmra.mxu2 %v16650_v49  ;;  %v16655_v34 = vld [vmem:[#allocation57_spill] sm:$0xff]  ;;  %v9888_v13 = vld [vmem:[%s16317_s3 + $0x638] sm:$0xf] }
 0x858   : > { %v10779_v49 = vld [vmem:[%s16317_s3 + $0x7c0] sm:$0xf0]  ;;  %v9889_v4 = vor.u32 %v10731_v20, %v9888_v13  ;;  %v10164_v20 = vld [vmem:[%s16317_s3 + $0x860] sm:$0xf] }
 0x859   : > { %v7379_v12 = vpop.f32.mrf.mxu3  ;;  %v10081_v54 = vor.u32 %v10779_v49, %v10080_v8  ;;  %v10776_v8 = vld [vmem:[%s16317_s3 + $0x7a8] sm:$0xf0]  ;;  %v9876_v49 = vld [vmem:[%s16317_s3 + $0x620] sm:$0xf] }
 0x85a   : > { %v7330_v38 = vpop.f32.mrf.mxu2  ;;  %v7234_v9 = vpop.f32.mrf.mxu0  ;;  %7610 = vmatpush.bf16.msrb.mxu0 %v9889_v4  ;;  %v10165_v4 = vor.u32 %v10800_v44, %v10164_v20  ;;  %v10725_v20 = vld [vmem:[%s16317_s3 + $0x610] sm:$0xf0]  ;;  %v10152_v44 = vld [vmem:[%s16317_s3 + $0x848] sm:$0xf] }
 0x85b   : > { %v7331_v22 = vadd.f32 %v7330_v38, %v7282_v45  ;;  %v7235_v57 = vadd.f32 %v7234_v9, %v15941_v7  ;;  %v7283_v40 = vpop.f32.mrf.mxu1  ;;  %v16654_v45 = vld [vmem:[#allocation56_spill] sm:$0xff]  ;;  %7708 = vmatpush.bf16.msrb.mxu2 %v10081_v54  ;;  %v10728_v54 = vld [vmem:[%s16317_s3 + $0x628] sm:$0xf0] }
 0x85c   : > { %7758 = vmatpush.bf16.msrb.mxu3 %v10165_v4 }
 0x85d   : > { %v16036_v56 = vadd.f32 %v7379_v12, %v7331_v22  ;;  %v7284_v32 = vadd.f32 %v7283_v40, %v7235_v57  ;;  %v9984_v57 = vld [vmem:[%s16317_s3 + $0x6f8] sm:$0xf]  ;;  %v10755_v40 = vld [vmem:[%s16317_s3 + $0x700] sm:$0xf0] }
 0x85e   : > { %v9985_v16 = vor.u32 %v10755_v40, %v9984_v57  ;;  %v9972_v57 = vld [vmem:[%s16317_s3 + $0x6e0] sm:$0xf]  ;;  %v10752_v40 = vld [vmem:[%s16317_s3 + $0x6e8] sm:$0xf0] }
 0x860   : > { %7659 = vmatpush.bf16.msrb.mxu1 %v9985_v16  ;;  %v9973_v16 = vor.u32 %v10752_v40, %v9972_v57 }
 0x861   : > { %v7381_v58 = vpop.f32.mrf.mxu3 }
 0x862   : > { %v7332_v55 = vpop.f32.mrf.mxu2  ;;  %v7237_v60 = vpop.f32.mrf.mxu0 }
 0x863   : > { %v7333_v17 = vadd.f32 %v7332_v55, %v7284_v32  ;;  %v7238_v33 = vadd.f32 %v7237_v60, %v15941_v7  ;;  %v7286_v26 = vpop.f32.mrf.mxu1 }
 0x864   : > { %7660 = vmatpush.bf16.msrb.mxu1 %v9973_v16  ;;  %v10749_v16 = vld [vmem:[%s16317_s3 + $0x6d0] sm:$0xf0] }
 0x865   : > { %v16045_v27 = vadd.f32 %v7381_v58, %v7333_v17  ;;  %v7287_v24 = vadd.f32 %v7286_v26, %v7238_v33  ;;  %7432 = vmatmul.bf16.gmra.mxu0 %v16652_v14  ;;  %v16657_v14 = vld [vmem:[#allocation46_spill] sm:$0xff] }
 0x866   : > { %7481 = vmatmul.bf16.gmra.mxu1 %v16653_v43  ;;  %7579 = vmatmul.bf16.gmra.mxu3 %v16655_v34  ;;  %v16658_v43 = vld [vmem:[#allocation58_spill] sm:$0xff]  ;;  %v10068_v34 = vld [vmem:[%s16317_s3 + $0x7a0] sm:$0xf] }
 0x867   : > { %7530 = vmatmul.bf16.gmra.mxu2 %v16654_v45  ;;  %v16659_v45 = vld [vmem:[#allocation59_spill] sm:$0xff]  ;;  %v10069_v13 = vor.u32 %v10776_v8, %v10068_v34  ;;  %v16663_v34 = vld [vmem:[#allocation61_spill] sm:$0xff]  ;;  %v10056_v8 = vld [vmem:[%s16317_s3 + $0x788] sm:$0xf] }
 0x869   : > { %v7384_v37 = vpop.f32.mrf.mxu3  ;;  %7709 = vmatpush.bf16.msrb.mxu2 %v10069_v13  ;;  %v9864_v13 = vld [vmem:[%s16317_s3 + $0x608] sm:$0xf] }
 0x86a   : > { %v7335_v63 = vpop.f32.mrf.mxu2  ;;  %v7239_v25 = vpop.f32.mrf.mxu0  ;;  %v9865_v4 = vor.u32 %v10725_v20, %v9864_v13  ;;  %v16667_v13 = vld [vmem:[#allocation63_spill] sm:$0xff] }
 0x86b   : > { %v7336_v38 = vadd.f32 %v7335_v63, %v7287_v24  ;;  %v7240_v22 = vadd.f32 %v7239_v25, %v15941_v7  ;;  %v7288_v12 = vpop.f32.mrf.mxu1  ;;  %v16656_v24 = vld [vmem:[#allocation38_spill] sm:$0xff]  ;;  %v9877_v63 = vor.u32 %v10728_v54, %v9876_v49  ;;  %v10773_v49 = vld [vmem:[%s16317_s3 + $0x790] sm:$0xf0] }
 0x86c   : > { %v10057_v54 = vor.u32 %v10773_v49, %v10056_v8  ;;  %v16665_v8 = vld [vmem:[#allocation48_spill] sm:$0xff]  ;;  %v16666_v49 = vld [vmem:[#allocation62_spill] sm:$0xff] }
 0x86d   : > { %v16070_v9 = vadd.f32 %v7384_v37, %v7336_v38  ;;  %v7289_v10 = vadd.f32 %v7288_v12, %v7240_v22  ;;  %7611 = vmatpush.bf16.msrb.mxu0 %v9877_v63 }
 0x86e   : > { %7710 = vmatpush.bf16.msrb.mxu2 %v10057_v54 }
 0x871   : > { %v7386_v55 = vpop.f32.mrf.mxu3  ;;  %7612 = vmatpush.bf16.msrb.mxu0 %v9865_v4 }
 0x872   : > { %v7337_v32 = vpop.f32.mrf.mxu2  ;;  %v7242_v17 = vpop.f32.mrf.mxu0 }
 0x873   : > { %v7338_v29 = vadd.f32 %v7337_v32, %v7289_v10  ;;  %v7243_v58 = vadd.f32 %v7242_v17, %v15941_v7  ;;  %v7291_v60 = vpop.f32.mrf.mxu1 }
 0x875   : > { %v16079_v33 = vadd.f32 %v7386_v55, %v7338_v29  ;;  %v7292_v26 = vadd.f32 %v7291_v60, %v7243_v58  ;;  %7437 = vmatmul.bf16.gmra.mxu0 %v16656_v24 }
 0x876   : > { %7486 = vmatmul.bf16.gmra.mxu1 %v16657_v14  ;;  %7584 = vmatmul.bf16.gmra.mxu3 %v16659_v45  ;;  %v16660_v14 = vld [vmem:[#allocation39_spill] sm:$0xff]  ;;  %v16662_v45 = vld [vmem:[#allocation60_spill] sm:$0xff] }
 0x877   : > { %7535 = vmatmul.bf16.gmra.mxu2 %v16658_v43  ;;  %v16661_v43 = vld [vmem:[#allocation47_spill] sm:$0xff] }
 0x879   : > { %v7389_v38 = vpop.f32.mrf.mxu3 }
 0x87a   : > { %v7340_v2 = vpop.f32.mrf.mxu2  ;;  %v7244_v37 = vpop.f32.mrf.mxu0 }
 0x87b   : > { %v7341_v61 = vadd.f32 %v7340_v2, %v7292_v26  ;;  %v7245_v25 = vadd.f32 %v7244_v37, %v15941_v7  ;;  %v7293_v22 = vpop.f32.mrf.mxu1  ;;  %v10797_v2 = vld [vmem:[%s16317_s3 + $0x850] sm:$0xf0] }
 0x87d   : > { %v16104_v12 = vadd.f32 %v7389_v38, %v7341_v61  ;;  %v7294_v10 = vadd.f32 %v7293_v22, %v7245_v25  ;;  %v10153_v61 = vor.u32 %v10797_v2, %v10152_v44 }
 0x87f   : > { %7759 = vmatpush.bf16.msrb.mxu3 %v10153_v61 }
 0x881   : > { %v7391_v55 = vpop.f32.mrf.mxu3 }
 0x882   : > { %v7342_v32 = vpop.f32.mrf.mxu2  ;;  %v7247_v17 = vpop.f32.mrf.mxu0 }
 0x883   : > { %v7343_v29 = vadd.f32 %v7342_v32, %v7294_v10  ;;  %v7248_v58 = vadd.f32 %v7247_v17, %v15941_v7  ;;  %v7296_v60 = vpop.f32.mrf.mxu1  ;;  %v9960_v10 = vld [vmem:[%s16317_s3 + $0x6c8] sm:$0xf] }
 0x885   : > { %v16113_v26 = vadd.f32 %v7391_v55, %v7343_v29  ;;  %v7297_v24 = vadd.f32 %v7296_v60, %v7248_v58  ;;  %7442 = vmatmul.bf16.gmra.mxu0 %v16660_v14  ;;  %v9961_v29 = vor.u32 %v10749_v16, %v9960_v10 }
 0x886   : > { %7491 = vmatmul.bf16.gmra.mxu1 %v16661_v43  ;;  %7589 = vmatmul.bf16.gmra.mxu3 %v16663_v34  ;;  %v16664_v34 = vld [vmem:[#allocation40_spill] sm:$0xff] }
 0x887   : > { %7540 = vmatmul.bf16.gmra.mxu2 %v16662_v45  ;;  %7661 = vmatpush.bf16.msrb.mxu1 %v9961_v29 }
 0x889   : > { %v7394_v37 = vpop.f32.mrf.mxu3 }
 0x88a   : > { %v7345_v63 = vpop.f32.mrf.mxu2  ;;  %v7249_v25 = vpop.f32.mrf.mxu0 }
 0x88b   : > { %v7346_v38 = vadd.f32 %v7345_v63, %v7297_v24  ;;  %v7250_v22 = vadd.f32 %v7249_v25, %v15941_v7  ;;  %v7298_v57 = vpop.f32.mrf.mxu1 }
 0x88d   : > { %v16138_v40 = vadd.f32 %v7394_v37, %v7346_v38  ;;  %v7299_v32 = vadd.f32 %v7298_v57, %v7250_v22 }
 0x891   : > { %v7396_v58 = vpop.f32.mrf.mxu3 }
 0x892   : > { %v7347_v55 = vpop.f32.mrf.mxu2  ;;  %v7252_v60 = vpop.f32.mrf.mxu0 }
 0x893   : > { %v7348_v17 = vadd.f32 %v7347_v55, %v7299_v32  ;;  %v7253_v24 = vadd.f32 %v7252_v60, %v15941_v7  ;;  %v7301_v14 = vpop.f32.mrf.mxu1  ;;  %v16668_v55 = vld [vmem:[#allocation49_spill] sm:$0xff] }
 0x895   : > { %v16147_v43 = vadd.f32 %v7396_v58, %v7348_v17  ;;  %v7302_v45 = vadd.f32 %v7301_v14, %v7253_v24  ;;  %7447 = vmatmul.bf16.gmra.mxu0 %v16664_v34  ;;  %v16669_v17 = vld [vmem:[#allocation64_spill] sm:$0xff]  ;;  %v16670_v58 = vld [vmem:[#allocation65_spill] sm:$0xff] }
 0x896   : > { %7496 = vmatmul.bf16.gmra.mxu1 %v16665_v8  ;;  %7594 = vmatmul.bf16.gmra.mxu3 %v16667_v13 }
 0x897   : > { %7545 = vmatmul.bf16.gmra.mxu2 %v16666_v49 }
 0x899   : > { %v7399_v44 = vpop.f32.mrf.mxu3 }
 0x89a   : > { %v7350_v54 = vpop.f32.mrf.mxu2  ;;  %v7254_v2 = vpop.f32.mrf.mxu0 }
 0x89b   : > { %v7351_v20 = vadd.f32 %v7350_v54, %v7302_v45  ;;  %v7255_v63 = vadd.f32 %v7254_v2, %v15941_v7  ;;  %v7303_v4 = vpop.f32.mrf.mxu1 }
 0x89d   : > { %v16154_v61 = vadd.f32 %v7399_v44, %v7351_v20  ;;  %v7304_v38 = vadd.f32 %v7303_v4, %v7255_v63 }
 0x8a1   : > { %v7401_v22 = vpop.f32.mrf.mxu3 }
 0x8a2   : > { %v7352_v37 = vpop.f32.mrf.mxu2  ;;  %v7257_v57 = vpop.f32.mrf.mxu0 }
 0x8a3   : > { %v7353_v25 = vadd.f32 %v7352_v37, %v7304_v38  ;;  %v7258_v10 = vadd.f32 %v7257_v57, %v15941_v7  ;;  %v7306_v16 = vpop.f32.mrf.mxu1 }
 0x8a5   : > { %v16157_v32 = vadd.f32 %v7401_v22, %v7353_v25  ;;  %v7307_v29 = vadd.f32 %v7306_v16, %v7258_v10  ;;  %7452 = vmatmul.bf16.gmra.mxu0 %v16541_v30 }
 0x8a6   : > { %7501 = vmatmul.bf16.gmra.mxu1 %v16668_v55  ;;  %7599 = vmatmul.bf16.gmra.mxu3 %v16670_v58 }
 0x8a7   : > { %7550 = vmatmul.bf16.gmra.mxu2 %v16669_v17 }
 0x8a9   : > { %v7404_v14 = vpop.f32.mrf.mxu3 }
 0x8aa   : > { %v7355_v60 = vpop.f32.mrf.mxu2  ;;  %v7259_v45 = vpop.f32.mrf.mxu0 }
 0x8ab   : > { %v7356_v24 = vadd.f32 %v7355_v60, %v7307_v29  ;;  %v7260_v34 = vadd.f32 %v7259_v45, %v15941_v7  ;;  %v7308_v8 = vpop.f32.mrf.mxu1  ;;  %v16671_v7 = vld [vmem:[#allocation19_spill] sm:$0xff] }
 0x8ad   : > { %v16164_v49 = vadd.f32 %v7404_v14, %v7356_v24  ;;  %v7309_v13 = vadd.f32 %v7308_v8, %v7260_v34 }
 0x8b1   : > { %v7406_v44 = vpop.f32.mrf.mxu3 }
 0x8b2   : > { %v7357_v54 = vpop.f32.mrf.mxu2  ;;  %v7418_v30 = vpop.f32.mrf.mxu0 }
 0x8b3   : > { %v7358_v20 = vadd.f32 %v7357_v54, %v7309_v13  ;;  %v7419_v2 = vadd.f32 %v7418_v30, %v15968_v59  ;;  %v7467_v63 = vpop.f32.mrf.mxu1 }
 0x8b5   : > { %v16167_v4 = vadd.f32 %v7406_v44, %v7358_v20  ;;  %v7468_v38 = vadd.f32 %v7467_v63, %v7419_v2  ;;  %7613 = vmatmul.bf16.vlgmr.msrb.gmra.mxu0 %v16545_v53 }
 0x8b6   : > { %7662 = vmatmul.bf16.vlgmr.msrb.gmra.mxu1 %v13748_v52  ;;  %7760 = vmatmul.bf16.vlgmr.msrb.gmra.mxu3 %v16671_v7 }
 0x8b7   : > { %7711 = vmatmul.bf16.vlgmr.msrb.gmra.mxu2 %v14067_v3 }
 0x8b9   : > { %v7565_v22 = vpop.f32.mrf.mxu3 }
 0x8ba   : > { %v7516_v37 = vpop.f32.mrf.mxu2  ;;  %v7420_v57 = vpop.f32.mrf.mxu0 }
 0x8bb   : > { %v7517_v25 = vadd.f32 %v7516_v37, %v7468_v38  ;;  %v7421_v10 = vadd.f32 %v7420_v57, %v15977_v1  ;;  %v7469_v16 = vpop.f32.mrf.mxu1  ;;  %v16672_v1 = vld [vmem:[#allocation5_spill] sm:$0xff] }
 0x8bd   : > { %v16174_v59 = vadd.f32 %v7565_v22, %v7517_v25  ;;  %v7470_v29 = vadd.f32 %v7469_v16, %v7421_v10 }
 0x8c1   : > { %v7567_v58 = vpop.f32.mrf.mxu3 }
 0x8c2   : > { %v7518_v55 = vpop.f32.mrf.mxu2  ;;  %v7423_v53 = vpop.f32.mrf.mxu0 }
 0x8c3   : > { %v7519_v17 = vadd.f32 %v7518_v55, %v7470_v29  ;;  %v7424_v52 = vadd.f32 %v7423_v53, %v16002_v50  ;;  %v7472_v60 = vpop.f32.mrf.mxu1 }
 0x8c5   : > { %v16177_v3 = vadd.f32 %v7567_v58, %v7519_v17  ;;  %v7473_v24 = vadd.f32 %v7472_v60, %v7424_v52  ;;  %7618 = vmatmul.bf16.gmra.mxu0 %v16546_v48 }
 0x8c6   : > { %7667 = vmatmul.bf16.gmra.mxu1 %v13788_v19  ;;  %7765 = vmatmul.bf16.gmra.mxu3 %v16672_v1 }
 0x8c7   : > { %7716 = vmatmul.bf16.gmra.mxu2 %v14103_v15 }
 0x8c9   : > { %v7570_v34 = vpop.f32.mrf.mxu3 }
 0x8ca   : > { %v7521_v14 = vpop.f32.mrf.mxu2  ;;  %v7425_v8 = vpop.f32.mrf.mxu0 }
 0x8cb   : > { %v7522_v45 = vadd.f32 %v7521_v14, %v7473_v24  ;;  %v7426_v13 = vadd.f32 %v7425_v8, %v16011_v36  ;;  %v7474_v54 = vpop.f32.mrf.mxu1  ;;  %v16673_v36 = vld [vmem:[#allocation12_spill] sm:$0xff] }
 0x8cd   : > { %v16184_v50 = vadd.f32 %v7570_v34, %v7522_v45  ;;  %v7475_v20 = vadd.f32 %v7474_v54, %v7426_v13 }
 0x8d1   : > { %v7572_v2 = vpop.f32.mrf.mxu3 }
 0x8d2   : > { %v7523_v44 = vpop.f32.mrf.mxu2  ;;  %v7428_v48 = vpop.f32.mrf.mxu0 }
 0x8d3   : > { %v7524_v30 = vadd.f32 %v7523_v44, %v7475_v20  ;;  %v7429_v19 = vadd.f32 %v7428_v48, %v16036_v56  ;;  %v7477_v63 = vpop.f32.mrf.mxu1 }
 0x8d5   : > { %v16187_v15 = vadd.f32 %v7572_v2, %v7524_v30  ;;  %v7478_v38 = vadd.f32 %v7477_v63, %v7429_v19  ;;  %7623 = vmatmul.bf16.gmra.mxu0 %v16547_v5 }
 0x8d6   : > { %7672 = vmatmul.bf16.gmra.mxu1 %v13828_v51  ;;  %7770 = vmatmul.bf16.gmra.mxu3 %v16673_v36 }
 0x8d7   : > { %7721 = vmatmul.bf16.gmra.mxu2 %v14139_v11 }
 0x8d9   : > { %v7575_v25 = vpop.f32.mrf.mxu3 }
 0x8da   : > { %v7526_v7 = vpop.f32.mrf.mxu2  ;;  %v7430_v22 = vpop.f32.mrf.mxu0 }
 0x8db   : > { %v7527_v37 = vadd.f32 %v7526_v7, %v7478_v38  ;;  %v7431_v57 = vadd.f32 %v7430_v22, %v16045_v27  ;;  %v7479_v10 = vpop.f32.mrf.mxu1  ;;  %v16674_v27 = vld [vmem:[#allocation20_spill] sm:$0xff] }
 0x8dd   : > { %v16194_v56 = vadd.f32 %v7575_v25, %v7527_v37  ;;  %v7480_v16 = vadd.f32 %v7479_v10, %v7431_v57 }
 0x8e1   : > { %v7577_v17 = vpop.f32.mrf.mxu3 }
 0x8e2   : > { %v7528_v29 = vpop.f32.mrf.mxu2  ;;  %v7433_v5 = vpop.f32.mrf.mxu0 }
 0x8e3   : > { %v7529_v55 = vadd.f32 %v7528_v29, %v7480_v16  ;;  %v7434_v51 = vadd.f32 %v7433_v5, %v16070_v9  ;;  %v7482_v58 = vpop.f32.mrf.mxu1 }
 0x8e5   : > { %v16197_v11 = vadd.f32 %v7577_v17, %v7529_v55  ;;  %v7483_v53 = vadd.f32 %v7482_v58, %v7434_v51  ;;  %7628 = vmatmul.bf16.gmra.mxu0 %v16548_v46 }
 0x8e6   : > { %7677 = vmatmul.bf16.gmra.mxu1 %v13868_v47  ;;  %7775 = vmatmul.bf16.gmra.mxu3 %v16674_v27 }
 0x8e7   : > { %7726 = vmatmul.bf16.gmra.mxu2 %v14175_v62 }
 0x8e9   : > { %v7580_v24 = vpop.f32.mrf.mxu3 }
 0x8ea   : > { %v7531_v52 = vpop.f32.mrf.mxu2  ;;  %v7435_v1 = vpop.f32.mrf.mxu0 }
 0x8eb   : > { %v7532_v60 = vadd.f32 %v7531_v52, %v7483_v53  ;;  %v7436_v14 = vadd.f32 %v7435_v1, %v16079_v33  ;;  %v7484_v45 = vpop.f32.mrf.mxu1  ;;  %v16675_v33 = vld [vmem:[#allocation74_spill] sm:$0xff]  ;;  %v16678_v1 = vld [vmem:[#allocation76_spill] sm:$0xff] }
 0x8ed   : > { %v16204_v9 = vadd.f32 %v7580_v24, %v7532_v60  ;;  %v7485_v34 = vadd.f32 %v7484_v45, %v7436_v14  ;;  %v16677_v24 = vld [vmem:[#allocation73_spill] sm:$0xff] }
 0x8f1   : > { %v7582_v54 = vpop.f32.mrf.mxu3 }
 0x8f2   : > { %v7533_v8 = vpop.f32.mrf.mxu2  ;;  %v7438_v46 = vpop.f32.mrf.mxu0 }
 0x8f3   : > { %v7534_v13 = vadd.f32 %v7533_v8, %v7485_v34  ;;  %v7439_v47 = vadd.f32 %v7438_v46, %v16104_v12  ;;  %v7487_v20 = vpop.f32.mrf.mxu1 }
 0x8f5   : > { %v16207_v62 = vadd.f32 %v7582_v54, %v7534_v13  ;;  %v7488_v44 = vadd.f32 %v7487_v20, %v7439_v47  ;;  %7633 = vmatmul.bf16.gmra.mxu0 %v16549_v21 }
 0x8f6   : > { %7682 = vmatmul.bf16.gmra.mxu1 %v13908_v0  ;;  %7780 = vmatmul.bf16.gmra.mxu3 %v16675_v33 }
 0x8f7   : > { %7731 = vmatmul.bf16.gmra.mxu2 %v14211_v35 }
 0x8f9   : > { %v7585_v48 = vpop.f32.mrf.mxu3 }
 0x8fa   : > { %v7536_v30 = vpop.f32.mrf.mxu2  ;;  %v7440_v19 = vpop.f32.mrf.mxu0 }
 0x8fb   : > { %v7537_v2 = vadd.f32 %v7536_v30, %v7488_v44  ;;  %v7441_v63 = vadd.f32 %v7440_v19, %v16113_v26  ;;  %v7489_v38 = vpop.f32.mrf.mxu1  ;;  %v16676_v26 = vld [vmem:[#allocation75_spill] sm:$0xff] }
 0x8fd   : > { %v16214_v12 = vadd.f32 %v7585_v48, %v7537_v2  ;;  %v7490_v36 = vadd.f32 %v7489_v38, %v7441_v63 }
 0x901   : > { %v7587_v25 = vpop.f32.mrf.mxu3 }
 0x902   : > { %v7538_v7 = vpop.f32.mrf.mxu2  ;;  %v7443_v21 = vpop.f32.mrf.mxu0 }
 0x903   : > { %v7539_v37 = vadd.f32 %v7538_v7, %v7490_v36  ;;  %v7444_v0 = vadd.f32 %v7443_v21, %v16138_v40  ;;  %v7492_v22 = vpop.f32.mrf.mxu1 }
 0x905   : > { %v16217_v35 = vadd.f32 %v7587_v25, %v7539_v37  ;;  %v7493_v57 = vadd.f32 %v7492_v22, %v7444_v0  ;;  %7638 = vmatmul.bf16.gmra.mxu0 %v16550_v23 }
 0x906   : > { %7687 = vmatmul.bf16.gmra.mxu1 %v13948_v28  ;;  %7785 = vmatmul.bf16.gmra.mxu3 %v16676_v26 }
 0x907   : > { %7736 = vmatmul.bf16.gmra.mxu2 %v14247_v41 }
 0x909   : > { %v7590_v29 = vpop.f32.mrf.mxu3 }
 0x90a   : > { %v7541_v10 = vpop.f32.mrf.mxu2  ;;  %v7445_v55 = vpop.f32.mrf.mxu0 }
 0x90b   : > { %v7542_v16 = vadd.f32 %v7541_v10, %v7493_v57  ;;  %v7446_v17 = vadd.f32 %v7445_v55, %v16147_v43  ;;  %v7494_v5 = vpop.f32.mrf.mxu1  ;;  %v16679_v43 = vld [vmem:[#allocation77_spill] sm:$0xff] }
 0x90d   : > { %v16224_v40 = vadd.f32 %v7590_v29, %v7542_v16  ;;  %v7495_v51 = vadd.f32 %v7494_v5, %v7446_v17 }
 0x911   : > { %v7592_v27 = vpop.f32.mrf.mxu3 }
 0x912   : > { %v7543_v58 = vpop.f32.mrf.mxu2  ;;  %v7448_v23 = vpop.f32.mrf.mxu0 }
 0x913   : > { %v7544_v53 = vadd.f32 %v7543_v58, %v7495_v51  ;;  %v7449_v28 = vadd.f32 %v7448_v23, %v16154_v61  ;;  %v7497_v52 = vpop.f32.mrf.mxu1 }
 0x915   : > { %v16227_v41 = vadd.f32 %v7592_v27, %v7544_v53  ;;  %v7498_v60 = vadd.f32 %v7497_v52, %v7449_v28  ;;  %7643 = vmatmul.bf16.gmra.mxu0 %v16551_v6 }
 0x916   : > { %7692 = vmatmul.bf16.gmra.mxu1 %v16677_v24  ;;  %7790 = vmatmul.bf16.gmra.mxu3 %v16679_v43 }
 0x917   : > { %7741 = vmatmul.bf16.gmra.mxu2 %v16678_v1 }
 0x919   : > { %v7595_v34 = vpop.f32.mrf.mxu3 }
 0x91a   : > { %v7546_v14 = vpop.f32.mrf.mxu2  ;;  %v7450_v8 = vpop.f32.mrf.mxu0 }
 0x91b   : > { %v7547_v45 = vadd.f32 %v7546_v14, %v7498_v60  ;;  %v7451_v13 = vadd.f32 %v7450_v8, %v16157_v32  ;;  %v7499_v54 = vpop.f32.mrf.mxu1 }
 0x91d   : > { %v16234_v61 = vadd.f32 %v7595_v34, %v7547_v45  ;;  %v7500_v46 = vadd.f32 %v7499_v54, %v7451_v13 }
 0x921   : > { %v7597_v44 = vpop.f32.mrf.mxu3 }
 0x922   : > { %v7548_v47 = vpop.f32.mrf.mxu2  ;;  %v7453_v6 = vpop.f32.mrf.mxu0 }
 0x923   : > { %v7549_v20 = vadd.f32 %v7548_v47, %v7500_v46  ;;  %v7454_v33 = vadd.f32 %v7453_v6, %v16164_v49  ;;  %v7502_v30 = vpop.f32.mrf.mxu1 }
 0x925   : > { %v16237_v2 = vadd.f32 %v7597_v44, %v7549_v20  ;;  %v7503_v48 = vadd.f32 %v7502_v30, %v7454_v33  ;;  %7648 = vmatmul.bf16.gmra.mxu0 %v13714_v31 }
 0x926   : > { %7697 = vmatmul.bf16.gmra.mxu1 %v14026_v42  ;;  %7795 = vmatmul.bf16.gmra.mxu3 %v14350_v18 }
 0x927   : > { %7746 = vmatmul.bf16.gmra.mxu2 %v14324_v39 }
 0x929   : > { %v7600_v63 = vpop.f32.mrf.mxu3 }
 0x92a   : > { %v7551_v32 = vpop.f32.mrf.mxu2  ;;  %v7455_v38 = vpop.f32.mrf.mxu0 }
 0x92b   : > { %v7552_v19 = vadd.f32 %v7551_v32, %v7503_v48  ;;  %v7456_v36 = vadd.f32 %v7455_v38, %v16167_v4  ;;  %v7504_v7 = vpop.f32.mrf.mxu1 }
 0x92d   : > { %v16244_v49 = vadd.f32 %v7600_v63, %v7552_v19  ;;  %v7505_v37 = vadd.f32 %v7504_v7, %v7456_v36 }
 0x931   : > { %v7602_v31 = vpop.f32.mrf.mxu3 }
 0x932   : > { %v7553_v25 = vpop.f32.mrf.mxu2  ;;  %v7614_v0 = vpop.f32.mrf.mxu0 }
 0x933   : > { %v7554_v21 = vadd.f32 %v7553_v25, %v7505_v37  ;;  %v7663_v42 = vpop.f32.mrf.mxu1  ;;  %v7615_v39 = vadd.f32 %v7614_v0, %v16174_v59 }
 0x935   : > { %v16246_v22 = vadd.f32 %v7602_v31, %v7554_v21  ;;  %v7664_v18 = vadd.f32 %v7663_v42, %v7615_v39 }
 0x939   : > { %v7761_v10 = vpop.f32.mrf.mxu3 }
 0x93a   : > { %v7712_v57 = vpop.f32.mrf.mxu2  ;;  %v7616_v4 = vpop.f32.mrf.mxu0 }
 0x93b   : > { %v7713_v26 = vadd.f32 %v7712_v57, %v7664_v18  ;;  %v7665_v16 = vpop.f32.mrf.mxu1  ;;  %v7617_v55 = vadd.f32 %v7616_v4, %v16177_v3 }
 0x93d   : > { %v7762_v29 = vadd.f32 %v7761_v10, %v7713_v26  ;;  %v7666_v17 = vadd.f32 %v7665_v16, %v7617_v55 }
 0x93f   : > { %7803 = vst [vmem:[%s14900_s7 + $0x10] sm:$0xff] %v7762_v29 }
 0x941   : > { %v7763_v58 = vpop.f32.mrf.mxu3 }
 0x942   : > { %v7714_v5 = vpop.f32.mrf.mxu2  ;;  %v7619_v53 = vpop.f32.mrf.mxu0 }
 0x943   : > { %v7715_v51 = vadd.f32 %v7714_v5, %v7666_v17  ;;  %v7668_v27 = vpop.f32.mrf.mxu1  ;;  %v7620_v59 = vadd.f32 %v7619_v53, %v16184_v50 }
 0x945   : > { %v7764_v23 = vadd.f32 %v7763_v58, %v7715_v51  ;;  %v7669_v28 = vadd.f32 %v7668_v27, %v7620_v59 }
 0x947   : > { %7806 = vst [vmem:[%s14900_s7 + $0x28] sm:$0xff] %v7764_v23 }
 0x949   : > { %v7766_v24 = vpop.f32.mrf.mxu3 }
 0x94a   : > { %v7717_v52 = vpop.f32.mrf.mxu2  ;;  %v7621_v1 = vpop.f32.mrf.mxu0 }
 0x94b   : > { %v7718_v60 = vadd.f32 %v7717_v52, %v7669_v28  ;;  %v7670_v43 = vpop.f32.mrf.mxu1  ;;  %v7622_v14 = vadd.f32 %v7621_v1, %v16187_v15 }
 0x94d   : > { %v7767_v3 = vadd.f32 %v7766_v24, %v7718_v60  ;;  %v7671_v45 = vadd.f32 %v7670_v43, %v7622_v14 }
 0x94f   : > { %7809 = vst [vmem:[%s14900_s7 + $0x40] sm:$0xff] %v7767_v3 }
 0x951   : > { %v7768_v13 = vpop.f32.mrf.mxu3 }
 0x952   : > { %v7719_v34 = vpop.f32.mrf.mxu2  ;;  %v7624_v54 = vpop.f32.mrf.mxu0 }
 0x953   : > { %v7720_v8 = vadd.f32 %v7719_v34, %v7671_v45  ;;  %v7673_v46 = vpop.f32.mrf.mxu1  ;;  %v7625_v47 = vadd.f32 %v7624_v54, %v16194_v56 }
 0x955   : > { %v7769_v50 = vadd.f32 %v7768_v13, %v7720_v8  ;;  %v7674_v20 = vadd.f32 %v7673_v46, %v7625_v47 }
 0x957   : > { %7812 = vst [vmem:[%s14900_s7 + $0x58] sm:$0xff] %v7769_v50 }
 0x959   : > { %v7771_v33 = vpop.f32.mrf.mxu3 }
 0x95a   : > { %v7722_v44 = vpop.f32.mrf.mxu2  ;;  %v7626_v30 = vpop.f32.mrf.mxu0 }
 0x95b   : > { %v7723_v6 = vadd.f32 %v7722_v44, %v7674_v20  ;;  %v7675_v48 = vpop.f32.mrf.mxu1  ;;  %v7627_v32 = vadd.f32 %v7626_v30, %v16197_v11 }
 0x95d   : > { %v7772_v15 = vadd.f32 %v7771_v33, %v7723_v6  ;;  %v7676_v19 = vadd.f32 %v7675_v48, %v7627_v32 }
 0x95f   : > { %7815 = vst [vmem:[%s14900_s7 + $0x70] sm:$0xff] %v7772_v15 }
 0x961   : > { %v7773_v36 = vpop.f32.mrf.mxu3 }
 0x962   : > { %v7724_v63 = vpop.f32.mrf.mxu2  ;;  %v7629_v7 = vpop.f32.mrf.mxu0 }
 0x963   : > { %v7725_v38 = vadd.f32 %v7724_v63, %v7676_v19  ;;  %v7678_v37 = vpop.f32.mrf.mxu1  ;;  %v7630_v25 = vadd.f32 %v7629_v7, %v16204_v9 }
 0x965   : > { %v7774_v56 = vadd.f32 %v7773_v36, %v7725_v38  ;;  %v7679_v21 = vadd.f32 %v7678_v37, %v7630_v25 }
 0x967   : > { %7818 = vst [vmem:[%s14900_s7 + $0x88] sm:$0xff] %v7774_v56 }
 0x969   : > { %v7776_v42 = vpop.f32.mrf.mxu3 }
 0x96a   : > { %v7727_v31 = vpop.f32.mrf.mxu2  ;;  %v7631_v39 = vpop.f32.mrf.mxu0 }
 0x96b   : > { %v7728_v0 = vadd.f32 %v7727_v31, %v7679_v21  ;;  %v7680_v18 = vpop.f32.mrf.mxu1  ;;  %v7632_v57 = vadd.f32 %v7631_v39, %v16207_v62 }
 0x96d   : > { %v7777_v11 = vadd.f32 %v7776_v42, %v7728_v0  ;;  %v7681_v26 = vadd.f32 %v7680_v18, %v7632_v57 }
 0x96f   : > { %7821 = vst [vmem:[%s14900_s7 + $0xa0] sm:$0xff] %v7777_v11 }
 0x971   : > { %v7778_v16 = vpop.f32.mrf.mxu3 }
 0x972   : > { %v7729_v10 = vpop.f32.mrf.mxu2  ;;  %v7634_v29 = vpop.f32.mrf.mxu0 }
 0x973   : > { %v7730_v4 = vadd.f32 %v7729_v10, %v7681_v26  ;;  %v7683_v55 = vpop.f32.mrf.mxu1  ;;  %v7635_v17 = vadd.f32 %v7634_v29, %v16214_v12 }
 0x975   : > { %v7779_v9 = vadd.f32 %v7778_v16, %v7730_v4  ;;  %v7684_v5 = vadd.f32 %v7683_v55, %v7635_v17 }
 0x977   : > { %7824 = vst [vmem:[%s14900_s7 + $0xb8] sm:$0xff] %v7779_v9 }
 0x979   : > { %v7781_v53 = vpop.f32.mrf.mxu3 }
 0x97a   : > { %v7732_v51 = vpop.f32.mrf.mxu2  ;;  %v7636_v27 = vpop.f32.mrf.mxu0 }
 0x97b   : > { %v7733_v58 = vadd.f32 %v7732_v51, %v7684_v5  ;;  %v7685_v23 = vpop.f32.mrf.mxu1  ;;  %v7637_v59 = vadd.f32 %v7636_v27, %v16217_v35 }
 0x97d   : > { %v7782_v62 = vadd.f32 %v7781_v53, %v7733_v58  ;;  %v7686_v28 = vadd.f32 %v7685_v23, %v7637_v59 }
 0x97f   : > { %7827 = vst [vmem:[%s14900_s7 + $0xd0] sm:$0xff] %v7782_v62 }
 0x981   : > { %v7783_v24 = vpop.f32.mrf.mxu3 }
 0x982   : > { %v7734_v52 = vpop.f32.mrf.mxu2  ;;  %v7639_v1 = vpop.f32.mrf.mxu0 }
 0x983   : > { %v7735_v60 = vadd.f32 %v7734_v52, %v7686_v28  ;;  %v7688_v43 = vpop.f32.mrf.mxu1  ;;  %v7640_v3 = vadd.f32 %v7639_v1, %v16224_v40 }
 0x985   : > { %v7784_v12 = vadd.f32 %v7783_v24, %v7735_v60  ;;  %v7689_v14 = vadd.f32 %v7688_v43, %v7640_v3 }
 0x987   : > { %7830 = vst [vmem:[%s14900_s7 + $0xe8] sm:$0xff] %v7784_v12 }
 0x989   : > { %v7786_v8 = vpop.f32.mrf.mxu3 }
 0x98a   : > { %v7737_v45 = vpop.f32.mrf.mxu2  ;;  %v7641_v13 = vpop.f32.mrf.mxu0 }
 0x98b   : > { %v7738_v34 = vadd.f32 %v7737_v45, %v7689_v14  ;;  %v7690_v54 = vpop.f32.mrf.mxu1  ;;  %v7642_v46 = vadd.f32 %v7641_v13, %v16227_v41 }
 0x98d   : > { %v7787_v35 = vadd.f32 %v7786_v8, %v7738_v34  ;;  %v7691_v50 = vadd.f32 %v7690_v54, %v7642_v46 }
 0x98f   : > { %7833 = vst [vmem:[%s14900_s7 + $0x100] sm:$0xff] %v7787_v35 }
 0x991   : > { %v7788_v44 = vpop.f32.mrf.mxu3 }
 0x992   : > { %v7739_v47 = vpop.f32.mrf.mxu2  ;;  %v7644_v6 = vpop.f32.mrf.mxu0 }
 0x993   : > { %v7740_v20 = vadd.f32 %v7739_v47, %v7691_v50  ;;  %v7693_v33 = vpop.f32.mrf.mxu1  ;;  %v7645_v30 = vadd.f32 %v7644_v6, %v16234_v61 }
 0x995   : > { %v7789_v40 = vadd.f32 %v7788_v44, %v7740_v20  ;;  %v7694_v48 = vadd.f32 %v7693_v33, %v7645_v30 }
 0x997   : > { %7836 = vst [vmem:[%s14900_s7 + $0x118] sm:$0xff] %v7789_v40 }
 0x999   : > { %v7791_v19 = vpop.f32.mrf.mxu3 }
 0x99a   : > { %v7742_v15 = vpop.f32.mrf.mxu2  ;;  %v7646_v63 = vpop.f32.mrf.mxu0 }
 0x99b   : > { %v7743_v32 = vadd.f32 %v7742_v15, %v7694_v48  ;;  %v7695_v41 = vpop.f32.mrf.mxu1  ;;  %v7647_v36 = vadd.f32 %v7646_v63, %v16237_v2 }
 0x99d   : > { %v7792_v38 = vadd.f32 %v7791_v19, %v7743_v32  ;;  %v7696_v7 = vadd.f32 %v7695_v41, %v7647_v36 }
 0x99f   : > { %7839 = vst [vmem:[%s14900_s7 + $0x130] sm:$0xff] %v7792_v38 }
 0x9a1   : > { %v7793_v25 = vpop.f32.mrf.mxu3 }
 0x9a2   : > { %v7744_v37 = vpop.f32.mrf.mxu2  ;;  %v7649_v21 = vpop.f32.mrf.mxu0 }
 0x9a3   : > { %v7745_v56 = vadd.f32 %v7744_v37, %v7696_v7  ;;  %v7650_v31 = vadd.f32 %v7649_v21, %v16244_v49  ;;  %v7698_v0 = vpop.f32.mrf.mxu1 }
 0x9a5   : > { %v7794_v61 = vadd.f32 %v7793_v25, %v7745_v56  ;;  %v7699_v42 = vadd.f32 %v7698_v0, %v7650_v31 }
 0x9a7   : > { %7842 = vst [vmem:[%s14900_s7 + $0x148] sm:$0xff] %v7794_v61 }
 0x9a9   : > { %v7796_v11 = vpop.f32.mrf.mxu3 }
 0x9aa   : > { %v7747_v39 = vpop.f32.mrf.mxu2  ;;  %v7651_v2 = vpop.f32.mrf.mxu0 }
 0x9ab   : > { %v7748_v18 = vadd.f32 %v7747_v39, %v7699_v42  ;;  %v7652_v26 = vadd.f32 %v7651_v2, %v16246_v22  ;;  %v7700_v10 = vpop.f32.mrf.mxu1 }
 0x9ad   : > { %v7797_v57 = vadd.f32 %v7796_v11, %v7748_v18  ;;  %v7701_v49 = vadd.f32 %v7700_v10, %v7652_v26 }
 0x9af   : > { %7845 = vst [vmem:[%s14900_s7 + $0x160] sm:$0xff] %v7797_v57 }
 0x9b1   : > { %v7798_v29 = vpop.f32.mrf.mxu3 }
 0x9b2   : > { %v7749_v4 = vpop.f32.mrf.mxu2 }
 0x9b3   : > { %v7750_v16 = vadd.f32 %v7749_v4, %v7701_v49 }
 0x9b5   : > { %v7799_v55 = vadd.f32 %v7798_v29, %v7750_v16 }
 0x9b7   : > { %7848 = vst [vmem:[%s14900_s7 + $0x178] sm:$0xff] %v7799_v55 }
 0x9b8   : > { %10895 = shalt.err (!%p10892_p3)
}
 0x9b9   : > { %s10932_s15 = smov 384   ;;  %s10933_s7 = smov 24  }
 0x9ba   : > { %10822 = dma.vmem_to_hbm [thread:$0]  (%p11002_p5), %s7864_s23, 6144, %s7866_s25, %s7850_s22, %s10932_s15, %s10932_s15, %s10933_s7  }
 0x9bb PF: > { %p10828_p4 = scmp.ge.s32.totalorder %s10930_s21, 2  ;;  %s7880_s11 = sand.u32 1, %s10918_s18  }
 0x9bc   : > { %s7881_s12 = scalar_lea.sflag [#allocation3], %s7880_s11 }
 0x9bd   : > { %p10825_p7 = pnand %p10828_p4, %p11006_p6 }
 0x9bf   : > { %p10826_p8 = pneg %p10825_p7 }
 0x9c1   : > { %10913 = dma.done.wait (%p10826_p8), %s7881_s12, 6144  }
 0x9c2   : > { %10915 = vsyncadd (%p10826_p8), %s7881_s12, 4294961152  ;;  %p15_p9 = scmp.ge.s32.totalorder %s10989_s24, 4   ;;  %s16680_s18 = smov %s10922_s19 }
 0x9c3   : > { %s16681_s19 = smov %s10926_s20  ;;  %s16682_s20 = smov %s11000_s27 }
 0x9c4   : > { %s16683_s21 = smov %s10989_s24  ;;  %17 = sbr.rel (!%p15_p9) target bundleno = 3 (0x3), region = 75 }
 0x9c9   :  { %7887 = vsyncpa [#allocation3], 1 }
 0x9ca   :  { %7889 = vsyncpa [#allocation3 + $0x1], 1 }

</bundles_post_ra>
